<compile_context>
chip_gen: v5e
topology: v5e:2x2
jax: 0.10.0
libtpu: 0.0.40
codegen_flags: <defaults>
</compile_context>

<pallas_src>
import numpy as np

import jax
import jax.numpy as jnp
from jax import lax
from jax.experimental import pallas as pl
from jax.experimental.pallas import tpu as pltpu


# Flip to jnp.bfloat16 on v5e/v6e/v7x for more MXU throughput / half the
# constant DMA bytes (accumulation stays f32); kept f32 here for exact parity
# with the f32 reference within the 1e-3 test tolerance.
MXU_DTYPE = jnp.float32


# ---------------------------------------------------------------------------
# Host-side structural constants (built once, outside jit)
# ---------------------------------------------------------------------------
def _build_gather(n, hi, wi, stride):
    """Stacked per-tap 0/1 gather matrices for a pad-1 3x3 conv.

    G[t*N*Pp + (b*Pp + iy*Wi + ix), b*P + oy*Wo + ox] = 1
      iff iy == oy*s + dy - 1, ix == ox*s + dx - 1   (t = dy*3 + dx)
    so  prev(Cin, N*Pp) @ G_t  extracts tap t (zero padding handled by
    all-zero columns).
    """
    ho = (hi + 2 - 3) // stride + 1
    wo = (wi + 2 - 3) // stride + 1
    pp, p = hi * wi, ho * wo
    g = np.zeros((9, n * pp, n * p), np.float32)
    for t in range(9):
        dy, dx = t // 3, t % 3
        for b in range(n):
            for oy in range(ho):
                iy = oy * stride + dy - 1
                if iy < 0 or iy >= hi:
                    continue
                for ox in range(wo):
                    ix = ox * stride + dx - 1
                    if ix < 0 or ix >= wi:
                        continue
                    g[t, b * pp + iy * wi + ix, b * p + oy * wo + ox] = 1.0
    return g.reshape(9 * n * pp, n * p), ho, wo


def _build_pool_expand(n, p):
    """Block-diagonal per-batch average-pool / gate-broadcast matrices."""
    pool = np.zeros((n * p, n), np.float32)
    exp = np.zeros((n, n * p), np.float32)
    for b in range(n):
        pool[b * p:(b + 1) * p, b] = 1.0 / p
        exp[b, b * p:(b + 1) * p] = 1.0
    return pool, exp


# ---------------------------------------------------------------------------
# The fused kernel: 5 RepBlocks, activations stay in VMEM, one grid step.
# ---------------------------------------------------------------------------
def _make_fused_kernel(layout):
    def kernel(*refs):
        o_ref = refs[-1]
        refs = refs[:-1]
        i = 0
        x = None  # running activation, (C, N*P) f32, batch merged on lanes
        for cfg in layout:
            cout, npp = cfg["cout"], cfg["np_prev"]
            if cfg["first"]:
                taps = refs[i][...]; i += 1      # (9*Cin, N*P)  external im2col
                wfull = refs[i][...]; i += 1     # (Cout, 9*Cin) fused weights
                acc = jnp.dot(wfull, taps, preferred_element_type=jnp.float32)
            else:
                w_ref = refs[i]; i += 1          # (9*Cout, Cin) per-tap weights
                g_ref = refs[i]; i += 1          # (9*N*Pp, N*P) 0/1 gather
                acc = None
                for t in range(9):               # gather tap t, then conv tap t
                    g_t = g_ref[pl.ds(t * npp, npp), :]      # (N*Pp, N*P)
                    w_t = w_ref[pl.ds(t * cout, cout), :]    # (Cout, Cin)
                    tap = jnp.dot(x, g_t, preferred_element_type=jnp.float32)
                    part = jnp.dot(w_t, tap, preferred_element_type=jnp.float32)
                    acc = part if acc is None else acc + part
            bias = refs[i][...]; i += 1          # (Cout, 1)
            wd = refs[i][...]; i += 1            # (cr, Cout)
            bd = refs[i][...]; i += 1            # (cr, 1)
            wu = refs[i][...]; i += 1            # (Cout, cr)
            bu = refs[i][...]; i += 1            # (Cout, 1)
            pool = refs[i][...]; i += 1          # (N*P, N)
            expd = refs[i][...]; i += 1          # (N, N*P)

            acc = acc + bias
            # SE block, segmented per batch element via pool / expand matmuls.
            pooled = jnp.dot(acc, pool, preferred_element_type=jnp.float32)
            hidden = jnp.maximum(
                jnp.dot(wd, pooled, preferred_element_type=jnp.float32) + bd,
                0.0)
            gate = jax.nn.sigmoid(
                jnp.dot(wu, hidden, preferred_element_type=jnp.float32) + bu)
            gate_full = jnp.dot(gate, expd, preferred_element_type=jnp.float32)
            x = jnp.maximum(acc * gate_full, 0.0)            # ReLU

        o_ref[...] = x
    return kernel


# ---------------------------------------------------------------------------
# Build all kernel constants (weights folded to kernel layout, gather / pool /
# expand matrices) and the block metadata.
# ---------------------------------------------------------------------------
def build_fused_basenet(blocks, n, h, w):
    params, layout = [], []
    hi, wi = h, w
    cin = blocks[0]["w3"].shape[2]
    flops, trans = 0, 0
    for bi, p in enumerate(blocks):
        s = p["stride"]
        cout = p["w3"].shape[3]
        cr = p["wd"].shape[0]
        w3f, w1f = p["w3"], p["w1"]          # BN-fused (HWIO) / (Cin, Cout)
        ho = (hi + 2 - 3) // s + 1
        wo = (wi + 2 - 3) // s + 1
        npp, npo = n * hi * wi, n * ho * wo

        if bi == 0:
            # single conv matmul on externally im2col'd taps (col order t*Cin+c)
            wfull = jnp.transpose(w3f, (3, 0, 1, 2)).reshape(cout, 9 * cin)
            wfull = wfull.at[:, 4 * cin:5 * cin].add(w1f.T)   # 1x1 -> center
            blk = [wfull.astype(MXU_DTYPE)]
            flops += 2 * cout * 9 * cin * npo
        else:
            # per-tap weights stacked (row order t*Cout + o) + gather matrix
            wstack = jnp.transpose(w3f, (0, 1, 3, 2)).reshape(9 * cout, cin)
            wstack = wstack.at[4 * cout:5 * cout, :].add(w1f.T)
            g_np, _, _ = _build_gather(n, hi, wi, s)
            blk = [wstack.astype(MXU_DTYPE), jnp.asarray(g_np, MXU_DTYPE)]
            flops += 9 * (2 * cin * npp * npo + 2 * cout * cin * npo)

        pool_np, exp_np = _build_pool_expand(n, ho * wo)
        blk += [p["bias"].reshape(cout, 1),
                p["wd"], p["bd"].reshape(cr, 1),
                p["wu"], p["bu"].reshape(cout, 1),
                jnp.asarray(pool_np), jnp.asarray(exp_np)]
        flops += 2 * cout * npo * n + 4 * cr * cout * n + 2 * cout * n * npo
        trans += cout * n

        params += blk
        layout.append(dict(first=(bi == 0), cout=cout, cin=cin, cr=cr,
                           np_prev=npp, np_out=npo, stride=s,
                           hin=hi, win=wi, hout=ho, wout=wo))
        hi, wi, cin = ho, wo, cout

    abytes = sum(int(a.size) * 4 for a in params)
    abytes += 4 * 9 * blocks[0]["w3"].shape[2] * layout[0]["np_out"]  # T0
    abytes += 4 * cin * n * hi * wi                                   # output
    cost = pl.CostEstimate(flops=int(flops), transcendentals=int(trans),
                           bytes_accessed=int(abytes))
    return params, layout, (cin, hi, wi), cost


# ---------------------------------------------------------------------------
# Forward: block-0 im2col glue in XLA, everything else in the fused kernel
# ---------------------------------------------------------------------------
def fused_forward(x_nchw, params, layout, out_chw, cost):
    n, cin = x_nchw.shape[0], x_nchw.shape[1]
    cfg0 = layout[0]
    s, ho, wo = cfg0["stride"], cfg0["hout"], cfg0["wout"]

    # im2col for block 0 only (its input comes from HBM anyway).
    # Row order t*Cin + c, column order n*P + h*W + w -- matches wfull0.
    xp = jnp.pad(x_nchw, ((0, 0), (0, 0), (1, 1), (1, 1)))
    taps = []
    for dy in range(3):
        for dx in range(3):
            taps.append(xp[:, :, dy:dy + (ho - 1) * s + 1:s,
                            dx:dx + (wo - 1) * s + 1:s])
    t = jnp.stack(taps, axis=0)                      # (9, N, Cin, Ho, Wo)
    t = jnp.transpose(t, (0, 2, 1, 3, 4))            # (9, Cin, N, Ho, Wo)
    t0 = t.reshape(9 * cin, n * ho * wo).astype(MXU_DTYPE)

    c_last, h_last, w_last = out_chw
    args = [t0] + list(params)

    out = pl.pallas_call(
        _make_fused_kernel(layout),
        out_shape=jax.ShapeDtypeStruct((c_last, n * h_last * w_last),
                                       jnp.float32),
        grid=(1,),
        in_specs=[pl.BlockSpec(a.shape, lambda i: (0, 0)) for a in args],
        out_specs=pl.BlockSpec((c_last, n * h_last * w_last),
                               lambda i: (0, 0)),
        compiler_params=pltpu.CompilerParams(
            dimension_semantics=("arbitrary",),
            vmem_limit_bytes=32 * 1024 * 1024),
        cost_estimate=cost,
    )(*args)

    out = out.reshape(c_last, n, h_last, w_last)
    return jnp.transpose(out, (1, 0, 2, 3))          # -> NCHW


# ---------------------------------------------------------------------------
# Deterministic parameter construction (eval-mode BN folded into conv weights)
# ---------------------------------------------------------------------------
def _init_bn(key, c):
    k1, k2, k3, k4 = jax.random.split(key, 4)
    gamma = 1.0 + 0.1 * jax.random.normal(k1, (c,), jnp.float32)
    beta = 0.1 * jax.random.normal(k2, (c,), jnp.float32)
    mean = 0.1 * jax.random.normal(k3, (c,), jnp.float32)
    var = 1.0 + 0.1 * jax.random.uniform(k4, (c,), jnp.float32)
    return gamma, beta, mean, var


def _fuse_bn(gamma, beta, mean, var, eps=1e-5):
    t = gamma / jnp.sqrt(var + eps)
    return t, beta - mean * t


def init_repblock(key, cin, cout, stride):
    ks = jax.random.split(key, 9)
    w3 = 0.1 * jax.random.normal(ks[0], (3, 3, cin, cout), jnp.float32)  # HWIO
    w1 = 0.1 * jax.random.normal(ks[1], (cin, cout), jnp.float32)

    t3, b3 = _fuse_bn(*_init_bn(ks[2], cout))
    t1, b1 = _fuse_bn(*_init_bn(ks[3], cout))
    w3f = w3 * t3                       # per-out-channel BN scale
    w1f = w1 * t1
    bias = b3 + b1
    if cin == cout and stride == 1:     # rbr_identity (BatchNorm branch)
        tid, bid = _fuse_bn(*_init_bn(ks[4], cout))
        w1f = w1f + jnp.diag(tid)       # identity BN == diagonal 1x1 conv
        bias = bias + bid

    cr = cout // 8                      # SEBlock internal_neurons
    wd = 0.2 * jax.random.normal(ks[5], (cr, cout), jnp.float32)
    bd = 0.1 * jax.random.normal(ks[6], (cr,), jnp.float32)
    wu = 0.2 * jax.random.normal(ks[7], (cout, cr), jnp.float32)
    bu = 0.1 * jax.random.normal(ks[8], (cout,), jnp.float32)

    return dict(w3=w3f, w1=w1f, bias=bias, wd=wd, bd=bd, wu=wu, bu=bu,
                stride=stride)


# ---------------------------------------------------------------------------
# Pure-JAX reference (same fused-BN math) for correctness checking
# ---------------------------------------------------------------------------
def ref_repblock(x, p):
    s = p["stride"]
    dense = lax.conv_general_dilated(
        x, p["w3"], (s, s), ((1, 1), (1, 1)),
        dimension_numbers=("NHWC", "HWIO", "NHWC"))
    one = lax.conv_general_dilated(
        x, p["w1"][None, None], (s, s), ((0, 0), (0, 0)),
        dimension_numbers=("NHWC", "HWIO", "NHWC"))
    y = dense + one + p["bias"]
    pooled = jnp.mean(y, axis=(1, 2))                       # (N, Cout)
    h = jnp.maximum(pooled @ p["wd"].T + p["bd"], 0.0)      # (N, cr)
    gate = jax.nn.sigmoid(h @ p["wu"].T + p["bu"])          # (N, Cout)
    return jnp.maximum(y * gate[:, None, None, :], 0.0)


if __name__ == "__main__":
    key = jax.random.PRNGKey(0)

    # Small BaseNet config (stage3/stage4 exist in the module but are unused
    # by forward(), so only stages 0..2 are built/run).
    depths = (1, 2, 2, 1, 1)
    channels = (8, 16, 32, 48, 64)
    stage_strides = (2, 2, 2)

    blocks = []
    in_ch = 3
    for si in range(3):
        strides = [stage_strides[si]] + [1] * (depths[si] - 1)
        for s in strides:
            key, kb = jax.random.split(key)
            blocks.append(init_repblock(kb, in_ch, channels[si], s))
            in_ch = channels[si]

    key, kx = jax.random.split(key)
    x = jax.random.normal(kx, (2, 3, 32, 32), jnp.float32)  # NCHW, like torch

    params, layout, out_chw, cost = build_fused_basenet(blocks, 2, 32, 32)

    fwd = jax.jit(lambda inp, ps: fused_forward(inp, ps, layout, out_chw, cost))
    out = jax.block_until_ready(fwd(x, params))

    # Reference check
    xr = jnp.transpose(x, (0, 2, 3, 1))
    for p in blocks:
        xr = ref_repblock(xr, p)
    ref = jnp.transpose(xr, (0, 3, 1, 2))

    assert out.shape == (2, 32, 4, 4), out.shape
    np.testing.assert_allclose(np.asarray(out), np.asarray(ref),
                               rtol=1e-3, atol=1e-3)
    print("KERNEL_OK")
</pallas_src>

<mosaic_0001>
module attributes {stable_mosaic.version = 11 : i64} {
  func.func @kernel(%arg0: i32, %arg1: memref<27x512xf32, #tpu.memory_space<vmem>>, %arg2: memref<8x27xf32, #tpu.memory_space<vmem>>, %arg3: memref<8x1xf32, #tpu.memory_space<vmem>>, %arg4: memref<1x8xf32, #tpu.memory_space<vmem>>, %arg5: memref<1x1xf32, #tpu.memory_space<vmem>>, %arg6: memref<8x1xf32, #tpu.memory_space<vmem>>, %arg7: memref<8x1xf32, #tpu.memory_space<vmem>>, %arg8: memref<512x2xf32, #tpu.memory_space<vmem>>, %arg9: memref<2x512xf32, #tpu.memory_space<vmem>>, %arg10: memref<144x8xf32, #tpu.memory_space<vmem>>, %arg11: memref<4608x128xf32, #tpu.memory_space<vmem>>, %arg12: memref<16x1xf32, #tpu.memory_space<vmem>>, %arg13: memref<2x16xf32, #tpu.memory_space<vmem>>, %arg14: memref<2x1xf32, #tpu.memory_space<vmem>>, %arg15: memref<16x2xf32, #tpu.memory_space<vmem>>, %arg16: memref<16x1xf32, #tpu.memory_space<vmem>>, %arg17: memref<128x2xf32, #tpu.memory_space<vmem>>, %arg18: memref<2x128xf32, #tpu.memory_space<vmem>>, %arg19: memref<144x16xf32, #tpu.memory_space<vmem>>, %arg20: memref<1152x128xf32, #tpu.memory_space<vmem>>, %arg21: memref<16x1xf32, #tpu.memory_space<vmem>>, %arg22: memref<2x16xf32, #tpu.memory_space<vmem>>, %arg23: memref<2x1xf32, #tpu.memory_space<vmem>>, %arg24: memref<16x2xf32, #tpu.memory_space<vmem>>, %arg25: memref<16x1xf32, #tpu.memory_space<vmem>>, %arg26: memref<128x2xf32, #tpu.memory_space<vmem>>, %arg27: memref<2x128xf32, #tpu.memory_space<vmem>>, %arg28: memref<288x16xf32, #tpu.memory_space<vmem>>, %arg29: memref<1152x32xf32, #tpu.memory_space<vmem>>, %arg30: memref<32x1xf32, #tpu.memory_space<vmem>>, %arg31: memref<4x32xf32, #tpu.memory_space<vmem>>, %arg32: memref<4x1xf32, #tpu.memory_space<vmem>>, %arg33: memref<32x4xf32, #tpu.memory_space<vmem>>, %arg34: memref<32x1xf32, #tpu.memory_space<vmem>>, %arg35: memref<32x2xf32, #tpu.memory_space<vmem>>, %arg36: memref<2x32xf32, #tpu.memory_space<vmem>>, %arg37: memref<288x32xf32, #tpu.memory_space<vmem>>, %arg38: memref<288x32xf32, #tpu.memory_space<vmem>>, %arg39: memref<32x1xf32, #tpu.memory_space<vmem>>, %arg40: memref<4x32xf32, #tpu.memory_space<vmem>>, %arg41: memref<4x1xf32, #tpu.memory_space<vmem>>, %arg42: memref<32x4xf32, #tpu.memory_space<vmem>>, %arg43: memref<32x1xf32, #tpu.memory_space<vmem>>, %arg44: memref<32x2xf32, #tpu.memory_space<vmem>>, %arg45: memref<2x32xf32, #tpu.memory_space<vmem>>, %arg46: memref<32x32xf32, #tpu.memory_space<vmem>>) attributes {dimension_semantics = [#tpu.dimension_semantics<arbitrary>], iteration_bounds = array<i64: 1>, scalar_prefetch = 0 : i64, scratch_operands = 0 : i64, tpu.core_type = #tpu.core_type<tc>, window_params = [{pipeline_mode = #tpu.pipeline_mode<synchronous>, transform_indices = @transform_0, window_bounds = array<i64: 27, 512>}, {pipeline_mode = #tpu.pipeline_mode<synchronous>, transform_indices = @transform_1, window_bounds = array<i64: 8, 27>}, {pipeline_mode = #tpu.pipeline_mode<synchronous>, transform_indices = @transform_2, window_bounds = array<i64: 8, 1>}, {pipeline_mode = #tpu.pipeline_mode<synchronous>, transform_indices = @transform_3, window_bounds = array<i64: 1, 8>}, {pipeline_mode = #tpu.pipeline_mode<synchronous>, transform_indices = @transform_4, window_bounds = array<i64: 1, 1>}, {pipeline_mode = #tpu.pipeline_mode<synchronous>, transform_indices = @transform_5, window_bounds = array<i64: 8, 1>}, {pipeline_mode = #tpu.pipeline_mode<synchronous>, transform_indices = @transform_6, window_bounds = array<i64: 8, 1>}, {pipeline_mode = #tpu.pipeline_mode<synchronous>, transform_indices = @transform_7, window_bounds = array<i64: 512, 2>}, {pipeline_mode = #tpu.pipeline_mode<synchronous>, transform_indices = @transform_8, window_bounds = array<i64: 2, 512>}, {pipeline_mode = #tpu.pipeline_mode<synchronous>, transform_indices = @transform_9, window_bounds = array<i64: 144, 8>}, {pipeline_mode = #tpu.pipeline_mode<synchronous>, transform_indices = @transform_10, window_bounds = array<i64: 4608, 128>}, {pipeline_mode = #tpu.pipeline_mode<synchronous>, transform_indices = @transform_11, window_bounds = array<i64: 16, 1>}, {pipeline_mode = #tpu.pipeline_mode<synchronous>, transform_indices = @transform_12, window_bounds = array<i64: 2, 16>}, {pipeline_mode = #tpu.pipeline_mode<synchronous>, transform_indices = @transform_13, window_bounds = array<i64: 2, 1>}, {pipeline_mode = #tpu.pipeline_mode<synchronous>, transform_indices = @transform_14, window_bounds = array<i64: 16, 2>}, {pipeline_mode = #tpu.pipeline_mode<synchronous>, transform_indices = @transform_15, window_bounds = array<i64: 16, 1>}, {pipeline_mode = #tpu.pipeline_mode<synchronous>, transform_indices = @transform_16, window_bounds = array<i64: 128, 2>}, {pipeline_mode = #tpu.pipeline_mode<synchronous>, transform_indices = @transform_17, window_bounds = array<i64: 2, 128>}, {pipeline_mode = #tpu.pipeline_mode<synchronous>, transform_indices = @transform_18, window_bounds = array<i64: 144, 16>}, {pipeline_mode = #tpu.pipeline_mode<synchronous>, transform_indices = @transform_19, window_bounds = array<i64: 1152, 128>}, {pipeline_mode = #tpu.pipeline_mode<synchronous>, transform_indices = @transform_20, window_bounds = array<i64: 16, 1>}, {pipeline_mode = #tpu.pipeline_mode<synchronous>, transform_indices = @transform_21, window_bounds = array<i64: 2, 16>}, {pipeline_mode = #tpu.pipeline_mode<synchronous>, transform_indices = @transform_22, window_bounds = array<i64: 2, 1>}, {pipeline_mode = #tpu.pipeline_mode<synchronous>, transform_indices = @transform_23, window_bounds = array<i64: 16, 2>}, {pipeline_mode = #tpu.pipeline_mode<synchronous>, transform_indices = @transform_24, window_bounds = array<i64: 16, 1>}, {pipeline_mode = #tpu.pipeline_mode<synchronous>, transform_indices = @transform_25, window_bounds = array<i64: 128, 2>}, {pipeline_mode = #tpu.pipeline_mode<synchronous>, transform_indices = @transform_26, window_bounds = array<i64: 2, 128>}, {pipeline_mode = #tpu.pipeline_mode<synchronous>, transform_indices = @transform_27, window_bounds = array<i64: 288, 16>}, {pipeline_mode = #tpu.pipeline_mode<synchronous>, transform_indices = @transform_28, window_bounds = array<i64: 1152, 32>}, {pipeline_mode = #tpu.pipeline_mode<synchronous>, transform_indices = @transform_29, window_bounds = array<i64: 32, 1>}, {pipeline_mode = #tpu.pipeline_mode<synchronous>, transform_indices = @transform_30, window_bounds = array<i64: 4, 32>}, {pipeline_mode = #tpu.pipeline_mode<synchronous>, transform_indices = @transform_31, window_bounds = array<i64: 4, 1>}, {pipeline_mode = #tpu.pipeline_mode<synchronous>, transform_indices = @transform_32, window_bounds = array<i64: 32, 4>}, {pipeline_mode = #tpu.pipeline_mode<synchronous>, transform_indices = @transform_33, window_bounds = array<i64: 32, 1>}, {pipeline_mode = #tpu.pipeline_mode<synchronous>, transform_indices = @transform_34, window_bounds = array<i64: 32, 2>}, {pipeline_mode = #tpu.pipeline_mode<synchronous>, transform_indices = @transform_35, window_bounds = array<i64: 2, 32>}, {pipeline_mode = #tpu.pipeline_mode<synchronous>, transform_indices = @transform_36, window_bounds = array<i64: 288, 32>}, {pipeline_mode = #tpu.pipeline_mode<synchronous>, transform_indices = @transform_37, window_bounds = array<i64: 288, 32>}, {pipeline_mode = #tpu.pipeline_mode<synchronous>, transform_indices = @transform_38, window_bounds = array<i64: 32, 1>}, {pipeline_mode = #tpu.pipeline_mode<synchronous>, transform_indices = @transform_39, window_bounds = array<i64: 4, 32>}, {pipeline_mode = #tpu.pipeline_mode<synchronous>, transform_indices = @transform_40, window_bounds = array<i64: 4, 1>}, {pipeline_mode = #tpu.pipeline_mode<synchronous>, transform_indices = @transform_41, window_bounds = array<i64: 32, 4>}, {pipeline_mode = #tpu.pipeline_mode<synchronous>, transform_indices = @transform_42, window_bounds = array<i64: 32, 1>}, {pipeline_mode = #tpu.pipeline_mode<synchronous>, transform_indices = @transform_43, window_bounds = array<i64: 32, 2>}, {pipeline_mode = #tpu.pipeline_mode<synchronous>, transform_indices = @transform_44, window_bounds = array<i64: 2, 32>}, {pipeline_mode = #tpu.pipeline_mode<synchronous>, transform_indices = @transform_45, window_bounds = array<i64: 32, 32>}]} {
    %c0 = arith.constant 0 : index
    %c0_0 = arith.constant 0 : index
    %0 = vector.load %arg1[%c0, %c0_0] : memref<27x512xf32, #tpu.memory_space<vmem>>, vector<27x512xf32>
    %c0_1 = arith.constant 0 : index
    %c0_2 = arith.constant 0 : index
    %1 = vector.load %arg2[%c0_1, %c0_2] : memref<8x27xf32, #tpu.memory_space<vmem>>, vector<8x27xf32>
    %cst = arith.constant dense<0.000000e+00> : vector<8x512xf32>
    %2 = tpu.matmul %1, %0, %cst {dimension_numbers = #tpu.dot_dimension_numbers<[1], [0], [0], [1], [0, 0, 1, 1], [], []>} : vector<8x27xf32>, vector<27x512xf32>, vector<8x512xf32> -> vector<8x512xf32>
    %c0_3 = arith.constant 0 : index
    %c0_4 = arith.constant 0 : index
    %3 = vector.load %arg3[%c0_3, %c0_4] : memref<8x1xf32, #tpu.memory_space<vmem>>, vector<8x1xf32>
    %c0_5 = arith.constant 0 : index
    %c0_6 = arith.constant 0 : index
    %4 = vector.load %arg4[%c0_5, %c0_6] : memref<1x8xf32, #tpu.memory_space<vmem>>, vector<1x8xf32>
    %c0_7 = arith.constant 0 : index
    %c0_8 = arith.constant 0 : index
    %5 = vector.load %arg5[%c0_7, %c0_8] : memref<1x1xf32, #tpu.memory_space<vmem>>, vector<1x1xf32>
    %c0_9 = arith.constant 0 : index
    %c0_10 = arith.constant 0 : index
    %6 = vector.load %arg6[%c0_9, %c0_10] : memref<8x1xf32, #tpu.memory_space<vmem>>, vector<8x1xf32>
    %c0_11 = arith.constant 0 : index
    %c0_12 = arith.constant 0 : index
    %7 = vector.load %arg7[%c0_11, %c0_12] : memref<8x1xf32, #tpu.memory_space<vmem>>, vector<8x1xf32>
    %c0_13 = arith.constant 0 : index
    %c0_14 = arith.constant 0 : index
    %8 = vector.load %arg8[%c0_13, %c0_14] : memref<512x2xf32, #tpu.memory_space<vmem>>, vector<512x2xf32>
    %c0_15 = arith.constant 0 : index
    %c0_16 = arith.constant 0 : index
    %9 = vector.load %arg9[%c0_15, %c0_16] : memref<2x512xf32, #tpu.memory_space<vmem>>, vector<2x512xf32>
    %10 = vector.broadcast %3 : vector<8x1xf32> to vector<8x512xf32>
    %11 = arith.addf %2, %10 : vector<8x512xf32>
    %cst_17 = arith.constant dense<0.000000e+00> : vector<8x2xf32>
    %12 = tpu.matmul %11, %8, %cst_17 {dimension_numbers = #tpu.dot_dimension_numbers<[1], [0], [0], [1], [0, 0, 1, 1], [], []>} : vector<8x512xf32>, vector<512x2xf32>, vector<8x2xf32> -> vector<8x2xf32>
    %cst_18 = arith.constant dense<0.000000e+00> : vector<1x2xf32>
    %13 = tpu.matmul %4, %12, %cst_18 {dimension_numbers = #tpu.dot_dimension_numbers<[1], [0], [0], [1], [0, 0, 1, 1], [], []>} : vector<1x8xf32>, vector<8x2xf32>, vector<1x2xf32> -> vector<1x2xf32>
    %14 = vector.broadcast %5 : vector<1x1xf32> to vector<1x2xf32>
    %15 = arith.addf %13, %14 : vector<1x2xf32>
    %cst_19 = arith.constant 0.000000e+00 : f32
    %16 = vector.broadcast %cst_19 : f32 to vector<1x2xf32>
    %17 = arith.maximumf %15, %16 : vector<1x2xf32>
    %cst_20 = arith.constant dense<0.000000e+00> : vector<8x2xf32>
    %18 = tpu.matmul %6, %17, %cst_20 {dimension_numbers = #tpu.dot_dimension_numbers<[1], [0], [0], [1], [0, 0, 1, 1], [], []>} : vector<8x1xf32>, vector<1x2xf32>, vector<8x2xf32> -> vector<8x2xf32>
    %19 = vector.broadcast %7 : vector<8x1xf32> to vector<8x2xf32>
    %20 = arith.addf %18, %19 : vector<8x2xf32>
    %21 = arith.negf %20 : vector<8x2xf32>
    %22 = math.exp %21 : vector<8x2xf32>
    %cst_21 = arith.constant 1.000000e+00 : f32
    %23 = vector.broadcast %cst_21 : f32 to vector<8x2xf32>
    %24 = arith.addf %23, %22 : vector<8x2xf32>
    %25 = arith.divf %23, %24 : vector<8x2xf32>
    %cst_22 = arith.constant dense<0.000000e+00> : vector<8x512xf32>
    %26 = tpu.matmul %25, %9, %cst_22 {dimension_numbers = #tpu.dot_dimension_numbers<[1], [0], [0], [1], [0, 0, 1, 1], [], []>} : vector<8x2xf32>, vector<2x512xf32>, vector<8x512xf32> -> vector<8x512xf32>
    %27 = arith.mulf %11, %26 : vector<8x512xf32>
    %cst_23 = arith.constant 0.000000e+00 : f32
    %28 = vector.broadcast %cst_23 : f32 to vector<8x512xf32>
    %29 = arith.maximumf %27, %28 : vector<8x512xf32>
    %c0_24 = arith.constant 0 : index
    %c0_25 = arith.constant 0 : index
    %30 = vector.load %arg11[%c0_24, %c0_25] : memref<4608x128xf32, #tpu.memory_space<vmem>>, vector<512x128xf32>
    %c0_26 = arith.constant 0 : index
    %c0_27 = arith.constant 0 : index
    %31 = vector.load %arg10[%c0_26, %c0_27] : memref<144x8xf32, #tpu.memory_space<vmem>>, vector<16x8xf32>
    %cst_28 = arith.constant dense<0.000000e+00> : vector<8x128xf32>
    %32 = tpu.matmul %29, %30, %cst_28 {dimension_numbers = #tpu.dot_dimension_numbers<[1], [0], [0], [1], [0, 0, 1, 1], [], []>} : vector<8x512xf32>, vector<512x128xf32>, vector<8x128xf32> -> vector<8x128xf32>
    %cst_29 = arith.constant dense<0.000000e+00> : vector<16x128xf32>
    %33 = tpu.matmul %31, %32, %cst_29 {dimension_numbers = #tpu.dot_dimension_numbers<[1], [0], [0], [1], [0, 0, 1, 1], [], []>} : vector<16x8xf32>, vector<8x128xf32>, vector<16x128xf32> -> vector<16x128xf32>
    %c512 = arith.constant 512 : index
    %c0_30 = arith.constant 0 : index
    %34 = vector.load %arg11[%c512, %c0_30] : memref<4608x128xf32, #tpu.memory_space<vmem>>, vector<512x128xf32>
    %c16 = arith.constant 16 : index
    %c0_31 = arith.constant 0 : index
    %35 = vector.load %arg10[%c16, %c0_31] : memref<144x8xf32, #tpu.memory_space<vmem>>, vector<16x8xf32>
    %cst_32 = arith.constant dense<0.000000e+00> : vector<8x128xf32>
    %36 = tpu.matmul %29, %34, %cst_32 {dimension_numbers = #tpu.dot_dimension_numbers<[1], [0], [0], [1], [0, 0, 1, 1], [], []>} : vector<8x512xf32>, vector<512x128xf32>, vector<8x128xf32> -> vector<8x128xf32>
    %cst_33 = arith.constant dense<0.000000e+00> : vector<16x128xf32>
    %37 = tpu.matmul %35, %36, %cst_33 {dimension_numbers = #tpu.dot_dimension_numbers<[1], [0], [0], [1], [0, 0, 1, 1], [], []>} : vector<16x8xf32>, vector<8x128xf32>, vector<16x128xf32> -> vector<16x128xf32>
    %38 = arith.addf %33, %37 : vector<16x128xf32>
    %c1024 = arith.constant 1024 : index
    %c0_34 = arith.constant 0 : index
    %39 = vector.load %arg11[%c1024, %c0_34] : memref<4608x128xf32, #tpu.memory_space<vmem>>, vector<512x128xf32>
    %c32 = arith.constant 32 : index
    %c0_35 = arith.constant 0 : index
    %40 = vector.load %arg10[%c32, %c0_35] : memref<144x8xf32, #tpu.memory_space<vmem>>, vector<16x8xf32>
    %cst_36 = arith.constant dense<0.000000e+00> : vector<8x128xf32>
    %41 = tpu.matmul %29, %39, %cst_36 {dimension_numbers = #tpu.dot_dimension_numbers<[1], [0], [0], [1], [0, 0, 1, 1], [], []>} : vector<8x512xf32>, vector<512x128xf32>, vector<8x128xf32> -> vector<8x128xf32>
    %cst_37 = arith.constant dense<0.000000e+00> : vector<16x128xf32>
    %42 = tpu.matmul %40, %41, %cst_37 {dimension_numbers = #tpu.dot_dimension_numbers<[1], [0], [0], [1], [0, 0, 1, 1], [], []>} : vector<16x8xf32>, vector<8x128xf32>, vector<16x128xf32> -> vector<16x128xf32>
    %43 = arith.addf %38, %42 : vector<16x128xf32>
    %c1536 = arith.constant 1536 : index
    %c0_38 = arith.constant 0 : index
    %44 = vector.load %arg11[%c1536, %c0_38] : memref<4608x128xf32, #tpu.memory_space<vmem>>, vector<512x128xf32>
    %c48 = arith.constant 48 : index
    %c0_39 = arith.constant 0 : index
    %45 = vector.load %arg10[%c48, %c0_39] : memref<144x8xf32, #tpu.memory_space<vmem>>, vector<16x8xf32>
    %cst_40 = arith.constant dense<0.000000e+00> : vector<8x128xf32>
    %46 = tpu.matmul %29, %44, %cst_40 {dimension_numbers = #tpu.dot_dimension_numbers<[1], [0], [0], [1], [0, 0, 1, 1], [], []>} : vector<8x512xf32>, vector<512x128xf32>, vector<8x128xf32> -> vector<8x128xf32>
    %cst_41 = arith.constant dense<0.000000e+00> : vector<16x128xf32>
    %47 = tpu.matmul %45, %46, %cst_41 {dimension_numbers = #tpu.dot_dimension_numbers<[1], [0], [0], [1], [0, 0, 1, 1], [], []>} : vector<16x8xf32>, vector<8x128xf32>, vector<16x128xf32> -> vector<16x128xf32>
    %48 = arith.addf %43, %47 : vector<16x128xf32>
    %c2048 = arith.constant 2048 : index
    %c0_42 = arith.constant 0 : index
    %49 = vector.load %arg11[%c2048, %c0_42] : memref<4608x128xf32, #tpu.memory_space<vmem>>, vector<512x128xf32>
    %c64 = arith.constant 64 : index
    %c0_43 = arith.constant 0 : index
    %50 = vector.load %arg10[%c64, %c0_43] : memref<144x8xf32, #tpu.memory_space<vmem>>, vector<16x8xf32>
    %cst_44 = arith.constant dense<0.000000e+00> : vector<8x128xf32>
    %51 = tpu.matmul %29, %49, %cst_44 {dimension_numbers = #tpu.dot_dimension_numbers<[1], [0], [0], [1], [0, 0, 1, 1], [], []>} : vector<8x512xf32>, vector<512x128xf32>, vector<8x128xf32> -> vector<8x128xf32>
    %cst_45 = arith.constant dense<0.000000e+00> : vector<16x128xf32>
    %52 = tpu.matmul %50, %51, %cst_45 {dimension_numbers = #tpu.dot_dimension_numbers<[1], [0], [0], [1], [0, 0, 1, 1], [], []>} : vector<16x8xf32>, vector<8x128xf32>, vector<16x128xf32> -> vector<16x128xf32>
    %53 = arith.addf %48, %52 : vector<16x128xf32>
    %c2560 = arith.constant 2560 : index
    %c0_46 = arith.constant 0 : index
    %54 = vector.load %arg11[%c2560, %c0_46] : memref<4608x128xf32, #tpu.memory_space<vmem>>, vector<512x128xf32>
    %c80 = arith.constant 80 : index
    %c0_47 = arith.constant 0 : index
    %55 = vector.load %arg10[%c80, %c0_47] : memref<144x8xf32, #tpu.memory_space<vmem>>, vector<16x8xf32>
    %cst_48 = arith.constant dense<0.000000e+00> : vector<8x128xf32>
    %56 = tpu.matmul %29, %54, %cst_48 {dimension_numbers = #tpu.dot_dimension_numbers<[1], [0], [0], [1], [0, 0, 1, 1], [], []>} : vector<8x512xf32>, vector<512x128xf32>, vector<8x128xf32> -> vector<8x128xf32>
    %cst_49 = arith.constant dense<0.000000e+00> : vector<16x128xf32>
    %57 = tpu.matmul %55, %56, %cst_49 {dimension_numbers = #tpu.dot_dimension_numbers<[1], [0], [0], [1], [0, 0, 1, 1], [], []>} : vector<16x8xf32>, vector<8x128xf32>, vector<16x128xf32> -> vector<16x128xf32>
    %58 = arith.addf %53, %57 : vector<16x128xf32>
    %c3072 = arith.constant 3072 : index
    %c0_50 = arith.constant 0 : index
    %59 = vector.load %arg11[%c3072, %c0_50] : memref<4608x128xf32, #tpu.memory_space<vmem>>, vector<512x128xf32>
    %c96 = arith.constant 96 : index
    %c0_51 = arith.constant 0 : index
    %60 = vector.load %arg10[%c96, %c0_51] : memref<144x8xf32, #tpu.memory_space<vmem>>, vector<16x8xf32>
    %cst_52 = arith.constant dense<0.000000e+00> : vector<8x128xf32>
    %61 = tpu.matmul %29, %59, %cst_52 {dimension_numbers = #tpu.dot_dimension_numbers<[1], [0], [0], [1], [0, 0, 1, 1], [], []>} : vector<8x512xf32>, vector<512x128xf32>, vector<8x128xf32> -> vector<8x128xf32>
    %cst_53 = arith.constant dense<0.000000e+00> : vector<16x128xf32>
    %62 = tpu.matmul %60, %61, %cst_53 {dimension_numbers = #tpu.dot_dimension_numbers<[1], [0], [0], [1], [0, 0, 1, 1], [], []>} : vector<16x8xf32>, vector<8x128xf32>, vector<16x128xf32> -> vector<16x128xf32>
    %63 = arith.addf %58, %62 : vector<16x128xf32>
    %c3584 = arith.constant 3584 : index
    %c0_54 = arith.constant 0 : index
    %64 = vector.load %arg11[%c3584, %c0_54] : memref<4608x128xf32, #tpu.memory_space<vmem>>, vector<512x128xf32>
    %c112 = arith.constant 112 : index
    %c0_55 = arith.constant 0 : index
    %65 = vector.load %arg10[%c112, %c0_55] : memref<144x8xf32, #tpu.memory_space<vmem>>, vector<16x8xf32>
    %cst_56 = arith.constant dense<0.000000e+00> : vector<8x128xf32>
    %66 = tpu.matmul %29, %64, %cst_56 {dimension_numbers = #tpu.dot_dimension_numbers<[1], [0], [0], [1], [0, 0, 1, 1], [], []>} : vector<8x512xf32>, vector<512x128xf32>, vector<8x128xf32> -> vector<8x128xf32>
    %cst_57 = arith.constant dense<0.000000e+00> : vector<16x128xf32>
    %67 = tpu.matmul %65, %66, %cst_57 {dimension_numbers = #tpu.dot_dimension_numbers<[1], [0], [0], [1], [0, 0, 1, 1], [], []>} : vector<16x8xf32>, vector<8x128xf32>, vector<16x128xf32> -> vector<16x128xf32>
    %68 = arith.addf %63, %67 : vector<16x128xf32>
    %c4096 = arith.constant 4096 : index
    %c0_58 = arith.constant 0 : index
    %69 = vector.load %arg11[%c4096, %c0_58] : memref<4608x128xf32, #tpu.memory_space<vmem>>, vector<512x128xf32>
    %c128 = arith.constant 128 : index
    %c0_59 = arith.constant 0 : index
    %70 = vector.load %arg10[%c128, %c0_59] : memref<144x8xf32, #tpu.memory_space<vmem>>, vector<16x8xf32>
    %cst_60 = arith.constant dense<0.000000e+00> : vector<8x128xf32>
    %71 = tpu.matmul %29, %69, %cst_60 {dimension_numbers = #tpu.dot_dimension_numbers<[1], [0], [0], [1], [0, 0, 1, 1], [], []>} : vector<8x512xf32>, vector<512x128xf32>, vector<8x128xf32> -> vector<8x128xf32>
    %cst_61 = arith.constant dense<0.000000e+00> : vector<16x128xf32>
    %72 = tpu.matmul %70, %71, %cst_61 {dimension_numbers = #tpu.dot_dimension_numbers<[1], [0], [0], [1], [0, 0, 1, 1], [], []>} : vector<16x8xf32>, vector<8x128xf32>, vector<16x128xf32> -> vector<16x128xf32>
    %73 = arith.addf %68, %72 : vector<16x128xf32>
    %c0_62 = arith.constant 0 : index
    %c0_63 = arith.constant 0 : index
    %74 = vector.load %arg12[%c0_62, %c0_63] : memref<16x1xf32, #tpu.memory_space<vmem>>, vector<16x1xf32>
    %c0_64 = arith.constant 0 : index
    %c0_65 = arith.constant 0 : index
    %75 = vector.load %arg13[%c0_64, %c0_65] : memref<2x16xf32, #tpu.memory_space<vmem>>, vector<2x16xf32>
    %c0_66 = arith.constant 0 : index
    %c0_67 = arith.constant 0 : index
    %76 = vector.load %arg14[%c0_66, %c0_67] : memref<2x1xf32, #tpu.memory_space<vmem>>, vector<2x1xf32>
    %c0_68 = arith.constant 0 : index
    %c0_69 = arith.constant 0 : index
    %77 = vector.load %arg15[%c0_68, %c0_69] : memref<16x2xf32, #tpu.memory_space<vmem>>, vector<16x2xf32>
    %c0_70 = arith.constant 0 : index
    %c0_71 = arith.constant 0 : index
    %78 = vector.load %arg16[%c0_70, %c0_71] : memref<16x1xf32, #tpu.memory_space<vmem>>, vector<16x1xf32>
    %c0_72 = arith.constant 0 : index
    %c0_73 = arith.constant 0 : index
    %79 = vector.load %arg17[%c0_72, %c0_73] : memref<128x2xf32, #tpu.memory_space<vmem>>, vector<128x2xf32>
    %c0_74 = arith.constant 0 : index
    %c0_75 = arith.constant 0 : index
    %80 = vector.load %arg18[%c0_74, %c0_75] : memref<2x128xf32, #tpu.memory_space<vmem>>, vector<2x128xf32>
    %81 = vector.broadcast %74 : vector<16x1xf32> to vector<16x128xf32>
    %82 = arith.addf %73, %81 : vector<16x128xf32>
    %cst_76 = arith.constant dense<0.000000e+00> : vector<16x2xf32>
    %83 = tpu.matmul %82, %79, %cst_76 {dimension_numbers = #tpu.dot_dimension_numbers<[1], [0], [0], [1], [0, 0, 1, 1], [], []>} : vector<16x128xf32>, vector<128x2xf32>, vector<16x2xf32> -> vector<16x2xf32>
    %cst_77 = arith.constant dense<0.000000e+00> : vector<2x2xf32>
    %84 = tpu.matmul %75, %83, %cst_77 {dimension_numbers = #tpu.dot_dimension_numbers<[1], [0], [0], [1], [0, 0, 1, 1], [], []>} : vector<2x16xf32>, vector<16x2xf32>, vector<2x2xf32> -> vector<2x2xf32>
    %85 = vector.broadcast %76 : vector<2x1xf32> to vector<2x2xf32>
    %86 = arith.addf %84, %85 : vector<2x2xf32>
    %cst_78 = arith.constant 0.000000e+00 : f32
    %87 = vector.broadcast %cst_78 : f32 to vector<2x2xf32>
    %88 = arith.maximumf %86, %87 : vector<2x2xf32>
    %cst_79 = arith.constant dense<0.000000e+00> : vector<16x2xf32>
    %89 = tpu.matmul %77, %88, %cst_79 {dimension_numbers = #tpu.dot_dimension_numbers<[1], [0], [0], [1], [0, 0, 1, 1], [], []>} : vector<16x2xf32>, vector<2x2xf32>, vector<16x2xf32> -> vector<16x2xf32>
    %90 = vector.broadcast %78 : vector<16x1xf32> to vector<16x2xf32>
    %91 = arith.addf %89, %90 : vector<16x2xf32>
    %92 = arith.negf %91 : vector<16x2xf32>
    %93 = math.exp %92 : vector<16x2xf32>
    %cst_80 = arith.constant 1.000000e+00 : f32
    %94 = vector.broadcast %cst_80 : f32 to vector<16x2xf32>
    %95 = arith.addf %94, %93 : vector<16x2xf32>
    %96 = arith.divf %94, %95 : vector<16x2xf32>
    %cst_81 = arith.constant dense<0.000000e+00> : vector<16x128xf32>
    %97 = tpu.matmul %96, %80, %cst_81 {dimension_numbers = #tpu.dot_dimension_numbers<[1], [0], [0], [1], [0, 0, 1, 1], [], []>} : vector<16x2xf32>, vector<2x128xf32>, vector<16x128xf32> -> vector<16x128xf32>
    %98 = arith.mulf %82, %97 : vector<16x128xf32>
    %cst_82 = arith.constant 0.000000e+00 : f32
    %99 = vector.broadcast %cst_82 : f32 to vector<16x128xf32>
    %100 = arith.maximumf %98, %99 : vector<16x128xf32>
    %c0_83 = arith.constant 0 : index
    %c0_84 = arith.constant 0 : index
    %101 = vector.load %arg20[%c0_83, %c0_84] : memref<1152x128xf32, #tpu.memory_space<vmem>>, vector<128x128xf32>
    %c0_85 = arith.constant 0 : index
    %c0_86 = arith.constant 0 : index
    %102 = vector.load %arg19[%c0_85, %c0_86] : memref<144x16xf32, #tpu.memory_space<vmem>>, vector<16x16xf32>
    %cst_87 = arith.constant dense<0.000000e+00> : vector<16x128xf32>
    %103 = tpu.matmul %100, %101, %cst_87 {dimension_numbers = #tpu.dot_dimension_numbers<[1], [0], [0], [1], [0, 0, 1, 1], [], []>} : vector<16x128xf32>, vector<128x128xf32>, vector<16x128xf32> -> vector<16x128xf32>
    %cst_88 = arith.constant dense<0.000000e+00> : vector<16x128xf32>
    %104 = tpu.matmul %102, %103, %cst_88 {dimension_numbers = #tpu.dot_dimension_numbers<[1], [0], [0], [1], [0, 0, 1, 1], [], []>} : vector<16x16xf32>, vector<16x128xf32>, vector<16x128xf32> -> vector<16x128xf32>
    %c128_89 = arith.constant 128 : index
    %c0_90 = arith.constant 0 : index
    %105 = vector.load %arg20[%c128_89, %c0_90] : memref<1152x128xf32, #tpu.memory_space<vmem>>, vector<128x128xf32>
    %c16_91 = arith.constant 16 : index
    %c0_92 = arith.constant 0 : index
    %106 = vector.load %arg19[%c16_91, %c0_92] : memref<144x16xf32, #tpu.memory_space<vmem>>, vector<16x16xf32>
    %cst_93 = arith.constant dense<0.000000e+00> : vector<16x128xf32>
    %107 = tpu.matmul %100, %105, %cst_93 {dimension_numbers = #tpu.dot_dimension_numbers<[1], [0], [0], [1], [0, 0, 1, 1], [], []>} : vector<16x128xf32>, vector<128x128xf32>, vector<16x128xf32> -> vector<16x128xf32>
    %cst_94 = arith.constant dense<0.000000e+00> : vector<16x128xf32>
    %108 = tpu.matmul %106, %107, %cst_94 {dimension_numbers = #tpu.dot_dimension_numbers<[1], [0], [0], [1], [0, 0, 1, 1], [], []>} : vector<16x16xf32>, vector<16x128xf32>, vector<16x128xf32> -> vector<16x128xf32>
    %109 = arith.addf %104, %108 : vector<16x128xf32>
    %c256 = arith.constant 256 : index
    %c0_95 = arith.constant 0 : index
    %110 = vector.load %arg20[%c256, %c0_95] : memref<1152x128xf32, #tpu.memory_space<vmem>>, vector<128x128xf32>
    %c32_96 = arith.constant 32 : index
    %c0_97 = arith.constant 0 : index
    %111 = vector.load %arg19[%c32_96, %c0_97] : memref<144x16xf32, #tpu.memory_space<vmem>>, vector<16x16xf32>
    %cst_98 = arith.constant dense<0.000000e+00> : vector<16x128xf32>
    %112 = tpu.matmul %100, %110, %cst_98 {dimension_numbers = #tpu.dot_dimension_numbers<[1], [0], [0], [1], [0, 0, 1, 1], [], []>} : vector<16x128xf32>, vector<128x128xf32>, vector<16x128xf32> -> vector<16x128xf32>
    %cst_99 = arith.constant dense<0.000000e+00> : vector<16x128xf32>
    %113 = tpu.matmul %111, %112, %cst_99 {dimension_numbers = #tpu.dot_dimension_numbers<[1], [0], [0], [1], [0, 0, 1, 1], [], []>} : vector<16x16xf32>, vector<16x128xf32>, vector<16x128xf32> -> vector<16x128xf32>
    %114 = arith.addf %109, %113 : vector<16x128xf32>
    %c384 = arith.constant 384 : index
    %c0_100 = arith.constant 0 : index
    %115 = vector.load %arg20[%c384, %c0_100] : memref<1152x128xf32, #tpu.memory_space<vmem>>, vector<128x128xf32>
    %c48_101 = arith.constant 48 : index
    %c0_102 = arith.constant 0 : index
    %116 = vector.load %arg19[%c48_101, %c0_102] : memref<144x16xf32, #tpu.memory_space<vmem>>, vector<16x16xf32>
    %cst_103 = arith.constant dense<0.000000e+00> : vector<16x128xf32>
    %117 = tpu.matmul %100, %115, %cst_103 {dimension_numbers = #tpu.dot_dimension_numbers<[1], [0], [0], [1], [0, 0, 1, 1], [], []>} : vector<16x128xf32>, vector<128x128xf32>, vector<16x128xf32> -> vector<16x128xf32>
    %cst_104 = arith.constant dense<0.000000e+00> : vector<16x128xf32>
    %118 = tpu.matmul %116, %117, %cst_104 {dimension_numbers = #tpu.dot_dimension_numbers<[1], [0], [0], [1], [0, 0, 1, 1], [], []>} : vector<16x16xf32>, vector<16x128xf32>, vector<16x128xf32> -> vector<16x128xf32>
    %119 = arith.addf %114, %118 : vector<16x128xf32>
    %c512_105 = arith.constant 512 : index
    %c0_106 = arith.constant 0 : index
    %120 = vector.load %arg20[%c512_105, %c0_106] : memref<1152x128xf32, #tpu.memory_space<vmem>>, vector<128x128xf32>
    %c64_107 = arith.constant 64 : index
    %c0_108 = arith.constant 0 : index
    %121 = vector.load %arg19[%c64_107, %c0_108] : memref<144x16xf32, #tpu.memory_space<vmem>>, vector<16x16xf32>
    %cst_109 = arith.constant dense<0.000000e+00> : vector<16x128xf32>
    %122 = tpu.matmul %100, %120, %cst_109 {dimension_numbers = #tpu.dot_dimension_numbers<[1], [0], [0], [1], [0, 0, 1, 1], [], []>} : vector<16x128xf32>, vector<128x128xf32>, vector<16x128xf32> -> vector<16x128xf32>
    %cst_110 = arith.constant dense<0.000000e+00> : vector<16x128xf32>
    %123 = tpu.matmul %121, %122, %cst_110 {dimension_numbers = #tpu.dot_dimension_numbers<[1], [0], [0], [1], [0, 0, 1, 1], [], []>} : vector<16x16xf32>, vector<16x128xf32>, vector<16x128xf32> -> vector<16x128xf32>
    %124 = arith.addf %119, %123 : vector<16x128xf32>
    %c640 = arith.constant 640 : index
    %c0_111 = arith.constant 0 : index
    %125 = vector.load %arg20[%c640, %c0_111] : memref<1152x128xf32, #tpu.memory_space<vmem>>, vector<128x128xf32>
    %c80_112 = arith.constant 80 : index
    %c0_113 = arith.constant 0 : index
    %126 = vector.load %arg19[%c80_112, %c0_113] : memref<144x16xf32, #tpu.memory_space<vmem>>, vector<16x16xf32>
    %cst_114 = arith.constant dense<0.000000e+00> : vector<16x128xf32>
    %127 = tpu.matmul %100, %125, %cst_114 {dimension_numbers = #tpu.dot_dimension_numbers<[1], [0], [0], [1], [0, 0, 1, 1], [], []>} : vector<16x128xf32>, vector<128x128xf32>, vector<16x128xf32> -> vector<16x128xf32>
    %cst_115 = arith.constant dense<0.000000e+00> : vector<16x128xf32>
    %128 = tpu.matmul %126, %127, %cst_115 {dimension_numbers = #tpu.dot_dimension_numbers<[1], [0], [0], [1], [0, 0, 1, 1], [], []>} : vector<16x16xf32>, vector<16x128xf32>, vector<16x128xf32> -> vector<16x128xf32>
    %129 = arith.addf %124, %128 : vector<16x128xf32>
    %c768 = arith.constant 768 : index
    %c0_116 = arith.constant 0 : index
    %130 = vector.load %arg20[%c768, %c0_116] : memref<1152x128xf32, #tpu.memory_space<vmem>>, vector<128x128xf32>
    %c96_117 = arith.constant 96 : index
    %c0_118 = arith.constant 0 : index
    %131 = vector.load %arg19[%c96_117, %c0_118] : memref<144x16xf32, #tpu.memory_space<vmem>>, vector<16x16xf32>
    %cst_119 = arith.constant dense<0.000000e+00> : vector<16x128xf32>
    %132 = tpu.matmul %100, %130, %cst_119 {dimension_numbers = #tpu.dot_dimension_numbers<[1], [0], [0], [1], [0, 0, 1, 1], [], []>} : vector<16x128xf32>, vector<128x128xf32>, vector<16x128xf32> -> vector<16x128xf32>
    %cst_120 = arith.constant dense<0.000000e+00> : vector<16x128xf32>
    %133 = tpu.matmul %131, %132, %cst_120 {dimension_numbers = #tpu.dot_dimension_numbers<[1], [0], [0], [1], [0, 0, 1, 1], [], []>} : vector<16x16xf32>, vector<16x128xf32>, vector<16x128xf32> -> vector<16x128xf32>
    %134 = arith.addf %129, %133 : vector<16x128xf32>
    %c896 = arith.constant 896 : index
    %c0_121 = arith.constant 0 : index
    %135 = vector.load %arg20[%c896, %c0_121] : memref<1152x128xf32, #tpu.memory_space<vmem>>, vector<128x128xf32>
    %c112_122 = arith.constant 112 : index
    %c0_123 = arith.constant 0 : index
    %136 = vector.load %arg19[%c112_122, %c0_123] : memref<144x16xf32, #tpu.memory_space<vmem>>, vector<16x16xf32>
    %cst_124 = arith.constant dense<0.000000e+00> : vector<16x128xf32>
    %137 = tpu.matmul %100, %135, %cst_124 {dimension_numbers = #tpu.dot_dimension_numbers<[1], [0], [0], [1], [0, 0, 1, 1], [], []>} : vector<16x128xf32>, vector<128x128xf32>, vector<16x128xf32> -> vector<16x128xf32>
    %cst_125 = arith.constant dense<0.000000e+00> : vector<16x128xf32>
    %138 = tpu.matmul %136, %137, %cst_125 {dimension_numbers = #tpu.dot_dimension_numbers<[1], [0], [0], [1], [0, 0, 1, 1], [], []>} : vector<16x16xf32>, vector<16x128xf32>, vector<16x128xf32> -> vector<16x128xf32>
    %139 = arith.addf %134, %138 : vector<16x128xf32>
    %c1024_126 = arith.constant 1024 : index
    %c0_127 = arith.constant 0 : index
    %140 = vector.load %arg20[%c1024_126, %c0_127] : memref<1152x128xf32, #tpu.memory_space<vmem>>, vector<128x128xf32>
    %c128_128 = arith.constant 128 : index
    %c0_129 = arith.constant 0 : index
    %141 = vector.load %arg19[%c128_128, %c0_129] : memref<144x16xf32, #tpu.memory_space<vmem>>, vector<16x16xf32>
    %cst_130 = arith.constant dense<0.000000e+00> : vector<16x128xf32>
    %142 = tpu.matmul %100, %140, %cst_130 {dimension_numbers = #tpu.dot_dimension_numbers<[1], [0], [0], [1], [0, 0, 1, 1], [], []>} : vector<16x128xf32>, vector<128x128xf32>, vector<16x128xf32> -> vector<16x128xf32>
    %cst_131 = arith.constant dense<0.000000e+00> : vector<16x128xf32>
    %143 = tpu.matmul %141, %142, %cst_131 {dimension_numbers = #tpu.dot_dimension_numbers<[1], [0], [0], [1], [0, 0, 1, 1], [], []>} : vector<16x16xf32>, vector<16x128xf32>, vector<16x128xf32> -> vector<16x128xf32>
    %144 = arith.addf %139, %143 : vector<16x128xf32>
    %c0_132 = arith.constant 0 : index
    %c0_133 = arith.constant 0 : index
    %145 = vector.load %arg21[%c0_132, %c0_133] : memref<16x1xf32, #tpu.memory_space<vmem>>, vector<16x1xf32>
    %c0_134 = arith.constant 0 : index
    %c0_135 = arith.constant 0 : index
    %146 = vector.load %arg22[%c0_134, %c0_135] : memref<2x16xf32, #tpu.memory_space<vmem>>, vector<2x16xf32>
    %c0_136 = arith.constant 0 : index
    %c0_137 = arith.constant 0 : index
    %147 = vector.load %arg23[%c0_136, %c0_137] : memref<2x1xf32, #tpu.memory_space<vmem>>, vector<2x1xf32>
    %c0_138 = arith.constant 0 : index
    %c0_139 = arith.constant 0 : index
    %148 = vector.load %arg24[%c0_138, %c0_139] : memref<16x2xf32, #tpu.memory_space<vmem>>, vector<16x2xf32>
    %c0_140 = arith.constant 0 : index
    %c0_141 = arith.constant 0 : index
    %149 = vector.load %arg25[%c0_140, %c0_141] : memref<16x1xf32, #tpu.memory_space<vmem>>, vector<16x1xf32>
    %c0_142 = arith.constant 0 : index
    %c0_143 = arith.constant 0 : index
    %150 = vector.load %arg26[%c0_142, %c0_143] : memref<128x2xf32, #tpu.memory_space<vmem>>, vector<128x2xf32>
    %c0_144 = arith.constant 0 : index
    %c0_145 = arith.constant 0 : index
    %151 = vector.load %arg27[%c0_144, %c0_145] : memref<2x128xf32, #tpu.memory_space<vmem>>, vector<2x128xf32>
    %152 = vector.broadcast %145 : vector<16x1xf32> to vector<16x128xf32>
    %153 = arith.addf %144, %152 : vector<16x128xf32>
    %cst_146 = arith.constant dense<0.000000e+00> : vector<16x2xf32>
    %154 = tpu.matmul %153, %150, %cst_146 {dimension_numbers = #tpu.dot_dimension_numbers<[1], [0], [0], [1], [0, 0, 1, 1], [], []>} : vector<16x128xf32>, vector<128x2xf32>, vector<16x2xf32> -> vector<16x2xf32>
    %cst_147 = arith.constant dense<0.000000e+00> : vector<2x2xf32>
    %155 = tpu.matmul %146, %154, %cst_147 {dimension_numbers = #tpu.dot_dimension_numbers<[1], [0], [0], [1], [0, 0, 1, 1], [], []>} : vector<2x16xf32>, vector<16x2xf32>, vector<2x2xf32> -> vector<2x2xf32>
    %156 = vector.broadcast %147 : vector<2x1xf32> to vector<2x2xf32>
    %157 = arith.addf %155, %156 : vector<2x2xf32>
    %cst_148 = arith.constant 0.000000e+00 : f32
    %158 = vector.broadcast %cst_148 : f32 to vector<2x2xf32>
    %159 = arith.maximumf %157, %158 : vector<2x2xf32>
    %cst_149 = arith.constant dense<0.000000e+00> : vector<16x2xf32>
    %160 = tpu.matmul %148, %159, %cst_149 {dimension_numbers = #tpu.dot_dimension_numbers<[1], [0], [0], [1], [0, 0, 1, 1], [], []>} : vector<16x2xf32>, vector<2x2xf32>, vector<16x2xf32> -> vector<16x2xf32>
    %161 = vector.broadcast %149 : vector<16x1xf32> to vector<16x2xf32>
    %162 = arith.addf %160, %161 : vector<16x2xf32>
    %163 = arith.negf %162 : vector<16x2xf32>
    %164 = math.exp %163 : vector<16x2xf32>
    %cst_150 = arith.constant 1.000000e+00 : f32
    %165 = vector.broadcast %cst_150 : f32 to vector<16x2xf32>
    %166 = arith.addf %165, %164 : vector<16x2xf32>
    %167 = arith.divf %165, %166 : vector<16x2xf32>
    %cst_151 = arith.constant dense<0.000000e+00> : vector<16x128xf32>
    %168 = tpu.matmul %167, %151, %cst_151 {dimension_numbers = #tpu.dot_dimension_numbers<[1], [0], [0], [1], [0, 0, 1, 1], [], []>} : vector<16x2xf32>, vector<2x128xf32>, vector<16x128xf32> -> vector<16x128xf32>
    %169 = arith.mulf %153, %168 : vector<16x128xf32>
    %cst_152 = arith.constant 0.000000e+00 : f32
    %170 = vector.broadcast %cst_152 : f32 to vector<16x128xf32>
    %171 = arith.maximumf %169, %170 : vector<16x128xf32>
    %c0_153 = arith.constant 0 : index
    %c0_154 = arith.constant 0 : index
    %172 = vector.load %arg29[%c0_153, %c0_154] : memref<1152x32xf32, #tpu.memory_space<vmem>>, vector<128x32xf32>
    %c0_155 = arith.constant 0 : index
    %c0_156 = arith.constant 0 : index
    %173 = vector.load %arg28[%c0_155, %c0_156] : memref<288x16xf32, #tpu.memory_space<vmem>>, vector<32x16xf32>
    %cst_157 = arith.constant dense<0.000000e+00> : vector<16x32xf32>
    %174 = tpu.matmul %171, %172, %cst_157 {dimension_numbers = #tpu.dot_dimension_numbers<[1], [0], [0], [1], [0, 0, 1, 1], [], []>} : vector<16x128xf32>, vector<128x32xf32>, vector<16x32xf32> -> vector<16x32xf32>
    %cst_158 = arith.constant dense<0.000000e+00> : vector<32x32xf32>
    %175 = tpu.matmul %173, %174, %cst_158 {dimension_numbers = #tpu.dot_dimension_numbers<[1], [0], [0], [1], [0, 0, 1, 1], [], []>} : vector<32x16xf32>, vector<16x32xf32>, vector<32x32xf32> -> vector<32x32xf32>
    %c128_159 = arith.constant 128 : index
    %c0_160 = arith.constant 0 : index
    %176 = vector.load %arg29[%c128_159, %c0_160] : memref<1152x32xf32, #tpu.memory_space<vmem>>, vector<128x32xf32>
    %c32_161 = arith.constant 32 : index
    %c0_162 = arith.constant 0 : index
    %177 = vector.load %arg28[%c32_161, %c0_162] : memref<288x16xf32, #tpu.memory_space<vmem>>, vector<32x16xf32>
    %cst_163 = arith.constant dense<0.000000e+00> : vector<16x32xf32>
    %178 = tpu.matmul %171, %176, %cst_163 {dimension_numbers = #tpu.dot_dimension_numbers<[1], [0], [0], [1], [0, 0, 1, 1], [], []>} : vector<16x128xf32>, vector<128x32xf32>, vector<16x32xf32> -> vector<16x32xf32>
    %cst_164 = arith.constant dense<0.000000e+00> : vector<32x32xf32>
    %179 = tpu.matmul %177, %178, %cst_164 {dimension_numbers = #tpu.dot_dimension_numbers<[1], [0], [0], [1], [0, 0, 1, 1], [], []>} : vector<32x16xf32>, vector<16x32xf32>, vector<32x32xf32> -> vector<32x32xf32>
    %180 = arith.addf %175, %179 : vector<32x32xf32>
    %c256_165 = arith.constant 256 : index
    %c0_166 = arith.constant 0 : index
    %181 = vector.load %arg29[%c256_165, %c0_166] : memref<1152x32xf32, #tpu.memory_space<vmem>>, vector<128x32xf32>
    %c64_167 = arith.constant 64 : index
    %c0_168 = arith.constant 0 : index
    %182 = vector.load %arg28[%c64_167, %c0_168] : memref<288x16xf32, #tpu.memory_space<vmem>>, vector<32x16xf32>
    %cst_169 = arith.constant dense<0.000000e+00> : vector<16x32xf32>
    %183 = tpu.matmul %171, %181, %cst_169 {dimension_numbers = #tpu.dot_dimension_numbers<[1], [0], [0], [1], [0, 0, 1, 1], [], []>} : vector<16x128xf32>, vector<128x32xf32>, vector<16x32xf32> -> vector<16x32xf32>
    %cst_170 = arith.constant dense<0.000000e+00> : vector<32x32xf32>
    %184 = tpu.matmul %182, %183, %cst_170 {dimension_numbers = #tpu.dot_dimension_numbers<[1], [0], [0], [1], [0, 0, 1, 1], [], []>} : vector<32x16xf32>, vector<16x32xf32>, vector<32x32xf32> -> vector<32x32xf32>
    %185 = arith.addf %180, %184 : vector<32x32xf32>
    %c384_171 = arith.constant 384 : index
    %c0_172 = arith.constant 0 : index
    %186 = vector.load %arg29[%c384_171, %c0_172] : memref<1152x32xf32, #tpu.memory_space<vmem>>, vector<128x32xf32>
    %c96_173 = arith.constant 96 : index
    %c0_174 = arith.constant 0 : index
    %187 = vector.load %arg28[%c96_173, %c0_174] : memref<288x16xf32, #tpu.memory_space<vmem>>, vector<32x16xf32>
    %cst_175 = arith.constant dense<0.000000e+00> : vector<16x32xf32>
    %188 = tpu.matmul %171, %186, %cst_175 {dimension_numbers = #tpu.dot_dimension_numbers<[1], [0], [0], [1], [0, 0, 1, 1], [], []>} : vector<16x128xf32>, vector<128x32xf32>, vector<16x32xf32> -> vector<16x32xf32>
    %cst_176 = arith.constant dense<0.000000e+00> : vector<32x32xf32>
    %189 = tpu.matmul %187, %188, %cst_176 {dimension_numbers = #tpu.dot_dimension_numbers<[1], [0], [0], [1], [0, 0, 1, 1], [], []>} : vector<32x16xf32>, vector<16x32xf32>, vector<32x32xf32> -> vector<32x32xf32>
    %190 = arith.addf %185, %189 : vector<32x32xf32>
    %c512_177 = arith.constant 512 : index
    %c0_178 = arith.constant 0 : index
    %191 = vector.load %arg29[%c512_177, %c0_178] : memref<1152x32xf32, #tpu.memory_space<vmem>>, vector<128x32xf32>
    %c128_179 = arith.constant 128 : index
    %c0_180 = arith.constant 0 : index
    %192 = vector.load %arg28[%c128_179, %c0_180] : memref<288x16xf32, #tpu.memory_space<vmem>>, vector<32x16xf32>
    %cst_181 = arith.constant dense<0.000000e+00> : vector<16x32xf32>
    %193 = tpu.matmul %171, %191, %cst_181 {dimension_numbers = #tpu.dot_dimension_numbers<[1], [0], [0], [1], [0, 0, 1, 1], [], []>} : vector<16x128xf32>, vector<128x32xf32>, vector<16x32xf32> -> vector<16x32xf32>
    %cst_182 = arith.constant dense<0.000000e+00> : vector<32x32xf32>
    %194 = tpu.matmul %192, %193, %cst_182 {dimension_numbers = #tpu.dot_dimension_numbers<[1], [0], [0], [1], [0, 0, 1, 1], [], []>} : vector<32x16xf32>, vector<16x32xf32>, vector<32x32xf32> -> vector<32x32xf32>
    %195 = arith.addf %190, %194 : vector<32x32xf32>
    %c640_183 = arith.constant 640 : index
    %c0_184 = arith.constant 0 : index
    %196 = vector.load %arg29[%c640_183, %c0_184] : memref<1152x32xf32, #tpu.memory_space<vmem>>, vector<128x32xf32>
    %c160 = arith.constant 160 : index
    %c0_185 = arith.constant 0 : index
    %197 = vector.load %arg28[%c160, %c0_185] : memref<288x16xf32, #tpu.memory_space<vmem>>, vector<32x16xf32>
    %cst_186 = arith.constant dense<0.000000e+00> : vector<16x32xf32>
    %198 = tpu.matmul %171, %196, %cst_186 {dimension_numbers = #tpu.dot_dimension_numbers<[1], [0], [0], [1], [0, 0, 1, 1], [], []>} : vector<16x128xf32>, vector<128x32xf32>, vector<16x32xf32> -> vector<16x32xf32>
    %cst_187 = arith.constant dense<0.000000e+00> : vector<32x32xf32>
    %199 = tpu.matmul %197, %198, %cst_187 {dimension_numbers = #tpu.dot_dimension_numbers<[1], [0], [0], [1], [0, 0, 1, 1], [], []>} : vector<32x16xf32>, vector<16x32xf32>, vector<32x32xf32> -> vector<32x32xf32>
    %200 = arith.addf %195, %199 : vector<32x32xf32>
    %c768_188 = arith.constant 768 : index
    %c0_189 = arith.constant 0 : index
    %201 = vector.load %arg29[%c768_188, %c0_189] : memref<1152x32xf32, #tpu.memory_space<vmem>>, vector<128x32xf32>
    %c192 = arith.constant 192 : index
    %c0_190 = arith.constant 0 : index
    %202 = vector.load %arg28[%c192, %c0_190] : memref<288x16xf32, #tpu.memory_space<vmem>>, vector<32x16xf32>
    %cst_191 = arith.constant dense<0.000000e+00> : vector<16x32xf32>
    %203 = tpu.matmul %171, %201, %cst_191 {dimension_numbers = #tpu.dot_dimension_numbers<[1], [0], [0], [1], [0, 0, 1, 1], [], []>} : vector<16x128xf32>, vector<128x32xf32>, vector<16x32xf32> -> vector<16x32xf32>
    %cst_192 = arith.constant dense<0.000000e+00> : vector<32x32xf32>
    %204 = tpu.matmul %202, %203, %cst_192 {dimension_numbers = #tpu.dot_dimension_numbers<[1], [0], [0], [1], [0, 0, 1, 1], [], []>} : vector<32x16xf32>, vector<16x32xf32>, vector<32x32xf32> -> vector<32x32xf32>
    %205 = arith.addf %200, %204 : vector<32x32xf32>
    %c896_193 = arith.constant 896 : index
    %c0_194 = arith.constant 0 : index
    %206 = vector.load %arg29[%c896_193, %c0_194] : memref<1152x32xf32, #tpu.memory_space<vmem>>, vector<128x32xf32>
    %c224 = arith.constant 224 : index
    %c0_195 = arith.constant 0 : index
    %207 = vector.load %arg28[%c224, %c0_195] : memref<288x16xf32, #tpu.memory_space<vmem>>, vector<32x16xf32>
    %cst_196 = arith.constant dense<0.000000e+00> : vector<16x32xf32>
    %208 = tpu.matmul %171, %206, %cst_196 {dimension_numbers = #tpu.dot_dimension_numbers<[1], [0], [0], [1], [0, 0, 1, 1], [], []>} : vector<16x128xf32>, vector<128x32xf32>, vector<16x32xf32> -> vector<16x32xf32>
    %cst_197 = arith.constant dense<0.000000e+00> : vector<32x32xf32>
    %209 = tpu.matmul %207, %208, %cst_197 {dimension_numbers = #tpu.dot_dimension_numbers<[1], [0], [0], [1], [0, 0, 1, 1], [], []>} : vector<32x16xf32>, vector<16x32xf32>, vector<32x32xf32> -> vector<32x32xf32>
    %210 = arith.addf %205, %209 : vector<32x32xf32>
    %c1024_198 = arith.constant 1024 : index
    %c0_199 = arith.constant 0 : index
    %211 = vector.load %arg29[%c1024_198, %c0_199] : memref<1152x32xf32, #tpu.memory_space<vmem>>, vector<128x32xf32>
    %c256_200 = arith.constant 256 : index
    %c0_201 = arith.constant 0 : index
    %212 = vector.load %arg28[%c256_200, %c0_201] : memref<288x16xf32, #tpu.memory_space<vmem>>, vector<32x16xf32>
    %cst_202 = arith.constant dense<0.000000e+00> : vector<16x32xf32>
    %213 = tpu.matmul %171, %211, %cst_202 {dimension_numbers = #tpu.dot_dimension_numbers<[1], [0], [0], [1], [0, 0, 1, 1], [], []>} : vector<16x128xf32>, vector<128x32xf32>, vector<16x32xf32> -> vector<16x32xf32>
    %cst_203 = arith.constant dense<0.000000e+00> : vector<32x32xf32>
    %214 = tpu.matmul %212, %213, %cst_203 {dimension_numbers = #tpu.dot_dimension_numbers<[1], [0], [0], [1], [0, 0, 1, 1], [], []>} : vector<32x16xf32>, vector<16x32xf32>, vector<32x32xf32> -> vector<32x32xf32>
    %215 = arith.addf %210, %214 : vector<32x32xf32>
    %c0_204 = arith.constant 0 : index
    %c0_205 = arith.constant 0 : index
    %216 = vector.load %arg30[%c0_204, %c0_205] : memref<32x1xf32, #tpu.memory_space<vmem>>, vector<32x1xf32>
    %c0_206 = arith.constant 0 : index
    %c0_207 = arith.constant 0 : index
    %217 = vector.load %arg31[%c0_206, %c0_207] : memref<4x32xf32, #tpu.memory_space<vmem>>, vector<4x32xf32>
    %c0_208 = arith.constant 0 : index
    %c0_209 = arith.constant 0 : index
    %218 = vector.load %arg32[%c0_208, %c0_209] : memref<4x1xf32, #tpu.memory_space<vmem>>, vector<4x1xf32>
    %c0_210 = arith.constant 0 : index
    %c0_211 = arith.constant 0 : index
    %219 = vector.load %arg33[%c0_210, %c0_211] : memref<32x4xf32, #tpu.memory_space<vmem>>, vector<32x4xf32>
    %c0_212 = arith.constant 0 : index
    %c0_213 = arith.constant 0 : index
    %220 = vector.load %arg34[%c0_212, %c0_213] : memref<32x1xf32, #tpu.memory_space<vmem>>, vector<32x1xf32>
    %c0_214 = arith.constant 0 : index
    %c0_215 = arith.constant 0 : index
    %221 = vector.load %arg35[%c0_214, %c0_215] : memref<32x2xf32, #tpu.memory_space<vmem>>, vector<32x2xf32>
    %c0_216 = arith.constant 0 : index
    %c0_217 = arith.constant 0 : index
    %222 = vector.load %arg36[%c0_216, %c0_217] : memref<2x32xf32, #tpu.memory_space<vmem>>, vector<2x32xf32>
    %223 = vector.broadcast %216 : vector<32x1xf32> to vector<32x32xf32>
    %224 = arith.addf %215, %223 : vector<32x32xf32>
    %cst_218 = arith.constant dense<0.000000e+00> : vector<32x2xf32>
    %225 = tpu.matmul %224, %221, %cst_218 {dimension_numbers = #tpu.dot_dimension_numbers<[1], [0], [0], [1], [0, 0, 1, 1], [], []>} : vector<32x32xf32>, vector<32x2xf32>, vector<32x2xf32> -> vector<32x2xf32>
    %cst_219 = arith.constant dense<0.000000e+00> : vector<4x2xf32>
    %226 = tpu.matmul %217, %225, %cst_219 {dimension_numbers = #tpu.dot_dimension_numbers<[1], [0], [0], [1], [0, 0, 1, 1], [], []>} : vector<4x32xf32>, vector<32x2xf32>, vector<4x2xf32> -> vector<4x2xf32>
    %227 = vector.broadcast %218 : vector<4x1xf32> to vector<4x2xf32>
    %228 = arith.addf %226, %227 : vector<4x2xf32>
    %cst_220 = arith.constant 0.000000e+00 : f32
    %229 = vector.broadcast %cst_220 : f32 to vector<4x2xf32>
    %230 = arith.maximumf %228, %229 : vector<4x2xf32>
    %cst_221 = arith.constant dense<0.000000e+00> : vector<32x2xf32>
    %231 = tpu.matmul %219, %230, %cst_221 {dimension_numbers = #tpu.dot_dimension_numbers<[1], [0], [0], [1], [0, 0, 1, 1], [], []>} : vector<32x4xf32>, vector<4x2xf32>, vector<32x2xf32> -> vector<32x2xf32>
    %232 = vector.broadcast %220 : vector<32x1xf32> to vector<32x2xf32>
    %233 = arith.addf %231, %232 : vector<32x2xf32>
    %234 = arith.negf %233 : vector<32x2xf32>
    %235 = math.exp %234 : vector<32x2xf32>
    %cst_222 = arith.constant 1.000000e+00 : f32
    %236 = vector.broadcast %cst_222 : f32 to vector<32x2xf32>
    %237 = arith.addf %236, %235 : vector<32x2xf32>
    %238 = arith.divf %236, %237 : vector<32x2xf32>
    %cst_223 = arith.constant dense<0.000000e+00> : vector<32x32xf32>
    %239 = tpu.matmul %238, %222, %cst_223 {dimension_numbers = #tpu.dot_dimension_numbers<[1], [0], [0], [1], [0, 0, 1, 1], [], []>} : vector<32x2xf32>, vector<2x32xf32>, vector<32x32xf32> -> vector<32x32xf32>
    %240 = arith.mulf %224, %239 : vector<32x32xf32>
    %cst_224 = arith.constant 0.000000e+00 : f32
    %241 = vector.broadcast %cst_224 : f32 to vector<32x32xf32>
    %242 = arith.maximumf %240, %241 : vector<32x32xf32>
    %c0_225 = arith.constant 0 : index
    %c0_226 = arith.constant 0 : index
    %243 = vector.load %arg38[%c0_225, %c0_226] : memref<288x32xf32, #tpu.memory_space<vmem>>, vector<32x32xf32>
    %c0_227 = arith.constant 0 : index
    %c0_228 = arith.constant 0 : index
    %244 = vector.load %arg37[%c0_227, %c0_228] : memref<288x32xf32, #tpu.memory_space<vmem>>, vector<32x32xf32>
    %cst_229 = arith.constant dense<0.000000e+00> : vector<32x32xf32>
    %245 = tpu.matmul %242, %243, %cst_229 {dimension_numbers = #tpu.dot_dimension_numbers<[1], [0], [0], [1], [0, 0, 1, 1], [], []>} : vector<32x32xf32>, vector<32x32xf32>, vector<32x32xf32> -> vector<32x32xf32>
    %cst_230 = arith.constant dense<0.000000e+00> : vector<32x32xf32>
    %246 = tpu.matmul %244, %245, %cst_230 {dimension_numbers = #tpu.dot_dimension_numbers<[1], [0], [0], [1], [0, 0, 1, 1], [], []>} : vector<32x32xf32>, vector<32x32xf32>, vector<32x32xf32> -> vector<32x32xf32>
    %c32_231 = arith.constant 32 : index
    %c0_232 = arith.constant 0 : index
    %247 = vector.load %arg38[%c32_231, %c0_232] : memref<288x32xf32, #tpu.memory_space<vmem>>, vector<32x32xf32>
    %c32_233 = arith.constant 32 : index
    %c0_234 = arith.constant 0 : index
    %248 = vector.load %arg37[%c32_233, %c0_234] : memref<288x32xf32, #tpu.memory_space<vmem>>, vector<32x32xf32>
    %cst_235 = arith.constant dense<0.000000e+00> : vector<32x32xf32>
    %249 = tpu.matmul %242, %247, %cst_235 {dimension_numbers = #tpu.dot_dimension_numbers<[1], [0], [0], [1], [0, 0, 1, 1], [], []>} : vector<32x32xf32>, vector<32x32xf32>, vector<32x32xf32> -> vector<32x32xf32>
    %cst_236 = arith.constant dense<0.000000e+00> : vector<32x32xf32>
    %250 = tpu.matmul %248, %249, %cst_236 {dimension_numbers = #tpu.dot_dimension_numbers<[1], [0], [0], [1], [0, 0, 1, 1], [], []>} : vector<32x32xf32>, vector<32x32xf32>, vector<32x32xf32> -> vector<32x32xf32>
    %251 = arith.addf %246, %250 : vector<32x32xf32>
    %c64_237 = arith.constant 64 : index
    %c0_238 = arith.constant 0 : index
    %252 = vector.load %arg38[%c64_237, %c0_238] : memref<288x32xf32, #tpu.memory_space<vmem>>, vector<32x32xf32>
    %c64_239 = arith.constant 64 : index
    %c0_240 = arith.constant 0 : index
    %253 = vector.load %arg37[%c64_239, %c0_240] : memref<288x32xf32, #tpu.memory_space<vmem>>, vector<32x32xf32>
    %cst_241 = arith.constant dense<0.000000e+00> : vector<32x32xf32>
    %254 = tpu.matmul %242, %252, %cst_241 {dimension_numbers = #tpu.dot_dimension_numbers<[1], [0], [0], [1], [0, 0, 1, 1], [], []>} : vector<32x32xf32>, vector<32x32xf32>, vector<32x32xf32> -> vector<32x32xf32>
    %cst_242 = arith.constant dense<0.000000e+00> : vector<32x32xf32>
    %255 = tpu.matmul %253, %254, %cst_242 {dimension_numbers = #tpu.dot_dimension_numbers<[1], [0], [0], [1], [0, 0, 1, 1], [], []>} : vector<32x32xf32>, vector<32x32xf32>, vector<32x32xf32> -> vector<32x32xf32>
    %256 = arith.addf %251, %255 : vector<32x32xf32>
    %c96_243 = arith.constant 96 : index
    %c0_244 = arith.constant 0 : index
    %257 = vector.load %arg38[%c96_243, %c0_244] : memref<288x32xf32, #tpu.memory_space<vmem>>, vector<32x32xf32>
    %c96_245 = arith.constant 96 : index
    %c0_246 = arith.constant 0 : index
    %258 = vector.load %arg37[%c96_245, %c0_246] : memref<288x32xf32, #tpu.memory_space<vmem>>, vector<32x32xf32>
    %cst_247 = arith.constant dense<0.000000e+00> : vector<32x32xf32>
    %259 = tpu.matmul %242, %257, %cst_247 {dimension_numbers = #tpu.dot_dimension_numbers<[1], [0], [0], [1], [0, 0, 1, 1], [], []>} : vector<32x32xf32>, vector<32x32xf32>, vector<32x32xf32> -> vector<32x32xf32>
    %cst_248 = arith.constant dense<0.000000e+00> : vector<32x32xf32>
    %260 = tpu.matmul %258, %259, %cst_248 {dimension_numbers = #tpu.dot_dimension_numbers<[1], [0], [0], [1], [0, 0, 1, 1], [], []>} : vector<32x32xf32>, vector<32x32xf32>, vector<32x32xf32> -> vector<32x32xf32>
    %261 = arith.addf %256, %260 : vector<32x32xf32>
    %c128_249 = arith.constant 128 : index
    %c0_250 = arith.constant 0 : index
    %262 = vector.load %arg38[%c128_249, %c0_250] : memref<288x32xf32, #tpu.memory_space<vmem>>, vector<32x32xf32>
    %c128_251 = arith.constant 128 : index
    %c0_252 = arith.constant 0 : index
    %263 = vector.load %arg37[%c128_251, %c0_252] : memref<288x32xf32, #tpu.memory_space<vmem>>, vector<32x32xf32>
    %cst_253 = arith.constant dense<0.000000e+00> : vector<32x32xf32>
    %264 = tpu.matmul %242, %262, %cst_253 {dimension_numbers = #tpu.dot_dimension_numbers<[1], [0], [0], [1], [0, 0, 1, 1], [], []>} : vector<32x32xf32>, vector<32x32xf32>, vector<32x32xf32> -> vector<32x32xf32>
    %cst_254 = arith.constant dense<0.000000e+00> : vector<32x32xf32>
    %265 = tpu.matmul %263, %264, %cst_254 {dimension_numbers = #tpu.dot_dimension_numbers<[1], [0], [0], [1], [0, 0, 1, 1], [], []>} : vector<32x32xf32>, vector<32x32xf32>, vector<32x32xf32> -> vector<32x32xf32>
    %266 = arith.addf %261, %265 : vector<32x32xf32>
    %c160_255 = arith.constant 160 : index
    %c0_256 = arith.constant 0 : index
    %267 = vector.load %arg38[%c160_255, %c0_256] : memref<288x32xf32, #tpu.memory_space<vmem>>, vector<32x32xf32>
    %c160_257 = arith.constant 160 : index
    %c0_258 = arith.constant 0 : index
    %268 = vector.load %arg37[%c160_257, %c0_258] : memref<288x32xf32, #tpu.memory_space<vmem>>, vector<32x32xf32>
    %cst_259 = arith.constant dense<0.000000e+00> : vector<32x32xf32>
    %269 = tpu.matmul %242, %267, %cst_259 {dimension_numbers = #tpu.dot_dimension_numbers<[1], [0], [0], [1], [0, 0, 1, 1], [], []>} : vector<32x32xf32>, vector<32x32xf32>, vector<32x32xf32> -> vector<32x32xf32>
    %cst_260 = arith.constant dense<0.000000e+00> : vector<32x32xf32>
    %270 = tpu.matmul %268, %269, %cst_260 {dimension_numbers = #tpu.dot_dimension_numbers<[1], [0], [0], [1], [0, 0, 1, 1], [], []>} : vector<32x32xf32>, vector<32x32xf32>, vector<32x32xf32> -> vector<32x32xf32>
    %271 = arith.addf %266, %270 : vector<32x32xf32>
    %c192_261 = arith.constant 192 : index
    %c0_262 = arith.constant 0 : index
    %272 = vector.load %arg38[%c192_261, %c0_262] : memref<288x32xf32, #tpu.memory_space<vmem>>, vector<32x32xf32>
    %c192_263 = arith.constant 192 : index
    %c0_264 = arith.constant 0 : index
    %273 = vector.load %arg37[%c192_263, %c0_264] : memref<288x32xf32, #tpu.memory_space<vmem>>, vector<32x32xf32>
    %cst_265 = arith.constant dense<0.000000e+00> : vector<32x32xf32>
    %274 = tpu.matmul %242, %272, %cst_265 {dimension_numbers = #tpu.dot_dimension_numbers<[1], [0], [0], [1], [0, 0, 1, 1], [], []>} : vector<32x32xf32>, vector<32x32xf32>, vector<32x32xf32> -> vector<32x32xf32>
    %cst_266 = arith.constant dense<0.000000e+00> : vector<32x32xf32>
    %275 = tpu.matmul %273, %274, %cst_266 {dimension_numbers = #tpu.dot_dimension_numbers<[1], [0], [0], [1], [0, 0, 1, 1], [], []>} : vector<32x32xf32>, vector<32x32xf32>, vector<32x32xf32> -> vector<32x32xf32>
    %276 = arith.addf %271, %275 : vector<32x32xf32>
    %c224_267 = arith.constant 224 : index
    %c0_268 = arith.constant 0 : index
    %277 = vector.load %arg38[%c224_267, %c0_268] : memref<288x32xf32, #tpu.memory_space<vmem>>, vector<32x32xf32>
    %c224_269 = arith.constant 224 : index
    %c0_270 = arith.constant 0 : index
    %278 = vector.load %arg37[%c224_269, %c0_270] : memref<288x32xf32, #tpu.memory_space<vmem>>, vector<32x32xf32>
    %cst_271 = arith.constant dense<0.000000e+00> : vector<32x32xf32>
    %279 = tpu.matmul %242, %277, %cst_271 {dimension_numbers = #tpu.dot_dimension_numbers<[1], [0], [0], [1], [0, 0, 1, 1], [], []>} : vector<32x32xf32>, vector<32x32xf32>, vector<32x32xf32> -> vector<32x32xf32>
    %cst_272 = arith.constant dense<0.000000e+00> : vector<32x32xf32>
    %280 = tpu.matmul %278, %279, %cst_272 {dimension_numbers = #tpu.dot_dimension_numbers<[1], [0], [0], [1], [0, 0, 1, 1], [], []>} : vector<32x32xf32>, vector<32x32xf32>, vector<32x32xf32> -> vector<32x32xf32>
    %281 = arith.addf %276, %280 : vector<32x32xf32>
    %c256_273 = arith.constant 256 : index
    %c0_274 = arith.constant 0 : index
    %282 = vector.load %arg38[%c256_273, %c0_274] : memref<288x32xf32, #tpu.memory_space<vmem>>, vector<32x32xf32>
    %c256_275 = arith.constant 256 : index
    %c0_276 = arith.constant 0 : index
    %283 = vector.load %arg37[%c256_275, %c0_276] : memref<288x32xf32, #tpu.memory_space<vmem>>, vector<32x32xf32>
    %cst_277 = arith.constant dense<0.000000e+00> : vector<32x32xf32>
    %284 = tpu.matmul %242, %282, %cst_277 {dimension_numbers = #tpu.dot_dimension_numbers<[1], [0], [0], [1], [0, 0, 1, 1], [], []>} : vector<32x32xf32>, vector<32x32xf32>, vector<32x32xf32> -> vector<32x32xf32>
    %cst_278 = arith.constant dense<0.000000e+00> : vector<32x32xf32>
    %285 = tpu.matmul %283, %284, %cst_278 {dimension_numbers = #tpu.dot_dimension_numbers<[1], [0], [0], [1], [0, 0, 1, 1], [], []>} : vector<32x32xf32>, vector<32x32xf32>, vector<32x32xf32> -> vector<32x32xf32>
    %286 = arith.addf %281, %285 : vector<32x32xf32>
    %c0_279 = arith.constant 0 : index
    %c0_280 = arith.constant 0 : index
    %287 = vector.load %arg39[%c0_279, %c0_280] : memref<32x1xf32, #tpu.memory_space<vmem>>, vector<32x1xf32>
    %c0_281 = arith.constant 0 : index
    %c0_282 = arith.constant 0 : index
    %288 = vector.load %arg40[%c0_281, %c0_282] : memref<4x32xf32, #tpu.memory_space<vmem>>, vector<4x32xf32>
    %c0_283 = arith.constant 0 : index
    %c0_284 = arith.constant 0 : index
    %289 = vector.load %arg41[%c0_283, %c0_284] : memref<4x1xf32, #tpu.memory_space<vmem>>, vector<4x1xf32>
    %c0_285 = arith.constant 0 : index
    %c0_286 = arith.constant 0 : index
    %290 = vector.load %arg42[%c0_285, %c0_286] : memref<32x4xf32, #tpu.memory_space<vmem>>, vector<32x4xf32>
    %c0_287 = arith.constant 0 : index
    %c0_288 = arith.constant 0 : index
    %291 = vector.load %arg43[%c0_287, %c0_288] : memref<32x1xf32, #tpu.memory_space<vmem>>, vector<32x1xf32>
    %c0_289 = arith.constant 0 : index
    %c0_290 = arith.constant 0 : index
    %292 = vector.load %arg44[%c0_289, %c0_290] : memref<32x2xf32, #tpu.memory_space<vmem>>, vector<32x2xf32>
    %c0_291 = arith.constant 0 : index
    %c0_292 = arith.constant 0 : index
    %293 = vector.load %arg45[%c0_291, %c0_292] : memref<2x32xf32, #tpu.memory_space<vmem>>, vector<2x32xf32>
    %294 = vector.broadcast %287 : vector<32x1xf32> to vector<32x32xf32>
    %295 = arith.addf %286, %294 : vector<32x32xf32>
    %cst_293 = arith.constant dense<0.000000e+00> : vector<32x2xf32>
    %296 = tpu.matmul %295, %292, %cst_293 {dimension_numbers = #tpu.dot_dimension_numbers<[1], [0], [0], [1], [0, 0, 1, 1], [], []>} : vector<32x32xf32>, vector<32x2xf32>, vector<32x2xf32> -> vector<32x2xf32>
    %cst_294 = arith.constant dense<0.000000e+00> : vector<4x2xf32>
    %297 = tpu.matmul %288, %296, %cst_294 {dimension_numbers = #tpu.dot_dimension_numbers<[1], [0], [0], [1], [0, 0, 1, 1], [], []>} : vector<4x32xf32>, vector<32x2xf32>, vector<4x2xf32> -> vector<4x2xf32>
    %298 = vector.broadcast %289 : vector<4x1xf32> to vector<4x2xf32>
    %299 = arith.addf %297, %298 : vector<4x2xf32>
    %cst_295 = arith.constant 0.000000e+00 : f32
    %300 = vector.broadcast %cst_295 : f32 to vector<4x2xf32>
    %301 = arith.maximumf %299, %300 : vector<4x2xf32>
    %cst_296 = arith.constant dense<0.000000e+00> : vector<32x2xf32>
    %302 = tpu.matmul %290, %301, %cst_296 {dimension_numbers = #tpu.dot_dimension_numbers<[1], [0], [0], [1], [0, 0, 1, 1], [], []>} : vector<32x4xf32>, vector<4x2xf32>, vector<32x2xf32> -> vector<32x2xf32>
    %303 = vector.broadcast %291 : vector<32x1xf32> to vector<32x2xf32>
    %304 = arith.addf %302, %303 : vector<32x2xf32>
    %305 = arith.negf %304 : vector<32x2xf32>
    %306 = math.exp %305 : vector<32x2xf32>
    %cst_297 = arith.constant 1.000000e+00 : f32
    %307 = vector.broadcast %cst_297 : f32 to vector<32x2xf32>
    %308 = arith.addf %307, %306 : vector<32x2xf32>
    %309 = arith.divf %307, %308 : vector<32x2xf32>
    %cst_298 = arith.constant dense<0.000000e+00> : vector<32x32xf32>
    %310 = tpu.matmul %309, %293, %cst_298 {dimension_numbers = #tpu.dot_dimension_numbers<[1], [0], [0], [1], [0, 0, 1, 1], [], []>} : vector<32x2xf32>, vector<2x32xf32>, vector<32x32xf32> -> vector<32x32xf32>
    %311 = arith.mulf %295, %310 : vector<32x32xf32>
    %cst_299 = arith.constant 0.000000e+00 : f32
    %312 = vector.broadcast %cst_299 : f32 to vector<32x32xf32>
    %313 = arith.maximumf %311, %312 : vector<32x32xf32>
    %c0_300 = arith.constant 0 : index
    %c0_301 = arith.constant 0 : index
    %314 = vector.load %arg46[%c0_300, %c0_301] : memref<32x32xf32, #tpu.memory_space<vmem>>, vector<32x32xf32>
    tpu.vector_store %arg46[%c0_300, %c0_301], %313 {strides = array<i32>} : memref<32x32xf32, #tpu.memory_space<vmem>>, vector<32x32xf32>,
    return
  }
  func.func @transform_0(%arg0: i32) -> (i32, i32) {
    %c0_i32 = arith.constant 0 : i32
    %c0_i32_0 = arith.constant 0 : i32
    %c0_i32_1 = arith.constant 0 : i32
    return %c0_i32, %c0_i32_0 : i32, i32
  }
  func.func @transform_1(%arg0: i32) -> (i32, i32) {
    %c0_i32 = arith.constant 0 : i32
    %c0_i32_0 = arith.constant 0 : i32
    %c0_i32_1 = arith.constant 0 : i32
    return %c0_i32, %c0_i32_0 : i32, i32
  }
  func.func @transform_2(%arg0: i32) -> (i32, i32) {
    %c0_i32 = arith.constant 0 : i32
    %c0_i32_0 = arith.constant 0 : i32
    %c0_i32_1 = arith.constant 0 : i32
    return %c0_i32, %c0_i32_0 : i32, i32
  }
  func.func @transform_3(%arg0: i32) -> (i32, i32) {
    %c0_i32 = arith.constant 0 : i32
    %c0_i32_0 = arith.constant 0 : i32
    %c0_i32_1 = arith.constant 0 : i32
    return %c0_i32, %c0_i32_0 : i32, i32
  }
  func.func @transform_4(%arg0: i32) -> (i32, i32) {
    %c0_i32 = arith.constant 0 : i32
    %c0_i32_0 = arith.constant 0 : i32
    %c0_i32_1 = arith.constant 0 : i32
    return %c0_i32, %c0_i32_0 : i32, i32
  }
  func.func @transform_5(%arg0: i32) -> (i32, i32) {
    %c0_i32 = arith.constant 0 : i32
    %c0_i32_0 = arith.constant 0 : i32
    %c0_i32_1 = arith.constant 0 : i32
    return %c0_i32, %c0_i32_0 : i32, i32
  }
  func.func @transform_6(%arg0: i32) -> (i32, i32) {
    %c0_i32 = arith.constant 0 : i32
    %c0_i32_0 = arith.constant 0 : i32
    %c0_i32_1 = arith.constant 0 : i32
    return %c0_i32, %c0_i32_0 : i32, i32
  }
  func.func @transform_7(%arg0: i32) -> (i32, i32) {
    %c0_i32 = arith.constant 0 : i32
    %c0_i32_0 = arith.constant 0 : i32
    %c0_i32_1 = arith.constant 0 : i32
    return %c0_i32, %c0_i32_0 : i32, i32
  }
  func.func @transform_8(%arg0: i32) -> (i32, i32) {
    %c0_i32 = arith.constant 0 : i32
    %c0_i32_0 = arith.constant 0 : i32
    %c0_i32_1 = arith.constant 0 : i32
    return %c0_i32, %c0_i32_0 : i32, i32
  }
  func.func @transform_9(%arg0: i32) -> (i32, i32) {
    %c0_i32 = arith.constant 0 : i32
    %c0_i32_0 = arith.constant 0 : i32
    %c0_i32_1 = arith.constant 0 : i32
    return %c0_i32, %c0_i32_0 : i32, i32
  }
  func.func @transform_10(%arg0: i32) -> (i32, i32) {
    %c0_i32 = arith.constant 0 : i32
    %c0_i32_0 = arith.constant 0 : i32
    %c0_i32_1 = arith.constant 0 : i32
    return %c0_i32, %c0_i32_0 : i32, i32
  }
  func.func @transform_11(%arg0: i32) -> (i32, i32) {
    %c0_i32 = arith.constant 0 : i32
    %c0_i32_0 = arith.constant 0 : i32
    %c0_i32_1 = arith.constant 0 : i32
    return %c0_i32, %c0_i32_0 : i32, i32
  }
  func.func @transform_12(%arg0: i32) -> (i32, i32) {
    %c0_i32 = arith.constant 0 : i32
    %c0_i32_0 = arith.constant 0 : i32
    %c0_i32_1 = arith.constant 0 : i32
    return %c0_i32, %c0_i32_0 : i32, i32
  }
  func.func @transform_13(%arg0: i32) -> (i32, i32) {
    %c0_i32 = arith.constant 0 : i32
    %c0_i32_0 = arith.constant 0 : i32
    %c0_i32_1 = arith.constant 0 : i32
    return %c0_i32, %c0_i32_0 : i32, i32
  }
  func.func @transform_14(%arg0: i32) -> (i32, i32) {
    %c0_i32 = arith.constant 0 : i32
    %c0_i32_0 = arith.constant 0 : i32
    %c0_i32_1 = arith.constant 0 : i32
    return %c0_i32, %c0_i32_0 : i32, i32
  }
  func.func @transform_15(%arg0: i32) -> (i32, i32) {
    %c0_i32 = arith.constant 0 : i32
    %c0_i32_0 = arith.constant 0 : i32
    %c0_i32_1 = arith.constant 0 : i32
    return %c0_i32, %c0_i32_0 : i32, i32
  }
  func.func @transform_16(%arg0: i32) -> (i32, i32) {
    %c0_i32 = arith.constant 0 : i32
    %c0_i32_0 = arith.constant 0 : i32
    %c0_i32_1 = arith.constant 0 : i32
    return %c0_i32, %c0_i32_0 : i32, i32
  }
  func.func @transform_17(%arg0: i32) -> (i32, i32) {
    %c0_i32 = arith.constant 0 : i32
    %c0_i32_0 = arith.constant 0 : i32
    %c0_i32_1 = arith.constant 0 : i32
    return %c0_i32, %c0_i32_0 : i32, i32
  }
  func.func @transform_18(%arg0: i32) -> (i32, i32) {
    %c0_i32 = arith.constant 0 : i32
    %c0_i32_0 = arith.constant 0 : i32
    %c0_i32_1 = arith.constant 0 : i32
    return %c0_i32, %c0_i32_0 : i32, i32
  }
  func.func @transform_19(%arg0: i32) -> (i32, i32) {
    %c0_i32 = arith.constant 0 : i32
    %c0_i32_0 = arith.constant 0 : i32
    %c0_i32_1 = arith.constant 0 : i32
    return %c0_i32, %c0_i32_0 : i32, i32
  }
  func.func @transform_20(%arg0: i32) -> (i32, i32) {
    %c0_i32 = arith.constant 0 : i32
    %c0_i32_0 = arith.constant 0 : i32
    %c0_i32_1 = arith.constant 0 : i32
    return %c0_i32, %c0_i32_0 : i32, i32
  }
  func.func @transform_21(%arg0: i32) -> (i32, i32) {
    %c0_i32 = arith.constant 0 : i32
    %c0_i32_0 = arith.constant 0 : i32
    %c0_i32_1 = arith.constant 0 : i32
    return %c0_i32, %c0_i32_0 : i32, i32
  }
  func.func @transform_22(%arg0: i32) -> (i32, i32) {
    %c0_i32 = arith.constant 0 : i32
    %c0_i32_0 = arith.constant 0 : i32
    %c0_i32_1 = arith.constant 0 : i32
    return %c0_i32, %c0_i32_0 : i32, i32
  }
  func.func @transform_23(%arg0: i32) -> (i32, i32) {
    %c0_i32 = arith.constant 0 : i32
    %c0_i32_0 = arith.constant 0 : i32
    %c0_i32_1 = arith.constant 0 : i32
    return %c0_i32, %c0_i32_0 : i32, i32
  }
  func.func @transform_24(%arg0: i32) -> (i32, i32) {
    %c0_i32 = arith.constant 0 : i32
    %c0_i32_0 = arith.constant 0 : i32
    %c0_i32_1 = arith.constant 0 : i32
    return %c0_i32, %c0_i32_0 : i32, i32
  }
  func.func @transform_25(%arg0: i32) -> (i32, i32) {
    %c0_i32 = arith.constant 0 : i32
    %c0_i32_0 = arith.constant 0 : i32
    %c0_i32_1 = arith.constant 0 : i32
    return %c0_i32, %c0_i32_0 : i32, i32
  }
  func.func @transform_26(%arg0: i32) -> (i32, i32) {
    %c0_i32 = arith.constant 0 : i32
    %c0_i32_0 = arith.constant 0 : i32
    %c0_i32_1 = arith.constant 0 : i32
    return %c0_i32, %c0_i32_0 : i32, i32
  }
  func.func @transform_27(%arg0: i32) -> (i32, i32) {
    %c0_i32 = arith.constant 0 : i32
    %c0_i32_0 = arith.constant 0 : i32
    %c0_i32_1 = arith.constant 0 : i32
    return %c0_i32, %c0_i32_0 : i32, i32
  }
  func.func @transform_28(%arg0: i32) -> (i32, i32) {
    %c0_i32 = arith.constant 0 : i32
    %c0_i32_0 = arith.constant 0 : i32
    %c0_i32_1 = arith.constant 0 : i32
    return %c0_i32, %c0_i32_0 : i32, i32
  }
  func.func @transform_29(%arg0: i32) -> (i32, i32) {
    %c0_i32 = arith.constant 0 : i32
    %c0_i32_0 = arith.constant 0 : i32
    %c0_i32_1 = arith.constant 0 : i32
    return %c0_i32, %c0_i32_0 : i32, i32
  }
  func.func @transform_30(%arg0: i32) -> (i32, i32) {
    %c0_i32 = arith.constant 0 : i32
    %c0_i32_0 = arith.constant 0 : i32
    %c0_i32_1 = arith.constant 0 : i32
    return %c0_i32, %c0_i32_0 : i32, i32
  }
  func.func @transform_31(%arg0: i32) -> (i32, i32) {
    %c0_i32 = arith.constant 0 : i32
    %c0_i32_0 = arith.constant 0 : i32
    %c0_i32_1 = arith.constant 0 : i32
    return %c0_i32, %c0_i32_0 : i32, i32
  }
  func.func @transform_32(%arg0: i32) -> (i32, i32) {
    %c0_i32 = arith.constant 0 : i32
    %c0_i32_0 = arith.constant 0 : i32
    %c0_i32_1 = arith.constant 0 : i32
    return %c0_i32, %c0_i32_0 : i32, i32
  }
  func.func @transform_33(%arg0: i32) -> (i32, i32) {
    %c0_i32 = arith.constant 0 : i32
    %c0_i32_0 = arith.constant 0 : i32
    %c0_i32_1 = arith.constant 0 : i32
    return %c0_i32, %c0_i32_0 : i32, i32
  }
  func.func @transform_34(%arg0: i32) -> (i32, i32) {
    %c0_i32 = arith.constant 0 : i32
    %c0_i32_0 = arith.constant 0 : i32
    %c0_i32_1 = arith.constant 0 : i32
    return %c0_i32, %c0_i32_0 : i32, i32
  }
  func.func @transform_35(%arg0: i32) -> (i32, i32) {
    %c0_i32 = arith.constant 0 : i32
    %c0_i32_0 = arith.constant 0 : i32
    %c0_i32_1 = arith.constant 0 : i32
    return %c0_i32, %c0_i32_0 : i32, i32
  }
  func.func @transform_36(%arg0: i32) -> (i32, i32) {
    %c0_i32 = arith.constant 0 : i32
    %c0_i32_0 = arith.constant 0 : i32
    %c0_i32_1 = arith.constant 0 : i32
    return %c0_i32, %c0_i32_0 : i32, i32
  }
  func.func @transform_37(%arg0: i32) -> (i32, i32) {
    %c0_i32 = arith.constant 0 : i32
    %c0_i32_0 = arith.constant 0 : i32
    %c0_i32_1 = arith.constant 0 : i32
    return %c0_i32, %c0_i32_0 : i32, i32
  }
  func.func @transform_38(%arg0: i32) -> (i32, i32) {
    %c0_i32 = arith.constant 0 : i32
    %c0_i32_0 = arith.constant 0 : i32
    %c0_i32_1 = arith.constant 0 : i32
    return %c0_i32, %c0_i32_0 : i32, i32
  }
  func.func @transform_39(%arg0: i32) -> (i32, i32) {
    %c0_i32 = arith.constant 0 : i32
    %c0_i32_0 = arith.constant 0 : i32
    %c0_i32_1 = arith.constant 0 : i32
    return %c0_i32, %c0_i32_0 : i32, i32
  }
  func.func @transform_40(%arg0: i32) -> (i32, i32) {
    %c0_i32 = arith.constant 0 : i32
    %c0_i32_0 = arith.constant 0 : i32
    %c0_i32_1 = arith.constant 0 : i32
    return %c0_i32, %c0_i32_0 : i32, i32
  }
  func.func @transform_41(%arg0: i32) -> (i32, i32) {
    %c0_i32 = arith.constant 0 : i32
    %c0_i32_0 = arith.constant 0 : i32
    %c0_i32_1 = arith.constant 0 : i32
    return %c0_i32, %c0_i32_0 : i32, i32
  }
  func.func @transform_42(%arg0: i32) -> (i32, i32) {
    %c0_i32 = arith.constant 0 : i32
    %c0_i32_0 = arith.constant 0 : i32
    %c0_i32_1 = arith.constant 0 : i32
    return %c0_i32, %c0_i32_0 : i32, i32
  }
  func.func @transform_43(%arg0: i32) -> (i32, i32) {
    %c0_i32 = arith.constant 0 : i32
    %c0_i32_0 = arith.constant 0 : i32
    %c0_i32_1 = arith.constant 0 : i32
    return %c0_i32, %c0_i32_0 : i32, i32
  }
  func.func @transform_44(%arg0: i32) -> (i32, i32) {
    %c0_i32 = arith.constant 0 : i32
    %c0_i32_0 = arith.constant 0 : i32
    %c0_i32_1 = arith.constant 0 : i32
    return %c0_i32, %c0_i32_0 : i32, i32
  }
  func.func @transform_45(%arg0: i32) -> (i32, i32) {
    %c0_i32 = arith.constant 0 : i32
    %c0_i32_0 = arith.constant 0 : i32
    %c0_i32_1 = arith.constant 0 : i32
    return %c0_i32, %c0_i32_0 : i32, i32
  }
}

</mosaic_0001>

<bundles_post_ra>
// kernel: _lambda_.1
= control target key start
LH: loop header
LB: loop body
LE: loop exit
PB: predicated region body
PF: predicated region fallthrough
CT: control target
= control target key end

     0   :  { %s5846_s6 = smov 1   ;;  %s5847_s10 = smov 2   ;;  %s7898_s0 = inlined_call_operand.smem [shape: u32[46], index: -1, kind: input, shape index: {}] }
   0x1   :  { %s5901_s5 = sld [smem:[%s7898_s0]]   ;;  %s5848_s14 = smov 3  }
   0x2   :  { %s5906_s9 = sld [smem:[%s7898_s0 + %s5846_s6]]   ;;  %s5849_s18 = smov 4  }
   0x3   :  { %s5911_s13 = sld [smem:[%s7898_s0 + %s5847_s10]]   ;;  %s5850_s22 = smov 5  }
   0x4   :  { %s5916_s17 = sld [smem:[%s7898_s0 + %s5848_s14]]   ;;  %s5851_s26 = smov 6  }
   0x5   :  { %s5456_s21 = sld [smem:[%s7898_s0 + %s5849_s18]]   ;;  %s5852_s30 = smov 7  }
   0x6   :  { %s5924_s25 = sld [smem:[%s7898_s0 + %s5850_s22]]   ;;  %s5853_s4 = smov 8  }
   0x7   :  { %s5929_s29 = sld [smem:[%s7898_s0 + %s5851_s26]]   ;;  %s5854_s10 = smov 9  }
   0x8   :  { %s5934_s3 = sld [smem:[%s7898_s0 + %s5852_s30]]   ;;  %s5855_s15 = smov 10  }
   0x9   :  { %s5939_s8 = sld [smem:[%s7898_s0 + %s5853_s4]]   ;;  %s5856_s20 = smov 11  }
   0xa   :  { %s5944_s14 = sld [smem:[%s7898_s0 + %s5854_s10]]   ;;  %s5857_s26 = smov 12  }
   0xb   :  { %s5949_s19 = sld [smem:[%s7898_s0 + %s5855_s15]]   ;;  %v96_v0 = vstv %s5456_s21  ;;  %s5858_s1 = smov 13  }
   0xc   :  { %7914 = sst [smem:[#allocation6_spill]] %s5924_s25  ;;  %97 = vst [vmem:[#allocation2] sm:$0x1] %v96_v0  ;;  %s5859_s7 = smov 14  }
   0xd   :  { %s5954_s24 = sld [smem:[%s7898_s0 + %s5856_s20]]   ;;  %s5860_s15 = smov 15  }
   0xe   :  { %s5959_s30 = sld [smem:[%s7898_s0 + %s5857_s26]]   ;;  %s5861_s21 = smov 16  }
   0xf   :  { %7915 = sst [smem:[#allocation7_spill]] %s5939_s8  ;;  %s5862_s27 = smov 17  }
  0x10   :  { %7916 = sst [smem:[#allocation8_spill]] %s5944_s14  ;;  %s5863_s4 = smov 18  }
  0x11   :  { %7917 = sst [smem:[#allocation9_spill]] %s5949_s19 }
  0x12   :  { %s5964_s6 = sld [smem:[%s7898_s0 + %s5858_s1]]  }
  0x13   :  { %s5969_s12 = sld [smem:[%s7898_s0 + %s5859_s7]]  }
  0x14   :  { %7918 = sst [smem:[#allocation10_spill]] %s5959_s30 }
  0x15   :  { %s5974_s20 = sld [smem:[%s7898_s0 + %s5860_s15]]   ;;  %s5864_s15 = smov 19  }
  0x16   :  { %s5979_s26 = sld [smem:[%s7898_s0 + %s5861_s21]]   ;;  %s5865_s21 = smov 20  }
  0x17   :  { %s5984_s2 = sld [smem:[%s7898_s0 + %s5862_s27]]   ;;  %s5866_s27 = smov 21  }
  0x18   :  { %7919 = sst [smem:[#allocation11_spill]] %s5964_s6 }
  0x19   :  { %7920 = sst [smem:[#allocation12_spill]] %s5969_s12 }
  0x1a   :  { %s5989_s11 = sld [smem:[%s7898_s0 + %s5863_s4]]   ;;  %s5867_s4 = smov 22  }
  0x1b   :  { %s5994_s12 = sld [smem:[%s7898_s0 + %s5864_s15]]   ;;  %s5868_s15 = smov 23  }
  0x1c   :  { %7921 = sst [smem:[#allocation13_spill]] %s5979_s26 }
  0x1d   :  { %7922 = sst [smem:[#allocation14_spill]] %s5984_s2 }
  0x1e   :  { %s5999_s30 = sld [smem:[%s7898_s0 + %s5865_s21]]   ;;  %s5869_s21 = smov 24  }
  0x1f   :  { %s6004_s2 = sld [smem:[%s7898_s0 + %s5866_s27]]   ;;  %s5870_s27 = smov 25  }
  0x20   :  { %7923 = sst [smem:[#allocation15_spill]] %s5989_s11 }
  0x21   :  { %7924 = sst [smem:[#allocation16_spill]] %s5994_s12 }
  0x22   :  { %s6009_s11 = sld [smem:[%s7898_s0 + %s5867_s4]]   ;;  %s5871_s4 = smov 26  }
  0x23   :  { %s6014_s12 = sld [smem:[%s7898_s0 + %s5868_s15]]   ;;  %s5872_s15 = smov 27  }
  0x24   :  { %s6019_s26 = sld [smem:[%s7898_s0 + %s5869_s21]]   ;;  %s5873_s21 = smov 28  }
  0x25   :  { %7925 = sst [smem:[#allocation17_spill]] %s6004_s2 }
  0x26   :  { %s6024_s2 = sld [smem:[%s7898_s0 + %s5870_s27]]   ;;  %s5874_s27 = smov 29  }
  0x27   :  { %s6029_s6 = sld [smem:[%s7898_s0 + %s5871_s4]]   ;;  %s5875_s4 = smov 30  }
  0x28   :  { %s6039_s14 = sld [smem:[%s7898_s0 + %s5873_s21]]   ;;  %s5877_s21 = smov 32  }
  0x29   :  { %7926 = sst [smem:[#allocation18_spill]] %s6014_s12 }
  0x2a   :  { %s6034_s12 = sld [smem:[%s7898_s0 + %s5872_s15]]   ;;  %s5876_s15 = smov 31  }
  0x2c   :  { %7927 = sst [smem:[#allocation19_spill]] %s6024_s2 }
  0x2d   :  { %7928 = sst [smem:[#allocation20_spill]] %s6029_s6 }
  0x2e   :  { %7930 = sst [smem:[#allocation22_spill]] %s6039_s14 }
  0x2f   :  { %s6044_s2 = sld [smem:[%s7898_s0 + %s5874_s27]]   ;;  %s5878_s27 = smov 33  }
  0x30   :  { %7929 = sst [smem:[#allocation21_spill]] %s6034_s12 }
  0x31   :  { %s6049_s6 = sld [smem:[%s7898_s0 + %s5875_s4]]   ;;  %s5879_s4 = smov 34  }
  0x32   :  { %s6054_s12 = sld [smem:[%s7898_s0 + %s5876_s15]]   ;;  %s5880_s15 = smov 35  }
  0x33   :  { %s6059_s14 = sld [smem:[%s7898_s0 + %s5877_s21]]   ;;  %s5881_s21 = smov 36  }
  0x34   :  { %s6064_s19 = sld [smem:[%s7898_s0 + %s5878_s27]]   ;;  %s5882_s27 = smov 37  }
  0x35   :  { %s6084_s8 = sld [smem:[%s7898_s0 + %s5882_s27]]   ;;  %s5886_s27 = smov 41  }
  0x37   :  { %7931 = sst [smem:[#allocation23_spill]] %s6049_s6 }
  0x38   :  { %7932 = sst [smem:[#allocation24_spill]] %s6054_s12 }
  0x39   :  { %7933 = sst [smem:[#allocation25_spill]] %s6059_s14 }
  0x3a   :  { %s6069_s6 = sld [smem:[%s7898_s0 + %s5879_s4]]   ;;  %s5883_s4 = smov 38  }
  0x3b   :  { %s6074_s12 = sld [smem:[%s7898_s0 + %s5880_s15]]   ;;  %s5884_s15 = smov 39  }
  0x3c   :  { %s6079_s14 = sld [smem:[%s7898_s0 + %s5881_s21]]   ;;  %s5885_s21 = smov 40  }
  0x3d   :  { %7937 = sst [smem:[#allocation29_spill]] %s6084_s8 }
  0x3e   :  { %s6104_s8 = sld [smem:[%s7898_s0 + %s5886_s27]]   ;;  %s5890_s27 = smov 45  }
  0x40   :  { %7934 = sst [smem:[#allocation26_spill]] %s6069_s6 }
  0x41   :  { %7935 = sst [smem:[#allocation27_spill]] %s6074_s12 }
  0x42   :  { %7936 = sst [smem:[#allocation28_spill]] %s6079_s14 }
  0x43   :  { %s6089_s6 = sld [smem:[%s7898_s0 + %s5883_s4]]   ;;  %s5887_s4 = smov 42  }
  0x44   :  { %s6094_s12 = sld [smem:[%s7898_s0 + %s5884_s15]]   ;;  %s5888_s15 = smov 43  }
  0x45   :  { %s6099_s14 = sld [smem:[%s7898_s0 + %s5885_s21]]   ;;  %s5889_s21 = smov 44  }
  0x46   :  { %7940 = sst [smem:[#allocation32_spill]] %s6104_s8 }
  0x47   :  { %s6109_s25 = sld [smem:[%s7898_s0 + %s5887_s4]]  }
  0x48   :  { %s6124_s8 = sld [smem:[%s7898_s0 + %s5890_s27]]  }
  0x4a   :  { %7938 = sst [smem:[#allocation30_spill]] %s6094_s12 }
  0x4b   :  { %7939 = sst [smem:[#allocation31_spill]] %s6099_s14 }
  0x4c   :  { %s6114_s12 = sld [smem:[%s7898_s0 + %s5888_s15]]  }
  0x4d   :  { %s6119_s14 = sld [smem:[%s7898_s0 + %s5889_s21]]  }
  0x4e   :  { %98 = vsyncpa [#allocation4], 0  ;;  %s110_s4 = sshll.u32 %s5916_s17, 4  ;;  %s5891_s7 = smov [#allocation3]   ;;  %s111_s4 = int_to_ptr.hbm [resolvable:$true] %s110_s4 }
  0x4f   :  { %s112_s10 = sshll.u32 %s5891_s7, 4  ;;  %s5820_s15 = sshra.s32 %s111_s4, 4  ;;  %s113_s10 = int_to_ptr.vmem [resolvable:$true] %s112_s10  ;;  %s5821_s15 = int_to_ptr.hbm [resolvable:$true] %s5820_s15 }
  0x50   :  { %s5822_s16 = scalar_lea.hbm %s5821_s15, 1  ;;  %s5824_s18 = scalar_lea.hbm %s5916_s17, 1 }
  0x51   :  { %p5823_p0 = scmp.ne.s32.totalorder %s5821_s15, %s5822_s16  ;;  %p5825_p1 = scmp.lt.s32.totalorder %s5821_s15, %s5916_s17 }
  0x52   :  { %p5826_p2 = scmp.lt.s32.totalorder %s5824_s18, %s5822_s16 }
  0x54   :  { %p5827_p3 = por %p5826_p2, %p5825_p1 }
  0x56   :  { %p5828_p4 = pnand %p5827_p3, %p5823_p0 }
  0x58   :  { %5831 = shalt.err (!%p5828_p4)
}
  0x59   :  { %115 = dma.hbm_to_vmem [thread:$0]  %s111_s4, 16, %s113_s10, [#allocation4]  }
  0x5a   :  { %5844 = dma.done.wait [#allocation4], 16  }
  0x5b   :  { %5845 = vsyncadd [#allocation4], 4294967280  ;;  %v5892_v1 = vmov 0   ;;  %vm298_vm0 = vcmask 1042432   ;;  %v219_v2 = vld [vmem:[%s5911_s13] sm:$0xff]  ;;  %v212_v5 = vld [vmem:[%s5901_s5 + $0x50] sm:$0xff] }
  0x5c   :  { %5765 = vset.pattern.permute.xlu0 %v5892_v1  ;;  %5766 = vset.pattern.permute.xlu1 %v5892_v1  ;;  %v216_v3 = vld [vmem:[%s5901_s5 + $0x70] sm:$0x7]  ;;  %v217_v4 = vld [vmem:[%s5901_s5 + $0x78] sm:$0x7]  ;;  %v214_v8 = vld [vmem:[%s5901_s5 + $0x60] sm:$0x7] }
  0x5d   :  { %5767 = vset.pattern.permute.xlu2 %v5892_v1  ;;  %291 = vperm.xlu0 %5765, %v219_v2   ;;  %v213_v6 = vld [vmem:[%s5901_s5 + $0x58] sm:$0xff]  ;;  %v208_v7 = vld [vmem:[%s5901_s5 + $0x30] sm:$0xff]  ;;  %v215_v9 = vld [vmem:[%s5901_s5 + $0x68] sm:$0x7]  ;;  %vm294_vm1 = vcmask 220160   ;;  %vm477_vm2 = vcmask 64512  }
  0x5e   :  { %5502 = vmatpush.msk.msra.mxu2 %vm298_vm0, %v216_v3  ;;  %5504 = vmatpush.msk.msra.mxu3 %vm298_vm0, %v217_v4  ;;  %v209_v10 = vld [vmem:[%s5901_s5 + $0x38] sm:$0xff]  ;;  %v204_v11 = vld [vmem:[%s5901_s5 + $0x10] sm:$0xff]  ;;  %v210_v12 = vld [vmem:[%s5901_s5 + $0x40] sm:$0xff]  ;;  %s7941_s0 = sld [smem:[#allocation6_spill]]  ;;  %vm511_vm3 = vcmask 1040384   ;;  %vm507_vm4 = vcmask 7168  }
  0x5f   :  { %5498 = vmatpush.msk.msra.mxu0 %vm298_vm0, %v214_v8  ;;  %5500 = vmatpush.msk.msra.mxu1 %vm298_vm0, %v215_v9  ;;  %v211_v13 = vld [vmem:[%s5901_s5 + $0x48] sm:$0xff]  ;;  %v205_v14 = vld [vmem:[%s5901_s5 + $0x18] sm:$0xff]  ;;  %v218_v15 = vld [vmem:[%s5906_s9] sm:$0xff]  ;;  %s7943_s9 = sld [smem:[#allocation9_spill]]  ;;  %vm564_vm5 = vcmask 1041408   ;;  %vm560_vm9 = vcmask 15360  }
  0x60   :  { %364 = vmatpush.msra.mxu2 %v212_v5  ;;  %384 = vmatpush.msra.mxu3 %v213_v6  ;;  %v206_v16 = vld [vmem:[%s5901_s5 + $0x20] sm:$0xff]  ;;  %v221_v17 = vld [vmem:[#allocation2] sm:$0x1]  ;;  %v4091_v24 = vld [vmem:[%s6044_s2 + $0x10] sm:$0xff]  ;;  %s7944_s13 = sld [smem:[#allocation8_spill]]  ;;  %vm2315_vm11 = vcmask 130048  }
  0x61   :  { %324 = vmatpush.msra.mxu0 %v210_v12  ;;  %344 = vmatpush.msra.mxu1 %v211_v13  ;;  %v207_v18 = vld [vmem:[%s5901_s5 + $0x28] sm:$0xff]  ;;  %v202_v19 = vld [vmem:[%s5901_s5] sm:$0xff]  ;;  %v239_v26 = vld [vmem:[%s5934_s3 + $0x78] sm:$0xff]  ;;  %s7945_s17 = sld [smem:[#allocation11_spill]] }
  0x62   :  { %365 = vmatpush.msra.mxu2 %v208_v7  ;;  %385 = vmatpush.msra.mxu3 %v209_v10  ;;  %v203_v20 = vld [vmem:[%s5901_s5 + $0x8] sm:$0xff]  ;;  %v2256_v21 = vld [vmem:[%s5974_s20] sm:$0xff]  ;;  %v255_v27 = vld [vmem:[%s5934_s3 + $0xf8] sm:$0xff]  ;;  %s7942_s5 = sld [smem:[#allocation7_spill]] }
  0x63   :  { %325 = vmatpush.msra.mxu0 %v206_v16  ;;  %345 = vmatpush.msra.mxu1 %v207_v18  ;;  %v3101_v22 = vld [vmem:[%s5999_s30 + $0x8] sm:$0xff]  ;;  %v4099_v25 = vld [vmem:[%s6064_s19] sm:$0xff]  ;;  %v271_v28 = vld [vmem:[%s5934_s3 + $0x178] sm:$0xff]  ;;  %s7957_s21 = sld [smem:[#allocation20_spill]] }
  0x64   :  { %366 = vmatpush.msra.mxu2 %v204_v11  ;;  %386 = vmatpush.msra.mxu3 %v205_v14  ;;  %v3107_v23 = vld [vmem:[%s6019_s26 + $0x8] sm:$0xff]  ;;  %v287_v29 = vld [vmem:[%s5934_s3 + $0x1f8] sm:$0xff]  ;;  %v238_v30 = vld [vmem:[%s5934_s3 + $0x70] sm:$0xff]  ;;  %s7958_s22 = sld [smem:[#allocation22_spill]] }
  0x65   :  { %5503 = vmatmul.msk.f32.vlgmr.msra.gmra.mxu2 %vm294_vm1, %v218_v15  ;;  %5505 = vmatmul.msk.f32.vlgmr.msra.gmra.mxu3 %vm294_vm1, %v218_v15  ;;  %v254_v31 = vld [vmem:[%s5934_s3 + $0xf0] sm:$0xff]  ;;  %v4102_v34 = vld [vmem:[%s6064_s19 + $0x18] sm:$0xff]  ;;  %v5149_v36 = vld [vmem:[%s6109_s25] sm:$0xff]  ;;  %s7959_s23 = sld [smem:[#allocation21_spill]] }
  0x66   :  { %473 = vperm.xlu0 %5765, %v221_v17   ;;  %326 = vmatpush.msra.mxu0 %v202_v19  ;;  %v270_v32 = vld [vmem:[%s5934_s3 + $0x170] sm:$0xff]  ;;  %v5152_v37 = vld [vmem:[%s6109_s25 + $0x18] sm:$0xff]  ;;  %v237_v38 = vld [vmem:[%s5934_s3 + $0x68] sm:$0xff]  ;;  %s7960_s27 = sld [smem:[#allocation26_spill]] }
  0x67   :  { %5499 = vmatmul.msk.f32.vlgmr.msra.gmra.mxu0 %vm294_vm1, %v218_v15  ;;  %346 = vmatpush.msra.mxu1 %v203_v20  ;;  %v286_v33 = vld [vmem:[%s5934_s3 + $0x1f0] sm:$0xff]  ;;  %v253_v39 = vld [vmem:[%s5934_s3 + $0xe8] sm:$0xff]  ;;  %v236_v42 = vld [vmem:[%s5934_s3 + $0x60] sm:$0xff]  ;;  %s7961_s28 = sld [smem:[#allocation23_spill]] }
  0x68   :  { %5501 = vmatmul.msk.f32.vlgmr.msra.gmra.mxu1 %vm294_vm1, %v218_v15  ;;  %391 = vmatpush.msrb.mxu0 %v239_v26  ;;  %v5141_v35 = vld [vmem:[%s6089_s6 + $0x10] sm:$0xff]  ;;  %v269_v40 = vld [vmem:[%s5934_s3 + $0x168] sm:$0xff]  ;;  %v252_v43 = vld [vmem:[%s5934_s3 + $0xe0] sm:$0xff]  ;;  %s7962_s1 = sld [smem:[#allocation25_spill]] }
  0x69   :  { %411 = vmatpush.msrb.mxu1 %v255_v27  ;;  %431 = vmatpush.msrb.mxu2 %v271_v28  ;;  %v285_v41 = vld [vmem:[%s5934_s3 + $0x1e8] sm:$0xff]  ;;  %v268_v44 = vld [vmem:[%s5934_s3 + $0x160] sm:$0xff]  ;;  %v235_v46 = vld [vmem:[%s5934_s3 + $0x58] sm:$0xff]  ;;  %s7963_s4 = sld [smem:[#allocation27_spill]] }
  0x6a   :  { %451 = vmatpush.msrb.mxu3 %v287_v29  ;;  %392 = vmatpush.msrb.mxu0 %v238_v30  ;;  %v284_v45 = vld [vmem:[%s5934_s3 + $0x1e0] sm:$0xff]  ;;  %v251_v47 = vld [vmem:[%s5934_s3 + $0xd8] sm:$0xff]  ;;  %v234_v50 = vld [vmem:[%s5934_s3 + $0x50] sm:$0xff]  ;;  %s7964_s7 = sld [smem:[#allocation29_spill]] }
  0x6b   :  { %412 = vmatpush.msrb.mxu1 %v254_v31  ;;  %432 = vmatpush.msrb.mxu2 %v270_v32  ;;  %v267_v48 = vld [vmem:[%s5934_s3 + $0x158] sm:$0xff]  ;;  %v250_v51 = vld [vmem:[%s5934_s3 + $0xd0] sm:$0xff]  ;;  %v233_v54 = vld [vmem:[%s5934_s3 + $0x48] sm:$0xff]  ;;  %s7965_s10 = sld [smem:[#allocation28_spill]] }
  0x6c   :  { %452 = vmatpush.msrb.mxu3 %v286_v33  ;;  %393 = vmatpush.msrb.mxu0 %v237_v38  ;;  %v283_v49 = vld [vmem:[%s5934_s3 + $0x1d8] sm:$0xff]  ;;  %v266_v52 = vld [vmem:[%s5934_s3 + $0x150] sm:$0xff]  ;;  %v249_v55 = vld [vmem:[%s5934_s3 + $0xc8] sm:$0xff]  ;;  %s7967_s15 = sld [smem:[#allocation32_spill]] }
  0x6d   :  { %413 = vmatpush.msrb.mxu1 %v253_v39  ;;  %433 = vmatpush.msrb.mxu2 %v269_v40  ;;  %v282_v53 = vld [vmem:[%s5934_s3 + $0x1d0] sm:$0xff]  ;;  %v265_v56 = vld [vmem:[%s5934_s3 + $0x148] sm:$0xff]  ;;  %v232_v58 = vld [vmem:[%s5934_s3 + $0x40] sm:$0xff] }
  0x6e   :  { %2342 = vperm.xlu0 %5765, %v2256_v21   ;;  %453 = vmatpush.msrb.mxu3 %v285_v41  ;;  %v281_v57 = vld [vmem:[%s5934_s3 + $0x1c8] sm:$0xff]  ;;  %v248_v59 = vld [vmem:[%s5934_s3 + $0xc0] sm:$0xff]  ;;  %v231_v62 = vld [vmem:[%s5934_s3 + $0x38] sm:$0xff] }
  0x6f   :  { %394 = vmatpush.msrb.mxu0 %v236_v42  ;;  %414 = vmatpush.msrb.mxu1 %v252_v43  ;;  %v264_v60 = vld [vmem:[%s5934_s3 + $0x140] sm:$0xff]  ;;  %v247_v63 = vld [vmem:[%s5934_s3 + $0xb8] sm:$0xff]  ;;  %v230_v2 = vld [vmem:[%s5934_s3 + $0x30] sm:$0xff] }
  0x70   :  { %434 = vmatpush.msrb.mxu2 %v268_v44  ;;  %454 = vmatpush.msrb.mxu3 %v284_v45  ;;  %v280_v61 = vld [vmem:[%s5934_s3 + $0x1c0] sm:$0xff]  ;;  %v263_v0 = vld [vmem:[%s5934_s3 + $0x138] sm:$0xff]  ;;  %v246_v3 = vld [vmem:[%s5934_s3 + $0xb0] sm:$0xff] }
  0x71   :  { %395 = vmatpush.msrb.mxu0 %v235_v46  ;;  %415 = vmatpush.msrb.mxu1 %v251_v47  ;;  %v279_v1 = vld [vmem:[%s5934_s3 + $0x1b8] sm:$0xff]  ;;  %v262_v4 = vld [vmem:[%s5934_s3 + $0x130] sm:$0xff]  ;;  %v229_v6 = vld [vmem:[%s5934_s3 + $0x28] sm:$0xff] }
  0x72   :  { %435 = vmatpush.msrb.mxu2 %v267_v48  ;;  %455 = vmatpush.msrb.mxu3 %v283_v49  ;;  %v278_v5 = vld [vmem:[%s5934_s3 + $0x1b0] sm:$0xff]  ;;  %v245_v7 = vld [vmem:[%s5934_s3 + $0xa8] sm:$0xff]  ;;  %v228_v10 = vld [vmem:[%s5934_s3 + $0x20] sm:$0xff] }
  0x73   :  { %396 = vmatpush.msrb.mxu0 %v234_v50  ;;  %416 = vmatpush.msrb.mxu1 %v250_v51  ;;  %v261_v8 = vld [vmem:[%s5934_s3 + $0x128] sm:$0xff]  ;;  %v244_v11 = vld [vmem:[%s5934_s3 + $0xa0] sm:$0xff]  ;;  %v227_v14 = vld [vmem:[%s5934_s3 + $0x18] sm:$0xff] }
  0x74   :  { %436 = vmatpush.msrb.mxu2 %v266_v52  ;;  %456 = vmatpush.msrb.mxu3 %v282_v53  ;;  %v277_v9 = vld [vmem:[%s5934_s3 + $0x1a8] sm:$0xff]  ;;  %v260_v12 = vld [vmem:[%s5934_s3 + $0x120] sm:$0xff]  ;;  %v243_v15 = vld [vmem:[%s5934_s3 + $0x98] sm:$0xff] }
  0x75   :  { %397 = vmatpush.msrb.mxu0 %v233_v54  ;;  %417 = vmatpush.msrb.mxu1 %v249_v55  ;;  %v276_v13 = vld [vmem:[%s5934_s3 + $0x1a0] sm:$0xff]  ;;  %v259_v16 = vld [vmem:[%s5934_s3 + $0x118] sm:$0xff]  ;;  %v226_v18 = vld [vmem:[%s5934_s3 + $0x10] sm:$0xff] }
  0x76   :  { %3132 = vperm.xlu0 %5765, %v3101_v22   ;;  %437 = vmatpush.msrb.mxu2 %v265_v56  ;;  %v275_v17 = vld [vmem:[%s5934_s3 + $0x198] sm:$0xff]  ;;  %v242_v19 = vld [vmem:[%s5934_s3 + $0x90] sm:$0xff]  ;;  %v225_v22 = vld [vmem:[%s5934_s3 + $0x8] sm:$0xff] }
  0x77   :  { %457 = vmatpush.msrb.mxu3 %v281_v57  ;;  %398 = vmatpush.msrb.mxu0 %v232_v58  ;;  %v258_v20 = vld [vmem:[%s5934_s3 + $0x110] sm:$0xff]  ;;  %v224_v26 = vld [vmem:[%s5934_s3] sm:$0xff]  ;;  %v2257_v41 = vld [vmem:[%s5974_s20 + $0x8] sm:$0xff]  ;;  %s7953_s20 = sld [smem:[#allocation15_spill]] }
  0x78   :  { %418 = vmatpush.msrb.mxu1 %v248_v59  ;;  %438 = vmatpush.msrb.mxu2 %v264_v60  ;;  %v274_v21 = vld [vmem:[%s5934_s3 + $0x190] sm:$0xff]  ;;  %v240_v27 = vld [vmem:[%s5934_s3 + $0x80] sm:$0xff]  ;;  %v220_v50 = vld [vmem:[#allocation3] sm:$0x1] }
  0x79   :  { %458 = vmatpush.msrb.mxu3 %v280_v61  ;;  %399 = vmatpush.msrb.mxu0 %v231_v62  ;;  %v256_v28 = vld [vmem:[%s5934_s3 + $0x100] sm:$0xff]  ;;  %v4092_v52 = vld [vmem:[%s6044_s2 + $0x18] sm:$0xff]  ;;  %v4100_v53 = vld [vmem:[%s6064_s19 + $0x8] sm:$0xff] }
  0x7a   :  { %419 = vmatpush.msrb.mxu1 %v247_v63  ;;  %439 = vmatpush.msrb.mxu2 %v263_v0  ;;  %v272_v29 = vld [vmem:[%s5934_s3 + $0x180] sm:$0xff]  ;;  %v5142_v55 = vld [vmem:[%s6089_s6 + $0x18] sm:$0xff]  ;;  %v5150_v56 = vld [vmem:[%s6109_s25 + $0x8] sm:$0xff] }
  0x7b   :  { %459 = vmatpush.msrb.mxu3 %v279_v1  ;;  %400 = vmatpush.msrb.mxu0 %v230_v2  ;;  %v223_v39 = vld [vmem:[%s5929_s29] sm:$0xff]  ;;  %s7946_s29 = sld [smem:[#allocation24_spill]] }
  0x7c   :  { %420 = vmatpush.msrb.mxu1 %v246_v3  ;;  %440 = vmatpush.msrb.mxu2 %v262_v4  ;;  %v2250_v40 = vld [vmem:[%s5954_s24] sm:$0xff] }
  0x7d   :  { %460 = vmatpush.msrb.mxu3 %v278_v5  ;;  %401 = vmatpush.msrb.mxu0 %v229_v6  ;;  %v3103_v44 = vld [vmem:[%s6009_s11] sm:$0x3]  ;;  %v708_v6 = vld [vmem:[%s7943_s9 + $0x178] sm:$0xff]  ;;  %s7956_s11 = sld [smem:[#allocation18_spill]] }
  0x7e   :  { %3196 = vperm.xlu0 %5765, %v3107_v23   ;;  %421 = vmatpush.msrb.mxu1 %v245_v7  ;;  %v241_v23 = vld [vmem:[%s5934_s3 + $0x88] sm:$0xff]  ;;  %v4089_v51 = vld [vmem:[%s6044_s2] sm:$0xff]  ;;  %v724_v7 = vld [vmem:[%s7943_s9 + $0x1f8] sm:$0xff] }
  0x7f   :  { %441 = vmatpush.msrb.mxu2 %v261_v8  ;;  %461 = vmatpush.msrb.mxu3 %v277_v9  ;;  %v5139_v54 = vld [vmem:[%s6089_s6] sm:$0xff]  ;;  %v707_v8 = vld [vmem:[%s7943_s9 + $0x170] sm:$0xff] }
  0x80   :  { %402 = vmatpush.msrb.mxu0 %v228_v10  ;;  %422 = vmatpush.msrb.mxu1 %v244_v11  ;;  %v222_v62 = vld [vmem:[%s7941_s0] sm:$0xff]  ;;  %v723_v10 = vld [vmem:[%s7943_s9 + $0x1f0] sm:$0xff]  ;;  %v706_v11 = vld [vmem:[%s7943_s9 + $0x168] sm:$0xff] }
  0x81   :  { %442 = vmatpush.msrb.mxu2 %v260_v12  ;;  %462 = vmatpush.msrb.mxu3 %v276_v13  ;;  %v288_v63 = vld [vmem:[%s7942_s5] sm:$0xff]  ;;  %v722_v12 = vld [vmem:[%s7943_s9 + $0x1e8] sm:$0xff] }
  0x82   :  { %403 = vmatpush.msrb.mxu0 %v227_v14  ;;  %423 = vmatpush.msrb.mxu1 %v243_v15  ;;  %555 = vst [vmem:[#allocation1] ss:$4 sm:$0xff] %v288_v63  ;;  %v705_v14 = vld [vmem:[%s7943_s9 + $0x160] sm:$0xff]  ;;  %v666_v63 = vld [vmem:[%s7943_s9 + $0x28] sm:$0xff] }
  0x83   :  { %443 = vmatpush.msrb.mxu2 %v259_v16  ;;  %463 = vmatpush.msrb.mxu3 %v275_v17  ;;  %v721_v15 = vld [vmem:[%s7943_s9 + $0x1e0] sm:$0xff]  ;;  %v676_v16 = vld [vmem:[%s7943_s9 + $0x78] sm:$0xff] }
  0x84   :  { %404 = vmatpush.msrb.mxu0 %v226_v18  ;;  %424 = vmatpush.msrb.mxu1 %v242_v19  ;;  %v704_v17 = vld [vmem:[%s7943_s9 + $0x158] sm:$0xff] }
  0x85   :  { %444 = vmatpush.msrb.mxu2 %v258_v20  ;;  %464 = vmatpush.msrb.mxu3 %v274_v21  ;;  %v692_v18 = vld [vmem:[%s7943_s9 + $0xf8] sm:$0xff]  ;;  %v675_v20 = vld [vmem:[%s7943_s9 + $0x70] sm:$0xff] }
  0x86   :  { %4120 = vperm.xlu0 %5765, %v4091_v24   ;;  %v257_v24 = vld [vmem:[%s5934_s3 + $0x108] sm:$0xff]  ;;  %405 = vmatpush.msrb.mxu0 %v225_v22  ;;  %v720_v19 = vld [vmem:[%s7943_s9 + $0x1d8] sm:$0xff]  ;;  %v691_v21 = vld [vmem:[%s7943_s9 + $0xf0] sm:$0xff] }
  0x87   :  { %425 = vmatpush.msrb.mxu1 %v241_v23  ;;  %445 = vmatpush.msrb.mxu2 %v257_v24  ;;  %v674_v22 = vld [vmem:[%s7943_s9 + $0x68] sm:$0xff]  ;;  %v703_v24 = vld [vmem:[%s7943_s9 + $0x150] sm:$0xff] }
  0x88   :  { %406 = vmatpush.msrb.mxu0 %v224_v26  ;;  %504 = vperm.xlu1 %5766, %v223_v39   ;;  %v690_v23 = vld [vmem:[%s7943_s9 + $0xe8] sm:$0xff]  ;;  %v673_v26 = vld [vmem:[%s7943_s9 + $0x60] sm:$0xff] }
  0x89   :  { %426 = vmatpush.msrb.mxu1 %v240_v27  ;;  %446 = vmatpush.msrb.mxu2 %v256_v28  ;;  %v556_v0 = vld.sshfl [vmem:[#allocation1] sm:$0xff pattern:$0x73625140]  ;;  %v557_v1 = vld.sshfl [vmem:[#allocation1 + $0x8] sm:$0xff pattern:$0x73625140] }
  0x8a   :  { %v558_v2 = vld.sshfl [vmem:[#allocation1 + $0x10] sm:$0xff pattern:$0x73625140]  ;;  %v559_v3 = vld.sshfl [vmem:[#allocation1 + $0x18] sm:$0xff pattern:$0x73625140] }
  0x8b   :  { %5510 = vmatpush.msk.msra.mxu2 %vm564_vm5, %v556_v0  ;;  %v689_v27 = vld [vmem:[%s7943_s9 + $0xe0] sm:$0xff]  ;;  %v702_v28 = vld [vmem:[%s7943_s9 + $0x148] sm:$0xff] }
  0x8c   :  { %v717_v39 = vld [vmem:[%s7943_s9 + $0x1c0] sm:$0xff]  ;;  %v682_v0 = vld [vmem:[%s7943_s9 + $0xa8] sm:$0xff] }
  0x8e   :  { %4205 = vperm.xlu0 %5765, %v4099_v25   ;;  %v273_v25 = vld [vmem:[%s5934_s3 + $0x188] sm:$0xff]  ;;  %s7947_s3 = sld [smem:[#allocation31_spill]] }
  0x8f   :  { %465 = vmatpush.msrb.mxu3 %v273_v25  ;;  %v719_v25 = vld [vmem:[%s7943_s9 + $0x1d0] sm:$0xff] }
  0x90   :  { %2277 = vperm.xlu1 %5766, %v2250_v40   ;;  %v671_v40 = vld [vmem:[%s7943_s9 + $0x50] sm:$0xff] }
  0x91   :  { %466 = vmatpush.msrb.mxu3 %v272_v29  ;;  %v718_v29 = vld [vmem:[%s7943_s9 + $0x1c8] sm:$0xff] }
  0x93   :  { %5512 = vmatpush.msk.msra.mxu3 %vm564_vm5, %v557_v1 }
  0x96   :  { %4220 = vperm.xlu0 %5765, %v4102_v34  }
  0x98   :  { %2347 = vperm.xlu1 %5766, %v2257_v41   ;;  %v687_v41 = vld [vmem:[%s7943_s9 + $0xd0] sm:$0xff] }
  0x9e   :  { %5170 = vperm.xlu0 %5765, %v5141_v35  }
  0xa0   :  { %3162 = vperm.xlu1 %5766, %v3103_v44   ;;  %v670_v44 = vld [vmem:[%s7943_s9 + $0x48] sm:$0xff] }
  0xa6   :  { %5254 = vperm.xlu0 %5765, %v5149_v36  }
  0xa8   :  { %4110 = vperm.xlu1 %5766, %v4089_v51   ;;  %v714_v51 = vld [vmem:[%s7943_s9 + $0x1a8] sm:$0xff] }
  0xae   :  { %5269 = vperm.xlu0 %5765, %v5152_v37  }
  0xb0   :  { %4125 = vperm.xlu1 %5766, %v4092_v52   ;;  %v668_v52 = vld [vmem:[%s7943_s9 + $0x38] sm:$0xff] }
  0xb8   :  { %4210 = vperm.xlu1 %5766, %v4100_v53   ;;  %v684_v53 = vld [vmem:[%s7943_s9 + $0xb8] sm:$0xff] }
  0xc0   :  { %5160 = vperm.xlu1 %5766, %v5139_v54  }
  0xc8   :  { %5175 = vperm.xlu1 %5766, %v5142_v55   ;;  %v697_v55 = vld [vmem:[%s7943_s9 + $0x120] sm:$0xff] }
  0xcf   :  { %v292_v30 = vpop.permute.xlu0 %291 }
  0xd0   :  { %5259 = vperm.xlu1 %5766, %v5150_v56   ;;  %v713_v56 = vld [vmem:[%s7943_s9 + $0x1a0] sm:$0xff] }
  0xd8   :  { %v474_v57 = vpop.permute.xlu0 %473 }
  0xd9   :  { %v476_v58 = vperm.slane %v474_v57, 0 }
  0xe4   :  { %v328_v31 = vpop.f32.mrf.mxu0 }
  0xe5   :  { %v6228_v32 = vadd.f32 %v328_v31, %v292_v30  ;;  %v348_v33 = vpop.f32.mrf.mxu1  ;;  %v672_v31 = vld [vmem:[%s7943_s9 + $0x58] sm:$0xff] }
  0xe6   :  { %v6230_v34 = vadd.f32 %v348_v33, %v292_v30  ;;  %v688_v33 = vld [vmem:[%s7943_s9 + $0xd8] sm:$0xff] }
  0xe7   :  { %407 = vmatmul.f32.vlgmr.msrb.gmra.mxu0 %v6228_v32 }
  0xe8   :  { %v368_v35 = vpop.f32.mrf.mxu2  ;;  %v388_v37 = vpop.f32.mrf.mxu3  ;;  %427 = vmatmul.f32.vlgmr.msrb.gmra.mxu1 %v6230_v34 }
  0xe9   :  { %v6233_v36 = vadd.f32 %v368_v35, %v292_v30  ;;  %v6235_v38 = vadd.f32 %v388_v37, %v292_v30  ;;  %v701_v37 = vld [vmem:[%s7943_s9 + $0x140] sm:$0xff] }
  0xeb   :  { %447 = vmatmul.f32.vlgmr.msrb.gmra.mxu2 %v6233_v36  ;;  %467 = vmatmul.f32.vlgmr.msrb.gmra.mxu3 %v6235_v38 }
  0xec   :  { %727 = vmatpush.msrb.mxu2 %v676_v16  ;;  %747 = vmatpush.msrb.mxu3 %v692_v18  ;;  %v693_v16 = vld [vmem:[%s7943_s9 + $0x100] sm:$0xff]  ;;  %v854_v18 = vld [vmem:[%s7943_s9 + $0x378] sm:$0xff] }
  0xee   :  { %728 = vmatpush.msrb.mxu2 %v675_v20  ;;  %748 = vmatpush.msrb.mxu3 %v691_v21  ;;  %v663_v20 = vld [vmem:[%s7943_s9 + $0x10] sm:$0xff] }
  0xef   :  { %v679_v21 = vld [vmem:[%s7943_s9 + $0x90] sm:$0xff] }
  0xf0   :  { %729 = vmatpush.msrb.mxu2 %v674_v22  ;;  %749 = vmatpush.msrb.mxu3 %v690_v23  ;;  %v853_v22 = vld [vmem:[%s7943_s9 + $0x370] sm:$0xff] }
  0xf1   :  { %v869_v23 = vld [vmem:[%s7943_s9 + $0x3f0] sm:$0xff] }
  0xf2   :  { %730 = vmatpush.msrb.mxu2 %v673_v26  ;;  %750 = vmatpush.msrb.mxu3 %v689_v27  ;;  %v852_v26 = vld [vmem:[%s7943_s9 + $0x368] sm:$0xff] }
  0xf3   :  { %v868_v27 = vld [vmem:[%s7943_s9 + $0x3e8] sm:$0xff] }
  0xf4   :  { %731 = vmatpush.msrb.mxu2 %v672_v31  ;;  %751 = vmatpush.msrb.mxu3 %v688_v33  ;;  %v867_v31 = vld [vmem:[%s7943_s9 + $0x3e0] sm:$0xff]  ;;  %v822_v33 = vld [vmem:[%s7943_s9 + $0x278] sm:$0xff] }
  0xf6   :  { %732 = vmatpush.msrb.mxu2 %v671_v40  ;;  %752 = vmatpush.msrb.mxu3 %v687_v41  ;;  %v821_v40 = vld [vmem:[%s7943_s9 + $0x270] sm:$0xff] }
  0xf7   :  { %v837_v41 = vld [vmem:[%s7943_s9 + $0x2f0] sm:$0xff] }
  0xf8   :  { %733 = vmatpush.msrb.mxu2 %v670_v44  ;;  %v820_v44 = vld [vmem:[%s7943_s9 + $0x268] sm:$0xff] }
  0xfa   :  { %v505_v4 = vpop.permute.xlu1 %504 }
 0x164   :  { %v408_v42 = vpop.f32.mrf.mxu0 }
 0x165   :  { %v428_v43 = vpop.f32.mrf.mxu1 }
 0x166   :  { %v429_v45 = vadd.f32 %v428_v43, %v408_v42  ;;  %v700_v42 = vld [vmem:[%s7943_s9 + $0x138] sm:$0xff] }
 0x167   :  { %v716_v43 = vld [vmem:[%s7943_s9 + $0x1b8] sm:$0xff] }
 0x16e   :  { %v448_v46 = vpop.f32.mrf.mxu2  ;;  %v468_v48 = vpop.f32.mrf.mxu3 }
 0x16f   :  { %v449_v47 = vadd.f32 %v448_v46, %v429_v45  ;;  %v686_v45 = vld [vmem:[%s7943_s9 + $0xc8] sm:$0xff]  ;;  %v699_v46 = vld [vmem:[%s7943_s9 + $0x130] sm:$0xff] }
 0x170   :  { %753 = vmatpush.msrb.mxu3 %v686_v45  ;;  %v836_v45 = vld [vmem:[%s7943_s9 + $0x2e8] sm:$0xff] }
 0x171   :  { %v469_v49 = vadd.f32 %v468_v48, %v449_v47  ;;  %v715_v47 = vld [vmem:[%s7943_s9 + $0x1b0] sm:$0xff]  ;;  %v669_v48 = vld [vmem:[%s7943_s9 + $0x40] sm:$0xff] }
 0x172   :  { %734 = vmatpush.msrb.mxu2 %v669_v48  ;;  %v819_v48 = vld [vmem:[%s7943_s9 + $0x260] sm:$0xff] }
 0x173   :  { %496 = vmatpush.msra.mxu0 %v469_v49  ;;  %v685_v49 = vld [vmem:[%s7943_s9 + $0xc0] sm:$0xff] }
 0x174   :  { %5506 = vmatmul.msk.f32.vlgmr.msra.gmra.mxu0 %vm477_vm2, %v220_v50  ;;  %v698_v50 = vld [vmem:[%s7943_s9 + $0x128] sm:$0xff]  ;;  %754 = vmatpush.msrb.mxu3 %v685_v49  ;;  %v835_v49 = vld [vmem:[%s7943_s9 + $0x2e0] sm:$0xff] }
 0x175   :  { %5514 = vmatpush.msk.msrb.mxu0 %vm564_vm5, %v558_v2  ;;  %735 = vmatpush.msrb.mxu2 %v668_v52  ;;  %v695_v2 = vld [vmem:[%s7943_s9 + $0x110] sm:$0xff]  ;;  %v818_v52 = vld [vmem:[%s7943_s9 + $0x258] sm:$0xff] }
 0x176   :  { %755 = vmatpush.msrb.mxu3 %v684_v53  ;;  %v834_v53 = vld [vmem:[%s7943_s9 + $0x2d8] sm:$0xff] }
 0x177   :  { %767 = vmatpush.msra.mxu0 %v708_v6  ;;  %v665_v6 = vld [vmem:[%s7943_s9 + $0x20] sm:$0xff] }
 0x179   :  { %768 = vmatpush.msra.mxu0 %v707_v8  ;;  %v694_v8 = vld [vmem:[%s7943_s9 + $0x108] sm:$0xff] }
 0x17b   :  { %769 = vmatpush.msra.mxu0 %v706_v11  ;;  %v664_v11 = vld [vmem:[%s7943_s9 + $0x18] sm:$0xff] }
 0x17d   :  { %770 = vmatpush.msra.mxu0 %v705_v14 }
 0x17f   :  { %771 = vmatpush.msra.mxu0 %v704_v17  ;;  %v709_v17 = vld [vmem:[%s7943_s9 + $0x180] sm:$0xff] }
 0x181   :  { %772 = vmatpush.msra.mxu0 %v703_v24  ;;  %v662_v24 = vld [vmem:[%s7943_s9 + $0x8] sm:$0xff] }
 0x183   :  { %773 = vmatpush.msra.mxu0 %v702_v28  ;;  %v661_v28 = vld [vmem:[%s7943_s9] sm:$0xff] }
 0x185   :  { %774 = vmatpush.msra.mxu0 %v701_v37  ;;  %v850_v37 = vld [vmem:[%s7943_s9 + $0x358] sm:$0xff] }
 0x187   :  { %775 = vmatpush.msra.mxu0 %v700_v42  ;;  %v849_v42 = vld [vmem:[%s7943_s9 + $0x350] sm:$0xff] }
 0x189   :  { %776 = vmatpush.msra.mxu0 %v699_v46  ;;  %v848_v46 = vld [vmem:[%s7943_s9 + $0x348] sm:$0xff] }
 0x18b   :  { %777 = vmatpush.msra.mxu0 %v698_v50  ;;  %v847_v50 = vld [vmem:[%s7943_s9 + $0x340] sm:$0xff] }
 0x18d   :  { %778 = vmatpush.msra.mxu0 %v697_v55  ;;  %v862_v55 = vld [vmem:[%s7943_s9 + $0x3b8] sm:$0xff] }
 0x1f1   :  { %v498_v59 = vpop.f32.mrf.mxu0 }
 0x1f2   :  { %v499_v60 = vadd.f32 %v498_v59, %v476_v58  ;;  %v667_v58 = vld [vmem:[%s7943_s9 + $0x30] sm:$0xff] }
 0x1f3   :  { %v683_v59 = vld [vmem:[%s7943_s9 + $0xb0] sm:$0xff]  ;;  %736 = vmatpush.msrb.mxu2 %v667_v58 }
 0x1f4   :  { %v501_v61 = vmax.f32 %v499_v60, 0.0  ;;  %v696_v60 = vld [vmem:[%s7943_s9 + $0x118] sm:$0xff]  ;;  %756 = vmatpush.msrb.mxu3 %v683_v59  ;;  %v845_v58 = vld [vmem:[%s7943_s9 + $0x330] sm:$0xff] }
 0x1f5   :  { %779 = vmatpush.msra.mxu0 %v696_v60  ;;  %737 = vmatpush.msrb.mxu2 %v666_v63  ;;  %v861_v59 = vld [vmem:[%s7943_s9 + $0x3b0] sm:$0xff]  ;;  %v844_v60 = vld [vmem:[%s7943_s9 + $0x328] sm:$0xff]  ;;  %v859_v63 = vld [vmem:[%s7943_s9 + $0x3a0] sm:$0xff] }
 0x1f6   :  { %5507 = vmatpush.msk.msra.mxu1 %vm511_vm3, %v501_v61  ;;  %v712_v61 = vld [vmem:[%s7943_s9 + $0x198] sm:$0xff]  ;;  %757 = vmatpush.msrb.mxu3 %v682_v0 }
 0x1f7   :  { %5508 = vmatmul.msk.f32.vlgmr.msra.gmra.mxu1 %vm507_vm4, %v222_v62  ;;  %780 = vmatpush.msra.mxu0 %v695_v2  ;;  %v842_v0 = vld [vmem:[%s7943_s9 + $0x318] sm:$0xff]  ;;  %v816_v2 = vld [vmem:[%s7943_s9 + $0x248] sm:$0xff] }
 0x1f8   :  { %5516 = vmatpush.msk.msrb.mxu1 %vm564_vm5, %v559_v3  ;;  %v711_v3 = vld [vmem:[%s7943_s9 + $0x190] sm:$0xff]  ;;  %738 = vmatpush.msrb.mxu2 %v665_v6  ;;  %v815_v6 = vld [vmem:[%s7943_s9 + $0x240] sm:$0xff] }
 0x1f9   :  { %781 = vmatpush.msra.mxu0 %v694_v8  ;;  %v840_v8 = vld [vmem:[%s7943_s9 + $0x308] sm:$0xff] }
 0x1fa   :  { %787 = vmatpush.msra.mxu1 %v724_v7  ;;  %v681_v7 = vld [vmem:[%s7943_s9 + $0xa0] sm:$0xff]  ;;  %739 = vmatpush.msrb.mxu2 %v664_v11  ;;  %v830_v11 = vld [vmem:[%s7943_s9 + $0x2b8] sm:$0xff] }
 0x1fb   :  { %758 = vmatpush.msrb.mxu3 %v681_v7  ;;  %782 = vmatpush.msra.mxu0 %v693_v16  ;;  %v831_v7 = vld [vmem:[%s7943_s9 + $0x2c0] sm:$0xff]  ;;  %v812_v16 = vld [vmem:[%s7943_s9 + $0x228] sm:$0xff] }
 0x1fc   :  { %788 = vmatpush.msra.mxu1 %v723_v10  ;;  %740 = vmatpush.msrb.mxu2 %v663_v20  ;;  %v810_v20 = vld [vmem:[%s7943_s9 + $0x218] sm:$0xff] }
 0x1fe   :  { %789 = vmatpush.msra.mxu1 %v722_v12  ;;  %v680_v12 = vld [vmem:[%s7943_s9 + $0x98] sm:$0xff]  ;;  %741 = vmatpush.msrb.mxu2 %v662_v24  ;;  %v808_v24 = vld [vmem:[%s7943_s9 + $0x208] sm:$0xff] }
 0x1ff   :  { %759 = vmatpush.msrb.mxu3 %v680_v12  ;;  %v839_v12 = vld [vmem:[%s7943_s9 + $0x300] sm:$0xff] }
 0x200   :  { %790 = vmatpush.msra.mxu1 %v721_v15  ;;  %742 = vmatpush.msrb.mxu2 %v661_v28 }
 0x201   :  { %760 = vmatpush.msrb.mxu3 %v679_v21  ;;  %v826_v21 = vld [vmem:[%s7943_s9 + $0x298] sm:$0xff] }
 0x202   :  { %791 = vmatpush.msra.mxu1 %v720_v19  ;;  %v870_v19 = vld [vmem:[%s7943_s9 + $0x3f8] sm:$0xff] }
 0x204   :  { %792 = vmatpush.msra.mxu1 %v719_v25  ;;  %v678_v25 = vld [vmem:[%s7943_s9 + $0x88] sm:$0xff] }
 0x205   :  { %761 = vmatpush.msrb.mxu3 %v678_v25  ;;  %v824_v25 = vld [vmem:[%s7943_s9 + $0x288] sm:$0xff] }
 0x206   :  { %793 = vmatpush.msra.mxu1 %v718_v29  ;;  %v677_v29 = vld [vmem:[%s7943_s9 + $0x80] sm:$0xff] }
 0x207   :  { %762 = vmatpush.msrb.mxu3 %v677_v29 }
 0x208   :  { %794 = vmatpush.msra.mxu1 %v717_v39  ;;  %v866_v39 = vld [vmem:[%s7943_s9 + $0x3d8] sm:$0xff] }
 0x20a   :  { %795 = vmatpush.msra.mxu1 %v716_v43  ;;  %v865_v43 = vld [vmem:[%s7943_s9 + $0x3d0] sm:$0xff] }
 0x20c   :  { %796 = vmatpush.msra.mxu1 %v715_v47  ;;  %v864_v47 = vld [vmem:[%s7943_s9 + $0x3c8] sm:$0xff] }
 0x20e   :  { %797 = vmatpush.msra.mxu1 %v714_v51  ;;  %v863_v51 = vld [vmem:[%s7943_s9 + $0x3c0] sm:$0xff] }
 0x210   :  { %798 = vmatpush.msra.mxu1 %v713_v56  ;;  %v817_v56 = vld [vmem:[%s7943_s9 + $0x250] sm:$0xff] }
 0x212   :  { %799 = vmatpush.msra.mxu1 %v712_v61  ;;  %v860_v61 = vld [vmem:[%s7943_s9 + $0x3a8] sm:$0xff] }
 0x214   :  { %800 = vmatpush.msra.mxu1 %v711_v3  ;;  %v832_v3 = vld [vmem:[%s7943_s9 + $0x2c8] sm:$0xff] }
 0x274   :  { %v532_v5 = vpop.f32.mrf.mxu1 }
 0x275   :  { %v533_v9 = vadd.f32 %v532_v5, %v505_v4 }
 0x277   :  { %v5509_v13 = vmul.f32 -1.442695, %v533_v9  ;;  %v710_v9 = vld [vmem:[%s7943_s9 + $0x188] sm:$0xff] }
 0x278   :  { %801 = vmatpush.msra.mxu1 %v710_v9  ;;  %v856_v9 = vld [vmem:[%s7943_s9 + $0x388] sm:$0xff] }
 0x279   :  { %5768 = vpow2.f32 %v5509_v13 }
 0x27a   :  { %802 = vmatpush.msra.mxu1 %v709_v17  ;;  %v828_v17 = vld [vmem:[%s7943_s9 + $0x2a8] sm:$0xff] }
 0x27f   :  { %v5769_v30 = vpop.eup %5768 }
 0x280   :  { %v6281_v35 = vadd.f32 1.0, %v5769_v30  ;;  %v851_v30 = vld [vmem:[%s7943_s9 + $0x360] sm:$0xff] }
 0x282   :  { %5770 = vrcp.f32 %v6281_v35  ;;  %v550_v1 = vand.u32 2147483648, %v6281_v35  ;;  %v548_v5 = vand.u32 2147483647, %v6281_v35  ;;  %vm544_vm7 = vweird.f32 %v6281_v35 }
 0x284   :  { %v551_v13 = vor.u32 1.1754944e-38, %v550_v1  ;;  %vm549_vm10 = vcmp.eq.f32.partialorder %v548_v5, 8.507059e+37  ;;  %v858_v1 = vld [vmem:[%s7943_s9 + $0x398] sm:$0xff]  ;;  %v857_v5 = vld [vmem:[%s7943_s9 + $0x390] sm:$0xff] }
 0x288   :  { %v5771_v54 = vpop.eup %5770 }
 0x289   :  { %v540_v57 = vmul.f32 %v5771_v54, %v6281_v35  ;;  %vm545_vm6 = vweird.f32 %v5771_v54  ;;  %v838_v35 = vld [vmem:[%s7943_s9 + $0x2f8] sm:$0xff] }
 0x28a   :  { %vm546_vm8 = vmor %vm544_vm7, %vm545_vm6 }
 0x28b   :  { %v541_v62 = vsub.f32 1.0, %v540_v57  ;;  %v833_v57 = vld [vmem:[%s7943_s9 + $0x2d0] sm:$0xff] }
 0x28d   :  { %v542_v4 = vmul.f32 %v5771_v54, %v541_v62  ;;  %v843_v62 = vld [vmem:[%s7943_s9 + $0x320] sm:$0xff] }
 0x28f   :  { %v543_v10 = vadd.f32 %v5771_v54, %v542_v4  ;;  %v841_v4 = vld [vmem:[%s7943_s9 + $0x310] sm:$0xff] }
 0x291   :  { %v547_v14 = vsel %vm546_vm8, %v5771_v54, %v543_v10  ;;  %v846_v54 = vld [vmem:[%s7943_s9 + $0x338] sm:$0xff] }
 0x292   :  { %v552_v15 = vsel %vm549_vm10, %v551_v13, %v547_v14  ;;  %v814_v10 = vld [vmem:[%s7943_s9 + $0x238] sm:$0xff]  ;;  %v855_v13 = vld [vmem:[%s7943_s9 + $0x380] sm:$0xff]  ;;  %v813_v14 = vld [vmem:[%s7943_s9 + $0x230] sm:$0xff] }
 0x293   :  { %5511 = vmatmul.msk.f32.vlgmr.msra.gmra.mxu2 %vm560_vm9, %v552_v15  ;;  %5513 = vmatmul.msk.f32.vlgmr.msra.gmra.mxu3 %vm560_vm9, %v552_v15 }
 0x294   :  { %5515 = vmatmul.msk.f32.vlgmr.msrb.gmra.mxu0 %vm560_vm9, %v552_v15  ;;  %5517 = vmatmul.msk.f32.vlgmr.msrb.gmra.mxu1 %vm560_vm9, %v552_v15  ;;  %v829_v15 = vld [vmem:[%s7943_s9 + $0x2b0] sm:$0xff] }
 0x295   :  { %913 = vmatpush.msrb.mxu0 %v854_v18  ;;  %933 = vmatpush.msrb.mxu1 %v870_v19  ;;  %v811_v18 = vld [vmem:[%s7943_s9 + $0x220] sm:$0xff] }
 0x296   :  { %873 = vmatpush.msra.mxu2 %v822_v33  ;;  %893 = vmatpush.msra.mxu3 %v838_v35  ;;  %v827_v19 = vld [vmem:[%s7943_s9 + $0x2a0] sm:$0xff] }
 0x297   :  { %914 = vmatpush.msrb.mxu0 %v853_v22  ;;  %934 = vmatpush.msrb.mxu1 %v869_v23  ;;  %v809_v22 = vld [vmem:[%s7943_s9 + $0x210] sm:$0xff] }
 0x298   :  { %874 = vmatpush.msra.mxu2 %v821_v40  ;;  %894 = vmatpush.msra.mxu3 %v837_v41  ;;  %v825_v23 = vld [vmem:[%s7943_s9 + $0x290] sm:$0xff] }
 0x299   :  { %915 = vmatpush.msrb.mxu0 %v852_v26  ;;  %935 = vmatpush.msrb.mxu1 %v868_v27  ;;  %v807_v26 = vld [vmem:[%s7943_s9 + $0x200] sm:$0xff] }
 0x29a   :  { %875 = vmatpush.msra.mxu2 %v820_v44  ;;  %895 = vmatpush.msra.mxu3 %v836_v45  ;;  %v823_v27 = vld [vmem:[%s7943_s9 + $0x280] sm:$0xff]  ;;  %v1024_v44 = vld [vmem:[%s7943_s9 + $0x468] sm:$0xff] }
 0x29b   :  { %916 = vmatpush.msrb.mxu0 %v851_v30  ;;  %936 = vmatpush.msrb.mxu1 %v867_v31  ;;  %v1040_v45 = vld [vmem:[%s7943_s9 + $0x4e8] sm:$0xff] }
 0x29c   :  { %876 = vmatpush.msra.mxu2 %v819_v48  ;;  %896 = vmatpush.msra.mxu3 %v835_v49  ;;  %v1023_v48 = vld [vmem:[%s7943_s9 + $0x460] sm:$0xff] }
 0x29d   :  { %917 = vmatpush.msrb.mxu0 %v850_v37  ;;  %937 = vmatpush.msrb.mxu1 %v866_v39  ;;  %v1026_v37 = vld [vmem:[%s7943_s9 + $0x478] sm:$0xff]  ;;  %v1039_v49 = vld [vmem:[%s7943_s9 + $0x4e0] sm:$0xff] }
 0x29e   :  { %877 = vmatpush.msra.mxu2 %v818_v52  ;;  %897 = vmatpush.msra.mxu3 %v834_v53  ;;  %v1042_v39 = vld [vmem:[%s7943_s9 + $0x4f8] sm:$0xff]  ;;  %v1020_v52 = vld [vmem:[%s7943_s9 + $0x448] sm:$0xff] }
 0x29f   :  { %918 = vmatpush.msrb.mxu0 %v849_v42  ;;  %938 = vmatpush.msrb.mxu1 %v865_v43  ;;  %v1025_v42 = vld [vmem:[%s7943_s9 + $0x470] sm:$0xff]  ;;  %v1036_v53 = vld [vmem:[%s7943_s9 + $0x4c8] sm:$0xff] }
 0x2a0   :  { %878 = vmatpush.msra.mxu2 %v817_v56  ;;  %898 = vmatpush.msra.mxu3 %v833_v57  ;;  %v1018_v56 = vld [vmem:[%s7943_s9 + $0x438] sm:$0xff] }
 0x2a1   :  { %919 = vmatpush.msrb.mxu0 %v848_v46  ;;  %939 = vmatpush.msrb.mxu1 %v864_v47  ;;  %v1034_v57 = vld [vmem:[%s7943_s9 + $0x4b8] sm:$0xff] }
 0x2a2   :  { %879 = vmatpush.msra.mxu2 %v816_v2  ;;  %899 = vmatpush.msra.mxu3 %v832_v3  ;;  %v1013_v2 = vld [vmem:[%s7943_s9 + $0x410] sm:$0xff] }
 0x2a3   :  { %920 = vmatpush.msrb.mxu0 %v847_v50  ;;  %940 = vmatpush.msrb.mxu1 %v863_v51  ;;  %v1021_v50 = vld [vmem:[%s7943_s9 + $0x450] sm:$0xff] }
 0x2a4   :  { %880 = vmatpush.msra.mxu2 %v815_v6  ;;  %900 = vmatpush.msra.mxu3 %v831_v7  ;;  %v1037_v51 = vld [vmem:[%s7943_s9 + $0x4d0] sm:$0xff]  ;;  %v1011_v6 = vld [vmem:[%s7943_s9 + $0x400] sm:$0xff] }
 0x2a5   :  { %921 = vmatpush.msrb.mxu0 %v846_v54  ;;  %941 = vmatpush.msrb.mxu1 %v862_v55  ;;  %v1019_v54 = vld [vmem:[%s7943_s9 + $0x440] sm:$0xff]  ;;  %v1029_v3 = vld [vmem:[%s7943_s9 + $0x490] sm:$0xff] }
 0x2a6   :  { %881 = vmatpush.msra.mxu2 %v814_v10  ;;  %901 = vmatpush.msra.mxu3 %v830_v11  ;;  %v1035_v55 = vld [vmem:[%s7943_s9 + $0x4c0] sm:$0xff]  ;;  %v1201_v10 = vld [vmem:[%s7943_s9 + $0x668] sm:$0xff] }
 0x2a7   :  { %922 = vmatpush.msrb.mxu0 %v845_v58  ;;  %942 = vmatpush.msrb.mxu1 %v861_v59  ;;  %v1017_v58 = vld [vmem:[%s7943_s9 + $0x430] sm:$0xff]  ;;  %v1027_v7 = vld [vmem:[%s7943_s9 + $0x480] sm:$0xff] }
 0x2a8   :  { %882 = vmatpush.msra.mxu2 %v813_v14  ;;  %902 = vmatpush.msra.mxu3 %v829_v15  ;;  %v1033_v59 = vld [vmem:[%s7943_s9 + $0x4b0] sm:$0xff]  ;;  %v1200_v11 = vld [vmem:[%s7943_s9 + $0x660] sm:$0xff]  ;;  %v1197_v14 = vld [vmem:[%s7943_s9 + $0x648] sm:$0xff] }
 0x2a9   :  { %923 = vmatpush.msrb.mxu0 %v844_v60  ;;  %943 = vmatpush.msrb.mxu1 %v860_v61  ;;  %v1016_v60 = vld [vmem:[%s7943_s9 + $0x428] sm:$0xff]  ;;  %v1196_v15 = vld [vmem:[%s7943_s9 + $0x640] sm:$0xff] }
 0x2aa   :  { %883 = vmatpush.msra.mxu2 %v812_v16  ;;  %903 = vmatpush.msra.mxu3 %v828_v17  ;;  %v1032_v61 = vld [vmem:[%s7943_s9 + $0x4a8] sm:$0xff]  ;;  %v1195_v16 = vld [vmem:[%s7943_s9 + $0x638] sm:$0xff]  ;;  %v1194_v17 = vld [vmem:[%s7943_s9 + $0x630] sm:$0xff] }
 0x2ab   :  { %924 = vmatpush.msrb.mxu0 %v843_v62  ;;  %944 = vmatpush.msrb.mxu1 %v859_v63  ;;  %v1015_v62 = vld [vmem:[%s7943_s9 + $0x420] sm:$0xff] }
 0x2ac   :  { %884 = vmatpush.msra.mxu2 %v811_v18  ;;  %904 = vmatpush.msra.mxu3 %v827_v19  ;;  %v1031_v63 = vld [vmem:[%s7943_s9 + $0x4a0] sm:$0xff]  ;;  %v1193_v18 = vld [vmem:[%s7943_s9 + $0x628] sm:$0xff] }
 0x2ad   :  { %925 = vmatpush.msrb.mxu0 %v842_v0  ;;  %945 = vmatpush.msrb.mxu1 %v858_v1  ;;  %v1014_v0 = vld [vmem:[%s7943_s9 + $0x418] sm:$0xff]  ;;  %v1192_v19 = vld [vmem:[%s7943_s9 + $0x620] sm:$0xff] }
 0x2ae   :  { %885 = vmatpush.msra.mxu2 %v810_v20  ;;  %905 = vmatpush.msra.mxu3 %v826_v21  ;;  %v1030_v1 = vld [vmem:[%s7943_s9 + $0x498] sm:$0xff]  ;;  %v1190_v21 = vld [vmem:[%s7943_s9 + $0x610] sm:$0xff] }
 0x2af   :  { %926 = vmatpush.msrb.mxu0 %v841_v4  ;;  %946 = vmatpush.msrb.mxu1 %v857_v5  ;;  %v1012_v4 = vld [vmem:[%s7943_s9 + $0x408] sm:$0xff]  ;;  %v1191_v20 = vld [vmem:[%s7943_s9 + $0x618] sm:$0xff] }
 0x2b0   :  { %886 = vmatpush.msra.mxu2 %v809_v22  ;;  %906 = vmatpush.msra.mxu3 %v825_v23  ;;  %v1028_v5 = vld [vmem:[%s7943_s9 + $0x488] sm:$0xff]  ;;  %v1188_v23 = vld [vmem:[%s7943_s9 + $0x600] sm:$0xff] }
 0x2b1   :  { %927 = vmatpush.msrb.mxu0 %v840_v8  ;;  %947 = vmatpush.msrb.mxu1 %v856_v9  ;;  %v1203_v8 = vld [vmem:[%s7943_s9 + $0x678] sm:$0xff]  ;;  %v1202_v9 = vld [vmem:[%s7943_s9 + $0x670] sm:$0xff]  ;;  %v1189_v22 = vld [vmem:[%s7943_s9 + $0x608] sm:$0xff] }
 0x2b2   :  { %887 = vmatpush.msra.mxu2 %v808_v24  ;;  %907 = vmatpush.msra.mxu3 %v824_v25 }
 0x2b3   :  { %928 = vmatpush.msrb.mxu0 %v839_v12  ;;  %948 = vmatpush.msrb.mxu1 %v855_v13  ;;  %v1199_v12 = vld [vmem:[%s7943_s9 + $0x658] sm:$0xff]  ;;  %v1198_v13 = vld [vmem:[%s7943_s9 + $0x650] sm:$0xff] }
 0x2b4   :  { %888 = vmatpush.msra.mxu2 %v807_v26  ;;  %908 = vmatpush.msra.mxu3 %v823_v27 }
 0x311   :  { %v630_v28 = vpop.f32.mrf.mxu0  ;;  %v650_v29 = vpop.f32.mrf.mxu1 }
 0x312   :  { %v655_v30 = vmul.f32 %v630_v28, %v6233_v36  ;;  %v656_v31 = vmul.f32 %v650_v29, %v6235_v38  ;;  %v1041_v36 = vld [vmem:[%s7943_s9 + $0x4f0] sm:$0xff] }
 0x314   :  { %v6399_v33 = vmax.f32 %v655_v30, 0.0  ;;  %v6401_v35 = vmax.f32 %v656_v31, 0.0  ;;  %v1074_v31 = vld [vmem:[%s7943_s9 + $0x5f8] sm:$0xff] }
 0x316   :  { %783 = vmatmul.f32.vlgmr.msra.gmra.mxu0 %v6399_v33  ;;  %803 = vmatmul.f32.vlgmr.msra.gmra.mxu1 %v6401_v35  ;;  %v590_v40 = vpop.f32.mrf.mxu2  ;;  %v610_v41 = vpop.f32.mrf.mxu3 }
 0x317   :  { %1077 = vmatpush.msra.mxu0 %v1026_v37  ;;  %1097 = vmatpush.msra.mxu1 %v1042_v39  ;;  %v653_v38 = vmul.f32 %v590_v40, %v6228_v32  ;;  %v654_v43 = vmul.f32 %v610_v41, %v6230_v34  ;;  %v1022_v32 = vld [vmem:[%s7943_s9 + $0x458] sm:$0xff]  ;;  %v725_v37 = vld [vmem:[%s7944_s13] sm:$0xff]  ;;  %v1073_v39 = vld [vmem:[%s7943_s9 + $0x5f0] sm:$0xff] }
 0x318   :  { %v1038_v34 = vld [vmem:[%s7943_s9 + $0x4d8] sm:$0xff] }
 0x319   :  { %v6413_v46 = vmax.f32 %v653_v38, 0.0  ;;  %v6415_v47 = vmax.f32 %v654_v43, 0.0  ;;  %1078 = vmatpush.msra.mxu0 %v1025_v42  ;;  %1098 = vmatpush.msra.mxu1 %v1041_v36  ;;  %v1072_v36 = vld [vmem:[%s7943_s9 + $0x5e8] sm:$0xff] }
 0x31b   :  { %1079 = vmatpush.msra.mxu0 %v1024_v44  ;;  %1099 = vmatpush.msra.mxu1 %v1040_v45  ;;  %v1071_v44 = vld [vmem:[%s7943_s9 + $0x5e0] sm:$0xff] }
 0x31c   :  { %743 = vmatmul.f32.vlgmr.msrb.gmra.mxu2 %v6413_v46  ;;  %763 = vmatmul.f32.vlgmr.msrb.gmra.mxu3 %v6415_v47 }
 0x31d   :  { %1080 = vmatpush.msra.mxu0 %v1023_v48  ;;  %1100 = vmatpush.msra.mxu1 %v1039_v49  ;;  %v1058_v49 = vld [vmem:[%s7943_s9 + $0x578] sm:$0xff] }
 0x31e   :  { %929 = vmatmul.f32.vlgmr.msrb.gmra.mxu0 %v6399_v33  ;;  %949 = vmatmul.f32.vlgmr.msrb.gmra.mxu1 %v6401_v35 }
 0x31f   :  { %1081 = vmatpush.msra.mxu0 %v1022_v32  ;;  %1101 = vmatpush.msra.mxu1 %v1038_v34  ;;  %v1070_v32 = vld [vmem:[%s7943_s9 + $0x5d8] sm:$0xff]  ;;  %v871_v34 = vld [vmem:[%s7944_s13 + $0x10] sm:$0xff] }
 0x321   :  { %1082 = vmatpush.msra.mxu0 %v1021_v50  ;;  %1102 = vmatpush.msra.mxu1 %v1037_v51  ;;  %v726_v50 = vld [vmem:[%s7944_s13 + $0x8] sm:$0xff]  ;;  %v1057_v51 = vld [vmem:[%s7943_s9 + $0x570] sm:$0xff] }
 0x323   :  { %1083 = vmatpush.msra.mxu0 %v1020_v52  ;;  %1103 = vmatpush.msra.mxu1 %v1036_v53  ;;  %v1069_v52 = vld [vmem:[%s7943_s9 + $0x5d0] sm:$0xff]  ;;  %v1056_v53 = vld [vmem:[%s7943_s9 + $0x568] sm:$0xff] }
 0x324   :  { %889 = vmatmul.f32.vlgmr.msra.gmra.mxu2 %v6413_v46  ;;  %909 = vmatmul.f32.vlgmr.msra.gmra.mxu3 %v6415_v47 }
 0x325   :  { %1084 = vmatpush.msra.mxu0 %v1019_v54  ;;  %1104 = vmatpush.msra.mxu1 %v1035_v55  ;;  %v1068_v54 = vld [vmem:[%s7943_s9 + $0x5c8] sm:$0xff]  ;;  %v1055_v55 = vld [vmem:[%s7943_s9 + $0x560] sm:$0xff] }
 0x327   :  { %1085 = vmatpush.msra.mxu0 %v1018_v56  ;;  %1105 = vmatpush.msra.mxu1 %v1034_v57  ;;  %v1067_v56 = vld [vmem:[%s7943_s9 + $0x5c0] sm:$0xff]  ;;  %v1054_v57 = vld [vmem:[%s7943_s9 + $0x558] sm:$0xff] }
 0x329   :  { %1086 = vmatpush.msra.mxu0 %v1017_v58  ;;  %1106 = vmatpush.msra.mxu1 %v1033_v59  ;;  %v1066_v58 = vld [vmem:[%s7943_s9 + $0x5b8] sm:$0xff] }
 0x32a   :  { %v872_v59 = vld [vmem:[%s7944_s13 + $0x18] sm:$0xff] }
 0x32b   :  { %1087 = vmatpush.msra.mxu0 %v1016_v60  ;;  %1107 = vmatpush.msra.mxu1 %v1032_v61  ;;  %v1053_v60 = vld [vmem:[%s7943_s9 + $0x550] sm:$0xff] }
 0x32c   :  { %v1065_v61 = vld [vmem:[%s7943_s9 + $0x5b0] sm:$0xff] }
 0x32d   :  { %1088 = vmatpush.msra.mxu0 %v1015_v62  ;;  %1108 = vmatpush.msra.mxu1 %v1031_v63  ;;  %v1052_v62 = vld [vmem:[%s7943_s9 + $0x548] sm:$0xff] }
 0x32e   :  { %v1064_v63 = vld [vmem:[%s7943_s9 + $0x5a8] sm:$0xff] }
 0x32f   :  { %1089 = vmatpush.msra.mxu0 %v1014_v0  ;;  %1109 = vmatpush.msra.mxu1 %v1030_v1  ;;  %v1051_v0 = vld [vmem:[%s7943_s9 + $0x540] sm:$0xff] }
 0x330   :  { %v1063_v1 = vld [vmem:[%s7943_s9 + $0x5a0] sm:$0xff] }
 0x331   :  { %1090 = vmatpush.msra.mxu0 %v1013_v2  ;;  %1110 = vmatpush.msra.mxu1 %v1029_v3  ;;  %v1050_v2 = vld [vmem:[%s7943_s9 + $0x538] sm:$0xff] }
 0x332   :  { %v1062_v3 = vld [vmem:[%s7943_s9 + $0x598] sm:$0xff] }
 0x333   :  { %1091 = vmatpush.msra.mxu0 %v1012_v4  ;;  %1111 = vmatpush.msra.mxu1 %v1028_v5  ;;  %v1049_v4 = vld [vmem:[%s7943_s9 + $0x530] sm:$0xff] }
 0x334   :  { %v1061_v5 = vld [vmem:[%s7943_s9 + $0x590] sm:$0xff] }
 0x335   :  { %1092 = vmatpush.msra.mxu0 %v1011_v6  ;;  %1112 = vmatpush.msra.mxu1 %v1027_v7  ;;  %v1048_v6 = vld [vmem:[%s7943_s9 + $0x528] sm:$0xff] }
 0x336   :  { %1093 = vmatmul.f32.vlgmr.msra.gmra.mxu0 %v6413_v46  ;;  %1113 = vmatmul.f32.vlgmr.msra.gmra.mxu1 %v6415_v47  ;;  %v1060_v7 = vld [vmem:[%s7943_s9 + $0x588] sm:$0xff] }
 0x337   :  { %1254 = vmatpush.msrb.mxu1 %v1203_v8  ;;  %v1047_v8 = vld [vmem:[%s7943_s9 + $0x520] sm:$0xff] }
 0x339   :  { %1255 = vmatpush.msrb.mxu1 %v1202_v9  ;;  %v1059_v9 = vld [vmem:[%s7943_s9 + $0x580] sm:$0xff] }
 0x33b   :  { %1256 = vmatpush.msrb.mxu1 %v1201_v10  ;;  %v1235_v10 = vld [vmem:[%s7943_s9 + $0x778] sm:$0xff] }
 0x33d   :  { %1257 = vmatpush.msrb.mxu1 %v1200_v11  ;;  %v1046_v11 = vld [vmem:[%s7943_s9 + $0x518] sm:$0xff] }
 0x33f   :  { %1258 = vmatpush.msrb.mxu1 %v1199_v12  ;;  %v1234_v12 = vld [vmem:[%s7943_s9 + $0x770] sm:$0xff] }
 0x341   :  { %1259 = vmatpush.msrb.mxu1 %v1198_v13  ;;  %v1045_v13 = vld [vmem:[%s7943_s9 + $0x510] sm:$0xff] }
 0x343   :  { %1260 = vmatpush.msrb.mxu1 %v1197_v14  ;;  %v1233_v14 = vld [vmem:[%s7943_s9 + $0x768] sm:$0xff] }
 0x345   :  { %1261 = vmatpush.msrb.mxu1 %v1196_v15  ;;  %v1044_v15 = vld [vmem:[%s7943_s9 + $0x508] sm:$0xff] }
 0x347   :  { %1262 = vmatpush.msrb.mxu1 %v1195_v16  ;;  %v1232_v16 = vld [vmem:[%s7943_s9 + $0x760] sm:$0xff] }
 0x349   :  { %1263 = vmatpush.msrb.mxu1 %v1194_v17  ;;  %v1043_v17 = vld [vmem:[%s7943_s9 + $0x500] sm:$0xff] }
 0x34b   :  { %1264 = vmatpush.msrb.mxu1 %v1193_v18  ;;  %v1219_v18 = vld [vmem:[%s7943_s9 + $0x6f8] sm:$0xff] }
 0x34d   :  { %1265 = vmatpush.msrb.mxu1 %v1192_v19  ;;  %v1231_v19 = vld [vmem:[%s7943_s9 + $0x758] sm:$0xff] }
 0x34f   :  { %1266 = vmatpush.msrb.mxu1 %v1191_v20  ;;  %v1218_v20 = vld [vmem:[%s7943_s9 + $0x6f0] sm:$0xff] }
 0x351   :  { %1267 = vmatpush.msrb.mxu1 %v1190_v21  ;;  %v1230_v21 = vld [vmem:[%s7943_s9 + $0x750] sm:$0xff] }
 0x353   :  { %1268 = vmatpush.msrb.mxu1 %v1189_v22  ;;  %v1217_v22 = vld [vmem:[%s7943_s9 + $0x6e8] sm:$0xff] }
 0x355   :  { %1269 = vmatpush.msrb.mxu1 %v1188_v23  ;;  %v1229_v23 = vld [vmem:[%s7943_s9 + $0x748] sm:$0xff] }
 0x356   :  { %1270 = vmatmul.f32.vlgmr.msrb.gmra.mxu1 %v6413_v46 }
 0x393   :  { %v784_v24 = vpop.f32.mrf.mxu0  ;;  %v804_v28 = vpop.f32.mrf.mxu1 }
 0x39b   :  { %v930_v38 = vpop.f32.mrf.mxu0  ;;  %v950_v45 = vpop.f32.mrf.mxu1 }
 0x39f   :  { %v744_v25 = vpop.f32.mrf.mxu2  ;;  %v764_v26 = vpop.f32.mrf.mxu3 }
 0x3a0   :  { %v765_v27 = vadd.f32 %v764_v26, %v744_v25  ;;  %v1228_v25 = vld [vmem:[%s7943_s9 + $0x740] sm:$0xff]  ;;  %v1215_v26 = vld [vmem:[%s7943_s9 + $0x6d8] sm:$0xff] }
 0x3a2   :  { %v785_v29 = vadd.f32 %v784_v24, %v765_v27  ;;  %v1216_v24 = vld [vmem:[%s7943_s9 + $0x6e0] sm:$0xff]  ;;  %v1227_v27 = vld [vmem:[%s7943_s9 + $0x738] sm:$0xff] }
 0x3a4   :  { %v805_v30 = vadd.f32 %v804_v28, %v785_v29  ;;  %v1214_v28 = vld [vmem:[%s7943_s9 + $0x6d0] sm:$0xff] }
 0x3a5   :  { %v1226_v29 = vld [vmem:[%s7943_s9 + $0x730] sm:$0xff] }
 0x3a6   :  { %1003 = vmatpush.msrb.mxu3 %v805_v30  ;;  %v1213_v30 = vld [vmem:[%s7943_s9 + $0x6c8] sm:$0xff] }
 0x3a7   :  { %v890_v40 = vpop.f32.mrf.mxu2  ;;  %v910_v41 = vpop.f32.mrf.mxu3  ;;  %5520 = vmatmul.msk.f32.vlgmr.msrb.gmra.mxu3 %vm477_vm2, %v725_v37  ;;  %v1212_v37 = vld [vmem:[%s7943_s9 + $0x6c0] sm:$0xff] }
 0x3a8   :  { %1137 = vmatpush.msra.mxu3 %v1074_v31  ;;  %v911_v42 = vadd.f32 %v910_v41, %v890_v40  ;;  %v1225_v31 = vld [vmem:[%s7943_s9 + $0x728] sm:$0xff]  ;;  %v1211_v40 = vld [vmem:[%s7943_s9 + $0x6b8] sm:$0xff] }
 0x3a9   :  { %v1223_v41 = vld [vmem:[%s7943_s9 + $0x718] sm:$0xff] }
 0x3aa   :  { %1138 = vmatpush.msra.mxu3 %v1073_v39  ;;  %v931_v43 = vadd.f32 %v930_v38, %v911_v42  ;;  %v1224_v39 = vld [vmem:[%s7943_s9 + $0x720] sm:$0xff]  ;;  %v1210_v42 = vld [vmem:[%s7943_s9 + $0x6b0] sm:$0xff]  ;;  %v1209_v38 = vld [vmem:[%s7943_s9 + $0x6a8] sm:$0xff] }
 0x3ac   :  { %1139 = vmatpush.msra.mxu3 %v1072_v36  ;;  %v951_v48 = vadd.f32 %v950_v45, %v931_v43  ;;  %v1222_v36 = vld [vmem:[%s7943_s9 + $0x710] sm:$0xff]  ;;  %v1221_v43 = vld [vmem:[%s7943_s9 + $0x708] sm:$0xff]  ;;  %v1220_v45 = vld [vmem:[%s7943_s9 + $0x700] sm:$0xff] }
 0x3ae   :  { %1140 = vmatpush.msra.mxu3 %v1071_v44  ;;  %974 = vmatpush.msrb.mxu2 %v951_v48  ;;  %v1208_v44 = vld [vmem:[%s7943_s9 + $0x6a0] sm:$0xff]  ;;  %v1396_v48 = vld [vmem:[%s7943_s9 + $0x8f8] sm:$0xff] }
 0x3af   :  { %5518 = vmatmul.msk.f32.vlgmr.msrb.gmra.mxu2 %vm477_vm2, %v871_v34  ;;  %5521 = vmatmul.msk.f32.gmra.mxu3 %vm477_vm2, %v726_v50  ;;  %v1206_v34 = vld [vmem:[%s7943_s9 + $0x690] sm:$0xff]  ;;  %v1394_v50 = vld [vmem:[%s7943_s9 + $0x8e8] sm:$0xff] }
 0x3b0   :  { %1117 = vmatpush.msra.mxu2 %v1058_v49  ;;  %1141 = vmatpush.msra.mxu3 %v1070_v32  ;;  %v1207_v49 = vld [vmem:[%s7943_s9 + $0x698] sm:$0xff]  ;;  %v1395_v32 = vld [vmem:[%s7943_s9 + $0x8f0] sm:$0xff] }
 0x3b2   :  { %1118 = vmatpush.msra.mxu2 %v1057_v51  ;;  %1142 = vmatpush.msra.mxu3 %v1069_v52  ;;  %v1205_v51 = vld [vmem:[%s7943_s9 + $0x688] sm:$0xff]  ;;  %v1393_v52 = vld [vmem:[%s7943_s9 + $0x8e0] sm:$0xff] }
 0x3b4   :  { %1119 = vmatpush.msra.mxu2 %v1056_v53  ;;  %1143 = vmatpush.msra.mxu3 %v1068_v54  ;;  %v1204_v53 = vld [vmem:[%s7943_s9 + $0x680] sm:$0xff]  ;;  %v1380_v54 = vld [vmem:[%s7943_s9 + $0x878] sm:$0xff] }
 0x3b6   :  { %1120 = vmatpush.msra.mxu2 %v1055_v55  ;;  %1144 = vmatpush.msra.mxu3 %v1067_v56  ;;  %v1392_v55 = vld [vmem:[%s7943_s9 + $0x8d8] sm:$0xff]  ;;  %v1379_v56 = vld [vmem:[%s7943_s9 + $0x870] sm:$0xff] }
 0x3b7   :  { %5519 = vmatmul.msk.f32.gmra.mxu2 %vm477_vm2, %v872_v59  ;;  %v1390_v59 = vld [vmem:[%s7943_s9 + $0x8c8] sm:$0xff] }
 0x3b8   :  { %1121 = vmatpush.msra.mxu2 %v1054_v57  ;;  %1145 = vmatpush.msra.mxu3 %v1066_v58  ;;  %v1391_v57 = vld [vmem:[%s7943_s9 + $0x8d0] sm:$0xff]  ;;  %v1378_v58 = vld [vmem:[%s7943_s9 + $0x868] sm:$0xff] }
 0x3ba   :  { %1122 = vmatpush.msra.mxu2 %v1053_v60  ;;  %1146 = vmatpush.msra.mxu3 %v1065_v61  ;;  %v1377_v60 = vld [vmem:[%s7943_s9 + $0x860] sm:$0xff] }
 0x3bb   :  { %v1389_v61 = vld [vmem:[%s7943_s9 + $0x8c0] sm:$0xff] }
 0x3bc   :  { %1123 = vmatpush.msra.mxu2 %v1052_v62  ;;  %1147 = vmatpush.msra.mxu3 %v1064_v63  ;;  %v1376_v62 = vld [vmem:[%s7943_s9 + $0x858] sm:$0xff] }
 0x3bd   :  { %v1388_v63 = vld [vmem:[%s7943_s9 + $0x8b8] sm:$0xff] }
 0x3be   :  { %1124 = vmatpush.msra.mxu2 %v1051_v0  ;;  %1148 = vmatpush.msra.mxu3 %v1063_v1  ;;  %v1375_v0 = vld [vmem:[%s7943_s9 + $0x850] sm:$0xff] }
 0x3bf   :  { %v1387_v1 = vld [vmem:[%s7943_s9 + $0x8b0] sm:$0xff] }
 0x3c0   :  { %1125 = vmatpush.msra.mxu2 %v1050_v2  ;;  %1149 = vmatpush.msra.mxu3 %v1062_v3  ;;  %v1374_v2 = vld [vmem:[%s7943_s9 + $0x848] sm:$0xff] }
 0x3c1   :  { %v1386_v3 = vld [vmem:[%s7943_s9 + $0x8a8] sm:$0xff] }
 0x3c2   :  { %1126 = vmatpush.msra.mxu2 %v1049_v4  ;;  %1150 = vmatpush.msra.mxu3 %v1061_v5  ;;  %v1373_v4 = vld [vmem:[%s7943_s9 + $0x840] sm:$0xff] }
 0x3c3   :  { %v1385_v5 = vld [vmem:[%s7943_s9 + $0x8a0] sm:$0xff] }
 0x3c4   :  { %1127 = vmatpush.msra.mxu2 %v1048_v6  ;;  %1151 = vmatpush.msra.mxu3 %v1060_v7  ;;  %v1372_v6 = vld [vmem:[%s7943_s9 + $0x838] sm:$0xff] }
 0x3c5   :  { %v1384_v7 = vld [vmem:[%s7943_s9 + $0x898] sm:$0xff] }
 0x3c6   :  { %1128 = vmatpush.msra.mxu2 %v1047_v8  ;;  %1152 = vmatpush.msra.mxu3 %v1059_v9  ;;  %v1371_v8 = vld [vmem:[%s7943_s9 + $0x830] sm:$0xff] }
 0x3c7   :  { %1153 = vmatmul.f32.vlgmr.msra.gmra.mxu3 %v6401_v35  ;;  %v1383_v9 = vld [vmem:[%s7943_s9 + $0x890] sm:$0xff] }
 0x3c8   :  { %1294 = vmatpush.msrb.mxu3 %v1235_v10  ;;  %1129 = vmatpush.msra.mxu2 %v1046_v11  ;;  %v1370_v10 = vld [vmem:[%s7943_s9 + $0x828] sm:$0xff] }
 0x3c9   :  { %v1382_v11 = vld [vmem:[%s7943_s9 + $0x888] sm:$0xff] }
 0x3ca   :  { %1295 = vmatpush.msrb.mxu3 %v1234_v12  ;;  %1130 = vmatpush.msra.mxu2 %v1045_v13  ;;  %v1369_v12 = vld [vmem:[%s7943_s9 + $0x820] sm:$0xff] }
 0x3cb   :  { %v1381_v13 = vld [vmem:[%s7943_s9 + $0x880] sm:$0xff] }
 0x3cc   :  { %1296 = vmatpush.msrb.mxu3 %v1233_v14  ;;  %1131 = vmatpush.msra.mxu2 %v1044_v15  ;;  %v1557_v14 = vld [vmem:[%s7943_s9 + $0xa78] sm:$0xff] }
 0x3cd   :  { %v1368_v15 = vld [vmem:[%s7943_s9 + $0x818] sm:$0xff] }
 0x3ce   :  { %1297 = vmatpush.msrb.mxu3 %v1232_v16  ;;  %1132 = vmatpush.msra.mxu2 %v1043_v17  ;;  %v1556_v16 = vld [vmem:[%s7943_s9 + $0xa70] sm:$0xff] }
 0x3cf   :  { %1133 = vmatmul.f32.vlgmr.msra.gmra.mxu2 %v6399_v33  ;;  %v1367_v17 = vld [vmem:[%s7943_s9 + $0x810] sm:$0xff] }
 0x3d0   :  { %1274 = vmatpush.msrb.mxu2 %v1219_v18  ;;  %1298 = vmatpush.msrb.mxu3 %v1231_v19  ;;  %v1555_v18 = vld [vmem:[%s7943_s9 + $0xa68] sm:$0xff] }
 0x3d1   :  { %v1366_v19 = vld [vmem:[%s7943_s9 + $0x808] sm:$0xff] }
 0x3d2   :  { %1275 = vmatpush.msrb.mxu2 %v1218_v20  ;;  %1299 = vmatpush.msrb.mxu3 %v1230_v21  ;;  %v1554_v20 = vld [vmem:[%s7943_s9 + $0xa60] sm:$0xff] }
 0x3d3   :  { %v1365_v21 = vld [vmem:[%s7943_s9 + $0x800] sm:$0xff] }
 0x3d4   :  { %1276 = vmatpush.msrb.mxu2 %v1217_v22  ;;  %1300 = vmatpush.msrb.mxu3 %v1229_v23  ;;  %v1553_v22 = vld [vmem:[%s7943_s9 + $0xa58] sm:$0xff]  ;;  %v1552_v23 = vld [vmem:[%s7943_s9 + $0xa50] sm:$0xff] }
 0x3d6   :  { %1277 = vmatpush.msrb.mxu2 %v1216_v24  ;;  %1301 = vmatpush.msrb.mxu3 %v1228_v25  ;;  %v1551_v24 = vld [vmem:[%s7943_s9 + $0xa48] sm:$0xff]  ;;  %v1550_v25 = vld [vmem:[%s7943_s9 + $0xa40] sm:$0xff] }
 0x3d8   :  { %1278 = vmatpush.msrb.mxu2 %v1215_v26  ;;  %1302 = vmatpush.msrb.mxu3 %v1227_v27  ;;  %v1549_v26 = vld [vmem:[%s7943_s9 + $0xa38] sm:$0xff]  ;;  %v1548_v27 = vld [vmem:[%s7943_s9 + $0xa30] sm:$0xff] }
 0x3da   :  { %1279 = vmatpush.msrb.mxu2 %v1214_v28  ;;  %1303 = vmatpush.msrb.mxu3 %v1226_v29  ;;  %v1547_v28 = vld [vmem:[%s7943_s9 + $0xa28] sm:$0xff]  ;;  %v1546_v29 = vld [vmem:[%s7943_s9 + $0xa20] sm:$0xff] }
 0x3dc   :  { %1280 = vmatpush.msrb.mxu2 %v1213_v30  ;;  %1304 = vmatpush.msrb.mxu3 %v1225_v31  ;;  %v1545_v30 = vld [vmem:[%s7943_s9 + $0xa18] sm:$0xff]  ;;  %v1544_v31 = vld [vmem:[%s7943_s9 + $0xa10] sm:$0xff] }
 0x3de   :  { %1281 = vmatpush.msrb.mxu2 %v1212_v37  ;;  %1305 = vmatpush.msrb.mxu3 %v1224_v39  ;;  %v1543_v37 = vld [vmem:[%s7943_s9 + $0xa08] sm:$0xff]  ;;  %v1542_v39 = vld [vmem:[%s7943_s9 + $0xa00] sm:$0xff] }
 0x3e0   :  { %1282 = vmatpush.msrb.mxu2 %v1211_v40  ;;  %1306 = vmatpush.msrb.mxu3 %v1223_v41 }
 0x3e2   :  { %1283 = vmatpush.msrb.mxu2 %v1210_v42  ;;  %1307 = vmatpush.msrb.mxu3 %v1222_v36 }
 0x3e4   :  { %1284 = vmatpush.msrb.mxu2 %v1209_v38  ;;  %1308 = vmatpush.msrb.mxu3 %v1221_v43  ;;  %v1094_v38 = vpop.f32.mrf.mxu0  ;;  %v1114_v43 = vpop.f32.mrf.mxu1 }
 0x3e6   :  { %1285 = vmatpush.msrb.mxu2 %v1208_v44  ;;  %1309 = vmatpush.msrb.mxu3 %v1220_v45  ;;  %v1115_v44 = vadd.f32 %v1114_v43, %v1094_v38  ;;  %v1558_v38 = vld [vmem:[%s7943_s9 + $0xa80] sm:$0xff]  ;;  %v1734_v43 = vld [vmem:[%s7943_s9 + $0xc78] sm:$0xff] }
 0x3e7   :  { %1310 = vmatmul.f32.vlgmr.msrb.gmra.mxu3 %v6399_v33 }
 0x3e8   :  { %1451 = vmatpush.msra.mxu3 %v1396_v48  ;;  %1286 = vmatpush.msrb.mxu2 %v1207_v49 }
 0x3ea   :  { %1452 = vmatpush.msra.mxu3 %v1395_v32  ;;  %1287 = vmatpush.msrb.mxu2 %v1206_v34  ;;  %v1075_v34 = vld [vmem:[%s7944_s13 + $0x20] sm:$0xff] }
 0x3ec   :  { %1453 = vmatpush.msra.mxu3 %v1394_v50  ;;  %1288 = vmatpush.msrb.mxu2 %v1205_v51  ;;  %v1251_v50 = vld [vmem:[%s7943_s9 + $0x7f8] sm:$0xff]  ;;  %v1250_v51 = vld [vmem:[%s7943_s9 + $0x7f0] sm:$0xff] }
 0x3ee   :  { %1454 = vmatpush.msra.mxu3 %v1393_v52  ;;  %1289 = vmatpush.msrb.mxu2 %v1204_v53  ;;  %v1249_v52 = vld [vmem:[%s7943_s9 + $0x7e8] sm:$0xff]  ;;  %v1248_v53 = vld [vmem:[%s7943_s9 + $0x7e0] sm:$0xff] }
 0x3ef   :  { %1290 = vmatmul.f32.vlgmr.msrb.gmra.mxu2 %v6415_v47 }
 0x3f0   :  { %1431 = vmatpush.msra.mxu2 %v1380_v54  ;;  %1455 = vmatpush.msra.mxu3 %v1392_v55  ;;  %v1076_v54 = vld [vmem:[%s7944_s13 + $0x28] sm:$0xff]  ;;  %v1247_v55 = vld [vmem:[%s7943_s9 + $0x7d8] sm:$0xff] }
 0x3f2   :  { %1432 = vmatpush.msra.mxu2 %v1379_v56  ;;  %1456 = vmatpush.msra.mxu3 %v1391_v57  ;;  %v1246_v56 = vld [vmem:[%s7943_s9 + $0x7d0] sm:$0xff]  ;;  %v1245_v57 = vld [vmem:[%s7943_s9 + $0x7c8] sm:$0xff] }
 0x3f4   :  { %1433 = vmatpush.msra.mxu2 %v1378_v58  ;;  %1457 = vmatpush.msra.mxu3 %v1390_v59  ;;  %v1244_v58 = vld [vmem:[%s7943_s9 + $0x7c0] sm:$0xff]  ;;  %v1243_v59 = vld [vmem:[%s7943_s9 + $0x7b8] sm:$0xff] }
 0x3f6   :  { %1434 = vmatpush.msra.mxu2 %v1377_v60  ;;  %1458 = vmatpush.msra.mxu3 %v1389_v61  ;;  %v1242_v60 = vld [vmem:[%s7943_s9 + $0x7b0] sm:$0xff]  ;;  %v1241_v61 = vld [vmem:[%s7943_s9 + $0x7a8] sm:$0xff] }
 0x3f8   :  { %1435 = vmatpush.msra.mxu2 %v1376_v62  ;;  %1459 = vmatpush.msra.mxu3 %v1388_v63  ;;  %v1240_v62 = vld [vmem:[%s7943_s9 + $0x7a0] sm:$0xff]  ;;  %v1239_v63 = vld [vmem:[%s7943_s9 + $0x798] sm:$0xff] }
 0x3fa   :  { %1436 = vmatpush.msra.mxu2 %v1375_v0  ;;  %1460 = vmatpush.msra.mxu3 %v1387_v1  ;;  %v1238_v0 = vld [vmem:[%s7943_s9 + $0x790] sm:$0xff]  ;;  %v1237_v1 = vld [vmem:[%s7943_s9 + $0x788] sm:$0xff] }
 0x3fc   :  { %1437 = vmatpush.msra.mxu2 %v1374_v2  ;;  %1461 = vmatpush.msra.mxu3 %v1386_v3  ;;  %v1236_v2 = vld [vmem:[%s7943_s9 + $0x780] sm:$0xff]  ;;  %v1412_v3 = vld [vmem:[%s7943_s9 + $0x978] sm:$0xff] }
 0x3fe   :  { %1438 = vmatpush.msra.mxu2 %v1373_v4  ;;  %1462 = vmatpush.msra.mxu3 %v1385_v5  ;;  %v1411_v4 = vld [vmem:[%s7943_s9 + $0x970] sm:$0xff]  ;;  %v1410_v5 = vld [vmem:[%s7943_s9 + $0x968] sm:$0xff] }
 0x400   :  { %1439 = vmatpush.msra.mxu2 %v1372_v6  ;;  %1463 = vmatpush.msra.mxu3 %v1384_v7  ;;  %v1409_v6 = vld [vmem:[%s7943_s9 + $0x960] sm:$0xff]  ;;  %v1408_v7 = vld [vmem:[%s7943_s9 + $0x958] sm:$0xff] }
 0x402   :  { %1440 = vmatpush.msra.mxu2 %v1371_v8  ;;  %1464 = vmatpush.msra.mxu3 %v1383_v9  ;;  %v1407_v8 = vld [vmem:[%s7943_s9 + $0x950] sm:$0xff]  ;;  %v1406_v9 = vld [vmem:[%s7943_s9 + $0x948] sm:$0xff] }
 0x404   :  { %1441 = vmatpush.msra.mxu2 %v1370_v10  ;;  %1465 = vmatpush.msra.mxu3 %v1382_v11  ;;  %v1405_v10 = vld [vmem:[%s7943_s9 + $0x940] sm:$0xff]  ;;  %v1404_v11 = vld [vmem:[%s7943_s9 + $0x938] sm:$0xff] }
 0x406   :  { %1442 = vmatpush.msra.mxu2 %v1369_v12  ;;  %1466 = vmatpush.msra.mxu3 %v1381_v13  ;;  %v1403_v12 = vld [vmem:[%s7943_s9 + $0x930] sm:$0xff]  ;;  %v1402_v13 = vld [vmem:[%s7943_s9 + $0x928] sm:$0xff] }
 0x407   :  { %1467 = vmatmul.f32.vlgmr.msra.gmra.mxu3 %v6415_v47 }
 0x408   :  { %1608 = vmatpush.msrb.mxu3 %v1557_v14  ;;  %1443 = vmatpush.msra.mxu2 %v1368_v15  ;;  %v1401_v14 = vld [vmem:[%s7943_s9 + $0x920] sm:$0xff]  ;;  %v1400_v15 = vld [vmem:[%s7943_s9 + $0x918] sm:$0xff] }
 0x40a   :  { %1609 = vmatpush.msrb.mxu3 %v1556_v16  ;;  %1444 = vmatpush.msra.mxu2 %v1367_v17  ;;  %v1399_v16 = vld [vmem:[%s7943_s9 + $0x910] sm:$0xff]  ;;  %v1398_v17 = vld [vmem:[%s7943_s9 + $0x908] sm:$0xff] }
 0x40c   :  { %1610 = vmatpush.msrb.mxu3 %v1555_v18  ;;  %1445 = vmatpush.msra.mxu2 %v1366_v19  ;;  %v1397_v18 = vld [vmem:[%s7943_s9 + $0x900] sm:$0xff]  ;;  %v1573_v19 = vld [vmem:[%s7943_s9 + $0xaf8] sm:$0xff] }
 0x40e   :  { %1611 = vmatpush.msrb.mxu3 %v1554_v20  ;;  %1446 = vmatpush.msra.mxu2 %v1365_v21  ;;  %v1572_v20 = vld [vmem:[%s7943_s9 + $0xaf0] sm:$0xff]  ;;  %v1571_v21 = vld [vmem:[%s7943_s9 + $0xae8] sm:$0xff] }
 0x40f   :  { %1447 = vmatmul.f32.vlgmr.msra.gmra.mxu2 %v6413_v46 }
 0x410   :  { %1612 = vmatpush.msrb.mxu3 %v1553_v22  ;;  %v1570_v22 = vld [vmem:[%s7943_s9 + $0xae0] sm:$0xff] }
 0x412   :  { %1613 = vmatpush.msrb.mxu3 %v1552_v23  ;;  %v1569_v23 = vld [vmem:[%s7943_s9 + $0xad8] sm:$0xff] }
 0x414   :  { %1614 = vmatpush.msrb.mxu3 %v1551_v24  ;;  %v1568_v24 = vld [vmem:[%s7943_s9 + $0xad0] sm:$0xff] }
 0x416   :  { %1615 = vmatpush.msrb.mxu3 %v1550_v25  ;;  %v1567_v25 = vld [vmem:[%s7943_s9 + $0xac8] sm:$0xff] }
 0x418   :  { %1616 = vmatpush.msrb.mxu3 %v1549_v26  ;;  %v1566_v26 = vld [vmem:[%s7943_s9 + $0xac0] sm:$0xff] }
 0x41a   :  { %1617 = vmatpush.msrb.mxu3 %v1548_v27  ;;  %v1565_v27 = vld [vmem:[%s7943_s9 + $0xab8] sm:$0xff] }
 0x41c   :  { %1618 = vmatpush.msrb.mxu3 %v1547_v28  ;;  %v1564_v28 = vld [vmem:[%s7943_s9 + $0xab0] sm:$0xff] }
 0x41e   :  { %1619 = vmatpush.msrb.mxu3 %v1546_v29  ;;  %v1563_v29 = vld [vmem:[%s7943_s9 + $0xaa8] sm:$0xff] }
 0x420   :  { %1620 = vmatpush.msrb.mxu3 %v1545_v30  ;;  %v1562_v30 = vld [vmem:[%s7943_s9 + $0xaa0] sm:$0xff] }
 0x422   :  { %1621 = vmatpush.msrb.mxu3 %v1544_v31  ;;  %v1561_v31 = vld [vmem:[%s7943_s9 + $0xa98] sm:$0xff] }
 0x424   :  { %1622 = vmatpush.msrb.mxu3 %v1543_v37  ;;  %v1560_v37 = vld [vmem:[%s7943_s9 + $0xa90] sm:$0xff] }
 0x426   :  { %1623 = vmatpush.msrb.mxu3 %v1542_v39  ;;  %v1559_v39 = vld [vmem:[%s7943_s9 + $0xa88] sm:$0xff] }
 0x427   :  { %1624 = vmatmul.f32.vlgmr.msrb.gmra.mxu3 %v6413_v46 }
 0x42a   :  { %v6597_v41 = vpop.f32.mrf.mxu3 }
 0x432   :  { %v6595_v40 = vpop.f32.mrf.mxu2  ;;  %v6601_v36 = vpop.f32.mrf.mxu3 }
 0x43a   :  { %v6599_v42 = vpop.f32.mrf.mxu2 }
 0x44a   :  { %v1154_v49 = vpop.f32.mrf.mxu3 }
 0x452   :  { %v1134_v45 = vpop.f32.mrf.mxu2 }
 0x453   :  { %v1135_v48 = vadd.f32 %v1134_v45, %v1115_v44  ;;  %v1733_v44 = vld [vmem:[%s7943_s9 + $0xc70] sm:$0xff]  ;;  %v1732_v45 = vld [vmem:[%s7943_s9 + $0xc68] sm:$0xff] }
 0x455   :  { %v1155_v32 = vadd.f32 %v1154_v49, %v1135_v48  ;;  %v1731_v48 = vld [vmem:[%s7943_s9 + $0xc60] sm:$0xff]  ;;  %v1730_v49 = vld [vmem:[%s7943_s9 + $0xc58] sm:$0xff] }
 0x457   :  { %1178 = vmatpush.msrb.mxu0 %v1155_v32  ;;  %v1729_v32 = vld [vmem:[%s7943_s9 + $0xc50] sm:$0xff] }
 0x458   :  { %5522 = vmatmul.msk.f32.vlgmr.msrb.gmra.mxu0 %vm477_vm2, %v1075_v34  ;;  %v1728_v34 = vld [vmem:[%s7943_s9 + $0xc48] sm:$0xff] }
 0x459   :  { %1314 = vmatpush.msra.mxu0 %v1251_v50  ;;  %v1727_v50 = vld [vmem:[%s7943_s9 + $0xc40] sm:$0xff] }
 0x45b   :  { %1315 = vmatpush.msra.mxu0 %v1250_v51  ;;  %v1726_v51 = vld [vmem:[%s7943_s9 + $0xc38] sm:$0xff] }
 0x45d   :  { %1316 = vmatpush.msra.mxu0 %v1249_v52  ;;  %v1725_v52 = vld [vmem:[%s7943_s9 + $0xc30] sm:$0xff] }
 0x45f   :  { %1317 = vmatpush.msra.mxu0 %v1248_v53  ;;  %v1724_v53 = vld [vmem:[%s7943_s9 + $0xc28] sm:$0xff] }
 0x460   :  { %5523 = vmatmul.msk.f32.gmra.mxu0 %vm477_vm2, %v1076_v54  ;;  %v1723_v54 = vld [vmem:[%s7943_s9 + $0xc20] sm:$0xff] }
 0x461   :  { %1318 = vmatpush.msra.mxu0 %v1247_v55  ;;  %v1722_v55 = vld [vmem:[%s7943_s9 + $0xc18] sm:$0xff] }
 0x463   :  { %1319 = vmatpush.msra.mxu0 %v1246_v56  ;;  %v1721_v56 = vld [vmem:[%s7943_s9 + $0xc10] sm:$0xff] }
 0x465   :  { %1320 = vmatpush.msra.mxu0 %v1245_v57  ;;  %v1720_v57 = vld [vmem:[%s7943_s9 + $0xc08] sm:$0xff] }
 0x467   :  { %1321 = vmatpush.msra.mxu0 %v1244_v58  ;;  %v1719_v58 = vld [vmem:[%s7943_s9 + $0xc00] sm:$0xff] }
 0x469   :  { %1322 = vmatpush.msra.mxu0 %v1243_v59 }
 0x46b   :  { %1323 = vmatpush.msra.mxu0 %v1242_v60 }
 0x46d   :  { %1324 = vmatpush.msra.mxu0 %v1241_v61 }
 0x46f   :  { %1325 = vmatpush.msra.mxu0 %v1240_v62  ;;  %v1271_v62 = vpop.f32.mrf.mxu1 }
 0x471   :  { %1326 = vmatpush.msra.mxu0 %v1239_v63 }
 0x472   :  { %v1291_v60 = vpop.f32.mrf.mxu2 }
 0x473   :  { %1327 = vmatpush.msra.mxu0 %v1238_v0  ;;  %v1292_v63 = vadd.f32 %v1291_v60, %v1271_v62  ;;  %v1311_v0 = vpop.f32.mrf.mxu3  ;;  %v1737_v60 = vld [vmem:[%s7943_s9 + $0xc90] sm:$0xff]  ;;  %v1736_v62 = vld [vmem:[%s7943_s9 + $0xc88] sm:$0xff] }
 0x475   :  { %1328 = vmatpush.msra.mxu0 %v1237_v1  ;;  %v1312_v1 = vadd.f32 %v1311_v0, %v1292_v63  ;;  %v1735_v63 = vld [vmem:[%s7943_s9 + $0xc80] sm:$0xff]  ;;  %v1911_v0 = vld [vmem:[%s7943_s9 + $0xe78] sm:$0xff] }
 0x477   :  { %1329 = vmatpush.msra.mxu0 %v1236_v2 }
 0x478   :  { %1330 = vmatmul.f32.vlgmr.msra.gmra.mxu0 %v6401_v35 }
 0x479   :  { %1471 = vmatpush.msrb.mxu0 %v1412_v3 }
 0x47b   :  { %1472 = vmatpush.msrb.mxu0 %v1411_v4  ;;  %v1252_v4 = vld [vmem:[%s7944_s13 + $0x30] sm:$0xff] }
 0x47d   :  { %1473 = vmatpush.msrb.mxu0 %v1410_v5  ;;  %v1428_v5 = vld [vmem:[%s7943_s9 + $0x9f8] sm:$0xff] }
 0x47f   :  { %1474 = vmatpush.msrb.mxu0 %v1409_v6  ;;  %v1427_v6 = vld [vmem:[%s7943_s9 + $0x9f0] sm:$0xff] }
 0x481   :  { %1475 = vmatpush.msrb.mxu0 %v1408_v7  ;;  %v1426_v7 = vld [vmem:[%s7943_s9 + $0x9e8] sm:$0xff] }
 0x483   :  { %1476 = vmatpush.msrb.mxu0 %v1407_v8  ;;  %v1425_v8 = vld [vmem:[%s7943_s9 + $0x9e0] sm:$0xff] }
 0x485   :  { %1477 = vmatpush.msrb.mxu0 %v1406_v9  ;;  %v1253_v9 = vld [vmem:[%s7944_s13 + $0x38] sm:$0xff] }
 0x487   :  { %1478 = vmatpush.msrb.mxu0 %v1405_v10  ;;  %v1424_v10 = vld [vmem:[%s7943_s9 + $0x9d8] sm:$0xff] }
 0x489   :  { %1479 = vmatpush.msrb.mxu0 %v1404_v11  ;;  %v1423_v11 = vld [vmem:[%s7943_s9 + $0x9d0] sm:$0xff] }
 0x48b   :  { %1480 = vmatpush.msrb.mxu0 %v1403_v12  ;;  %v1422_v12 = vld [vmem:[%s7943_s9 + $0x9c8] sm:$0xff] }
 0x48d   :  { %1481 = vmatpush.msrb.mxu0 %v1402_v13  ;;  %v1421_v13 = vld [vmem:[%s7943_s9 + $0x9c0] sm:$0xff] }
 0x48f   :  { %1482 = vmatpush.msrb.mxu0 %v1401_v14  ;;  %v1420_v14 = vld [vmem:[%s7943_s9 + $0x9b8] sm:$0xff] }
 0x491   :  { %1483 = vmatpush.msrb.mxu0 %v1400_v15  ;;  %v1419_v15 = vld [vmem:[%s7943_s9 + $0x9b0] sm:$0xff] }
 0x493   :  { %1484 = vmatpush.msrb.mxu0 %v1399_v16  ;;  %v1418_v16 = vld [vmem:[%s7943_s9 + $0x9a8] sm:$0xff] }
 0x495   :  { %1485 = vmatpush.msrb.mxu0 %v1398_v17  ;;  %v1417_v17 = vld [vmem:[%s7943_s9 + $0x9a0] sm:$0xff] }
 0x497   :  { %1486 = vmatpush.msrb.mxu0 %v1397_v18  ;;  %v1416_v18 = vld [vmem:[%s7943_s9 + $0x998] sm:$0xff] }
 0x498   :  { %1487 = vmatmul.f32.vlgmr.msrb.gmra.mxu0 %v6399_v33 }
 0x499   :  { %1628 = vmatpush.msra.mxu0 %v1573_v19  ;;  %v1415_v19 = vld [vmem:[%s7943_s9 + $0x990] sm:$0xff] }
 0x49b   :  { %1629 = vmatpush.msra.mxu0 %v1572_v20  ;;  %v1414_v20 = vld [vmem:[%s7943_s9 + $0x988] sm:$0xff] }
 0x49d   :  { %1630 = vmatpush.msra.mxu0 %v1571_v21  ;;  %v1413_v21 = vld [vmem:[%s7943_s9 + $0x980] sm:$0xff] }
 0x49f   :  { %1631 = vmatpush.msra.mxu0 %v1570_v22  ;;  %v1589_v22 = vld [vmem:[%s7943_s9 + $0xb78] sm:$0xff] }
 0x4a1   :  { %1632 = vmatpush.msra.mxu0 %v1569_v23  ;;  %v1588_v23 = vld [vmem:[%s7943_s9 + $0xb70] sm:$0xff] }
 0x4a3   :  { %1633 = vmatpush.msra.mxu0 %v1568_v24  ;;  %v1587_v24 = vld [vmem:[%s7943_s9 + $0xb68] sm:$0xff] }
 0x4a5   :  { %1634 = vmatpush.msra.mxu0 %v1567_v25  ;;  %v1586_v25 = vld [vmem:[%s7943_s9 + $0xb60] sm:$0xff] }
 0x4a7   :  { %1635 = vmatpush.msra.mxu0 %v1566_v26  ;;  %v1585_v26 = vld [vmem:[%s7943_s9 + $0xb58] sm:$0xff] }
 0x4a9   :  { %1636 = vmatpush.msra.mxu0 %v1565_v27  ;;  %v1584_v27 = vld [vmem:[%s7943_s9 + $0xb50] sm:$0xff] }
 0x4ab   :  { %1637 = vmatpush.msra.mxu0 %v1564_v28  ;;  %v1583_v28 = vld [vmem:[%s7943_s9 + $0xb48] sm:$0xff] }
 0x4ad   :  { %1638 = vmatpush.msra.mxu0 %v1563_v29  ;;  %v1582_v29 = vld [vmem:[%s7943_s9 + $0xb40] sm:$0xff] }
 0x4af   :  { %1639 = vmatpush.msra.mxu0 %v1562_v30  ;;  %v1581_v30 = vld [vmem:[%s7943_s9 + $0xb38] sm:$0xff] }
 0x4b1   :  { %1640 = vmatpush.msra.mxu0 %v1561_v31  ;;  %v1580_v31 = vld [vmem:[%s7943_s9 + $0xb30] sm:$0xff] }
 0x4b3   :  { %1641 = vmatpush.msra.mxu0 %v1560_v37  ;;  %v1579_v37 = vld [vmem:[%s7943_s9 + $0xb28] sm:$0xff] }
 0x4b5   :  { %1642 = vmatpush.msra.mxu0 %v1559_v39  ;;  %v1578_v39 = vld [vmem:[%s7943_s9 + $0xb20] sm:$0xff] }
 0x4b7   :  { %1643 = vmatpush.msra.mxu0 %v1558_v38  ;;  %v1577_v38 = vld [vmem:[%s7943_s9 + $0xb18] sm:$0xff] }
 0x4b8   :  { %1644 = vmatmul.f32.vlgmr.msra.gmra.mxu0 %v6415_v47 }
 0x4b9   :  { %1785 = vmatpush.msrb.mxu0 %v1734_v43  ;;  %v1576_v43 = vld [vmem:[%s7943_s9 + $0xb10] sm:$0xff] }
 0x4bb   :  { %1786 = vmatpush.msrb.mxu0 %v1733_v44  ;;  %v1575_v44 = vld [vmem:[%s7943_s9 + $0xb08] sm:$0xff] }
 0x4bd   :  { %1787 = vmatpush.msrb.mxu0 %v1732_v45  ;;  %v1574_v45 = vld [vmem:[%s7943_s9 + $0xb00] sm:$0xff] }
 0x4bf   :  { %1788 = vmatpush.msrb.mxu0 %v1731_v48  ;;  %v1750_v48 = vld [vmem:[%s7943_s9 + $0xcf8] sm:$0xff] }
 0x4c1   :  { %1789 = vmatpush.msrb.mxu0 %v1730_v49  ;;  %v1749_v49 = vld [vmem:[%s7943_s9 + $0xcf0] sm:$0xff] }
 0x4c3   :  { %1790 = vmatpush.msrb.mxu0 %v1729_v32  ;;  %v1748_v32 = vld [vmem:[%s7943_s9 + $0xce8] sm:$0xff] }
 0x4c5   :  { %1791 = vmatpush.msrb.mxu0 %v1728_v34  ;;  %v1747_v34 = vld [vmem:[%s7943_s9 + $0xce0] sm:$0xff] }
 0x4c7   :  { %1792 = vmatpush.msrb.mxu0 %v1727_v50  ;;  %v1746_v50 = vld [vmem:[%s7943_s9 + $0xcd8] sm:$0xff] }
 0x4c9   :  { %1793 = vmatpush.msrb.mxu0 %v1726_v51  ;;  %v1745_v51 = vld [vmem:[%s7943_s9 + $0xcd0] sm:$0xff] }
 0x4cb   :  { %1794 = vmatpush.msrb.mxu0 %v1725_v52  ;;  %v1744_v52 = vld [vmem:[%s7943_s9 + $0xcc8] sm:$0xff] }
 0x4cd   :  { %1795 = vmatpush.msrb.mxu0 %v1724_v53  ;;  %v1743_v53 = vld [vmem:[%s7943_s9 + $0xcc0] sm:$0xff] }
 0x4cf   :  { %1796 = vmatpush.msrb.mxu0 %v1723_v54  ;;  %v1742_v54 = vld [vmem:[%s7943_s9 + $0xcb8] sm:$0xff] }
 0x4d1   :  { %1797 = vmatpush.msrb.mxu0 %v1722_v55  ;;  %v1741_v55 = vld [vmem:[%s7943_s9 + $0xcb0] sm:$0xff] }
 0x4d3   :  { %1798 = vmatpush.msrb.mxu0 %v1721_v56  ;;  %v1740_v56 = vld [vmem:[%s7943_s9 + $0xca8] sm:$0xff] }
 0x4d5   :  { %1799 = vmatpush.msrb.mxu0 %v1720_v57  ;;  %v6675_v59 = vpop.f32.mrf.mxu0  ;;  %v1739_v57 = vld [vmem:[%s7943_s9 + $0xca0] sm:$0xff] }
 0x4d7   :  { %1800 = vmatpush.msrb.mxu0 %v1719_v58  ;;  %v1738_v58 = vld [vmem:[%s7943_s9 + $0xc98] sm:$0xff] }
 0x4d8   :  { %1801 = vmatmul.f32.vlgmr.msrb.gmra.mxu0 %v6413_v46 }
 0x4dd   :  { %v6677_v61 = vpop.f32.mrf.mxu0 }
 0x4f5   :  { %v1331_v2 = vpop.f32.mrf.mxu0 }
 0x4f6   :  { %v1332_v3 = vadd.f32 %v1331_v2, %v1312_v1  ;;  %v1910_v1 = vld [vmem:[%s7943_s9 + $0xe70] sm:$0xff]  ;;  %v1909_v2 = vld [vmem:[%s7943_s9 + $0xe68] sm:$0xff] }
 0x4f8   :  { %1355 = vmatpush.msra.mxu1 %v1332_v3  ;;  %v1908_v3 = vld [vmem:[%s7943_s9 + $0xe60] sm:$0xff] }
 0x4f9   :  { %5524 = vmatmul.msk.f32.vlgmr.msra.gmra.mxu1 %vm477_vm2, %v1252_v4  ;;  %v1907_v4 = vld [vmem:[%s7943_s9 + $0xe58] sm:$0xff] }
 0x4fa   :  { %1491 = vmatpush.msrb.mxu1 %v1428_v5  ;;  %v1906_v5 = vld [vmem:[%s7943_s9 + $0xe50] sm:$0xff] }
 0x4fc   :  { %1492 = vmatpush.msrb.mxu1 %v1427_v6  ;;  %v1905_v6 = vld [vmem:[%s7943_s9 + $0xe48] sm:$0xff] }
 0x4fe   :  { %1493 = vmatpush.msrb.mxu1 %v1426_v7  ;;  %v1904_v7 = vld [vmem:[%s7943_s9 + $0xe40] sm:$0xff] }
 0x500   :  { %1494 = vmatpush.msrb.mxu1 %v1425_v8  ;;  %v1903_v8 = vld [vmem:[%s7943_s9 + $0xe38] sm:$0xff] }
 0x501   :  { %5525 = vmatmul.msk.f32.gmra.mxu1 %vm477_vm2, %v1253_v9  ;;  %v1902_v9 = vld [vmem:[%s7943_s9 + $0xe30] sm:$0xff] }
 0x502   :  { %1495 = vmatpush.msrb.mxu1 %v1424_v10  ;;  %v1901_v10 = vld [vmem:[%s7943_s9 + $0xe28] sm:$0xff] }
 0x504   :  { %1496 = vmatpush.msrb.mxu1 %v1423_v11  ;;  %v1900_v11 = vld [vmem:[%s7943_s9 + $0xe20] sm:$0xff] }
 0x506   :  { %1497 = vmatpush.msrb.mxu1 %v1422_v12  ;;  %v1899_v12 = vld [vmem:[%s7943_s9 + $0xe18] sm:$0xff] }
 0x508   :  { %1498 = vmatpush.msrb.mxu1 %v1421_v13  ;;  %v1898_v13 = vld [vmem:[%s7943_s9 + $0xe10] sm:$0xff] }
 0x50a   :  { %1499 = vmatpush.msrb.mxu1 %v1420_v14  ;;  %v1897_v14 = vld [vmem:[%s7943_s9 + $0xe08] sm:$0xff] }
 0x50c   :  { %1500 = vmatpush.msrb.mxu1 %v1419_v15  ;;  %v1896_v15 = vld [vmem:[%s7943_s9 + $0xe00] sm:$0xff] }
 0x50e   :  { %1501 = vmatpush.msrb.mxu1 %v1418_v16 }
 0x510   :  { %1502 = vmatpush.msrb.mxu1 %v1417_v17 }
 0x512   :  { %1503 = vmatpush.msrb.mxu1 %v1416_v18  ;;  %v1448_v18 = vpop.f32.mrf.mxu2 }
 0x514   :  { %1504 = vmatpush.msrb.mxu1 %v1415_v19  ;;  %v1468_v19 = vpop.f32.mrf.mxu3 }
 0x516   :  { %1505 = vmatpush.msrb.mxu1 %v1414_v20  ;;  %v1488_v20 = vpop.f32.mrf.mxu0 }
 0x518   :  { %1506 = vmatpush.msrb.mxu1 %v1413_v21  ;;  %v1469_v21 = vadd.f32 %v1468_v19, %v1448_v18  ;;  %v1916_v18 = vld [vmem:[%s7943_s9 + $0xea0] sm:$0xff]  ;;  %v1915_v19 = vld [vmem:[%s7943_s9 + $0xe98] sm:$0xff] }
 0x519   :  { %1507 = vmatmul.f32.vlgmr.msrb.gmra.mxu1 %v6401_v35 }
 0x51a   :  { %1648 = vmatpush.msra.mxu1 %v1589_v22  ;;  %v1489_v22 = vadd.f32 %v1488_v20, %v1469_v21  ;;  %v1914_v20 = vld [vmem:[%s7943_s9 + $0xe90] sm:$0xff]  ;;  %v1913_v21 = vld [vmem:[%s7943_s9 + $0xe88] sm:$0xff] }
 0x51c   :  { %1649 = vmatpush.msra.mxu1 %v1588_v23 }
 0x51e   :  { %1650 = vmatpush.msra.mxu1 %v1587_v24 }
 0x520   :  { %1651 = vmatpush.msra.mxu1 %v1586_v25  ;;  %v1429_v25 = vld [vmem:[%s7944_s13 + $0x40] sm:$0xff] }
 0x522   :  { %1652 = vmatpush.msra.mxu1 %v1585_v26  ;;  %v1605_v26 = vld [vmem:[%s7943_s9 + $0xbf8] sm:$0xff] }
 0x524   :  { %1653 = vmatpush.msra.mxu1 %v1584_v27  ;;  %v1604_v27 = vld [vmem:[%s7943_s9 + $0xbf0] sm:$0xff] }
 0x526   :  { %1654 = vmatpush.msra.mxu1 %v1583_v28  ;;  %v1603_v28 = vld [vmem:[%s7943_s9 + $0xbe8] sm:$0xff] }
 0x528   :  { %1655 = vmatpush.msra.mxu1 %v1582_v29  ;;  %v1602_v29 = vld [vmem:[%s7943_s9 + $0xbe0] sm:$0xff] }
 0x52a   :  { %1656 = vmatpush.msra.mxu1 %v1581_v30  ;;  %v1430_v30 = vld [vmem:[%s7944_s13 + $0x48] sm:$0xff] }
 0x52c   :  { %1657 = vmatpush.msra.mxu1 %v1580_v31  ;;  %v1601_v31 = vld [vmem:[%s7943_s9 + $0xbd8] sm:$0xff] }
 0x52e   :  { %1658 = vmatpush.msra.mxu1 %v1579_v37  ;;  %v1600_v37 = vld [vmem:[%s7943_s9 + $0xbd0] sm:$0xff] }
 0x530   :  { %1659 = vmatpush.msra.mxu1 %v1578_v39  ;;  %v1599_v39 = vld [vmem:[%s7943_s9 + $0xbc8] sm:$0xff] }
 0x532   :  { %1660 = vmatpush.msra.mxu1 %v1577_v38  ;;  %v1598_v38 = vld [vmem:[%s7943_s9 + $0xbc0] sm:$0xff] }
 0x534   :  { %1661 = vmatpush.msra.mxu1 %v1576_v43  ;;  %v1597_v43 = vld [vmem:[%s7943_s9 + $0xbb8] sm:$0xff] }
 0x536   :  { %1662 = vmatpush.msra.mxu1 %v1575_v44  ;;  %v1596_v44 = vld [vmem:[%s7943_s9 + $0xbb0] sm:$0xff] }
 0x538   :  { %1663 = vmatpush.msra.mxu1 %v1574_v45  ;;  %v1595_v45 = vld [vmem:[%s7943_s9 + $0xba8] sm:$0xff] }
 0x539   :  { %1664 = vmatmul.f32.vlgmr.msra.gmra.mxu1 %v6399_v33 }
 0x53a   :  { %1805 = vmatpush.msrb.mxu1 %v1750_v48  ;;  %v1594_v48 = vld [vmem:[%s7943_s9 + $0xba0] sm:$0xff] }
 0x53c   :  { %1806 = vmatpush.msrb.mxu1 %v1749_v49  ;;  %v1593_v49 = vld [vmem:[%s7943_s9 + $0xb98] sm:$0xff] }
 0x53e   :  { %1807 = vmatpush.msrb.mxu1 %v1748_v32  ;;  %v1592_v32 = vld [vmem:[%s7943_s9 + $0xb90] sm:$0xff] }
 0x540   :  { %1808 = vmatpush.msrb.mxu1 %v1747_v34  ;;  %v1591_v34 = vld [vmem:[%s7943_s9 + $0xb88] sm:$0xff] }
 0x542   :  { %1809 = vmatpush.msrb.mxu1 %v1746_v50  ;;  %v1590_v50 = vld [vmem:[%s7943_s9 + $0xb80] sm:$0xff] }
 0x544   :  { %1810 = vmatpush.msrb.mxu1 %v1745_v51  ;;  %v1766_v51 = vld [vmem:[%s7943_s9 + $0xd78] sm:$0xff] }
 0x546   :  { %1811 = vmatpush.msrb.mxu1 %v1744_v52  ;;  %v1765_v52 = vld [vmem:[%s7943_s9 + $0xd70] sm:$0xff] }
 0x548   :  { %1812 = vmatpush.msrb.mxu1 %v1743_v53  ;;  %v1764_v53 = vld [vmem:[%s7943_s9 + $0xd68] sm:$0xff] }
 0x54a   :  { %1813 = vmatpush.msrb.mxu1 %v1742_v54  ;;  %v1763_v54 = vld [vmem:[%s7943_s9 + $0xd60] sm:$0xff] }
 0x54c   :  { %1814 = vmatpush.msrb.mxu1 %v1741_v55  ;;  %v1762_v55 = vld [vmem:[%s7943_s9 + $0xd58] sm:$0xff] }
 0x54e   :  { %1815 = vmatpush.msrb.mxu1 %v1740_v56  ;;  %v1761_v56 = vld [vmem:[%s7943_s9 + $0xd50] sm:$0xff] }
 0x550   :  { %1816 = vmatpush.msrb.mxu1 %v1739_v57  ;;  %v1760_v57 = vld [vmem:[%s7943_s9 + $0xd48] sm:$0xff] }
 0x552   :  { %1817 = vmatpush.msrb.mxu1 %v1738_v58  ;;  %v1759_v58 = vld [vmem:[%s7943_s9 + $0xd40] sm:$0xff] }
 0x554   :  { %1818 = vmatpush.msrb.mxu1 %v1737_v60  ;;  %v1758_v60 = vld [vmem:[%s7943_s9 + $0xd38] sm:$0xff] }
 0x556   :  { %1819 = vmatpush.msrb.mxu1 %v1736_v62  ;;  %v1757_v62 = vld [vmem:[%s7943_s9 + $0xd30] sm:$0xff] }
 0x558   :  { %1820 = vmatpush.msrb.mxu1 %v1735_v63  ;;  %v1756_v63 = vld [vmem:[%s7943_s9 + $0xd28] sm:$0xff] }
 0x559   :  { %1821 = vmatmul.f32.vlgmr.msrb.gmra.mxu1 %v6415_v47 }
 0x55a   :  { %1962 = vmatpush.msra.mxu1 %v1911_v0  ;;  %v1755_v0 = vld [vmem:[%s7943_s9 + $0xd20] sm:$0xff] }
 0x55c   :  { %1963 = vmatpush.msra.mxu1 %v1910_v1  ;;  %v1754_v1 = vld [vmem:[%s7943_s9 + $0xd18] sm:$0xff] }
 0x55e   :  { %1964 = vmatpush.msra.mxu1 %v1909_v2  ;;  %v1753_v2 = vld [vmem:[%s7943_s9 + $0xd10] sm:$0xff] }
 0x560   :  { %1965 = vmatpush.msra.mxu1 %v1908_v3  ;;  %v1752_v3 = vld [vmem:[%s7943_s9 + $0xd08] sm:$0xff] }
 0x562   :  { %1966 = vmatpush.msra.mxu1 %v1907_v4  ;;  %v1751_v4 = vld [vmem:[%s7943_s9 + $0xd00] sm:$0xff] }
 0x564   :  { %1967 = vmatpush.msra.mxu1 %v1906_v5  ;;  %v1927_v5 = vld [vmem:[%s7943_s9 + $0xef8] sm:$0xff] }
 0x566   :  { %1968 = vmatpush.msra.mxu1 %v1905_v6  ;;  %v1926_v6 = vld [vmem:[%s7943_s9 + $0xef0] sm:$0xff] }
 0x568   :  { %1969 = vmatpush.msra.mxu1 %v1904_v7  ;;  %v1925_v7 = vld [vmem:[%s7943_s9 + $0xee8] sm:$0xff] }
 0x56a   :  { %1970 = vmatpush.msra.mxu1 %v1903_v8  ;;  %v1924_v8 = vld [vmem:[%s7943_s9 + $0xee0] sm:$0xff] }
 0x56c   :  { %1971 = vmatpush.msra.mxu1 %v1902_v9  ;;  %v1923_v9 = vld [vmem:[%s7943_s9 + $0xed8] sm:$0xff] }
 0x56e   :  { %1972 = vmatpush.msra.mxu1 %v1901_v10  ;;  %v1922_v10 = vld [vmem:[%s7943_s9 + $0xed0] sm:$0xff] }
 0x570   :  { %1973 = vmatpush.msra.mxu1 %v1900_v11  ;;  %v1921_v11 = vld [vmem:[%s7943_s9 + $0xec8] sm:$0xff] }
 0x572   :  { %1974 = vmatpush.msra.mxu1 %v1899_v12  ;;  %v1920_v12 = vld [vmem:[%s7943_s9 + $0xec0] sm:$0xff] }
 0x574   :  { %1975 = vmatpush.msra.mxu1 %v1898_v13  ;;  %v1919_v13 = vld [vmem:[%s7943_s9 + $0xeb8] sm:$0xff] }
 0x576   :  { %1976 = vmatpush.msra.mxu1 %v1897_v14  ;;  %v6751_v16 = vpop.f32.mrf.mxu1  ;;  %v1918_v14 = vld [vmem:[%s7943_s9 + $0xeb0] sm:$0xff] }
 0x578   :  { %1977 = vmatpush.msra.mxu1 %v1896_v15  ;;  %v1917_v15 = vld [vmem:[%s7943_s9 + $0xea8] sm:$0xff] }
 0x579   :  { %1978 = vmatmul.f32.vlgmr.msra.gmra.mxu1 %v6413_v46 }
 0x57e   :  { %v6753_v17 = vpop.f32.mrf.mxu1 }
 0x596   :  { %v1508_v23 = vpop.f32.mrf.mxu1 }
 0x597   :  { %v1509_v24 = vadd.f32 %v1508_v23, %v1489_v22  ;;  %v1912_v22 = vld [vmem:[%s7943_s9 + $0xe80] sm:$0xff]  ;;  %v2088_v23 = vld [vmem:[%s7943_s9 + $0x1078] sm:$0xff] }
 0x599   :  { %1532 = vmatpush.msrb.mxu2 %v1509_v24  ;;  %v2087_v24 = vld [vmem:[%s7943_s9 + $0x1070] sm:$0xff] }
 0x59a   :  { %5526 = vmatmul.msk.f32.vlgmr.msrb.gmra.mxu2 %vm477_vm2, %v1429_v25  ;;  %v2086_v25 = vld [vmem:[%s7943_s9 + $0x1068] sm:$0xff] }
 0x59b   :  { %1668 = vmatpush.msra.mxu2 %v1605_v26  ;;  %v2085_v26 = vld [vmem:[%s7943_s9 + $0x1060] sm:$0xff] }
 0x59d   :  { %1669 = vmatpush.msra.mxu2 %v1604_v27  ;;  %v2084_v27 = vld [vmem:[%s7943_s9 + $0x1058] sm:$0xff] }
 0x59f   :  { %1670 = vmatpush.msra.mxu2 %v1603_v28  ;;  %v2083_v28 = vld [vmem:[%s7943_s9 + $0x1050] sm:$0xff] }
 0x5a1   :  { %1671 = vmatpush.msra.mxu2 %v1602_v29  ;;  %v2082_v29 = vld [vmem:[%s7943_s9 + $0x1048] sm:$0xff] }
 0x5a2   :  { %5527 = vmatmul.msk.f32.gmra.mxu2 %vm477_vm2, %v1430_v30  ;;  %v2081_v30 = vld [vmem:[%s7943_s9 + $0x1040] sm:$0xff] }
 0x5a3   :  { %1672 = vmatpush.msra.mxu2 %v1601_v31  ;;  %v2080_v31 = vld [vmem:[%s7943_s9 + $0x1038] sm:$0xff] }
 0x5a5   :  { %1673 = vmatpush.msra.mxu2 %v1600_v37  ;;  %v2079_v37 = vld [vmem:[%s7943_s9 + $0x1030] sm:$0xff] }
 0x5a7   :  { %1674 = vmatpush.msra.mxu2 %v1599_v39  ;;  %v2078_v39 = vld [vmem:[%s7943_s9 + $0x1028] sm:$0xff] }
 0x5a9   :  { %1675 = vmatpush.msra.mxu2 %v1598_v38  ;;  %v2077_v38 = vld [vmem:[%s7943_s9 + $0x1020] sm:$0xff] }
 0x5ab   :  { %1676 = vmatpush.msra.mxu2 %v1597_v43  ;;  %v2076_v43 = vld [vmem:[%s7943_s9 + $0x1018] sm:$0xff] }
 0x5ad   :  { %1677 = vmatpush.msra.mxu2 %v1596_v44  ;;  %v2075_v44 = vld [vmem:[%s7943_s9 + $0x1010] sm:$0xff] }
 0x5af   :  { %1678 = vmatpush.msra.mxu2 %v1595_v45  ;;  %v2074_v45 = vld [vmem:[%s7943_s9 + $0x1008] sm:$0xff] }
 0x5b1   :  { %1679 = vmatpush.msra.mxu2 %v1594_v48  ;;  %v2073_v48 = vld [vmem:[%s7943_s9 + $0x1000] sm:$0xff] }
 0x5b3   :  { %1680 = vmatpush.msra.mxu2 %v1593_v49 }
 0x5b5   :  { %1681 = vmatpush.msra.mxu2 %v1592_v32 }
 0x5b7   :  { %1682 = vmatpush.msra.mxu2 %v1591_v34  ;;  %v1645_v34 = vpop.f32.mrf.mxu0 }
 0x5b9   :  { %1683 = vmatpush.msra.mxu2 %v1590_v50  ;;  %v1625_v50 = vpop.f32.mrf.mxu3 }
 0x5ba   :  { %1684 = vmatmul.f32.vlgmr.msra.gmra.mxu2 %v6401_v35 }
 0x5bb   :  { %1825 = vmatpush.msrb.mxu2 %v1766_v51  ;;  %v1665_v51 = vpop.f32.mrf.mxu1 }
 0x5bd   :  { %1826 = vmatpush.msrb.mxu2 %v1765_v52  ;;  %v1646_v52 = vadd.f32 %v1645_v34, %v1625_v50  ;;  %v2094_v34 = vld [vmem:[%s7943_s9 + $0x10a8] sm:$0xff]  ;;  %v2093_v50 = vld [vmem:[%s7943_s9 + $0x10a0] sm:$0xff] }
 0x5bf   :  { %1827 = vmatpush.msrb.mxu2 %v1764_v53  ;;  %v1666_v53 = vadd.f32 %v1665_v51, %v1646_v52  ;;  %v2092_v51 = vld [vmem:[%s7943_s9 + $0x1098] sm:$0xff]  ;;  %v2091_v52 = vld [vmem:[%s7943_s9 + $0x1090] sm:$0xff] }
 0x5c1   :  { %1828 = vmatpush.msrb.mxu2 %v1763_v54 }
 0x5c3   :  { %1829 = vmatpush.msrb.mxu2 %v1762_v55 }
 0x5c5   :  { %1830 = vmatpush.msrb.mxu2 %v1761_v56  ;;  %v1606_v56 = vld [vmem:[%s7944_s13 + $0x50] sm:$0xff] }
 0x5c7   :  { %1831 = vmatpush.msrb.mxu2 %v1760_v57  ;;  %v1782_v57 = vld [vmem:[%s7943_s9 + $0xdf8] sm:$0xff] }
 0x5c9   :  { %1832 = vmatpush.msrb.mxu2 %v1759_v58  ;;  %v1780_v58 = vld [vmem:[%s7943_s9 + $0xde8] sm:$0xff] }
 0x5cb   :  { %1833 = vmatpush.msrb.mxu2 %v1758_v60  ;;  %v1779_v60 = vld [vmem:[%s7943_s9 + $0xde0] sm:$0xff] }
 0x5cd   :  { %1834 = vmatpush.msrb.mxu2 %v1757_v62  ;;  %v1607_v62 = vld [vmem:[%s7944_s13 + $0x58] sm:$0xff] }
 0x5cf   :  { %1835 = vmatpush.msrb.mxu2 %v1756_v63  ;;  %v1778_v63 = vld [vmem:[%s7943_s9 + $0xdd8] sm:$0xff] }
 0x5d1   :  { %1836 = vmatpush.msrb.mxu2 %v1755_v0  ;;  %v1777_v0 = vld [vmem:[%s7943_s9 + $0xdd0] sm:$0xff] }
 0x5d3   :  { %1837 = vmatpush.msrb.mxu2 %v1754_v1  ;;  %v1776_v1 = vld [vmem:[%s7943_s9 + $0xdc8] sm:$0xff] }
 0x5d5   :  { %1838 = vmatpush.msrb.mxu2 %v1753_v2  ;;  %v1775_v2 = vld [vmem:[%s7943_s9 + $0xdc0] sm:$0xff] }
 0x5d7   :  { %1839 = vmatpush.msrb.mxu2 %v1752_v3  ;;  %v1774_v3 = vld [vmem:[%s7943_s9 + $0xdb8] sm:$0xff] }
 0x5d9   :  { %1840 = vmatpush.msrb.mxu2 %v1751_v4  ;;  %v1773_v4 = vld [vmem:[%s7943_s9 + $0xdb0] sm:$0xff] }
 0x5da   :  { %1841 = vmatmul.f32.vlgmr.msrb.gmra.mxu2 %v6399_v33 }
 0x5db   :  { %1982 = vmatpush.msra.mxu2 %v1927_v5  ;;  %v1772_v5 = vld [vmem:[%s7943_s9 + $0xda8] sm:$0xff] }
 0x5dd   :  { %1983 = vmatpush.msra.mxu2 %v1926_v6  ;;  %v1771_v6 = vld [vmem:[%s7943_s9 + $0xda0] sm:$0xff] }
 0x5df   :  { %1984 = vmatpush.msra.mxu2 %v1925_v7  ;;  %v1770_v7 = vld [vmem:[%s7943_s9 + $0xd98] sm:$0xff] }
 0x5e1   :  { %1985 = vmatpush.msra.mxu2 %v1924_v8  ;;  %v1769_v8 = vld [vmem:[%s7943_s9 + $0xd90] sm:$0xff] }
 0x5e3   :  { %1986 = vmatpush.msra.mxu2 %v1923_v9  ;;  %v1768_v9 = vld [vmem:[%s7943_s9 + $0xd88] sm:$0xff] }
 0x5e5   :  { %1987 = vmatpush.msra.mxu2 %v1922_v10  ;;  %v1767_v10 = vld [vmem:[%s7943_s9 + $0xd80] sm:$0xff] }
 0x5e7   :  { %1988 = vmatpush.msra.mxu2 %v1921_v11  ;;  %v1943_v11 = vld [vmem:[%s7943_s9 + $0xf78] sm:$0xff] }
 0x5e9   :  { %1989 = vmatpush.msra.mxu2 %v1920_v12  ;;  %v1942_v12 = vld [vmem:[%s7943_s9 + $0xf70] sm:$0xff] }
 0x5eb   :  { %1990 = vmatpush.msra.mxu2 %v1919_v13  ;;  %v1941_v13 = vld [vmem:[%s7943_s9 + $0xf68] sm:$0xff] }
 0x5ed   :  { %1991 = vmatpush.msra.mxu2 %v1918_v14  ;;  %v1940_v14 = vld [vmem:[%s7943_s9 + $0xf60] sm:$0xff] }
 0x5ef   :  { %1992 = vmatpush.msra.mxu2 %v1917_v15  ;;  %v1939_v15 = vld [vmem:[%s7943_s9 + $0xf58] sm:$0xff] }
 0x5f1   :  { %1993 = vmatpush.msra.mxu2 %v1916_v18  ;;  %v1938_v18 = vld [vmem:[%s7943_s9 + $0xf50] sm:$0xff] }
 0x5f3   :  { %1994 = vmatpush.msra.mxu2 %v1915_v19  ;;  %v1937_v19 = vld [vmem:[%s7943_s9 + $0xf48] sm:$0xff] }
 0x5f5   :  { %1995 = vmatpush.msra.mxu2 %v1914_v20  ;;  %v1936_v20 = vld [vmem:[%s7943_s9 + $0xf40] sm:$0xff] }
 0x5f7   :  { %1996 = vmatpush.msra.mxu2 %v1913_v21  ;;  %v1935_v21 = vld [vmem:[%s7943_s9 + $0xf38] sm:$0xff] }
 0x5f9   :  { %1997 = vmatpush.msra.mxu2 %v1912_v22  ;;  %v1934_v22 = vld [vmem:[%s7943_s9 + $0xf30] sm:$0xff] }
 0x5fa   :  { %1998 = vmatmul.f32.vlgmr.msra.gmra.mxu2 %v6415_v47 }
 0x5fb   :  { %2139 = vmatpush.msrb.mxu2 %v2088_v23  ;;  %v1933_v23 = vld [vmem:[%s7943_s9 + $0xf28] sm:$0xff] }
 0x5fd   :  { %2140 = vmatpush.msrb.mxu2 %v2087_v24  ;;  %v1932_v24 = vld [vmem:[%s7943_s9 + $0xf20] sm:$0xff] }
 0x5ff   :  { %2141 = vmatpush.msrb.mxu2 %v2086_v25  ;;  %v1931_v25 = vld [vmem:[%s7943_s9 + $0xf18] sm:$0xff] }
 0x601   :  { %2142 = vmatpush.msrb.mxu2 %v2085_v26  ;;  %v1930_v26 = vld [vmem:[%s7943_s9 + $0xf10] sm:$0xff] }
 0x603   :  { %2143 = vmatpush.msrb.mxu2 %v2084_v27  ;;  %v1929_v27 = vld [vmem:[%s7943_s9 + $0xf08] sm:$0xff] }
 0x605   :  { %2144 = vmatpush.msrb.mxu2 %v2083_v28  ;;  %v1928_v28 = vld [vmem:[%s7943_s9 + $0xf00] sm:$0xff] }
 0x607   :  { %2145 = vmatpush.msrb.mxu2 %v2082_v29  ;;  %v2104_v29 = vld [vmem:[%s7943_s9 + $0x10f8] sm:$0xff] }
 0x609   :  { %2146 = vmatpush.msrb.mxu2 %v2081_v30  ;;  %v2103_v30 = vld [vmem:[%s7943_s9 + $0x10f0] sm:$0xff] }
 0x60b   :  { %2147 = vmatpush.msrb.mxu2 %v2080_v31  ;;  %v2102_v31 = vld [vmem:[%s7943_s9 + $0x10e8] sm:$0xff] }
 0x60d   :  { %2148 = vmatpush.msrb.mxu2 %v2079_v37  ;;  %v2101_v37 = vld [vmem:[%s7943_s9 + $0x10e0] sm:$0xff] }
 0x60f   :  { %2149 = vmatpush.msrb.mxu2 %v2078_v39  ;;  %v2100_v39 = vld [vmem:[%s7943_s9 + $0x10d8] sm:$0xff] }
 0x611   :  { %2150 = vmatpush.msrb.mxu2 %v2077_v38  ;;  %v2099_v38 = vld [vmem:[%s7943_s9 + $0x10d0] sm:$0xff] }
 0x613   :  { %2151 = vmatpush.msrb.mxu2 %v2076_v43  ;;  %v2098_v43 = vld [vmem:[%s7943_s9 + $0x10c8] sm:$0xff] }
 0x615   :  { %2152 = vmatpush.msrb.mxu2 %v2075_v44  ;;  %v2097_v44 = vld [vmem:[%s7943_s9 + $0x10c0] sm:$0xff] }
 0x617   :  { %2153 = vmatpush.msrb.mxu2 %v2074_v45  ;;  %v2096_v45 = vld [vmem:[%s7943_s9 + $0x10b8] sm:$0xff] }
 0x619   :  { %2154 = vmatpush.msrb.mxu2 %v2073_v48  ;;  %v2095_v48 = vld [vmem:[%s7943_s9 + $0x10b0] sm:$0xff] }
 0x61a   :  { %2155 = vmatmul.f32.vlgmr.msrb.gmra.mxu2 %v6413_v46  ;;  %v1781_v46 = vld [vmem:[%s7943_s9 + $0xdf0] sm:$0xff] }
 0x61d   :  { %v6827_v49 = vpop.f32.mrf.mxu2 }
 0x625   :  { %v6829_v32 = vpop.f32.mrf.mxu2 }
 0x63d   :  { %v1685_v54 = vpop.f32.mrf.mxu2 }
 0x63e   :  { %v1686_v55 = vadd.f32 %v1685_v54, %v1666_v53  ;;  %v2090_v53 = vld [vmem:[%s7943_s9 + $0x1088] sm:$0xff]  ;;  %v2089_v54 = vld [vmem:[%s7943_s9 + $0x1080] sm:$0xff] }
 0x640   :  { %1709 = vmatpush.msra.mxu3 %v1686_v55 }
 0x641   :  { %5528 = vmatmul.msk.f32.vlgmr.msra.gmra.mxu3 %vm477_vm2, %v1606_v56 }
 0x642   :  { %1845 = vmatpush.msrb.mxu3 %v1782_v57  ;;  %v1822_v57 = vpop.f32.mrf.mxu1 }
 0x644   :  { %1846 = vmatpush.msrb.mxu3 %v1781_v46  ;;  %v1802_v46 = vpop.f32.mrf.mxu0 }
 0x646   :  { %1847 = vmatpush.msrb.mxu3 %v1780_v58 }
 0x648   :  { %1848 = vmatpush.msrb.mxu3 %v1779_v60  ;;  %v1823_v60 = vadd.f32 %v1822_v57, %v1802_v46  ;;  %v1960_v57 = vld [vmem:[%s7944_s13 + $0x70] sm:$0xff]  ;;  %v2136_v46 = vld [vmem:[%s7943_s9 + $0x11f8] sm:$0xff] }
 0x649   :  { %5529 = vmatmul.msk.f32.gmra.mxu3 %vm477_vm2, %v1607_v62 }
 0x64a   :  { %1849 = vmatpush.msrb.mxu3 %v1778_v63 }
 0x64c   :  { %1850 = vmatpush.msrb.mxu3 %v1777_v0 }
 0x64e   :  { %1851 = vmatpush.msrb.mxu3 %v1776_v1  ;;  %v1783_v1 = vld [vmem:[%s7944_s13 + $0x60] sm:$0xff] }
 0x650   :  { %1852 = vmatpush.msrb.mxu3 %v1775_v2  ;;  %v1959_v2 = vld [vmem:[%s7943_s9 + $0xff8] sm:$0xff] }
 0x652   :  { %1853 = vmatpush.msrb.mxu3 %v1774_v3  ;;  %v1957_v3 = vld [vmem:[%s7943_s9 + $0xfe8] sm:$0xff] }
 0x654   :  { %1854 = vmatpush.msrb.mxu3 %v1773_v4  ;;  %v1956_v4 = vld [vmem:[%s7943_s9 + $0xfe0] sm:$0xff] }
 0x656   :  { %1855 = vmatpush.msrb.mxu3 %v1772_v5  ;;  %v1784_v5 = vld [vmem:[%s7944_s13 + $0x68] sm:$0xff] }
 0x658   :  { %1856 = vmatpush.msrb.mxu3 %v1771_v6  ;;  %v1955_v6 = vld [vmem:[%s7943_s9 + $0xfd8] sm:$0xff] }
 0x65a   :  { %1857 = vmatpush.msrb.mxu3 %v1770_v7  ;;  %v1954_v7 = vld [vmem:[%s7943_s9 + $0xfd0] sm:$0xff] }
 0x65c   :  { %1858 = vmatpush.msrb.mxu3 %v1769_v8  ;;  %v1953_v8 = vld [vmem:[%s7943_s9 + $0xfc8] sm:$0xff] }
 0x65d   :  { %v1842_v58 = vpop.f32.mrf.mxu2 }
 0x65e   :  { %1859 = vmatpush.msrb.mxu3 %v1768_v9  ;;  %v1843_v62 = vadd.f32 %v1842_v58, %v1823_v60  ;;  %v1952_v9 = vld [vmem:[%s7943_s9 + $0xfc0] sm:$0xff]  ;;  %v2134_v58 = vld [vmem:[%s7943_s9 + $0x11e8] sm:$0xff] }
 0x65f   :  { %v2133_v60 = vld [vmem:[%s7943_s9 + $0x11e0] sm:$0xff] }
 0x660   :  { %1860 = vmatpush.msrb.mxu3 %v1767_v10  ;;  %v1951_v10 = vld [vmem:[%s7943_s9 + $0xfb8] sm:$0xff] }
 0x661   :  { %1861 = vmatmul.f32.vlgmr.msrb.gmra.mxu3 %v6401_v35 }
 0x662   :  { %2002 = vmatpush.msra.mxu3 %v1943_v11  ;;  %v1950_v11 = vld [vmem:[%s7943_s9 + $0xfb0] sm:$0xff] }
 0x664   :  { %2003 = vmatpush.msra.mxu3 %v1942_v12  ;;  %v1949_v12 = vld [vmem:[%s7943_s9 + $0xfa8] sm:$0xff] }
 0x666   :  { %2004 = vmatpush.msra.mxu3 %v1941_v13  ;;  %v1948_v13 = vld [vmem:[%s7943_s9 + $0xfa0] sm:$0xff] }
 0x668   :  { %2005 = vmatpush.msra.mxu3 %v1940_v14  ;;  %v1947_v14 = vld [vmem:[%s7943_s9 + $0xf98] sm:$0xff] }
 0x66a   :  { %2006 = vmatpush.msra.mxu3 %v1939_v15  ;;  %v1946_v15 = vld [vmem:[%s7943_s9 + $0xf90] sm:$0xff] }
 0x66c   :  { %2007 = vmatpush.msra.mxu3 %v1938_v18  ;;  %v1945_v18 = vld [vmem:[%s7943_s9 + $0xf88] sm:$0xff] }
 0x66e   :  { %2008 = vmatpush.msra.mxu3 %v1937_v19  ;;  %v1944_v19 = vld [vmem:[%s7943_s9 + $0xf80] sm:$0xff] }
 0x670   :  { %2009 = vmatpush.msra.mxu3 %v1936_v20  ;;  %v2120_v20 = vld [vmem:[%s7943_s9 + $0x1178] sm:$0xff] }
 0x672   :  { %2010 = vmatpush.msra.mxu3 %v1935_v21  ;;  %v2119_v21 = vld [vmem:[%s7943_s9 + $0x1170] sm:$0xff] }
 0x674   :  { %2011 = vmatpush.msra.mxu3 %v1934_v22  ;;  %v2118_v22 = vld [vmem:[%s7943_s9 + $0x1168] sm:$0xff] }
 0x676   :  { %2012 = vmatpush.msra.mxu3 %v1933_v23  ;;  %v2117_v23 = vld [vmem:[%s7943_s9 + $0x1160] sm:$0xff] }
 0x678   :  { %2013 = vmatpush.msra.mxu3 %v1932_v24  ;;  %v2116_v24 = vld [vmem:[%s7943_s9 + $0x1158] sm:$0xff] }
 0x67a   :  { %2014 = vmatpush.msra.mxu3 %v1931_v25  ;;  %v2115_v25 = vld [vmem:[%s7943_s9 + $0x1150] sm:$0xff] }
 0x67c   :  { %2015 = vmatpush.msra.mxu3 %v1930_v26  ;;  %v2114_v26 = vld [vmem:[%s7943_s9 + $0x1148] sm:$0xff] }
 0x67e   :  { %2016 = vmatpush.msra.mxu3 %v1929_v27  ;;  %v2113_v27 = vld [vmem:[%s7943_s9 + $0x1140] sm:$0xff] }
 0x680   :  { %2017 = vmatpush.msra.mxu3 %v1928_v28  ;;  %v2112_v28 = vld [vmem:[%s7943_s9 + $0x1138] sm:$0xff] }
 0x681   :  { %2018 = vmatmul.f32.vlgmr.msra.gmra.mxu3 %v6399_v33 }
 0x682   :  { %2159 = vmatpush.msrb.mxu3 %v2104_v29  ;;  %v2111_v29 = vld [vmem:[%s7943_s9 + $0x1130] sm:$0xff] }
 0x684   :  { %2160 = vmatpush.msrb.mxu3 %v2103_v30  ;;  %v2110_v30 = vld [vmem:[%s7943_s9 + $0x1128] sm:$0xff] }
 0x686   :  { %2161 = vmatpush.msrb.mxu3 %v2102_v31  ;;  %v2109_v31 = vld [vmem:[%s7943_s9 + $0x1120] sm:$0xff] }
 0x688   :  { %2162 = vmatpush.msrb.mxu3 %v2101_v37  ;;  %v2108_v37 = vld [vmem:[%s7943_s9 + $0x1118] sm:$0xff] }
 0x68a   :  { %2163 = vmatpush.msrb.mxu3 %v2100_v39  ;;  %v2107_v39 = vld [vmem:[%s7943_s9 + $0x1110] sm:$0xff] }
 0x68c   :  { %2164 = vmatpush.msrb.mxu3 %v2099_v38  ;;  %v2106_v38 = vld [vmem:[%s7943_s9 + $0x1108] sm:$0xff] }
 0x68e   :  { %2165 = vmatpush.msrb.mxu3 %v2098_v43  ;;  %v2105_v43 = vld [vmem:[%s7943_s9 + $0x1100] sm:$0xff] }
 0x690   :  { %2166 = vmatpush.msrb.mxu3 %v2097_v44 }
 0x692   :  { %2167 = vmatpush.msrb.mxu3 %v2096_v45 }
 0x694   :  { %2168 = vmatpush.msrb.mxu3 %v2095_v48  ;;  %v1999_v48 = vpop.f32.mrf.mxu2 }
 0x696   :  { %2169 = vmatpush.msrb.mxu3 %v2094_v34  ;;  %v1979_v34 = vpop.f32.mrf.mxu1 }
 0x698   :  { %2170 = vmatpush.msrb.mxu3 %v2093_v50 }
 0x69a   :  { %2171 = vmatpush.msrb.mxu3 %v2092_v51  ;;  %v2000_v51 = vadd.f32 %v1999_v48, %v1979_v34 }
 0x69c   :  { %2172 = vmatpush.msrb.mxu3 %v2091_v52 }
 0x69e   :  { %2173 = vmatpush.msrb.mxu3 %v2090_v53 }
 0x6a0   :  { %2174 = vmatpush.msrb.mxu3 %v2089_v54 }
 0x6a1   :  { %2175 = vmatmul.f32.vlgmr.msrb.gmra.mxu3 %v6415_v47  ;;  %v1958_v47 = vld [vmem:[%s7943_s9 + $0xff0] sm:$0xff] }
 0x6c4   :  { %v6886_v55 = vpop.f32.mrf.mxu3 }
 0x6cc   :  { %v6888_v56 = vpop.f32.mrf.mxu3 }
 0x6e4   :  { %v1862_v63 = vpop.f32.mrf.mxu3 }
 0x6e5   :  { %v1863_v0 = vadd.f32 %v1862_v63, %v1843_v62  ;;  %v1961_v62 = vld [vmem:[%s7944_s13 + $0x78] sm:$0xff] }
 0x6e6   :  { %v2132_v63 = vld [vmem:[%s7943_s9 + $0x11d8] sm:$0xff] }
 0x6e7   :  { %1886 = vmatpush.msra.mxu0 %v1863_v0  ;;  %v2131_v0 = vld [vmem:[%s7943_s9 + $0x11d0] sm:$0xff] }
 0x6e8   :  { %5530 = vmatmul.msk.f32.vlgmr.msra.gmra.mxu0 %vm477_vm2, %v1783_v1  ;;  %v2130_v1 = vld [vmem:[%s7943_s9 + $0x11c8] sm:$0xff] }
 0x6e9   :  { %2022 = vmatpush.msrb.mxu0 %v1959_v2  ;;  %v2129_v2 = vld [vmem:[%s7943_s9 + $0x11c0] sm:$0xff] }
 0x6eb   :  { %2023 = vmatpush.msrb.mxu0 %v1958_v47  ;;  %v2128_v47 = vld [vmem:[%s7943_s9 + $0x11b8] sm:$0xff] }
 0x6ed   :  { %2024 = vmatpush.msrb.mxu0 %v1957_v3  ;;  %v2127_v3 = vld [vmem:[%s7943_s9 + $0x11b0] sm:$0xff] }
 0x6ef   :  { %2025 = vmatpush.msrb.mxu0 %v1956_v4  ;;  %v2126_v4 = vld [vmem:[%s7943_s9 + $0x11a8] sm:$0xff] }
 0x6f0   :  { %5531 = vmatmul.msk.f32.gmra.mxu0 %vm477_vm2, %v1784_v5  ;;  %v2125_v5 = vld [vmem:[%s7943_s9 + $0x11a0] sm:$0xff] }
 0x6f1   :  { %2026 = vmatpush.msrb.mxu0 %v1955_v6  ;;  %v2124_v6 = vld [vmem:[%s7943_s9 + $0x1198] sm:$0xff] }
 0x6f3   :  { %2027 = vmatpush.msrb.mxu0 %v1954_v7  ;;  %v2123_v7 = vld [vmem:[%s7943_s9 + $0x1190] sm:$0xff] }
 0x6f5   :  { %2028 = vmatpush.msrb.mxu0 %v1953_v8  ;;  %v2122_v8 = vld [vmem:[%s7943_s9 + $0x1188] sm:$0xff] }
 0x6f7   :  { %2029 = vmatpush.msrb.mxu0 %v1952_v9  ;;  %v2121_v9 = vld [vmem:[%s7943_s9 + $0x1180] sm:$0xff] }
 0x6f9   :  { %2030 = vmatpush.msrb.mxu0 %v1951_v10  ;;  %v2251_v10 = vld [vmem:[%s5954_s24 + $0x8] sm:$0xff]  ;;  %s7948_s24 = sld [smem:[#allocation13_spill]] }
 0x6fa   :  { %2282 = vperm.xlu2 %5767, %v2251_v10  }
 0x6fb   :  { %2031 = vmatpush.msrb.mxu0 %v1950_v11  ;;  %v2253_v11 = vld [vmem:[%s7945_s17] sm:$0x3] }
 0x6fd   :  { %2032 = vmatpush.msrb.mxu0 %v1949_v12  ;;  %v3100_v12 = vld [vmem:[%s5999_s30] sm:$0xff]  ;;  %s7951_s30 = sld [smem:[#allocation14_spill]] }
 0x6ff   :  { %2033 = vmatpush.msrb.mxu0 %v1948_v13  ;;  %v3106_v13 = vld [vmem:[%s6019_s26] sm:$0xff]  ;;  %v2269_v48 = vld [vmem:[%s7948_s24 + $0x58] sm:$0xff]  ;;  %v2268_v34 = vld [vmem:[%s7948_s24 + $0x50] sm:$0xff]  ;;  %s7954_s26 = sld [smem:[#allocation19_spill]] }
 0x701   :  { %2034 = vmatpush.msrb.mxu0 %v1947_v14  ;;  %v4090_v14 = vld [vmem:[%s6044_s2 + $0x8] sm:$0xff]  ;;  %s7955_s2 = sld [smem:[#allocation17_spill]] }
 0x702   :  { %2312 = vperm.xlu2 %5767, %v2253_v11  }
 0x703   :  { %2035 = vmatpush.msrb.mxu0 %v1946_v15 }
 0x704   :  { %v2019_v50 = vpop.f32.mrf.mxu3 }
 0x705   :  { %2036 = vmatpush.msrb.mxu0 %v1945_v18  ;;  %v2020_v52 = vadd.f32 %v2019_v50, %v2000_v51  ;;  %v4094_v18 = vld [vmem:[%s7946_s29] sm:$0xf]  ;;  %v2267_v50 = vld [vmem:[%s7948_s24 + $0x48] sm:$0xff] }
 0x706   :  { %v2266_v51 = vld [vmem:[%s7948_s24 + $0x40] sm:$0xff] }
 0x707   :  { %2037 = vmatpush.msrb.mxu0 %v1944_v19 }
 0x708   :  { %2038 = vmatmul.f32.vlgmr.msrb.gmra.mxu0 %v6401_v35 }
 0x709   :  { %2179 = vmatpush.msra.mxu0 %v2120_v20  ;;  %v4101_v20 = vld [vmem:[%s6064_s19 + $0x10] sm:$0xff]  ;;  %s7950_s19 = sld [smem:[#allocation12_spill]] }
 0x70a   :  { %3127 = vperm.xlu2 %5767, %v3100_v12  }
 0x70b   :  { %2180 = vmatpush.msra.mxu0 %v2119_v21  ;;  %v2156_v21 = vpop.f32.mrf.mxu2 }
 0x70d   :  { %2181 = vmatpush.msra.mxu0 %v2118_v22 }
 0x70f   :  { %2182 = vmatpush.msra.mxu0 %v2117_v23  ;;  %v2254_v12 = vld [vmem:[%s7950_s19] sm:$0xff] }
 0x711   :  { %2183 = vmatpush.msra.mxu0 %v2116_v24 }
 0x712   :  { %3191 = vperm.xlu2 %5767, %v3106_v13   ;;  %v2255_v13 = vld [vmem:[%s7950_s19 + $0x8] sm:$0xff] }
 0x713   :  { %2184 = vmatpush.msra.mxu0 %v2115_v25 }
 0x715   :  { %2185 = vmatpush.msra.mxu0 %v2114_v26 }
 0x717   :  { %2186 = vmatpush.msra.mxu0 %v2113_v27  ;;  %v2137_v27 = vld [vmem:[%s7944_s13 + $0x80] sm:$0xff] }
 0x719   :  { %2187 = vmatpush.msra.mxu0 %v2112_v28  ;;  %v5140_v28 = vld [vmem:[%s6089_s6 + $0x8] sm:$0xff]  ;;  %s7952_s6 = sld [smem:[#allocation16_spill]] }
 0x71a   :  { %4115 = vperm.xlu2 %5767, %v4090_v14   ;;  %v2274_v14 = vld [vmem:[%s7951_s30] sm:$0x3] }
 0x71b   :  { %2188 = vmatpush.msra.mxu0 %v2111_v29  ;;  %v2138_v29 = vld [vmem:[%s7944_s13 + $0x88] sm:$0xff] }
 0x71d   :  { %2189 = vmatpush.msra.mxu0 %v2110_v30  ;;  %v5144_v30 = vld [vmem:[%s7947_s3] sm:$0xf] }
 0x71f   :  { %2190 = vmatpush.msra.mxu0 %v2109_v31  ;;  %v5151_v31 = vld [vmem:[%s6109_s25 + $0x10] sm:$0xff]  ;;  %s7949_s25 = sld [smem:[#allocation10_spill]] }
 0x721   :  { %2191 = vmatpush.msra.mxu0 %v2108_v37  ;;  %v2273_v37 = vld [vmem:[%s7948_s24 + $0x78] sm:$0xff] }
 0x722   :  { %4176 = vperm.xlu2 %5767, %v4094_v18   ;;  %2287 = vmatpush.msra.mxu3 %v2273_v37 }
 0x723   :  { %2192 = vmatpush.msra.mxu0 %v2107_v39  ;;  %v2272_v39 = vld [vmem:[%s7948_s24 + $0x70] sm:$0xff] }
 0x724   :  { %2288 = vmatpush.msra.mxu3 %v2272_v39  ;;  %v2508_v39 = vld [vmem:[%s7952_s6 + $0xd8] sm:$0xff] }
 0x725   :  { %2193 = vmatpush.msra.mxu0 %v2106_v38  ;;  %v2271_v38 = vld [vmem:[%s7948_s24 + $0x68] sm:$0xff] }
 0x726   :  { %2289 = vmatpush.msra.mxu3 %v2271_v38  ;;  %v2468_v38 = vld [vmem:[%s7952_s6 + $0x60] sm:$0xff] }
 0x727   :  { %2194 = vmatpush.msra.mxu0 %v2105_v43  ;;  %v2270_v43 = vld [vmem:[%s7948_s24 + $0x60] sm:$0xff] }
 0x728   :  { %2195 = vmatmul.f32.vlgmr.msra.gmra.mxu0 %v6399_v33  ;;  %v2135_v33 = vld [vmem:[%s7943_s9 + $0x11f0] sm:$0xff]  ;;  %2290 = vmatpush.msra.mxu3 %v2270_v43 }
 0x729   :  { %v2507_v43 = vld [vmem:[%s7952_s6 + $0xd0] sm:$0xff] }
 0x72a   :  { %4215 = vperm.xlu2 %5767, %v4101_v20   ;;  %2291 = vmatpush.msra.mxu3 %v2269_v48  ;;  %v2512_v20 = vld [vmem:[%s7952_s6 + $0xf8] sm:$0xff] }
 0x72b   :  { %v2467_v48 = vld [vmem:[%s7952_s6 + $0x58] sm:$0xff] }
 0x72c   :  { %2292 = vmatpush.msra.mxu3 %v2268_v34  ;;  %v2506_v34 = vld [vmem:[%s7952_s6 + $0xc8] sm:$0xff] }
 0x72e   :  { %2293 = vmatpush.msra.mxu3 %v2267_v50  ;;  %v2466_v50 = vld [vmem:[%s7952_s6 + $0x50] sm:$0xff] }
 0x730   :  { %2294 = vmatpush.msra.mxu3 %v2266_v51 }
 0x732   :  { %5165 = vperm.xlu2 %5767, %v5140_v28  }
 0x73a   :  { %5225 = vperm.xlu2 %5767, %v5144_v30   ;;  %v2509_v30 = vld [vmem:[%s7952_s6 + $0xe0] sm:$0xff] }
 0x742   :  { %5264 = vperm.xlu2 %5767, %v5151_v31   ;;  %v2469_v31 = vld [vmem:[%s7952_s6 + $0x68] sm:$0xff] }
 0x765   :  { %v6928_v44 = vpop.f32.mrf.mxu0 }
 0x76d   :  { %v6930_v45 = vpop.f32.mrf.mxu0 }
 0x785   :  { %v2039_v53 = vpop.f32.mrf.mxu0 }
 0x786   :  { %v2040_v54 = vadd.f32 %v2039_v53, %v2020_v52  ;;  %v2265_v52 = vld [vmem:[%s7948_s24 + $0x38] sm:$0xff]  ;;  %v2264_v53 = vld [vmem:[%s7948_s24 + $0x30] sm:$0xff] }
 0x787   :  { %2295 = vmatpush.msra.mxu3 %v2265_v52  ;;  %v2505_v52 = vld [vmem:[%s7952_s6 + $0xc0] sm:$0xff] }
 0x788   :  { %2063 = vmatpush.msrb.mxu1 %v2040_v54  ;;  %v2263_v54 = vld [vmem:[%s7948_s24 + $0x28] sm:$0xff] }
 0x789   :  { %5532 = vmatmul.msk.f32.vlgmr.msrb.gmra.mxu1 %vm477_vm2, %v1960_v57  ;;  %2296 = vmatpush.msra.mxu3 %v2264_v53  ;;  %v2262_v57 = vld [vmem:[%s7948_s24 + $0x20] sm:$0xff]  ;;  %v2465_v53 = vld [vmem:[%s7952_s6 + $0x48] sm:$0xff] }
 0x78a   :  { %2199 = vmatpush.msra.mxu1 %v2136_v46  ;;  %v2261_v46 = vld [vmem:[%s7948_s24 + $0x18] sm:$0xff] }
 0x78b   :  { %2297 = vmatpush.msra.mxu3 %v2263_v54 }
 0x78c   :  { %2200 = vmatpush.msra.mxu1 %v2135_v33  ;;  %v2260_v33 = vld [vmem:[%s7948_s24 + $0x10] sm:$0xff] }
 0x78d   :  { %2298 = vmatpush.msra.mxu3 %v2262_v57 }
 0x78e   :  { %2201 = vmatpush.msra.mxu1 %v2134_v58  ;;  %v2259_v58 = vld [vmem:[%s7948_s24 + $0x8] sm:$0xff] }
 0x78f   :  { %2299 = vmatpush.msra.mxu3 %v2261_v46 }
 0x790   :  { %2202 = vmatpush.msra.mxu1 %v2133_v60  ;;  %v2258_v60 = vld [vmem:[%s7948_s24] sm:$0xff] }
 0x791   :  { %5533 = vmatmul.msk.f32.gmra.mxu1 %vm477_vm2, %v1961_v62  ;;  %2300 = vmatpush.msra.mxu3 %v2260_v33  ;;  %v1006_v62 = vadd.f32 %v6597_v41, %v6595_v40  ;;  %v2504_v33 = vld [vmem:[%s7952_s6 + $0xb8] sm:$0xff] }
 0x792   :  { %2203 = vmatpush.msra.mxu1 %v2132_v63 }
 0x793   :  { %2301 = vmatpush.msra.mxu3 %v2259_v58  ;;  %v1186_v63 = vadd.f32 %v6675_v59, %v1006_v62  ;;  %v2464_v58 = vld [vmem:[%s7952_s6 + $0x40] sm:$0xff]  ;;  %v2503_v62 = vld [vmem:[%s7952_s6 + $0xb0] sm:$0xff] }
 0x794   :  { %2204 = vmatpush.msra.mxu1 %v2131_v0 }
 0x795   :  { %2302 = vmatpush.msra.mxu3 %v2258_v60  ;;  %v1363_v0 = vadd.f32 %v6751_v16, %v1186_v63  ;;  %v2278_v16 = vpop.permute.xlu1 %2277  ;;  %v2463_v63 = vld [vmem:[%s7952_s6 + $0x38] sm:$0xff] }
 0x796   :  { %2205 = vmatpush.msra.mxu1 %v2130_v1 }
 0x797   :  { %v1540_v1 = vadd.f32 %v6827_v49, %v1363_v0 }
 0x798   :  { %2206 = vmatpush.msra.mxu1 %v2129_v2  ;;  %v1009_v2 = vadd.f32 %v6601_v36, %v6599_v42 }
 0x79a   :  { %2207 = vmatpush.msra.mxu1 %v2128_v47  ;;  %v1717_v47 = vadd.f32 %v6886_v55, %v1540_v1  ;;  %v2283_v55 = vpop.permute.xlu2 %2282 }
 0x79c   :  { %2208 = vmatpush.msra.mxu1 %v2127_v3  ;;  %v1187_v3 = vadd.f32 %v6677_v61, %v1009_v2 }
 0x79e   :  { %2209 = vmatpush.msra.mxu1 %v2126_v4  ;;  %v1894_v4 = vadd.f32 %v6928_v44, %v1717_v47  ;;  %v2502_v47 = vld [vmem:[%s7952_s6 + $0xa8] sm:$0xff] }
 0x7a0   :  { %2210 = vmatpush.msra.mxu1 %v2125_v5  ;;  %v1364_v5 = vadd.f32 %v6753_v17, %v1187_v3  ;;  %v2462_v3 = vld [vmem:[%s7952_s6 + $0x30] sm:$0xff] }
 0x7a2   :  { %2211 = vmatpush.msra.mxu1 %v2124_v6  ;;  %v1541_v41 = vadd.f32 %v6829_v32, %v1364_v5  ;;  %v2501_v5 = vld [vmem:[%s7952_s6 + $0xa0] sm:$0xff] }
 0x7a4   :  { %2212 = vmatpush.msra.mxu1 %v2123_v7  ;;  %v1718_v49 = vadd.f32 %v6888_v56, %v1541_v41 }
 0x7a5   :  { %v2196_v22 = vpop.f32.mrf.mxu0 }
 0x7a6   :  { %2213 = vmatpush.msra.mxu1 %v2122_v8  ;;  %v1895_v42 = vadd.f32 %v6930_v45, %v1718_v49  ;;  %v2252_v8 = vld [vmem:[%s7949_s25] sm:$0x3]  ;;  %v2313_v45 = vpop.permute.xlu2 %2312  ;;  %v2500_v49 = vld [vmem:[%s7952_s6 + $0x98] sm:$0xff] }
 0x7a8   :  { %2214 = vmatpush.msra.mxu1 %v2121_v9 }
 0x7a9   :  { %2215 = vmatmul.f32.vlgmr.msra.gmra.mxu1 %v6401_v35  ;;  %v2176_v35 = vpop.f32.mrf.mxu3 }
 0x7aa   :  { %v2177_v23 = vadd.f32 %v2176_v35, %v2156_v21  ;;  %v2511_v21 = vld [vmem:[%s7952_s6 + $0xf0] sm:$0xff] }
 0x7ac   :  { %v2197_v24 = vadd.f32 %v2196_v22, %v2177_v23  ;;  %v2348_v22 = vpop.permute.xlu1 %2347 }
 0x806   :  { %v6958_v15 = vpop.f32.mrf.mxu1 }
 0x807   :  { %v2071_v6 = vadd.f32 %v6958_v15, %v1894_v4  ;;  %v2343_v15 = vpop.permute.xlu0 %2342 }
 0x80e   :  { %v6961_v19 = vpop.f32.mrf.mxu1 }
 0x80f   :  { %v2072_v36 = vadd.f32 %v6961_v19, %v1895_v42  ;;  %v2460_v42 = vld [vmem:[%s7952_s6 + $0x20] sm:$0xff] }
 0x826   :  { %v2216_v25 = vpop.f32.mrf.mxu1 }
 0x827   :  { %v2217_v26 = vadd.f32 %v2216_v25, %v2197_v24  ;;  %v2510_v25 = vld [vmem:[%s7952_s6 + $0xe8] sm:$0xff] }
 0x829   :  { %2240 = vmatpush.msra.mxu2 %v2217_v26  ;;  %v2471_v26 = vld [vmem:[%s7952_s6 + $0x78] sm:$0xff] }
 0x82a   :  { %5534 = vmatmul.msk.f32.vlgmr.msra.gmra.mxu2 %vm477_vm2, %v2137_v27  ;;  %v2470_v27 = vld [vmem:[%s7952_s6 + $0x70] sm:$0xff] }
 0x82b   :  { %2474 = vmatpush.msrb.mxu2 %v2471_v26  ;;  %v2675_v26 = vld [vmem:[%s7952_s6 + $0x1b8] sm:$0xff] }
 0x82d   :  { %2475 = vmatpush.msrb.mxu2 %v2470_v27  ;;  %v2674_v27 = vld [vmem:[%s7952_s6 + $0x1b0] sm:$0xff] }
 0x82f   :  { %2476 = vmatpush.msrb.mxu2 %v2469_v31  ;;  %v2670_v31 = vld [vmem:[%s7952_s6 + $0x190] sm:$0xff] }
 0x831   :  { %2477 = vmatpush.msrb.mxu2 %v2468_v38 }
 0x832   :  { %5535 = vmatmul.msk.f32.gmra.mxu2 %vm477_vm2, %v2138_v29 }
 0x833   :  { %2478 = vmatpush.msrb.mxu2 %v2467_v48 }
 0x835   :  { %2479 = vmatpush.msrb.mxu2 %v2466_v50 }
 0x837   :  { %2480 = vmatpush.msrb.mxu2 %v2465_v53 }
 0x839   :  { %2481 = vmatpush.msrb.mxu2 %v2464_v58  ;;  %v2608_v58 = vld [vmem:[%s7952_s6 + $0x160] sm:$0xff] }
 0x83b   :  { %2482 = vmatpush.msrb.mxu2 %v2463_v63  ;;  %v2607_v63 = vld [vmem:[%s7952_s6 + $0x158] sm:$0xff] }
 0x83d   :  { %2483 = vmatpush.msrb.mxu2 %v2462_v3  ;;  %v2473_v3 = vld [vmem:[%s7953_s20 + $0x8] sm:$0xff] }
 0x8ad   :  { %v2242_v40 = vpop.f32.mrf.mxu2 }
 0x8ae   :  { %v2248_v59 = vadd.f32 %v2242_v40, %v2071_v6  ;;  %v2461_v6 = vld [vmem:[%s7952_s6 + $0x28] sm:$0xff] }
 0x8af   :  { %2484 = vmatpush.msrb.mxu2 %v2461_v6  ;;  %v2602_v6 = vld [vmem:[%s7952_s6 + $0x130] sm:$0xff] }
 0x8b0   :  { %v7001_v7 = vadd.f32 %v2278_v16, %v2248_v59 }
 0x8b1   :  { %2485 = vmatpush.msrb.mxu2 %v2460_v42  ;;  %v2596_v42 = vld [vmem:[%s7952_s6 + $0x100] sm:$0xff] }
 0x8b2   :  { %2303 = vmatmul.f32.vlgmr.msra.gmra.mxu3 %v7001_v7 }
 0x8b5   :  { %v2245_v61 = vpop.f32.mrf.mxu2 }
 0x8b6   :  { %v2249_v17 = vadd.f32 %v2245_v61, %v2072_v36 }
 0x8b8   :  { %v7006_v44 = vadd.f32 %v2283_v55, %v2249_v17  ;;  %v2499_v17 = vld [vmem:[%s7952_s6 + $0x90] sm:$0xff]  ;;  %v2459_v55 = vld [vmem:[%s7952_s6 + $0x18] sm:$0xff] }
 0x8b9   :  { %2486 = vmatpush.msrb.mxu2 %v2459_v55  ;;  %v2824_v55 = vld [vmem:[%s7952_s6 + $0x2e0] sm:$0xff] }
 0x8ba   :  { %2306 = vmatmul.f32.gmra.mxu3 %v7006_v44 }
 0x935   :  { %v2304_v32 = vpop.f32.mrf.mxu3 }
 0x93d   :  { %v2307_v56 = vpop.f32.mrf.mxu3 }
 0x93e   :  { %2333 = vmatpush.msrb.mxu0 %v2307_v56 }
 0x940   :  { %2334 = vmatpush.msrb.mxu0 %v2304_v32 }
 0x941   :  { %5536 = vmatmul.msk.f32.vlgmr.msrb.gmra.mxu0 %vm2315_vm11, %v2252_v8 }
 0x9be   :  { %v2336_v9 = vpop.f32.mrf.mxu0 }
 0x9bf   :  { %v2337_v10 = vadd.f32 %v2336_v9, %v2313_v45  ;;  %v2498_v45 = vld [vmem:[%s7952_s6 + $0x88] sm:$0xff] }
 0x9c1   :  { %v2339_v11 = vmax.f32 %v2337_v10, 0.0  ;;  %v2497_v10 = vld [vmem:[%s7952_s6 + $0x80] sm:$0xff] }
 0x9c3   :  { %5537 = vmatpush.msk.msrb.mxu1 %vm564_vm5, %v2339_v11 }
 0x9c4   :  { %5538 = vmatmul.msk.f32.vlgmr.msrb.gmra.mxu1 %vm560_vm9, %v2254_v12 }
 0x9c5   :  { %5542 = vmatpush.msk.msra.mxu1 %vm564_vm5, %v2274_v14 }
 0x9c7   :  { %2515 = vmatpush.msrb.mxu1 %v2512_v20  ;;  %v2458_v20 = vld [vmem:[%s7952_s6 + $0x10] sm:$0xff] }
 0x9c8   :  { %2487 = vmatpush.msrb.mxu2 %v2458_v20  ;;  %v2685_v20 = vld [vmem:[%s7953_s20 + $0x38] sm:$0xff] }
 0x9c9   :  { %2516 = vmatpush.msrb.mxu1 %v2511_v21  ;;  %v2678_v21 = vld [vmem:[%s7952_s6 + $0x1d0] sm:$0xff] }
 0x9cb   :  { %2517 = vmatpush.msrb.mxu1 %v2510_v25  ;;  %v2676_v25 = vld [vmem:[%s7952_s6 + $0x1c0] sm:$0xff] }
 0x9cc   :  { %5539 = vmatmul.msk.f32.gmra.mxu1 %vm560_vm9, %v2255_v13  ;;  %v2683_v13 = vld [vmem:[%s7952_s6 + $0x1f8] sm:$0xff] }
 0x9cd   :  { %2518 = vmatpush.msrb.mxu1 %v2509_v30  ;;  %v2671_v30 = vld [vmem:[%s7952_s6 + $0x198] sm:$0xff] }
 0x9cf   :  { %2519 = vmatpush.msrb.mxu1 %v2508_v39  ;;  %v2668_v39 = vld [vmem:[%s7952_s6 + $0x180] sm:$0xff] }
 0x9d1   :  { %2520 = vmatpush.msrb.mxu1 %v2507_v43 }
 0x9d3   :  { %2521 = vmatpush.msrb.mxu1 %v2506_v34 }
 0x9d5   :  { %2522 = vmatpush.msrb.mxu1 %v2505_v52 }
 0x9d7   :  { %2523 = vmatpush.msrb.mxu1 %v2504_v33 }
 0x9d9   :  { %2524 = vmatpush.msrb.mxu1 %v2503_v62 }
 0x9db   :  { %2525 = vmatpush.msrb.mxu1 %v2502_v47  ;;  %v2604_v47 = vld [vmem:[%s7952_s6 + $0x140] sm:$0xff] }
 0x9dd   :  { %2526 = vmatpush.msrb.mxu1 %v2501_v5  ;;  %v2603_v5 = vld [vmem:[%s7952_s6 + $0x138] sm:$0xff] }
 0x9df   :  { %2527 = vmatpush.msrb.mxu1 %v2500_v49  ;;  %v2597_v49 = vld [vmem:[%s7952_s6 + $0x108] sm:$0xff] }
 0x9e1   :  { %2528 = vmatpush.msrb.mxu1 %v2499_v17  ;;  %v2825_v17 = vld [vmem:[%s7952_s6 + $0x2e8] sm:$0xff] }
 0x9e3   :  { %2529 = vmatpush.msrb.mxu1 %v2498_v45  ;;  %v2820_v45 = vld [vmem:[%s7952_s6 + $0x2c0] sm:$0xff] }
 0x9e5   :  { %2530 = vmatpush.msrb.mxu1 %v2497_v10  ;;  %v2818_v10 = vld [vmem:[%s7952_s6 + $0x2b0] sm:$0xff] }
 0xa41   :  { %v2376_v18 = vpop.f32.mrf.mxu1 }
 0xa42   :  { %v2377_v19 = vadd.f32 %v2376_v18, %v2343_v15  ;;  %v2682_v15 = vld [vmem:[%s7952_s6 + $0x1f0] sm:$0xff]  ;;  %v2681_v18 = vld [vmem:[%s7952_s6 + $0x1e8] sm:$0xff] }
 0xa44   :  { %v5540_v35 = vmul.f32 -1.442695, %v2377_v19  ;;  %v2680_v19 = vld [vmem:[%s7952_s6 + $0x1e0] sm:$0xff] }
 0xa46   :  { %5772 = vpow2.f32 %v5540_v35  ;;  %v2679_v35 = vld [vmem:[%s7952_s6 + $0x1d8] sm:$0xff] }
 0xa49   :  { %v2379_v23 = vpop.f32.mrf.mxu1 }
 0xa4a   :  { %v2380_v24 = vadd.f32 %v2379_v23, %v2348_v22  ;;  %v2457_v22 = vld [vmem:[%s7952_s6 + $0x8] sm:$0xff] }
 0xa4b   :  { %v2677_v23 = vld [vmem:[%s7952_s6 + $0x1c8] sm:$0xff]  ;;  %2488 = vmatpush.msrb.mxu2 %v2457_v22 }
 0xa4c   :  { %v5773_v28 = vpop.eup %5772  ;;  %v5541_v29 = vmul.f32 -1.442695, %v2380_v24  ;;  %v2456_v24 = vld [vmem:[%s7952_s6] sm:$0xff] }
 0xa4d   :  { %v2388_v37 = vadd.f32 1.0, %v5773_v28  ;;  %2489 = vmatpush.msrb.mxu2 %v2456_v24  ;;  %v2673_v28 = vld [vmem:[%s7952_s6 + $0x1a8] sm:$0xff]  ;;  %v2612_v24 = vld [vmem:[%s7953_s20 + $0x20] sm:$0xff] }
 0xa4e   :  { %5774 = vpow2.f32 %v5541_v29  ;;  %v2672_v29 = vld [vmem:[%s7952_s6 + $0x1a0] sm:$0xff] }
 0xa4f   :  { %5776 = vrcp.f32 %v2388_v37  ;;  %v2401_v0 = vand.u32 2147483648, %v2388_v37  ;;  %v2399_v2 = vand.u32 2147483647, %v2388_v37  ;;  %vm2395_vm13 = vweird.f32 %v2388_v37 }
 0xa51   :  { %v2402_v41 = vor.u32 1.1754944e-38, %v2401_v0  ;;  %vm2400_vm15 = vcmp.eq.f32.partialorder %v2399_v2, 8.507059e+37  ;;  %v2514_v0 = vld [vmem:[%s7953_s20 + $0x18] sm:$0xff]  ;;  %v2605_v2 = vld [vmem:[%s7952_s6 + $0x148] sm:$0xff] }
 0xa54   :  { %v5775_v51 = vpop.eup %5774 }
 0xa55   :  { %v5777_v54 = vpop.eup %5776  ;;  %v2389_v57 = vadd.f32 1.0, %v5775_v51 }
 0xa56   :  { %v2391_v46 = vmul.f32 %v5777_v54, %v2388_v37  ;;  %vm2396_vm12 = vweird.f32 %v5777_v54  ;;  %v2669_v37 = vld [vmem:[%s7952_s6 + $0x188] sm:$0xff] }
 0xa57   :  { %5778 = vrcp.f32 %v2389_v57  ;;  %vm2397_vm14 = vmor %vm2395_vm13, %vm2396_vm12  ;;  %v2416_v32 = vand.u32 2147483648, %v2389_v57  ;;  %v2414_v8 = vand.u32 2147483647, %v2389_v57  ;;  %vm2410_vm1 = vweird.f32 %v2389_v57 }
 0xa58   :  { %v2392_v60 = vsub.f32 1.0, %v2391_v46  ;;  %v2609_v46 = vld [vmem:[%s7952_s6 + $0x168] sm:$0xff] }
 0xa59   :  { %v2417_v11 = vor.u32 1.1754944e-38, %v2416_v32  ;;  %vm2415_vm3 = vcmp.eq.f32.partialorder %v2414_v8, 8.507059e+37  ;;  %v2823_v32 = vld [vmem:[%s7952_s6 + $0x2d8] sm:$0xff]  ;;  %v2821_v8 = vld [vmem:[%s7952_s6 + $0x2c8] sm:$0xff] }
 0xa5a   :  { %v2393_v1 = vmul.f32 %v5777_v54, %v2392_v60  ;;  %v2472_v60 = vld [vmem:[%s7953_s20] sm:$0xff] }
 0xa5c   :  { %v2394_v4 = vadd.f32 %v5777_v54, %v2393_v1  ;;  %v2606_v1 = vld [vmem:[%s7952_s6 + $0x150] sm:$0xff] }
 0xa5d   :  { %v5779_v40 = vpop.eup %5778 }
 0xa5e   :  { %v2398_v59 = vsel %vm2397_vm14, %v5777_v54, %v2394_v4  ;;  %v2406_v16 = vmul.f32 %v5779_v40, %v2389_v57  ;;  %vm2411_vm0 = vweird.f32 %v5779_v40  ;;  %v2611_v54 = vld [vmem:[%s7952_s6 + $0x178] sm:$0xff]  ;;  %v2513_v57 = vld [vmem:[%s7953_s20 + $0x10] sm:$0xff] }
 0xa5f   :  { %v2403_v36 = vsel %vm2400_vm15, %v2402_v41, %v2398_v59  ;;  %vm2412_vm2 = vmor %vm2410_vm1, %vm2411_vm0  ;;  %v2600_v41 = vld [vmem:[%s7952_s6 + $0x120] sm:$0xff]  ;;  %v2599_v59 = vld [vmem:[%s7952_s6 + $0x118] sm:$0xff]  ;;  %vm4236_vm15 = vcmask 1043456   ;;  %vm4223_vm0 = vcmask 31744  }
 0xa60   :  { %5543 = vmatmul.msk.f32.vlgmr.msra.gmra.mxu1 %vm560_vm9, %v2403_v36  ;;  %v2407_v61 = vsub.f32 1.0, %v2406_v16  ;;  %v2598_v16 = vld [vmem:[%s7952_s6 + $0x110] sm:$0xff]  ;;  %v2827_v36 = vld [vmem:[%s7952_s6 + $0x2f8] sm:$0xff] }
 0xa61   :  { %2686 = vmatpush.msra.mxu1 %v2683_v13  ;;  %v2815_v13 = vld [vmem:[%s7952_s6 + $0x298] sm:$0xff] }
 0xa62   :  { %v2408_v56 = vmul.f32 %v5779_v40, %v2407_v61  ;;  %v2826_v61 = vld [vmem:[%s7952_s6 + $0x2f0] sm:$0xff] }
 0xa63   :  { %2687 = vmatpush.msra.mxu1 %v2682_v15  ;;  %v2813_v15 = vld [vmem:[%s7952_s6 + $0x288] sm:$0xff] }
 0xa64   :  { %v2409_v9 = vadd.f32 %v5779_v40, %v2408_v56  ;;  %v2822_v56 = vld [vmem:[%s7952_s6 + $0x2d0] sm:$0xff] }
 0xa65   :  { %2688 = vmatpush.msra.mxu1 %v2681_v18  ;;  %v2812_v18 = vld [vmem:[%s7952_s6 + $0x280] sm:$0xff] }
 0xa66   :  { %v2413_v12 = vsel %vm2412_vm2, %v5779_v40, %v2409_v9  ;;  %v2601_v40 = vld [vmem:[%s7952_s6 + $0x128] sm:$0xff]  ;;  %v2819_v9 = vld [vmem:[%s7952_s6 + $0x2b8] sm:$0xff] }
 0xa67   :  { %v2418_v14 = vsel %vm2415_vm3, %v2417_v11, %v2413_v12  ;;  %2689 = vmatpush.msra.mxu1 %v2680_v19  ;;  %v2817_v11 = vld [vmem:[%s7952_s6 + $0x2a8] sm:$0xff]  ;;  %v2816_v12 = vld [vmem:[%s7952_s6 + $0x2a0] sm:$0xff] }
 0xa68   :  { %5544 = vmatmul.msk.f32.gmra.mxu1 %vm560_vm9, %v2418_v14  ;;  %v2814_v14 = vld [vmem:[%s7952_s6 + $0x290] sm:$0xff] }
 0xa69   :  { %2690 = vmatpush.msra.mxu1 %v2679_v35  ;;  %v2684_v35 = vld [vmem:[%s7953_s20 + $0x30] sm:$0xff] }
 0xa6b   :  { %2691 = vmatpush.msra.mxu1 %v2678_v21 }
 0xa6d   :  { %2692 = vmatpush.msra.mxu1 %v2677_v23 }
 0xa6f   :  { %2693 = vmatpush.msra.mxu1 %v2676_v25  ;;  %v2755_v25 = vld [vmem:[%s7952_s6 + $0x278] sm:$0xff] }
 0xa71   :  { %2694 = vmatpush.msra.mxu1 %v2675_v26  ;;  %v2754_v26 = vld [vmem:[%s7952_s6 + $0x270] sm:$0xff] }
 0xa73   :  { %2695 = vmatpush.msra.mxu1 %v2674_v27  ;;  %v2753_v27 = vld [vmem:[%s7952_s6 + $0x268] sm:$0xff] }
 0xa75   :  { %2696 = vmatpush.msra.mxu1 %v2673_v28  ;;  %v2752_v28 = vld [vmem:[%s7952_s6 + $0x260] sm:$0xff] }
 0xa77   :  { %2697 = vmatpush.msra.mxu1 %v2672_v29  ;;  %v2613_v29 = vld [vmem:[%s7953_s20 + $0x28] sm:$0xff] }
 0xa79   :  { %2698 = vmatpush.msra.mxu1 %v2671_v30  ;;  %v2751_v30 = vld [vmem:[%s7952_s6 + $0x258] sm:$0xff] }
 0xa7b   :  { %2699 = vmatpush.msra.mxu1 %v2670_v31  ;;  %v2750_v31 = vld [vmem:[%s7952_s6 + $0x250] sm:$0xff] }
 0xa7d   :  { %2700 = vmatpush.msra.mxu1 %v2669_v37  ;;  %v2749_v37 = vld [vmem:[%s7952_s6 + $0x248] sm:$0xff] }
 0xa7f   :  { %2701 = vmatpush.msra.mxu1 %v2668_v39  ;;  %v2748_v39 = vld [vmem:[%s7952_s6 + $0x240] sm:$0xff] }
 0xadd   :  { %v2446_v38 = vpop.f32.mrf.mxu1 }
 0xade   :  { %v2452_v43 = vmul.f32 %v2446_v38, %v7001_v7  ;;  %v2747_v38 = vld [vmem:[%s7952_s6 + $0x238] sm:$0xff] }
 0xae0   :  { %v7069_v48 = vmax.f32 %v2452_v43, 0.0  ;;  %v2746_v43 = vld [vmem:[%s7952_s6 + $0x230] sm:$0xff] }
 0xae2   :  { %2490 = vmatmul.f32.vlgmr.msrb.gmra.mxu2 %v7069_v48  ;;  %2531 = vmatmul.f32.vlgmr.msrb.gmra.mxu1 %v7069_v48 }
 0xae5   :  { %v2449_v34 = vpop.f32.mrf.mxu1 }
 0xae6   :  { %v2453_v50 = vmul.f32 %v2449_v34, %v7006_v44  ;;  %v2610_v44 = vld [vmem:[%s7952_s6 + $0x170] sm:$0xff]  ;;  %v2745_v34 = vld [vmem:[%s7952_s6 + $0x228] sm:$0xff] }
 0xae8   :  { %v7074_v51 = vmax.f32 %v2453_v50, 0.0 }
 0xaea   :  { %2493 = vmatmul.f32.gmra.mxu2 %v7074_v51  ;;  %2534 = vmatmul.f32.gmra.mxu1 %v7074_v51 }
 0xaf2   :  { %2702 = vmatmul.f32.vlgmr.msra.gmra.mxu1 %v7069_v48 }
 0xafa   :  { %2705 = vmatmul.f32.gmra.mxu1 %v7074_v51 }
 0xb5f   :  { %v2532_v7 = vpop.f32.mrf.mxu1 }
 0xb65   :  { %v2491_v52 = vpop.f32.mrf.mxu2 }
 0xb67   :  { %v2535_v53 = vpop.f32.mrf.mxu1 }
 0xb68   :  { %2558 = vmatpush.msra.mxu0 %v2535_v53  ;;  %v2742_v53 = vld [vmem:[%s7952_s6 + $0x210] sm:$0xff] }
 0xb6a   :  { %2559 = vmatpush.msra.mxu0 %v2532_v7  ;;  %v2744_v7 = vld [vmem:[%s7952_s6 + $0x220] sm:$0xff] }
 0xb6b   :  { %5545 = vmatmul.msk.f32.vlgmr.msra.gmra.mxu0 %vm2315_vm11, %v2513_v57 }
 0xb6c   :  { %2614 = vmatpush.msrb.mxu0 %v2611_v54  ;;  %v2741_v54 = vld [vmem:[%s7952_s6 + $0x208] sm:$0xff] }
 0xb6d   :  { %v2494_v33 = vpop.f32.mrf.mxu2 }
 0xb6e   :  { %2615 = vmatpush.msrb.mxu0 %v2610_v44  ;;  %2587 = vmatpush.msrb.mxu3 %v2494_v33  ;;  %v2740_v44 = vld [vmem:[%s7952_s6 + $0x200] sm:$0xff]  ;;  %v2828_v33 = vld [vmem:[%s7953_s20 + $0x50] sm:$0xff] }
 0xb6f   :  { %v2703_v62 = vpop.f32.mrf.mxu1 }
 0xb70   :  { %2616 = vmatpush.msrb.mxu0 %v2609_v46  ;;  %2588 = vmatpush.msrb.mxu3 %v2491_v52  ;;  %v2743_v52 = vld [vmem:[%s7952_s6 + $0x218] sm:$0xff] }
 0xb71   :  { %5547 = vmatmul.msk.f32.vlgmr.msrb.gmra.mxu3 %vm2315_vm11, %v2472_v60  ;;  %v2971_v46 = vld [vmem:[%s7952_s6 + $0x3f8] sm:$0xff]  ;;  %v2969_v60 = vld [vmem:[%s7952_s6 + $0x3e8] sm:$0xff] }
 0xb72   :  { %2617 = vmatpush.msrb.mxu0 %v2608_v58  ;;  %v2970_v58 = vld [vmem:[%s7952_s6 + $0x3f0] sm:$0xff] }
 0xb73   :  { %5546 = vmatmul.msk.f32.gmra.mxu0 %vm2315_vm11, %v2514_v0  ;;  %v2829_v0 = vld [vmem:[%s7953_s20 + $0x58] sm:$0xff] }
 0xb74   :  { %2618 = vmatpush.msrb.mxu0 %v2607_v63  ;;  %v2967_v63 = vld [vmem:[%s7952_s6 + $0x3d8] sm:$0xff] }
 0xb76   :  { %2619 = vmatpush.msrb.mxu0 %v2606_v1  ;;  %v2966_v1 = vld [vmem:[%s7952_s6 + $0x3d0] sm:$0xff] }
 0xb77   :  { %v2706_v4 = vpop.f32.mrf.mxu1 }
 0xb78   :  { %2620 = vmatpush.msrb.mxu0 %v2605_v2  ;;  %2729 = vmatpush.msra.mxu3 %v2706_v4  ;;  %v2965_v2 = vld [vmem:[%s7952_s6 + $0x3c8] sm:$0xff]  ;;  %v2962_v4 = vld [vmem:[%s7952_s6 + $0x3b0] sm:$0xff] }
 0xb79   :  { %5548 = vmatmul.msk.f32.gmra.mxu3 %vm2315_vm11, %v2473_v3  ;;  %v2963_v3 = vld [vmem:[%s7952_s6 + $0x3b8] sm:$0xff] }
 0xb7a   :  { %2621 = vmatpush.msrb.mxu0 %v2604_v47  ;;  %2730 = vmatpush.msra.mxu3 %v2703_v62  ;;  %v2968_v62 = vld [vmem:[%s7952_s6 + $0x3e0] sm:$0xff] }
 0xb7b   :  { %v2964_v47 = vld [vmem:[%s7952_s6 + $0x3c0] sm:$0xff] }
 0xb7c   :  { %2622 = vmatpush.msrb.mxu0 %v2603_v5  ;;  %v2961_v5 = vld [vmem:[%s7952_s6 + $0x3a8] sm:$0xff] }
 0xb7e   :  { %2623 = vmatpush.msrb.mxu0 %v2602_v6  ;;  %v2960_v6 = vld [vmem:[%s7952_s6 + $0x3a0] sm:$0xff] }
 0xb80   :  { %2624 = vmatpush.msrb.mxu0 %v2601_v40  ;;  %v2959_v40 = vld [vmem:[%s7952_s6 + $0x398] sm:$0xff] }
 0xb81   :  { %5551 = vmatmul.msk.f32.vlgmr.msra.gmra.mxu3 %vm2315_vm11, %v2684_v35  ;;  %v2890_v35 = vld [vmem:[%s7952_s6 + $0x330] sm:$0xff] }
 0xb82   :  { %2625 = vmatpush.msrb.mxu0 %v2600_v41  ;;  %v2958_v41 = vld [vmem:[%s7952_s6 + $0x390] sm:$0xff] }
 0xb84   :  { %2626 = vmatpush.msrb.mxu0 %v2599_v59  ;;  %v2957_v59 = vld [vmem:[%s7952_s6 + $0x388] sm:$0xff] }
 0xb86   :  { %2627 = vmatpush.msrb.mxu0 %v2598_v16  ;;  %v2956_v16 = vld [vmem:[%s7952_s6 + $0x380] sm:$0xff] }
 0xb88   :  { %2628 = vmatpush.msrb.mxu0 %v2597_v49 }
 0xb89   :  { %5552 = vmatmul.msk.f32.gmra.mxu3 %vm2315_vm11, %v2685_v20  ;;  %v2889_v20 = vld [vmem:[%s7952_s6 + $0x328] sm:$0xff] }
 0xb8a   :  { %2629 = vmatpush.msrb.mxu0 %v2596_v42 }
 0xb8b   :  { %2630 = vmatmul.f32.vlgmr.msrb.gmra.mxu0 %v7069_v48 }
 0xb8c   :  { %2830 = vmatpush.msra.mxu0 %v2827_v36 }
 0xb8e   :  { %2831 = vmatpush.msra.mxu0 %v2826_v61 }
 0xb90   :  { %2832 = vmatpush.msra.mxu0 %v2825_v17 }
 0xb92   :  { %2833 = vmatpush.msra.mxu0 %v2824_v55  ;;  %v2756_v55 = vld [vmem:[%s7953_s20 + $0x40] sm:$0xff] }
 0xb93   :  { %2633 = vmatmul.f32.gmra.mxu0 %v7074_v51 }
 0xb94   :  { %2834 = vmatpush.msra.mxu0 %v2823_v32  ;;  %v2899_v32 = vld [vmem:[%s7952_s6 + $0x378] sm:$0xff] }
 0xb96   :  { %2835 = vmatpush.msra.mxu0 %v2822_v56  ;;  %v2898_v56 = vld [vmem:[%s7952_s6 + $0x370] sm:$0xff] }
 0xb98   :  { %2836 = vmatpush.msra.mxu0 %v2821_v8  ;;  %v2897_v8 = vld [vmem:[%s7952_s6 + $0x368] sm:$0xff] }
 0xb9a   :  { %2837 = vmatpush.msra.mxu0 %v2820_v45 }
 0xb9c   :  { %2838 = vmatpush.msra.mxu0 %v2819_v9  ;;  %v2896_v9 = vld [vmem:[%s7952_s6 + $0x360] sm:$0xff] }
 0xb9e   :  { %2839 = vmatpush.msra.mxu0 %v2818_v10  ;;  %v2757_v10 = vld [vmem:[%s7953_s20 + $0x48] sm:$0xff] }
 0xba0   :  { %2840 = vmatpush.msra.mxu0 %v2817_v11  ;;  %v2895_v11 = vld [vmem:[%s7952_s6 + $0x358] sm:$0xff] }
 0xba2   :  { %2841 = vmatpush.msra.mxu0 %v2816_v12  ;;  %v2894_v12 = vld [vmem:[%s7952_s6 + $0x350] sm:$0xff] }
 0xba4   :  { %2842 = vmatpush.msra.mxu0 %v2815_v13  ;;  %v2893_v13 = vld [vmem:[%s7952_s6 + $0x348] sm:$0xff] }
 0xba6   :  { %2843 = vmatpush.msra.mxu0 %v2814_v14  ;;  %v2892_v14 = vld [vmem:[%s7952_s6 + $0x340] sm:$0xff] }
 0xba8   :  { %2844 = vmatpush.msra.mxu0 %v2813_v15 }
 0xbaa   :  { %2845 = vmatpush.msra.mxu0 %v2812_v18  ;;  %v2891_v18 = vld [vmem:[%s7952_s6 + $0x338] sm:$0xff] }
 0xbab   :  { %2846 = vmatmul.f32.vlgmr.msra.gmra.mxu0 %v7069_v48 }
 0xbb3   :  { %2849 = vmatmul.f32.gmra.mxu0 %v7074_v51 }
 0xbe8   :  { %v7124_v19 = vpop.f32.mrf.mxu0 }
 0xbf0   :  { %v7129_v21 = vpop.f32.mrf.mxu0 }
 0xc08   :  { %v2631_v22 = vpop.f32.mrf.mxu0 }
 0xc10   :  { %v2634_v23 = vpop.f32.mrf.mxu0 }
 0xc11   :  { %2657 = vmatpush.msra.mxu2 %v2634_v23 }
 0xc13   :  { %2658 = vmatpush.msra.mxu2 %v2631_v22  ;;  %v2888_v22 = vld [vmem:[%s7952_s6 + $0x320] sm:$0xff] }
 0xc14   :  { %5549 = vmatmul.msk.f32.vlgmr.msra.gmra.mxu2 %vm2315_vm11, %v2612_v24  ;;  %v2887_v24 = vld [vmem:[%s7952_s6 + $0x318] sm:$0xff] }
 0xc15   :  { %2758 = vmatpush.msrb.mxu2 %v2755_v25  ;;  %v2886_v25 = vld [vmem:[%s7952_s6 + $0x310] sm:$0xff] }
 0xc17   :  { %2759 = vmatpush.msrb.mxu2 %v2754_v26  ;;  %v2885_v26 = vld [vmem:[%s7952_s6 + $0x308] sm:$0xff] }
 0xc19   :  { %2760 = vmatpush.msrb.mxu2 %v2753_v27  ;;  %v2884_v27 = vld [vmem:[%s7952_s6 + $0x300] sm:$0xff] }
 0xc1b   :  { %2761 = vmatpush.msrb.mxu2 %v2752_v28  ;;  %v7206_v28 = vpop.f32.mrf.mxu3 }
 0xc1c   :  { %5550 = vmatmul.msk.f32.gmra.mxu2 %vm2315_vm11, %v2613_v29 }
 0xc1d   :  { %2762 = vmatpush.msrb.mxu2 %v2751_v30 }
 0xc1f   :  { %2763 = vmatpush.msrb.mxu2 %v2750_v31 }
 0xc21   :  { %2764 = vmatpush.msrb.mxu2 %v2749_v37 }
 0xc23   :  { %2765 = vmatpush.msrb.mxu2 %v2748_v39  ;;  %v7208_v29 = vpop.f32.mrf.mxu3  ;;  %v2972_v39 = vld [vmem:[%s7953_s20 + $0x70] sm:$0xff] }
 0xc25   :  { %2766 = vmatpush.msrb.mxu2 %v2747_v38 }
 0xc27   :  { %2767 = vmatpush.msrb.mxu2 %v2746_v43  ;;  %v2973_v43 = vld [vmem:[%s7953_s20 + $0x78] sm:$0xff] }
 0xc28   :  { %v2847_v50 = vpop.f32.mrf.mxu0 }
 0xc29   :  { %2768 = vmatpush.msrb.mxu2 %v2745_v34 }
 0xc2b   :  { %2769 = vmatpush.msrb.mxu2 %v2744_v7  ;;  %v7210_v30 = vpop.f32.mrf.mxu3  ;;  %v2900_v7 = vld [vmem:[%s7953_s20 + $0x60] sm:$0xff] }
 0xc2d   :  { %2770 = vmatpush.msrb.mxu2 %v2743_v52  ;;  %v3043_v52 = vld [vmem:[%s7952_s6 + $0x478] sm:$0xff] }
 0xc2f   :  { %2771 = vmatpush.msrb.mxu2 %v2742_v53  ;;  %v3042_v53 = vld [vmem:[%s7952_s6 + $0x470] sm:$0xff] }
 0xc30   :  { %v2850_v57 = vpop.f32.mrf.mxu0 }
 0xc31   :  { %2772 = vmatpush.msrb.mxu2 %v2741_v54  ;;  %2873 = vmatpush.msrb.mxu1 %v2850_v57  ;;  %v3041_v54 = vld [vmem:[%s7952_s6 + $0x468] sm:$0xff]  ;;  %v3040_v57 = vld [vmem:[%s7952_s6 + $0x460] sm:$0xff] }
 0xc33   :  { %2773 = vmatpush.msrb.mxu2 %v2740_v44  ;;  %2874 = vmatpush.msrb.mxu1 %v2847_v50  ;;  %v7212_v31 = vpop.f32.mrf.mxu3  ;;  %v2901_v44 = vld [vmem:[%s7953_s20 + $0x68] sm:$0xff] }
 0xc34   :  { %2774 = vmatmul.f32.vlgmr.msrb.gmra.mxu2 %v7069_v48  ;;  %5555 = vmatmul.msk.f32.vlgmr.msrb.gmra.mxu1 %vm2315_vm11, %v2828_v33  ;;  %v3038_v33 = vld [vmem:[%s7952_s6 + $0x450] sm:$0xff] }
 0xc35   :  { %2974 = vmatpush.msra.mxu1 %v2971_v46  ;;  %v3039_v46 = vld [vmem:[%s7952_s6 + $0x458] sm:$0xff] }
 0xc37   :  { %2975 = vmatpush.msra.mxu1 %v2970_v58  ;;  %v3037_v58 = vld [vmem:[%s7952_s6 + $0x448] sm:$0xff] }
 0xc39   :  { %2976 = vmatpush.msra.mxu1 %v2969_v60  ;;  %v3036_v60 = vld [vmem:[%s7952_s6 + $0x440] sm:$0xff] }
 0xc3b   :  { %2977 = vmatpush.msra.mxu1 %v2968_v62  ;;  %v3035_v62 = vld [vmem:[%s7952_s6 + $0x438] sm:$0xff] }
 0xc3c   :  { %2777 = vmatmul.f32.gmra.mxu2 %v7074_v51  ;;  %5556 = vmatmul.msk.f32.gmra.mxu1 %vm2315_vm11, %v2829_v0  ;;  %v3033_v0 = vld [vmem:[%s7952_s6 + $0x428] sm:$0xff] }
 0xc3d   :  { %2978 = vmatpush.msra.mxu1 %v2967_v63  ;;  %v3034_v63 = vld [vmem:[%s7952_s6 + $0x430] sm:$0xff] }
 0xc3f   :  { %2979 = vmatpush.msra.mxu1 %v2966_v1  ;;  %v3032_v1 = vld [vmem:[%s7952_s6 + $0x420] sm:$0xff] }
 0xc41   :  { %2980 = vmatpush.msra.mxu1 %v2965_v2  ;;  %v3031_v2 = vld [vmem:[%s7952_s6 + $0x418] sm:$0xff] }
 0xc43   :  { %2981 = vmatpush.msra.mxu1 %v2964_v47  ;;  %v3030_v47 = vld [vmem:[%s7952_s6 + $0x410] sm:$0xff] }
 0xc45   :  { %2982 = vmatpush.msra.mxu1 %v2963_v3  ;;  %v3029_v3 = vld [vmem:[%s7952_s6 + $0x408] sm:$0xff] }
 0xc47   :  { %2983 = vmatpush.msra.mxu1 %v2962_v4  ;;  %v3028_v4 = vld [vmem:[%s7952_s6 + $0x400] sm:$0xff] }
 0xc49   :  { %2984 = vmatpush.msra.mxu1 %v2961_v5 }
 0xc4b   :  { %2985 = vmatpush.msra.mxu1 %v2960_v6  ;;  %v3123_v6 = vld [vmem:[%s7954_s26 + $0x78] sm:$0xff] }
 0xc4d   :  { %2986 = vmatpush.msra.mxu1 %v2959_v40  ;;  %v3122_v40 = vld [vmem:[%s7954_s26 + $0x70] sm:$0xff] }
 0xc4f   :  { %2987 = vmatpush.msra.mxu1 %v2958_v41  ;;  %v3121_v41 = vld [vmem:[%s7954_s26 + $0x68] sm:$0xff] }
 0xc51   :  { %2988 = vmatpush.msra.mxu1 %v2957_v59 }
 0xc53   :  { %2989 = vmatpush.msra.mxu1 %v2956_v16  ;;  %v3120_v16 = vld [vmem:[%s7954_s26 + $0x60] sm:$0xff] }
 0xc54   :  { %2990 = vmatmul.f32.vlgmr.msra.gmra.mxu1 %v7069_v48 }
 0xc5c   :  { %2993 = vmatmul.f32.gmra.mxu1 %v7074_v51 }
 0xc97   :  { %v7176_v49 = vpop.f32.mrf.mxu2 }
 0xc9f   :  { %v7178_v42 = vpop.f32.mrf.mxu2 }
 0xcb1   :  { %v7180_v61 = vpop.f32.mrf.mxu1 }
 0xcb7   :  { %v2775_v36 = vpop.f32.mrf.mxu2 }
 0xcb9   :  { %v7187_v45 = vpop.f32.mrf.mxu1 }
 0xcbf   :  { %v2778_v17 = vpop.f32.mrf.mxu2 }
 0xcc0   :  { %2801 = vmatpush.msrb.mxu3 %v2778_v17  ;;  %v3118_v17 = vld [vmem:[%s7954_s26 + $0x50] sm:$0xff] }
 0xcc2   :  { %2802 = vmatpush.msrb.mxu3 %v2775_v36  ;;  %v3119_v36 = vld [vmem:[%s7954_s26 + $0x58] sm:$0xff] }
 0xcc3   :  { %5553 = vmatmul.msk.f32.vlgmr.msrb.gmra.mxu3 %vm2315_vm11, %v2756_v55  ;;  %v3116_v55 = vld [vmem:[%s7954_s26 + $0x40] sm:$0xff] }
 0xcc4   :  { %2902 = vmatpush.msra.mxu3 %v2899_v32  ;;  %v3115_v32 = vld [vmem:[%s7954_s26 + $0x38] sm:$0xff] }
 0xcc6   :  { %2903 = vmatpush.msra.mxu3 %v2898_v56  ;;  %v3114_v56 = vld [vmem:[%s7954_s26 + $0x30] sm:$0xff] }
 0xcc8   :  { %2904 = vmatpush.msra.mxu3 %v2897_v8  ;;  %v3113_v8 = vld [vmem:[%s7954_s26 + $0x28] sm:$0xff] }
 0xcca   :  { %2905 = vmatpush.msra.mxu3 %v2896_v9 }
 0xccb   :  { %5554 = vmatmul.msk.f32.gmra.mxu3 %vm2315_vm11, %v2757_v10  ;;  %v3112_v10 = vld [vmem:[%s7954_s26 + $0x20] sm:$0xff] }
 0xccc   :  { %2906 = vmatpush.msra.mxu3 %v2895_v11  ;;  %v3044_v11 = vld [vmem:[%s7953_s20 + $0x80] sm:$0xff] }
 0xcce   :  { %2907 = vmatpush.msra.mxu3 %v2894_v12  ;;  %v3111_v12 = vld [vmem:[%s7954_s26 + $0x18] sm:$0xff] }
 0xcd0   :  { %2908 = vmatpush.msra.mxu3 %v2893_v13  ;;  %v3045_v13 = vld [vmem:[%s7953_s20 + $0x88] sm:$0xff] }
 0xcd1   :  { %v2991_v15 = vpop.f32.mrf.mxu1 }
 0xcd2   :  { %2909 = vmatpush.msra.mxu3 %v2892_v14  ;;  %v3110_v14 = vld [vmem:[%s7954_s26 + $0x10] sm:$0xff] }
 0xcd4   :  { %2910 = vmatpush.msra.mxu3 %v2891_v18  ;;  %v3108_v18 = vld [vmem:[%s7954_s26] sm:$0xff] }
 0xcd6   :  { %2911 = vmatpush.msra.mxu3 %v2890_v35  ;;  %v2591_v35 = vadd.f32 %v7206_v28, %v7124_v19 }
 0xcd8   :  { %2912 = vmatpush.msra.mxu3 %v2889_v20  ;;  %v2666_v20 = vadd.f32 %v7176_v49, %v2591_v35  ;;  %v3312_v35 = vld [vmem:[%s7958_s22 + $0x38] sm:$0xff] }
 0xcd9   :  { %v2994_v23 = vpop.f32.mrf.mxu1 }
 0xcda   :  { %3017 = vmatpush.msrb.mxu0 %v2994_v23  ;;  %2913 = vmatpush.msra.mxu3 %v2888_v22  ;;  %v2738_v22 = vadd.f32 %v7210_v30, %v2666_v20  ;;  %v2594_v23 = vadd.f32 %v7208_v29, %v7129_v21  ;;  %v3355_v20 = vld [vmem:[%s7958_s22 + $0xb8] sm:$0xff] }
 0xcdc   :  { %3018 = vmatpush.msrb.mxu0 %v2991_v15  ;;  %2914 = vmatpush.msra.mxu3 %v2887_v24  ;;  %v3109_v15 = vld [vmem:[%s7954_s26 + $0x8] sm:$0xff] }
 0xcdd   :  { %5559 = vmatmul.msk.f32.vlgmr.msrb.gmra.mxu0 %vm2315_vm11, %v2972_v39 }
 0xcde   :  { %2915 = vmatpush.msra.mxu3 %v2886_v25  ;;  %3137 = vmatpush.msra.mxu0 %v3123_v6  ;;  %v2667_v25 = vadd.f32 %v7178_v42, %v2594_v23  ;;  %v3362_v6 = vld [vmem:[%s7958_s22 + $0xf0] sm:$0xff] }
 0xcdf   :  { %v3311_v23 = vld [vmem:[%s7958_s22 + $0x30] sm:$0xff] }
 0xce0   :  { %2916 = vmatpush.msra.mxu3 %v2885_v26  ;;  %3138 = vmatpush.msra.mxu0 %v3122_v40  ;;  %v2739_v39 = vadd.f32 %v7212_v31, %v2667_v25 }
 0xce2   :  { %2917 = vmatpush.msra.mxu3 %v2884_v27  ;;  %3139 = vmatpush.msra.mxu0 %v3121_v41  ;;  %v3318_v41 = vld [vmem:[%s7958_s22 + $0x68] sm:$0xff] }
 0xce3   :  { %2918 = vmatmul.f32.vlgmr.msra.gmra.mxu3 %v7069_v48 }
 0xce4   :  { %3140 = vmatpush.msra.mxu0 %v3120_v16 }
 0xce5   :  { %5560 = vmatmul.msk.f32.gmra.mxu0 %vm2315_vm11, %v2973_v43 }
 0xce6   :  { %3141 = vmatpush.msra.mxu0 %v3119_v36 }
 0xce8   :  { %3142 = vmatpush.msra.mxu0 %v3118_v17  ;;  %v3317_v17 = vld [vmem:[%s7958_s22 + $0x60] sm:$0xff] }
 0xceb   :  { %2921 = vmatmul.f32.gmra.mxu3 %v7074_v51 }
 0xd46   :  { %v7214_v37 = vpop.f32.mrf.mxu3 }
 0xd47   :  { %v2810_v24 = vadd.f32 %v7214_v37, %v2738_v22 }
 0xd49   :  { %v2882_v26 = vadd.f32 %v7180_v61, %v2810_v24  ;;  %v3354_v24 = vld [vmem:[%s7958_s22 + $0xb0] sm:$0xff] }
 0xd4e   :  { %v7218_v38 = vpop.f32.mrf.mxu3 }
 0xd5a   :  { %v3020_v27 = vpop.f32.mrf.mxu0 }
 0xd62   :  { %v3023_v37 = vpop.f32.mrf.mxu0 }
 0xd66   :  { %v2919_v34 = vpop.f32.mrf.mxu3 }
 0xd6e   :  { %v2922_v50 = vpop.f32.mrf.mxu3 }
 0xd6f   :  { %2945 = vmatpush.msra.mxu2 %v2922_v50  ;;  %v3128_v50 = vpop.permute.xlu2 %3127 }
 0xd71   :  { %2946 = vmatpush.msra.mxu2 %v2919_v34  ;;  %v2811_v34 = vadd.f32 %v7218_v38, %v2739_v39  ;;  %v3310_v39 = vld [vmem:[%s7958_s22 + $0x28] sm:$0xff] }
 0xd72   :  { %5557 = vmatmul.msk.f32.vlgmr.msra.gmra.mxu2 %vm2315_vm11, %v2900_v7  ;;  %v3133_v7 = vpop.permute.xlu0 %3132 }
 0xd73   :  { %3046 = vmatpush.msrb.mxu2 %v3043_v52  ;;  %v2883_v49 = vadd.f32 %v7187_v45, %v2811_v34 }
 0xd75   :  { %3047 = vmatpush.msrb.mxu2 %v3042_v53  ;;  %v3102_v53 = vld [vmem:[%s7955_s2] sm:$0x3] }
 0xd77   :  { %3048 = vmatpush.msrb.mxu2 %v3041_v54  ;;  %v3163_v54 = vpop.permute.xlu1 %3162 }
 0xd79   :  { %3049 = vmatpush.msrb.mxu2 %v3040_v57 }
 0xd7a   :  { %5558 = vmatmul.msk.f32.gmra.mxu2 %vm2315_vm11, %v2901_v44 }
 0xd7b   :  { %3050 = vmatpush.msrb.mxu2 %v3039_v46 }
 0xd7d   :  { %3051 = vmatpush.msrb.mxu2 %v3038_v33  ;;  %v3104_v33 = vld [vmem:[%s7956_s11] sm:$0xff] }
 0xd7f   :  { %3052 = vmatpush.msrb.mxu2 %v3037_v58  ;;  %v3105_v58 = vld [vmem:[%s7956_s11 + $0x8] sm:$0xff] }
 0xd81   :  { %3053 = vmatpush.msrb.mxu2 %v3036_v60  ;;  %v3124_v60 = vld [vmem:[%s7957_s21] sm:$0x3] }
 0xd83   :  { %3054 = vmatpush.msrb.mxu2 %v3035_v62  ;;  %v3192_v62 = vpop.permute.xlu2 %3191 }
 0xd85   :  { %3055 = vmatpush.msrb.mxu2 %v3034_v63 }
 0xd87   :  { %3056 = vmatpush.msrb.mxu2 %v3033_v0 }
 0xd89   :  { %3057 = vmatpush.msrb.mxu2 %v3032_v1 }
 0xd8b   :  { %3058 = vmatpush.msrb.mxu2 %v3031_v2  ;;  %v3320_v2 = vld [vmem:[%s7958_s22 + $0x78] sm:$0xff] }
 0xd8d   :  { %3059 = vmatpush.msrb.mxu2 %v3030_v47  ;;  %v3363_v47 = vld [vmem:[%s7958_s22 + $0xf8] sm:$0xff] }
 0xd8f   :  { %3060 = vmatpush.msrb.mxu2 %v3029_v3  ;;  %v3319_v3 = vld [vmem:[%s7958_s22 + $0x70] sm:$0xff] }
 0xd91   :  { %3061 = vmatpush.msrb.mxu2 %v3028_v4  ;;  %v3197_v4 = vpop.permute.xlu0 %3196 }
 0xd92   :  { %3062 = vmatmul.f32.vlgmr.msrb.gmra.mxu2 %v7069_v48  ;;  %v3117_v48 = vld [vmem:[%s7954_s26 + $0x48] sm:$0xff] }
 0xd93   :  { %3143 = vmatpush.msra.mxu0 %v3117_v48  ;;  %3325 = vmatpush.msra.mxu2 %v3320_v2  ;;  %v3360_v48 = vld [vmem:[%s7958_s22 + $0xe0] sm:$0xff] }
 0xd95   :  { %3144 = vmatpush.msra.mxu0 %v3116_v55  ;;  %3326 = vmatpush.msra.mxu2 %v3319_v3  ;;  %v3316_v55 = vld [vmem:[%s7958_s22 + $0x58] sm:$0xff] }
 0xd97   :  { %3145 = vmatpush.msra.mxu0 %v3115_v32  ;;  %3327 = vmatpush.msra.mxu2 %v3318_v41  ;;  %v3359_v32 = vld [vmem:[%s7958_s22 + $0xd8] sm:$0xff]  ;;  %v3364_v41 = vld [vmem:[%s7959_s23 + $0x20] sm:$0xff] }
 0xd99   :  { %3146 = vmatpush.msra.mxu0 %v3114_v56  ;;  %3328 = vmatpush.msra.mxu2 %v3317_v17  ;;  %v3315_v56 = vld [vmem:[%s7958_s22 + $0x50] sm:$0xff] }
 0xd9a   :  { %3065 = vmatmul.f32.gmra.mxu2 %v7074_v51  ;;  %v3575_v17 = vld [vmem:[%s7958_s22 + $0x1f0] sm:$0xff] }
 0xd9b   :  { %3147 = vmatpush.msra.mxu0 %v3113_v8  ;;  %v3358_v8 = vld [vmem:[%s7958_s22 + $0xd0] sm:$0xff]  ;;  %3329 = vmatpush.msra.mxu2 %v3316_v55  ;;  %v3485_v55 = vld [vmem:[%s7958_s22 + $0x160] sm:$0xff] }
 0xd9d   :  { %3148 = vmatpush.msra.mxu0 %v3112_v10  ;;  %v3357_v10 = vld [vmem:[%s7958_s22 + $0xc8] sm:$0xff]  ;;  %3330 = vmatpush.msra.mxu2 %v3315_v56 }
 0xd9e   :  { %v3365_v56 = vld [vmem:[%s7959_s23 + $0x28] sm:$0xff] }
 0xd9f   :  { %3149 = vmatpush.msra.mxu0 %v3111_v12  ;;  %v3313_v12 = vld [vmem:[%s7958_s22 + $0x40] sm:$0xff] }
 0xda1   :  { %3150 = vmatpush.msra.mxu0 %v3110_v14 }
 0xda3   :  { %3151 = vmatpush.msra.mxu0 %v3109_v15 }
 0xda5   :  { %3152 = vmatpush.msra.mxu0 %v3108_v18 }
 0xdf5   :  { %v2948_v5 = vpop.f32.mrf.mxu2 }
 0xdf6   :  { %v2954_v43 = vadd.f32 %v2948_v5, %v2882_v26 }
 0xdf8   :  { %v3026_v19 = vadd.f32 %v3020_v27, %v2954_v43  ;;  %v3353_v43 = vld [vmem:[%s7958_s22 + $0xa8] sm:$0xff] }
 0xdfd   :  { %v2951_v59 = vpop.f32.mrf.mxu2 }
 0xdfe   :  { %v2955_v21 = vadd.f32 %v2951_v59, %v2883_v49  ;;  %v3361_v59 = vld [vmem:[%s7958_s22 + $0xe8] sm:$0xff] }
 0xe00   :  { %v3027_v42 = vadd.f32 %v3023_v37, %v2955_v21  ;;  %v3308_v37 = vld [vmem:[%s7958_s22 + $0x18] sm:$0xff] }
 0xe15   :  { %v3063_v51 = vpop.f32.mrf.mxu2 }
 0xe1d   :  { %v3066_v9 = vpop.f32.mrf.mxu2 }
 0xe1e   :  { %3089 = vmatpush.msrb.mxu3 %v3066_v9  ;;  %v3314_v9 = vld [vmem:[%s7958_s22 + $0x48] sm:$0xff] }
 0xe1f   :  { %3331 = vmatpush.msra.mxu2 %v3314_v9  ;;  %v3484_v9 = vld [vmem:[%s7958_s22 + $0x158] sm:$0xff] }
 0xe20   :  { %3090 = vmatpush.msrb.mxu3 %v3063_v51 }
 0xe21   :  { %5561 = vmatmul.msk.f32.vlgmr.msrb.gmra.mxu3 %vm2315_vm11, %v3044_v11  ;;  %3332 = vmatpush.msra.mxu2 %v3313_v12  ;;  %v3571_v12 = vld [vmem:[%s7958_s22 + $0x1d0] sm:$0xff] }
 0xe23   :  { %3333 = vmatpush.msra.mxu2 %v3312_v35  ;;  %v3366_v35 = vld [vmem:[%s7959_s23 + $0x30] sm:$0xff] }
 0xe25   :  { %3334 = vmatpush.msra.mxu2 %v3311_v23  ;;  %v3568_v23 = vld [vmem:[%s7958_s22 + $0x1b8] sm:$0xff] }
 0xe27   :  { %3335 = vmatpush.msra.mxu2 %v3310_v39  ;;  %v3477_v39 = vld [vmem:[%s7958_s22 + $0x120] sm:$0xff] }
 0xe29   :  { %5562 = vmatmul.msk.f32.gmra.mxu3 %vm2315_vm11, %v3045_v13  ;;  %v3356_v13 = vld [vmem:[%s7958_s22 + $0xc0] sm:$0xff] }
 0xea4   :  { %v3092_v28 = vpop.f32.mrf.mxu3 }
 0xea5   :  { %v3098_v30 = vadd.f32 %v3092_v28, %v3026_v19  ;;  %v3309_v19 = vld [vmem:[%s7958_s22 + $0x20] sm:$0xff] }
 0xea6   :  { %v3352_v28 = vld [vmem:[%s7958_s22 + $0xa0] sm:$0xff]  ;;  %3336 = vmatpush.msra.mxu2 %v3309_v19  ;;  %v3324_v19 = vld [vmem:[%s7959_s23 + $0x18] sm:$0xff] }
 0xea7   :  { %v7276_v29 = vadd.f32 %v3128_v50, %v3098_v30 }
 0xea8   :  { %3337 = vmatpush.msra.mxu2 %v3308_v37  ;;  %v3562_v37 = vld [vmem:[%s7958_s22 + $0x188] sm:$0xff] }
 0xea9   :  { %3153 = vmatmul.f32.vlgmr.msra.gmra.mxu0 %v7276_v29 }
 0xeac   :  { %v3095_v61 = vpop.f32.mrf.mxu3 }
 0xead   :  { %v3099_v31 = vadd.f32 %v3095_v61, %v3027_v42  ;;  %v3351_v42 = vld [vmem:[%s7958_s22 + $0x98] sm:$0xff] }
 0xeaf   :  { %v7279_v38 = vadd.f32 %v3133_v7, %v3099_v31 }
 0xeb1   :  { %3156 = vmatmul.f32.gmra.mxu0 %v7279_v38 }
 0xf26   :  { %v3154_v45 = vpop.f32.mrf.mxu0 }
 0xf2e   :  { %v3157_v52 = vpop.f32.mrf.mxu0 }
 0xf2f   :  { %3182 = vmatpush.msrb.mxu1 %v3157_v52 }
 0xf31   :  { %3183 = vmatpush.msrb.mxu1 %v3154_v45 }
 0xf32   :  { %5563 = vmatmul.msk.f32.vlgmr.msrb.gmra.mxu1 %vm2315_vm11, %v3102_v53 }
 0xf33   :  { %5569 = vmatpush.msk.msra.mxu1 %vm564_vm5, %v3124_v60  ;;  %v3349_v60 = vld [vmem:[%s7958_s22 + $0x88] sm:$0xff] }
 0xfaf   :  { %v3185_v57 = vpop.f32.mrf.mxu1 }
 0xfb0   :  { %v3186_v44 = vadd.f32 %v3185_v57, %v3163_v54 }
 0xfb2   :  { %v3188_v46 = vmax.f32 %v3186_v44, 0.0 }
 0xfb4   :  { %5564 = vmatpush.msk.msra.mxu3 %vm564_vm5, %v3188_v46  ;;  %v3307_v46 = vld [vmem:[%s7958_s22 + $0x10] sm:$0xff] }
 0xfb5   :  { %5565 = vmatmul.msk.f32.vlgmr.msra.gmra.mxu3 %vm560_vm9, %v3104_v33  ;;  %v3350_v33 = vld [vmem:[%s7958_s22 + $0x90] sm:$0xff]  ;;  %3338 = vmatpush.msra.mxu2 %v3307_v46 }
 0xfb6   :  { %3368 = vmatpush.msrb.mxu3 %v3363_v47 }
 0xfb8   :  { %3369 = vmatpush.msrb.mxu3 %v3362_v6 }
 0xfba   :  { %3370 = vmatpush.msrb.mxu3 %v3361_v59  ;;  %v3321_v59 = vld [vmem:[%s7959_s23] sm:$0xff] }
 0xfbc   :  { %3371 = vmatpush.msrb.mxu3 %v3360_v48  ;;  %v3486_v48 = vld [vmem:[%s7958_s22 + $0x168] sm:$0xff] }
 0xfbd   :  { %5566 = vmatmul.msk.f32.gmra.mxu3 %vm560_vm9, %v3105_v58  ;;  %v3306_v58 = vld [vmem:[%s7958_s22 + $0x8] sm:$0xff] }
 0xfbe   :  { %3372 = vmatpush.msrb.mxu3 %v3359_v32  ;;  %3339 = vmatpush.msra.mxu2 %v3306_v58  ;;  %v3573_v32 = vld [vmem:[%s7958_s22 + $0x1e0] sm:$0xff] }
 0xfc0   :  { %3373 = vmatpush.msrb.mxu3 %v3358_v8  ;;  %v3322_v8 = vld [vmem:[%s7959_s23 + $0x8] sm:$0xff] }
 0xfc2   :  { %3374 = vmatpush.msrb.mxu3 %v3357_v10  ;;  %v3572_v10 = vld [vmem:[%s7958_s22 + $0x1d8] sm:$0xff] }
 0xfc4   :  { %3375 = vmatpush.msrb.mxu3 %v3356_v13  ;;  %v3482_v13 = vld [vmem:[%s7958_s22 + $0x148] sm:$0xff] }
 0xfc6   :  { %3376 = vmatpush.msrb.mxu3 %v3355_v20  ;;  %v3323_v20 = vld [vmem:[%s7959_s23 + $0x10] sm:$0xff] }
 0xfc8   :  { %3377 = vmatpush.msrb.mxu3 %v3354_v24  ;;  %v3479_v24 = vld [vmem:[%s7958_s22 + $0x130] sm:$0xff] }
 0xfca   :  { %3378 = vmatpush.msrb.mxu3 %v3353_v43  ;;  %v3565_v43 = vld [vmem:[%s7958_s22 + $0x1a0] sm:$0xff] }
 0xfcc   :  { %3379 = vmatpush.msrb.mxu3 %v3352_v28  ;;  %v3476_v28 = vld [vmem:[%s7958_s22 + $0x118] sm:$0xff] }
 0xfce   :  { %3380 = vmatpush.msrb.mxu3 %v3351_v42  ;;  %v3473_v42 = vld [vmem:[%s7958_s22 + $0x100] sm:$0xff] }
 0xfd0   :  { %3381 = vmatpush.msrb.mxu3 %v3350_v33 }
 0xfd2   :  { %3382 = vmatpush.msrb.mxu3 %v3349_v60 }
0x1038   :  { %v3225_v63 = vpop.f32.mrf.mxu3 }
0x1039   :  { %v3226_v0 = vadd.f32 %v3225_v63, %v3192_v62  ;;  %v3305_v62 = vld [vmem:[%s7958_s22] sm:$0xff] }
0x103a   :  { %v3348_v63 = vld [vmem:[%s7958_s22 + $0x80] sm:$0xff]  ;;  %3340 = vmatpush.msra.mxu2 %v3305_v62 }
0x103b   :  { %v5567_v1 = vmul.f32 -1.442695, %v3226_v0  ;;  %3383 = vmatpush.msrb.mxu3 %v3348_v63  ;;  %v3489_v62 = vld [vmem:[%s7959_s23 + $0x40] sm:$0xff] }
0x103c   :  { %v3577_v63 = vld [vmem:[%s7959_s23 + $0x60] sm:$0xff] }
0x103d   :  { %5780 = vpow2.f32 %v5567_v1 }
0x1040   :  { %v3228_v5 = vpop.f32.mrf.mxu3 }
0x1041   :  { %v3229_v40 = vadd.f32 %v3228_v5, %v3197_v4 }
0x1043   :  { %v5781_v16 = vpop.eup %5780  ;;  %v5568_v36 = vmul.f32 -1.442695, %v3229_v40 }
0x1044   :  { %v3237_v51 = vadd.f32 1.0, %v5781_v16  ;;  %v3576_v16 = vld [vmem:[%s7958_s22 + $0x1f8] sm:$0xff] }
0x1045   :  { %5782 = vpow2.f32 %v5568_v36  ;;  %v3487_v36 = vld [vmem:[%s7958_s22 + $0x170] sm:$0xff] }
0x1046   :  { %5784 = vrcp.f32 %v3237_v51  ;;  %v3250_v25 = vand.u32 2147483648, %v3237_v51  ;;  %v3248_v27 = vand.u32 2147483647, %v3237_v51  ;;  %vm3244_vm6 = vweird.f32 %v3237_v51 }
0x1048   :  { %v3251_v30 = vor.u32 1.1754944e-38, %v3250_v25  ;;  %vm3249_vm8 = vcmp.eq.f32.partialorder %v3248_v27, 8.507059e+37  ;;  %v3567_v25 = vld [vmem:[%s7958_s22 + $0x1b0] sm:$0xff]  ;;  %v3566_v27 = vld [vmem:[%s7958_s22 + $0x1a8] sm:$0xff] }
0x104b   :  { %v5783_v11 = vpop.eup %5782 }
0x104c   :  { %v5785_v14 = vpop.eup %5784  ;;  %v3238_v15 = vadd.f32 1.0, %v5783_v11  ;;  %v3483_v11 = vld [vmem:[%s7958_s22 + $0x150] sm:$0xff] }
0x104d   :  { %v3240_v18 = vmul.f32 %v5785_v14, %v3237_v51  ;;  %vm3245_vm4 = vweird.f32 %v5785_v14  ;;  %v3574_v51 = vld [vmem:[%s7958_s22 + $0x1e8] sm:$0xff] }
0x104e   :  { %5786 = vrcp.f32 %v3238_v15  ;;  %vm3246_vm7 = vmor %vm3244_vm6, %vm3245_vm4  ;;  %v3265_v7 = vand.u32 2147483648, %v3238_v15  ;;  %v3263_v52 = vand.u32 2147483647, %v3238_v15  ;;  %vm3259_vm12 = vweird.f32 %v3238_v15 }
0x104f   :  { %v3241_v22 = vsub.f32 1.0, %v3240_v18  ;;  %v3569_v18 = vld [vmem:[%s7958_s22 + $0x1c0] sm:$0xff] }
0x1050   :  { %v3266_v54 = vor.u32 1.1754944e-38, %v3265_v7  ;;  %vm3264_vm14 = vcmp.eq.f32.partialorder %v3263_v52, 8.507059e+37 }
0x1051   :  { %v3242_v26 = vmul.f32 %v5785_v14, %v3241_v22  ;;  %v3480_v22 = vld [vmem:[%s7958_s22 + $0x138] sm:$0xff] }
0x1053   :  { %v3243_v34 = vadd.f32 %v5785_v14, %v3242_v26  ;;  %v3478_v26 = vld [vmem:[%s7958_s22 + $0x128] sm:$0xff] }
0x1054   :  { %v5787_v49 = vpop.eup %5786 }
0x1055   :  { %v3247_v50 = vsel %vm3246_vm7, %v5785_v14, %v3243_v34  ;;  %v3255_v21 = vmul.f32 %v5787_v49, %v3238_v15  ;;  %vm3260_vm10 = vweird.f32 %v5787_v49  ;;  %v3570_v14 = vld [vmem:[%s7958_s22 + $0x1c8] sm:$0xff]  ;;  %v3481_v15 = vld [vmem:[%s7958_s22 + $0x140] sm:$0xff]  ;;  %v3367_v34 = vld [vmem:[%s7959_s23 + $0x38] sm:$0xff] }
0x1056   :  { %v3252_v61 = vsel %vm3249_vm8, %v3251_v30, %v3247_v50  ;;  %vm3261_vm13 = vmor %vm3259_vm12, %vm3260_vm10  ;;  %v3475_v30 = vld [vmem:[%s7958_s22 + $0x110] sm:$0xff] }
0x1057   :  { %5570 = vmatmul.msk.f32.vlgmr.msra.gmra.mxu1 %vm560_vm9, %v3252_v61  ;;  %v3256_v31 = vsub.f32 1.0, %v3255_v21  ;;  %v3563_v50 = vld [vmem:[%s7958_s22 + $0x190] sm:$0xff]  ;;  %v3474_v21 = vld [vmem:[%s7958_s22 + $0x108] sm:$0xff]  ;;  %v3561_v61 = vld [vmem:[%s7958_s22 + $0x180] sm:$0xff] }
0x1059   :  { %v3257_v45 = vmul.f32 %v5787_v49, %v3256_v31 }
0x105b   :  { %v3258_v53 = vadd.f32 %v5787_v49, %v3257_v45 }
0x105d   :  { %v3262_v57 = vsel %vm3261_vm13, %v5787_v49, %v3258_v53  ;;  %v3564_v49 = vld [vmem:[%s7958_s22 + $0x198] sm:$0xff] }
0x105e   :  { %v3267_v44 = vsel %vm3264_vm14, %v3266_v54, %v3262_v57 }
0x105f   :  { %5571 = vmatmul.msk.f32.gmra.mxu1 %vm560_vm9, %v3267_v44 }
0x10d4   :  { %v3295_v0 = vpop.f32.mrf.mxu1 }
0x10d5   :  { %v3301_v1 = vmul.f32 %v3295_v0, %v7276_v29  ;;  %v3664_v0 = vld [vmem:[%s7958_s22 + $0x278] sm:$0xff] }
0x10d7   :  { %v7326_v2 = vmax.f32 %v3301_v1, 0.0  ;;  %v3752_v1 = vld [vmem:[%s7958_s22 + $0x2f8] sm:$0xff] }
0x10d9   :  { %3341 = vmatmul.f32.vlgmr.msra.gmra.mxu2 %v7326_v2  ;;  %3384 = vmatmul.f32.vlgmr.msrb.gmra.mxu3 %v7326_v2 }
0x10dc   :  { %v3298_v47 = vpop.f32.mrf.mxu1 }
0x10dd   :  { %v3302_v3 = vmul.f32 %v3298_v47, %v7279_v38  ;;  %v3488_v38 = vld [vmem:[%s7958_s22 + $0x178] sm:$0xff]  ;;  %v3663_v47 = vld [vmem:[%s7958_s22 + $0x270] sm:$0xff] }
0x10df   :  { %v7331_v4 = vmax.f32 %v3302_v3, 0.0  ;;  %v3751_v3 = vld [vmem:[%s7958_s22 + $0x2f0] sm:$0xff] }
0x10e1   :  { %3344 = vmatmul.f32.gmra.mxu2 %v7331_v4  ;;  %3387 = vmatmul.f32.gmra.mxu3 %v7331_v4 }
0x115c   :  { %v3342_v29 = vpop.f32.mrf.mxu2  ;;  %v3385_v5 = vpop.f32.mrf.mxu3 }
0x1164   :  { %v3345_v6 = vpop.f32.mrf.mxu2  ;;  %v3388_v40 = vpop.f32.mrf.mxu3 }
0x1165   :  { %3417 = vmatpush.msrb.mxu0 %v3388_v40  ;;  %3458 = vmatpush.msrb.mxu1 %v3345_v6  ;;  %v3661_v6 = vld [vmem:[%s7958_s22 + $0x260] sm:$0xff] }
0x1166   :  { %v3749_v40 = vld [vmem:[%s7958_s22 + $0x2e0] sm:$0xff] }
0x1167   :  { %3418 = vmatpush.msrb.mxu0 %v3385_v5  ;;  %3459 = vmatpush.msrb.mxu1 %v3342_v29  ;;  %v3662_v29 = vld [vmem:[%s7958_s22 + $0x268] sm:$0xff] }
0x1168   :  { %5572 = vmatmul.msk.f32.vlgmr.msrb.gmra.mxu0 %vm2315_vm11, %v3364_v41  ;;  %5576 = vmatmul.msk.f32.vlgmr.msrb.gmra.mxu1 %vm2315_vm11, %v3321_v59  ;;  %v3750_v5 = vld [vmem:[%s7958_s22 + $0x2e8] sm:$0xff] }
0x1169   :  { %3493 = vmatpush.msra.mxu0 %v3488_v38  ;;  %3581 = vmatpush.msra.mxu1 %v3576_v16  ;;  %v3490_v41 = vld [vmem:[%s7959_s23 + $0x48] sm:$0xff]  ;;  %v3660_v38 = vld [vmem:[%s7958_s22 + $0x258] sm:$0xff] }
0x116a   :  { %v3578_v59 = vld [vmem:[%s7959_s23 + $0x68] sm:$0xff]  ;;  %v3748_v16 = vld [vmem:[%s7958_s22 + $0x2d8] sm:$0xff] }
0x116b   :  { %3494 = vmatpush.msra.mxu0 %v3487_v36  ;;  %3582 = vmatpush.msra.mxu1 %v3575_v17  ;;  %v3659_v36 = vld [vmem:[%s7958_s22 + $0x250] sm:$0xff] }
0x116c   :  { %v3747_v17 = vld [vmem:[%s7958_s22 + $0x2d0] sm:$0xff] }
0x116d   :  { %3495 = vmatpush.msra.mxu0 %v3486_v48  ;;  %3583 = vmatpush.msra.mxu1 %v3574_v51  ;;  %v3658_v48 = vld [vmem:[%s7958_s22 + $0x248] sm:$0xff] }
0x116e   :  { %v3746_v51 = vld [vmem:[%s7958_s22 + $0x2c8] sm:$0xff] }
0x116f   :  { %3496 = vmatpush.msra.mxu0 %v3485_v55  ;;  %3584 = vmatpush.msra.mxu1 %v3573_v32  ;;  %v3657_v55 = vld [vmem:[%s7958_s22 + $0x240] sm:$0xff] }
0x1170   :  { %5573 = vmatmul.msk.f32.gmra.mxu0 %vm2315_vm11, %v3365_v56  ;;  %5577 = vmatmul.msk.f32.gmra.mxu1 %vm2315_vm11, %v3322_v8  ;;  %v3745_v32 = vld [vmem:[%s7958_s22 + $0x2c0] sm:$0xff]  ;;  %v3491_v56 = vld [vmem:[%s7959_s23 + $0x50] sm:$0xff] }
0x1171   :  { %3497 = vmatpush.msra.mxu0 %v3484_v9  ;;  %3585 = vmatpush.msra.mxu1 %v3572_v10  ;;  %v3579_v8 = vld [vmem:[%s7959_s23 + $0x70] sm:$0xff]  ;;  %v3656_v9 = vld [vmem:[%s7958_s22 + $0x238] sm:$0xff] }
0x1172   :  { %v3744_v10 = vld [vmem:[%s7958_s22 + $0x2b8] sm:$0xff] }
0x1173   :  { %3498 = vmatpush.msra.mxu0 %v3483_v11  ;;  %3586 = vmatpush.msra.mxu1 %v3571_v12  ;;  %v3655_v11 = vld [vmem:[%s7958_s22 + $0x230] sm:$0xff] }
0x1174   :  { %v3743_v12 = vld [vmem:[%s7958_s22 + $0x2b0] sm:$0xff] }
0x1175   :  { %3499 = vmatpush.msra.mxu0 %v3482_v13  ;;  %3587 = vmatpush.msra.mxu1 %v3570_v14  ;;  %v3654_v13 = vld [vmem:[%s7958_s22 + $0x228] sm:$0xff] }
0x1176   :  { %v3742_v14 = vld [vmem:[%s7958_s22 + $0x2a8] sm:$0xff] }
0x1177   :  { %3500 = vmatpush.msra.mxu0 %v3481_v15  ;;  %3588 = vmatpush.msra.mxu1 %v3569_v18  ;;  %v3653_v15 = vld [vmem:[%s7958_s22 + $0x220] sm:$0xff] }
0x1178   :  { %5574 = vmatmul.msk.f32.gmra.mxu0 %vm2315_vm11, %v3366_v35  ;;  %5578 = vmatmul.msk.f32.gmra.mxu1 %vm2315_vm11, %v3323_v20  ;;  %v3741_v18 = vld [vmem:[%s7958_s22 + $0x2a0] sm:$0xff]  ;;  %v3492_v35 = vld [vmem:[%s7959_s23 + $0x58] sm:$0xff] }
0x1179   :  { %3501 = vmatpush.msra.mxu0 %v3480_v22  ;;  %3589 = vmatpush.msra.mxu1 %v3568_v23  ;;  %v3580_v20 = vld [vmem:[%s7959_s23 + $0x78] sm:$0xff] }
0x117a   :  { %v3652_v22 = vld [vmem:[%s7958_s22 + $0x218] sm:$0xff] }
0x117b   :  { %3502 = vmatpush.msra.mxu0 %v3479_v24  ;;  %3590 = vmatpush.msra.mxu1 %v3567_v25  ;;  %v3740_v23 = vld [vmem:[%s7958_s22 + $0x298] sm:$0xff]  ;;  %v3651_v24 = vld [vmem:[%s7958_s22 + $0x210] sm:$0xff] }
0x117c   :  { %v3739_v25 = vld [vmem:[%s7958_s22 + $0x290] sm:$0xff] }
0x117d   :  { %3503 = vmatpush.msra.mxu0 %v3478_v26  ;;  %3591 = vmatpush.msra.mxu1 %v3566_v27  ;;  %v3650_v26 = vld [vmem:[%s7958_s22 + $0x208] sm:$0xff] }
0x117e   :  { %v3738_v27 = vld [vmem:[%s7958_s22 + $0x288] sm:$0xff] }
0x117f   :  { %3504 = vmatpush.msra.mxu0 %v3477_v39  ;;  %3592 = vmatpush.msra.mxu1 %v3565_v43  ;;  %v3649_v39 = vld [vmem:[%s7958_s22 + $0x200] sm:$0xff] }
0x1180   :  { %5575 = vmatmul.msk.f32.gmra.mxu0 %vm2315_vm11, %v3367_v34  ;;  %5579 = vmatmul.msk.f32.gmra.mxu1 %vm2315_vm11, %v3324_v19  ;;  %v3737_v43 = vld [vmem:[%s7958_s22 + $0x280] sm:$0xff] }
0x1181   :  { %3505 = vmatpush.msra.mxu0 %v3476_v28  ;;  %3593 = vmatpush.msra.mxu1 %v3564_v49 }
0x1183   :  { %3506 = vmatpush.msra.mxu0 %v3475_v30  ;;  %3594 = vmatpush.msra.mxu1 %v3563_v50 }
0x1185   :  { %3507 = vmatpush.msra.mxu0 %v3474_v21  ;;  %3595 = vmatpush.msra.mxu1 %v3562_v37 }
0x1187   :  { %3508 = vmatpush.msra.mxu0 %v3473_v42  ;;  %3596 = vmatpush.msra.mxu1 %v3561_v61 }
0x1188   :  { %3509 = vmatmul.f32.vlgmr.msra.gmra.mxu0 %v7326_v2  ;;  %3597 = vmatmul.f32.vlgmr.msra.gmra.mxu1 %v7326_v2 }
0x1190   :  { %3512 = vmatmul.f32.gmra.mxu0 %v7331_v4  ;;  %3600 = vmatmul.f32.gmra.mxu1 %v7331_v4 }
0x11e5   :  { %v7387_v31 = vpop.f32.mrf.mxu0  ;;  %v7389_v7 = vpop.f32.mrf.mxu1 }
0x11ed   :  { %v7391_v45 = vpop.f32.mrf.mxu0  ;;  %v7393_v52 = vpop.f32.mrf.mxu1 }
0x11f5   :  { %v7395_v53 = vpop.f32.mrf.mxu0  ;;  %v7397_v54 = vpop.f32.mrf.mxu1 }
0x11fd   :  { %v7399_v57 = vpop.f32.mrf.mxu0  ;;  %v7401_v44 = vpop.f32.mrf.mxu1 }
0x1205   :  { %v3510_v46 = vpop.f32.mrf.mxu0  ;;  %v3598_v33 = vpop.f32.mrf.mxu1 }
0x120d   :  { %v3513_v58 = vpop.f32.mrf.mxu0  ;;  %v3601_v60 = vpop.f32.mrf.mxu1 }
0x120e   :  { %3542 = vmatpush.msrb.mxu2 %v3513_v58  ;;  %3630 = vmatpush.msra.mxu3 %v3601_v60  ;;  %v3665_v58 = vld [vmem:[%s7959_s23 + $0x80] sm:$0xff] }
0x120f   :  { %v3753_v60 = vld [vmem:[%s7959_s23 + $0xa0] sm:$0xff] }
0x1210   :  { %3543 = vmatpush.msrb.mxu2 %v3510_v46  ;;  %3631 = vmatpush.msra.mxu3 %v3598_v33 }
0x1211   :  { %5580 = vmatmul.msk.f32.vlgmr.msrb.gmra.mxu2 %vm2315_vm11, %v3489_v62  ;;  %5584 = vmatmul.msk.f32.vlgmr.msra.gmra.mxu3 %vm2315_vm11, %v3577_v63  ;;  %v3840_v62 = vld [vmem:[%s7958_s22 + $0x378] sm:$0xff] }
0x1212   :  { %3669 = vmatpush.msra.mxu2 %v3664_v0  ;;  %3757 = vmatpush.msrb.mxu3 %v3752_v1  ;;  %v3928_v63 = vld [vmem:[%s7958_s22 + $0x3f8] sm:$0xff]  ;;  %v3839_v0 = vld [vmem:[%s7958_s22 + $0x370] sm:$0xff] }
0x1213   :  { %v3927_v1 = vld [vmem:[%s7958_s22 + $0x3f0] sm:$0xff] }
0x1214   :  { %3670 = vmatpush.msra.mxu2 %v3663_v47  ;;  %3758 = vmatpush.msrb.mxu3 %v3751_v3  ;;  %v3838_v47 = vld [vmem:[%s7958_s22 + $0x368] sm:$0xff] }
0x1215   :  { %v3926_v3 = vld [vmem:[%s7958_s22 + $0x3e8] sm:$0xff] }
0x1216   :  { %3671 = vmatpush.msra.mxu2 %v3662_v29  ;;  %3759 = vmatpush.msrb.mxu3 %v3750_v5  ;;  %v3837_v29 = vld [vmem:[%s7958_s22 + $0x360] sm:$0xff] }
0x1217   :  { %v3925_v5 = vld [vmem:[%s7958_s22 + $0x3e0] sm:$0xff] }
0x1218   :  { %3672 = vmatpush.msra.mxu2 %v3661_v6  ;;  %3760 = vmatpush.msrb.mxu3 %v3749_v40  ;;  %v3666_v6 = vld [vmem:[%s7959_s23 + $0x88] sm:$0xff] }
0x1219   :  { %5581 = vmatmul.msk.f32.gmra.mxu2 %vm2315_vm11, %v3490_v41  ;;  %5585 = vmatmul.msk.f32.gmra.mxu3 %vm2315_vm11, %v3578_v59  ;;  %v3754_v40 = vld [vmem:[%s7959_s23 + $0xa8] sm:$0xff]  ;;  %v3836_v41 = vld [vmem:[%s7958_s22 + $0x358] sm:$0xff] }
0x121a   :  { %3673 = vmatpush.msra.mxu2 %v3660_v38  ;;  %3761 = vmatpush.msrb.mxu3 %v3748_v16  ;;  %v3924_v59 = vld [vmem:[%s7958_s22 + $0x3d8] sm:$0xff]  ;;  %v3835_v38 = vld [vmem:[%s7958_s22 + $0x350] sm:$0xff] }
0x121b   :  { %v3923_v16 = vld [vmem:[%s7958_s22 + $0x3d0] sm:$0xff] }
0x121c   :  { %3674 = vmatpush.msra.mxu2 %v3659_v36  ;;  %3762 = vmatpush.msrb.mxu3 %v3747_v17  ;;  %v3834_v36 = vld [vmem:[%s7958_s22 + $0x348] sm:$0xff] }
0x121d   :  { %v3922_v17 = vld [vmem:[%s7958_s22 + $0x3c8] sm:$0xff] }
0x121e   :  { %3675 = vmatpush.msra.mxu2 %v3658_v48  ;;  %3763 = vmatpush.msrb.mxu3 %v3746_v51  ;;  %v3833_v48 = vld [vmem:[%s7958_s22 + $0x340] sm:$0xff] }
0x121f   :  { %v3921_v51 = vld [vmem:[%s7958_s22 + $0x3c0] sm:$0xff] }
0x1220   :  { %3676 = vmatpush.msra.mxu2 %v3657_v55  ;;  %3764 = vmatpush.msrb.mxu3 %v3745_v32  ;;  %v3667_v55 = vld [vmem:[%s7959_s23 + $0x90] sm:$0xff] }
0x1221   :  { %5582 = vmatmul.msk.f32.gmra.mxu2 %vm2315_vm11, %v3491_v56  ;;  %5586 = vmatmul.msk.f32.gmra.mxu3 %vm2315_vm11, %v3579_v8  ;;  %v3755_v32 = vld [vmem:[%s7959_s23 + $0xb0] sm:$0xff]  ;;  %v3832_v56 = vld [vmem:[%s7958_s22 + $0x338] sm:$0xff] }
0x1222   :  { %3677 = vmatpush.msra.mxu2 %v3656_v9  ;;  %3765 = vmatpush.msrb.mxu3 %v3744_v10  ;;  %v3920_v8 = vld [vmem:[%s7958_s22 + $0x3b8] sm:$0xff]  ;;  %v3831_v9 = vld [vmem:[%s7958_s22 + $0x330] sm:$0xff] }
0x1223   :  { %v3919_v10 = vld [vmem:[%s7958_s22 + $0x3b0] sm:$0xff] }
0x1224   :  { %3678 = vmatpush.msra.mxu2 %v3655_v11  ;;  %3766 = vmatpush.msrb.mxu3 %v3743_v12  ;;  %v3830_v11 = vld [vmem:[%s7958_s22 + $0x328] sm:$0xff] }
0x1225   :  { %v3918_v12 = vld [vmem:[%s7958_s22 + $0x3a8] sm:$0xff] }
0x1226   :  { %3679 = vmatpush.msra.mxu2 %v3654_v13  ;;  %3767 = vmatpush.msrb.mxu3 %v3742_v14  ;;  %v3829_v13 = vld [vmem:[%s7958_s22 + $0x320] sm:$0xff] }
0x1227   :  { %v3917_v14 = vld [vmem:[%s7958_s22 + $0x3a0] sm:$0xff] }
0x1228   :  { %3680 = vmatpush.msra.mxu2 %v3653_v15  ;;  %3768 = vmatpush.msrb.mxu3 %v3741_v18  ;;  %v3668_v15 = vld [vmem:[%s7959_s23 + $0x98] sm:$0xff] }
0x1229   :  { %5583 = vmatmul.msk.f32.gmra.mxu2 %vm2315_vm11, %v3492_v35  ;;  %5587 = vmatmul.msk.f32.gmra.mxu3 %vm2315_vm11, %v3580_v20  ;;  %v3756_v18 = vld [vmem:[%s7959_s23 + $0xb8] sm:$0xff] }
0x122a   :  { %3681 = vmatpush.msra.mxu2 %v3652_v22  ;;  %3769 = vmatpush.msrb.mxu3 %v3740_v23  ;;  %v3828_v35 = vld [vmem:[%s7958_s22 + $0x318] sm:$0xff]  ;;  %v3827_v22 = vld [vmem:[%s7958_s22 + $0x310] sm:$0xff] }
0x122b   :  { %v3916_v20 = vld [vmem:[%s7958_s22 + $0x398] sm:$0xff]  ;;  %v3915_v23 = vld [vmem:[%s7958_s22 + $0x390] sm:$0xff] }
0x122c   :  { %3682 = vmatpush.msra.mxu2 %v3651_v24  ;;  %3770 = vmatpush.msrb.mxu3 %v3739_v25  ;;  %v3826_v24 = vld [vmem:[%s7958_s22 + $0x308] sm:$0xff] }
0x122d   :  { %v3914_v25 = vld [vmem:[%s7958_s22 + $0x388] sm:$0xff] }
0x122e   :  { %3683 = vmatpush.msra.mxu2 %v3650_v26  ;;  %3771 = vmatpush.msrb.mxu3 %v3738_v27  ;;  %v3825_v26 = vld [vmem:[%s7958_s22 + $0x300] sm:$0xff] }
0x122f   :  { %v3913_v27 = vld [vmem:[%s7958_s22 + $0x380] sm:$0xff] }
0x1230   :  { %3684 = vmatpush.msra.mxu2 %v3649_v39  ;;  %3772 = vmatpush.msrb.mxu3 %v3737_v43 }
0x1231   :  { %3685 = vmatmul.f32.vlgmr.msra.gmra.mxu2 %v7326_v2  ;;  %3773 = vmatmul.f32.vlgmr.msrb.gmra.mxu3 %v7326_v2 }
0x1239   :  { %3688 = vmatmul.f32.gmra.mxu2 %v7331_v4  ;;  %3776 = vmatmul.f32.gmra.mxu3 %v7331_v4 }
0x1294   :  { %v7455_v34 = vpop.f32.mrf.mxu2  ;;  %v7457_v19 = vpop.f32.mrf.mxu3 }
0x129c   :  { %v7459_v28 = vpop.f32.mrf.mxu2  ;;  %v7461_v49 = vpop.f32.mrf.mxu3 }
0x12a4   :  { %v7463_v30 = vpop.f32.mrf.mxu2  ;;  %v7465_v50 = vpop.f32.mrf.mxu3 }
0x12ac   :  { %v7467_v21 = vpop.f32.mrf.mxu2  ;;  %v7469_v37 = vpop.f32.mrf.mxu3 }
0x12b4   :  { %v3686_v42 = vpop.f32.mrf.mxu2  ;;  %v3774_v61 = vpop.f32.mrf.mxu3 }
0x12bc   :  { %v3689_v46 = vpop.f32.mrf.mxu2  ;;  %v3777_v33 = vpop.f32.mrf.mxu3 }
0x12bd   :  { %3718 = vmatpush.msrb.mxu0 %v3689_v46  ;;  %3806 = vmatpush.msrb.mxu1 %v3777_v33 }
0x12bf   :  { %3719 = vmatpush.msrb.mxu0 %v3686_v42  ;;  %3807 = vmatpush.msrb.mxu1 %v3774_v61 }
0x12c0   :  { %5588 = vmatmul.msk.f32.vlgmr.msrb.gmra.mxu0 %vm2315_vm11, %v3665_v58  ;;  %5592 = vmatmul.msk.f32.vlgmr.msrb.gmra.mxu1 %vm2315_vm11, %v3753_v60 }
0x12c1   :  { %3845 = vmatpush.msra.mxu0 %v3840_v62  ;;  %3933 = vmatpush.msra.mxu1 %v3928_v63 }
0x12c3   :  { %3846 = vmatpush.msra.mxu0 %v3839_v0  ;;  %3934 = vmatpush.msra.mxu1 %v3927_v1 }
0x12c5   :  { %3847 = vmatpush.msra.mxu0 %v3838_v47  ;;  %3935 = vmatpush.msra.mxu1 %v3926_v3  ;;  %v3841_v47 = vld [vmem:[%s7959_s23 + $0xc0] sm:$0xff] }
0x12c6   :  { %v3929_v3 = vld [vmem:[%s7959_s23 + $0xe0] sm:$0xff] }
0x12c7   :  { %3848 = vmatpush.msra.mxu0 %v3837_v29  ;;  %3936 = vmatpush.msra.mxu1 %v3925_v5  ;;  %v4016_v29 = vld [vmem:[%s7958_s22 + $0x478] sm:$0xff]  ;;  %v4015_v5 = vld [vmem:[%s7958_s22 + $0x470] sm:$0xff] }
0x12c8   :  { %5589 = vmatmul.msk.f32.gmra.mxu0 %vm2315_vm11, %v3666_v6  ;;  %5593 = vmatmul.msk.f32.gmra.mxu1 %vm2315_vm11, %v3754_v40  ;;  %v4014_v6 = vld [vmem:[%s7958_s22 + $0x468] sm:$0xff]  ;;  %v4013_v40 = vld [vmem:[%s7958_s22 + $0x460] sm:$0xff] }
0x12c9   :  { %3849 = vmatpush.msra.mxu0 %v3836_v41  ;;  %3937 = vmatpush.msra.mxu1 %v3924_v59  ;;  %v3842_v41 = vld [vmem:[%s7959_s23 + $0xc8] sm:$0xff] }
0x12ca   :  { %v3930_v59 = vld [vmem:[%s7959_s23 + $0xe8] sm:$0xff] }
0x12cb   :  { %3850 = vmatpush.msra.mxu0 %v3835_v38  ;;  %3938 = vmatpush.msra.mxu1 %v3923_v16  ;;  %v4012_v38 = vld [vmem:[%s7958_s22 + $0x458] sm:$0xff]  ;;  %v4011_v16 = vld [vmem:[%s7958_s22 + $0x450] sm:$0xff] }
0x12cd   :  { %3851 = vmatpush.msra.mxu0 %v3834_v36  ;;  %3939 = vmatpush.msra.mxu1 %v3922_v17  ;;  %v4010_v36 = vld [vmem:[%s7958_s22 + $0x448] sm:$0xff]  ;;  %v4009_v17 = vld [vmem:[%s7958_s22 + $0x440] sm:$0xff] }
0x12cf   :  { %3852 = vmatpush.msra.mxu0 %v3833_v48  ;;  %3940 = vmatpush.msra.mxu1 %v3921_v51  ;;  %v3843_v48 = vld [vmem:[%s7959_s23 + $0xd0] sm:$0xff] }
0x12d0   :  { %5590 = vmatmul.msk.f32.gmra.mxu0 %vm2315_vm11, %v3667_v55  ;;  %5594 = vmatmul.msk.f32.gmra.mxu1 %vm2315_vm11, %v3755_v32  ;;  %v3931_v51 = vld [vmem:[%s7959_s23 + $0xf0] sm:$0xff]  ;;  %v4008_v55 = vld [vmem:[%s7958_s22 + $0x438] sm:$0xff] }
0x12d1   :  { %3853 = vmatpush.msra.mxu0 %v3832_v56  ;;  %3941 = vmatpush.msra.mxu1 %v3920_v8  ;;  %v4007_v32 = vld [vmem:[%s7958_s22 + $0x430] sm:$0xff]  ;;  %v4006_v56 = vld [vmem:[%s7958_s22 + $0x428] sm:$0xff]  ;;  %v4005_v8 = vld [vmem:[%s7958_s22 + $0x420] sm:$0xff] }
0x12d3   :  { %3854 = vmatpush.msra.mxu0 %v3831_v9  ;;  %3942 = vmatpush.msra.mxu1 %v3919_v10  ;;  %v3844_v9 = vld [vmem:[%s7959_s23 + $0xd8] sm:$0xff] }
0x12d4   :  { %v3932_v10 = vld [vmem:[%s7959_s23 + $0xf8] sm:$0xff] }
0x12d5   :  { %3855 = vmatpush.msra.mxu0 %v3830_v11  ;;  %3943 = vmatpush.msra.mxu1 %v3918_v12  ;;  %v4004_v11 = vld [vmem:[%s7958_s22 + $0x418] sm:$0xff]  ;;  %v4003_v12 = vld [vmem:[%s7958_s22 + $0x410] sm:$0xff] }
0x12d7   :  { %3856 = vmatpush.msra.mxu0 %v3829_v13  ;;  %3944 = vmatpush.msra.mxu1 %v3917_v14  ;;  %v4002_v13 = vld [vmem:[%s7958_s22 + $0x408] sm:$0xff]  ;;  %v4001_v14 = vld [vmem:[%s7958_s22 + $0x400] sm:$0xff] }
0x12d8   :  { %5591 = vmatmul.msk.f32.gmra.mxu0 %vm2315_vm11, %v3668_v15  ;;  %5595 = vmatmul.msk.f32.gmra.mxu1 %vm2315_vm11, %v3756_v18 }
0x12d9   :  { %3857 = vmatpush.msra.mxu0 %v3828_v35  ;;  %3945 = vmatpush.msra.mxu1 %v3916_v20 }
0x12db   :  { %3858 = vmatpush.msra.mxu0 %v3827_v22  ;;  %3946 = vmatpush.msra.mxu1 %v3915_v23  ;;  %v4106_v23 = vld [vmem:[%s7960_s27 + $0x18] sm:$0xff] }
0x12dd   :  { %3859 = vmatpush.msra.mxu0 %v3826_v24  ;;  %3947 = vmatpush.msra.mxu1 %v3914_v25  ;;  %v4017_v25 = vld [vmem:[%s7959_s23 + $0x100] sm:$0xff] }
0x12df   :  { %3860 = vmatpush.msra.mxu0 %v3825_v26  ;;  %3948 = vmatpush.msra.mxu1 %v3913_v27  ;;  %v4020_v26 = vld [vmem:[%s7959_s23 + $0x118] sm:$0xff]  ;;  %v4105_v27 = vld [vmem:[%s7960_s27 + $0x10] sm:$0xff] }
0x12e0   :  { %3861 = vmatmul.f32.vlgmr.msra.gmra.mxu0 %v7326_v2  ;;  %3949 = vmatmul.f32.vlgmr.msra.gmra.mxu1 %v7326_v2 }
0x12e1   :  { %4157 = vmatpush.msrb.mxu1 %v4106_v23 }
0x12e3   :  { %4158 = vmatpush.msrb.mxu1 %v4105_v27  ;;  %v4107_v27 = vld [vmem:[%s7963_s4] sm:$0x3] }
0x12e8   :  { %3864 = vmatmul.f32.gmra.mxu0 %v7331_v4  ;;  %3952 = vmatmul.f32.gmra.mxu1 %v7331_v4 }
0x133d   :  { %v7523_v39 = vpop.f32.mrf.mxu0  ;;  %v7525_v43 = vpop.f32.mrf.mxu1 }
0x1345   :  { %v7527_v42 = vpop.f32.mrf.mxu0  ;;  %v7529_v61 = vpop.f32.mrf.mxu1 }
0x134d   :  { %v7531_v46 = vpop.f32.mrf.mxu0  ;;  %v7533_v33 = vpop.f32.mrf.mxu1 }
0x1355   :  { %v7535_v58 = vpop.f32.mrf.mxu0  ;;  %v7537_v60 = vpop.f32.mrf.mxu1 }
0x135d   :  { %v3862_v62 = vpop.f32.mrf.mxu0  ;;  %v3950_v63 = vpop.f32.mrf.mxu1 }
0x1365   :  { %v3865_v0 = vpop.f32.mrf.mxu0  ;;  %v3953_v1 = vpop.f32.mrf.mxu1 }
0x1366   :  { %3894 = vmatpush.msrb.mxu2 %v3865_v0  ;;  %3982 = vmatpush.msra.mxu3 %v3953_v1  ;;  %v3462_v0 = vadd.f32 %v7389_v7, %v7387_v31  ;;  %v3468_v31 = vadd.f32 %v7397_v54, %v7395_v53  ;;  %v3471_v53 = vadd.f32 %v7401_v44, %v7399_v57 }
0x1368   :  { %3895 = vmatpush.msrb.mxu2 %v3862_v62  ;;  %3983 = vmatpush.msra.mxu3 %v3950_v63  ;;  %v4104_v62 = vld [vmem:[%s7960_s27 + $0x8] sm:$0xff]  ;;  %v4103_v63 = vld [vmem:[%s7960_s27] sm:$0xff]  ;;  %v3557_v1 = vadd.f32 %v7455_v34, %v3462_v0  ;;  %v3559_v34 = vadd.f32 %v7463_v30, %v3468_v31  ;;  %v3560_v30 = vadd.f32 %v7467_v21, %v3471_v53 }
0x1369   :  { %5596 = vmatmul.msk.f32.vlgmr.msrb.gmra.mxu2 %vm2315_vm11, %v3841_v47  ;;  %5600 = vmatmul.msk.f32.vlgmr.msra.gmra.mxu3 %vm2315_vm11, %v3929_v3  ;;  %v3465_v3 = vadd.f32 %v7393_v52, %v7391_v45 }
0x136a   :  { %4021 = vmatpush.msra.mxu2 %v4016_v29  ;;  %4159 = vmatpush.msrb.mxu1 %v4104_v62  ;;  %v3645_v47 = vadd.f32 %v7457_v19, %v3557_v1 }
0x136c   :  { %4022 = vmatpush.msra.mxu2 %v4015_v5  ;;  %4160 = vmatpush.msrb.mxu1 %v4103_v63  ;;  %v3733_v29 = vadd.f32 %v7523_v39, %v3645_v47 }
0x136e   :  { %4023 = vmatpush.msra.mxu2 %v4014_v6  ;;  %v3558_v6 = vadd.f32 %v7459_v28, %v3465_v3  ;;  %v3647_v28 = vadd.f32 %v7465_v50, %v3559_v34 }
0x1370   :  { %4024 = vmatpush.msra.mxu2 %v4013_v40  ;;  %v3821_v40 = vadd.f32 %v7525_v43, %v3733_v29  ;;  %v3735_v54 = vadd.f32 %v7531_v46, %v3647_v28 }
0x1371   :  { %5597 = vmatmul.msk.f32.gmra.mxu2 %vm2315_vm11, %v3842_v41  ;;  %5601 = vmatmul.msk.f32.gmra.mxu3 %vm2315_vm11, %v3930_v59  ;;  %v3646_v41 = vadd.f32 %v7461_v49, %v3558_v6 }
0x1372   :  { %4025 = vmatpush.msra.mxu2 %v4012_v38 }
0x1373   :  { %v3734_v7 = vadd.f32 %v7527_v42, %v3646_v41 }
0x1374   :  { %4026 = vmatpush.msra.mxu2 %v4011_v16  ;;  %v4111_v16 = vpop.permute.xlu1 %4110 }
0x1375   :  { %v3822_v52 = vadd.f32 %v7529_v61, %v3734_v7 }
0x1376   :  { %4027 = vmatpush.msra.mxu2 %v4010_v36  ;;  %v3823_v36 = vadd.f32 %v7533_v33, %v3735_v54 }
0x1378   :  { %4028 = vmatpush.msra.mxu2 %v4009_v17 }
0x1379   :  { %5598 = vmatmul.msk.f32.gmra.mxu2 %vm2315_vm11, %v3843_v48  ;;  %5602 = vmatmul.msk.f32.gmra.mxu3 %vm2315_vm11, %v3931_v51  ;;  %v4116_v48 = vpop.permute.xlu2 %4115  ;;  %v3648_v51 = vadd.f32 %v7469_v37, %v3560_v30 }
0x137a   :  { %4029 = vmatpush.msra.mxu2 %v4008_v55 }
0x137b   :  { %v3736_v57 = vadd.f32 %v7535_v58, %v3648_v51 }
0x137c   :  { %4030 = vmatpush.msra.mxu2 %v4007_v32 }
0x137d   :  { %v3824_v21 = vadd.f32 %v7537_v60, %v3736_v57 }
0x137e   :  { %4031 = vmatpush.msra.mxu2 %v4006_v56 }
0x1380   :  { %4032 = vmatpush.msra.mxu2 %v4005_v8  ;;  %v4121_v8 = vpop.permute.xlu0 %4120 }
0x1381   :  { %5599 = vmatmul.msk.f32.gmra.mxu2 %vm2315_vm11, %v3844_v9  ;;  %5603 = vmatmul.msk.f32.gmra.mxu3 %vm2315_vm11, %v3932_v10 }
0x1382   :  { %4033 = vmatpush.msra.mxu2 %v4004_v11 }
0x1384   :  { %4034 = vmatpush.msra.mxu2 %v4003_v12  ;;  %v4126_v12 = vpop.permute.xlu1 %4125 }
0x1386   :  { %4035 = vmatpush.msra.mxu2 %v4002_v13 }
0x1388   :  { %4036 = vmatpush.msra.mxu2 %v4001_v14  ;;  %v4206_v62 = vpop.permute.xlu0 %4205 }
0x1389   :  { %4037 = vmatmul.f32.vlgmr.msra.gmra.mxu2 %v7326_v2  ;;  %v4018_v2 = vld [vmem:[%s7959_s23 + $0x108] sm:$0xff] }
0x138c   :  { %v4211_v47 = vpop.permute.xlu1 %4210 }
0x1390   :  { %v4221_v28 = vpop.permute.xlu0 %4220 }
0x1391   :  { %4040 = vmatmul.f32.gmra.mxu2 %v7331_v4  ;;  %v4019_v4 = vld [vmem:[%s7959_s23 + $0x110] sm:$0xff] }
0x13ec   :  { %v3897_v15 = vpop.f32.mrf.mxu2  ;;  %v3985_v5 = vpop.f32.mrf.mxu3 }
0x13ed   :  { %v3909_v59 = vadd.f32 %v3897_v15, %v3821_v40 }
0x13ef   :  { %v3997_v19 = vadd.f32 %v3985_v5, %v3909_v59 }
0x13f4   :  { %v3900_v18 = vpop.f32.mrf.mxu2  ;;  %v3988_v38 = vpop.f32.mrf.mxu3 }
0x13f5   :  { %v3910_v43 = vadd.f32 %v3900_v18, %v3822_v52 }
0x13f7   :  { %v3998_v42 = vadd.f32 %v3988_v38, %v3910_v43 }
0x13fc   :  { %v3903_v35 = vpop.f32.mrf.mxu2  ;;  %v3991_v50 = vpop.f32.mrf.mxu3 }
0x13fd   :  { %v3911_v55 = vadd.f32 %v3903_v35, %v3823_v36  ;;  %v4093_v35 = vld [vmem:[%s7961_s28] sm:$0xf] }
0x13ff   :  { %v3999_v44 = vadd.f32 %v3991_v50, %v3911_v55 }
0x1404   :  { %v7573_v20 = vpop.f32.mrf.mxu2  ;;  %v3994_v37 = vpop.f32.mrf.mxu3 }
0x1405   :  { %v3912_v33 = vadd.f32 %v7573_v20, %v3824_v21  ;;  %v4177_v20 = vpop.permute.xlu2 %4176 }
0x1407   :  { %v4000_v10 = vadd.f32 %v3994_v37, %v3912_v33 }
0x140c   :  { %v4038_v22 = vpop.f32.mrf.mxu2 }
0x140d   :  { %v4216_v41 = vpop.permute.xlu2 %4215 }
0x1414   :  { %v4041_v24 = vpop.f32.mrf.mxu2 }
0x1415   :  { %4070 = vmatpush.msrb.mxu0 %v4041_v24 }
0x1417   :  { %4071 = vmatpush.msrb.mxu0 %v4038_v22 }
0x1418   :  { %5604 = vmatmul.msk.f32.vlgmr.msrb.gmra.mxu0 %vm2315_vm11, %v4017_v25  ;;  %v4095_v25 = vld [vmem:[%s7962_s1] sm:$0xff] }
0x1420   :  { %5605 = vmatmul.msk.f32.gmra.mxu0 %vm2315_vm11, %v4018_v2  ;;  %v4096_v2 = vld [vmem:[%s7962_s1 + $0x8] sm:$0xff] }
0x1428   :  { %5606 = vmatmul.msk.f32.gmra.mxu0 %vm2315_vm11, %v4019_v4  ;;  %v4097_v4 = vld [vmem:[%s7962_s1 + $0x10] sm:$0xff] }
0x1430   :  { %5607 = vmatmul.msk.f32.gmra.mxu0 %vm2315_vm11, %v4020_v26  ;;  %vm4132_vm11 = vcmask 261120   ;;  %v4098_v26 = vld [vmem:[%s7962_s1 + $0x18] sm:$0xff] }
0x1495   :  { %v4073_v45 = vpop.f32.mrf.mxu0 }
0x1496   :  { %v4085_v39 = vadd.f32 %v4073_v45, %v3997_v19 }
0x1498   :  { %v7603_v49 = vadd.f32 %v4111_v16, %v4085_v39  ;;  %v4400_v39 = vld [vmem:[%s7964_s7 + $0x18] sm:$0xff] }
0x1499   :  { %v4449_v16 = vld [vmem:[%s7964_s7 + $0x38] sm:$0xff]  ;;  %4429 = vmatpush.msra.mxu0 %v4400_v39 }
0x149a   :  { %5608 = vmatmul.msk.f32.vlgmr.msrb.gmra.mxu1 %vm4132_vm11, %v7603_v49 }
0x149b   :  { %4466 = vmatpush.msra.mxu1 %v4449_v16 }
0x149d   :  { %v4076_v61 = vpop.f32.mrf.mxu0 }
0x149e   :  { %v4086_v17 = vadd.f32 %v4076_v61, %v3998_v42 }
0x14a0   :  { %v7613_v32 = vadd.f32 %v4116_v48, %v4086_v17 }
0x14a2   :  { %5609 = vmatmul.msk.f32.gmra.mxu1 %vm4132_vm11, %v7613_v32 }
0x14a5   :  { %v4079_v46 = vpop.f32.mrf.mxu0 }
0x14a6   :  { %v4087_v56 = vadd.f32 %v4079_v46, %v3999_v44 }
0x14a8   :  { %v7620_v9 = vadd.f32 %v4121_v8, %v4087_v56 }
0x14aa   :  { %5610 = vmatmul.msk.f32.gmra.mxu1 %vm4132_vm11, %v7620_v9 }
0x14ad   :  { %v4082_v58 = vpop.f32.mrf.mxu0 }
0x14ae   :  { %v4088_v11 = vadd.f32 %v4082_v58, %v4000_v10 }
0x14b0   :  { %v7624_v13 = vadd.f32 %v4126_v12, %v4088_v11 }
0x14b2   :  { %5611 = vmatmul.msk.f32.gmra.mxu1 %vm4132_vm11, %v7624_v13 }
0x1517   :  { %v4162_v60 = vpop.f32.mrf.mxu1 }
0x151f   :  { %v4165_v14 = vpop.f32.mrf.mxu1 }
0x1527   :  { %v4168_v15 = vpop.f32.mrf.mxu1 }
0x152f   :  { %v4171_v18 = vpop.f32.mrf.mxu1 }
0x1530   :  { %4194 = vmatpush.msrb.mxu3 %v4171_v18 }
0x1532   :  { %4195 = vmatpush.msrb.mxu3 %v4168_v15 }
0x1534   :  { %4196 = vmatpush.msrb.mxu3 %v4165_v14 }
0x1536   :  { %4197 = vmatpush.msrb.mxu3 %v4162_v60 }
0x1537   :  { %5612 = vmatmul.msk.f32.vlgmr.msrb.gmra.mxu3 %vm4132_vm11, %v4093_v35 }
0x1538   :  { %5622 = vmatpush.msk.msra.mxu3 %vm564_vm5, %v4107_v27 }
0x15ba   :  { %v4199_v22 = vpop.f32.mrf.mxu3 }
0x15bb   :  { %v4200_v23 = vadd.f32 %v4199_v22, %v4177_v20 }
0x15bd   :  { %v4202_v24 = vmax.f32 %v4200_v23, 0.0 }
0x15bf   :  { %5613 = vmatpush.msk.msrb.mxu2 %vm4236_vm15, %v4202_v24 }
0x15c0   :  { %5614 = vmatmul.msk.f32.vlgmr.msrb.gmra.mxu2 %vm4223_vm0, %v4095_v25 }
0x15c8   :  { %5615 = vmatmul.msk.f32.gmra.mxu2 %vm4223_vm0, %v4096_v2 }
0x15d0   :  { %5616 = vmatmul.msk.f32.gmra.mxu2 %vm4223_vm0, %v4097_v4 }
0x15d8   :  { %5617 = vmatmul.msk.f32.gmra.mxu2 %vm4223_vm0, %v4098_v26 }
0x1643   :  { %v4257_v63 = vpop.f32.mrf.mxu2 }
0x1644   :  { %v4258_v0 = vadd.f32 %v4257_v63, %v4206_v62 }
0x1646   :  { %v5618_v1 = vmul.f32 -1.442695, %v4258_v0 }
0x1648   :  { %5788 = vpow2.f32 %v5618_v1 }
0x164b   :  { %v4260_v3 = vpop.f32.mrf.mxu2 }
0x164c   :  { %v4261_v29 = vadd.f32 %v4260_v3, %v4211_v47 }
0x164e   :  { %v5789_v5 = vpop.eup %5788  ;;  %v5619_v6 = vmul.f32 -1.442695, %v4261_v29  ;;  %v4399_v29 = vld [vmem:[%s7964_s7 + $0x10] sm:$0xff] }
0x164f   :  { %v4281_v40 = vadd.f32 1.0, %v5789_v5  ;;  %v4448_v5 = vld [vmem:[%s7964_s7 + $0x30] sm:$0xff]  ;;  %4430 = vmatpush.msra.mxu0 %v4399_v29  ;;  %v4570_v29 = vld [vmem:[%s7965_s10 + $0x48] sm:$0xff] }
0x1650   :  { %5790 = vpow2.f32 %v5619_v6  ;;  %4467 = vmatpush.msra.mxu1 %v4448_v5  ;;  %v4398_v6 = vld [vmem:[%s7964_s7 + $0x8] sm:$0xff] }
0x1651   :  { %5792 = vrcp.f32 %v4281_v40  ;;  %v4296_v53 = vand.u32 2147483648, %v4281_v40  ;;  %v4294_v42 = vand.u32 2147483647, %v4281_v40  ;;  %vm4290_vm2 = vweird.f32 %v4281_v40  ;;  %4431 = vmatpush.msra.mxu0 %v4398_v6  ;;  %v4571_v6 = vld [vmem:[%s7965_s10 + $0x50] sm:$0xff] }
0x1653   :  { %v4263_v59 = vpop.f32.mrf.mxu2  ;;  %v4297_v51 = vor.u32 1.1754944e-38, %v4296_v53  ;;  %vm4295_vm4 = vcmp.eq.f32.partialorder %v4294_v42, 8.507059e+37  ;;  %v4731_v42 = vld [vmem:[%s7964_s7 + $0x90] sm:$0xff] }
0x1654   :  { %v4264_v31 = vadd.f32 %v4263_v59, %v4216_v41  ;;  %v4397_v41 = vld [vmem:[%s7964_s7] sm:$0xff] }
0x1655   :  { %v4446_v59 = vld [vmem:[%s7964_s7 + $0x20] sm:$0xff]  ;;  %4432 = vmatpush.msra.mxu0 %v4397_v41  ;;  %v4572_v41 = vld [vmem:[%s7965_s10 + $0x58] sm:$0xff] }
0x1656   :  { %v5791_v7 = vpop.eup %5790  ;;  %v5620_v34 = vmul.f32 -1.442695, %v4264_v31  ;;  %v4568_v31 = vld [vmem:[%s7964_s7 + $0x58] sm:$0xff] }
0x1657   :  { %v5793_v19 = vpop.eup %5792  ;;  %v4282_v38 = vadd.f32 1.0, %v5791_v7  ;;  %v4567_v7 = vld [vmem:[%s7964_s7 + $0x50] sm:$0xff]  ;;  %4585 = vmatpush.msrb.mxu0 %v4568_v31  ;;  %v4978_v31 = vld [vmem:[%s7964_s7 + $0xf8] sm:$0xff] }
0x1658   :  { %v4286_v45 = vmul.f32 %v5793_v19, %v4281_v40  ;;  %5794 = vpow2.f32 %v5620_v34  ;;  %vm4291_vm1 = vweird.f32 %v5793_v19  ;;  %v4447_v40 = vld [vmem:[%s7964_s7 + $0x28] sm:$0xff] }
0x1659   :  { %5796 = vrcp.f32 %v4282_v38  ;;  %vm4292_vm3 = vmor %vm4290_vm2, %vm4291_vm1  ;;  %v4311_v21 = vand.u32 2147483648, %v4282_v38  ;;  %v4309_v8 = vand.u32 2147483647, %v4282_v38  ;;  %vm4305_vm7 = vweird.f32 %v4282_v38  ;;  %4468 = vmatpush.msra.mxu1 %v4447_v40  ;;  %v4566_v34 = vld [vmem:[%s7964_s7 + $0x48] sm:$0xff]  ;;  %4586 = vmatpush.msrb.mxu0 %v4567_v7  ;;  %v4977_v7 = vld [vmem:[%s7964_s7 + $0xf0] sm:$0xff] }
0x165a   :  { %v4287_v52 = vsub.f32 1.0, %v4286_v45  ;;  %v4565_v45 = vld [vmem:[%s7964_s7 + $0x40] sm:$0xff] }
0x165b   :  { %v4266_v43 = vpop.f32.mrf.mxu2  ;;  %v4312_v11 = vor.u32 1.1754944e-38, %v4311_v21  ;;  %vm4310_vm10 = vcmp.eq.f32.partialorder %v4309_v8, 8.507059e+37  ;;  %4469 = vmatpush.msra.mxu1 %v4446_v59  ;;  %4587 = vmatpush.msrb.mxu0 %v4566_v34  ;;  %v4976_v34 = vld [vmem:[%s7964_s7 + $0xe8] sm:$0xff] }
0x165c   :  { %v4267_v54 = vadd.f32 %v4266_v43, %v4221_v28  ;;  %v4288_v30 = vmul.f32 %v5793_v19, %v4287_v52 }
0x165d   :  { %4588 = vmatpush.msrb.mxu0 %v4565_v45 }
0x165e   :  { %v5795_v61 = vpop.eup %5794  ;;  %v5621_v36 = vmul.f32 -1.442695, %v4267_v54  ;;  %v4289_v17 = vadd.f32 %v5793_v19, %v4288_v30 }
0x165f   :  { %v5797_v48 = vpop.eup %5796  ;;  %v4283_v50 = vadd.f32 1.0, %v5795_v61  ;;  %v4730_v61 = vld [vmem:[%s7964_s7 + $0x88] sm:$0xff] }
0x1660   :  { %5798 = vpow2.f32 %v5621_v36  ;;  %v4293_v55 = vsel %vm4292_vm3, %v5793_v19, %v4289_v17  ;;  %v4301_v57 = vmul.f32 %v5797_v48, %v4282_v38  ;;  %vm4306_vm6 = vweird.f32 %v5797_v48  ;;  %v4729_v36 = vld [vmem:[%s7964_s7 + $0x80] sm:$0xff]  ;;  %v4895_v17 = vld [vmem:[%s7964_s7 + $0xd0] sm:$0xff] }
0x1661   :  { %5800 = vrcp.f32 %v4283_v50  ;;  %v4298_v44 = vsel %vm4295_vm4, %v4297_v51, %v4293_v55  ;;  %vm4307_vm8 = vmor %vm4305_vm7, %vm4306_vm6  ;;  %v4326_v18 = vand.u32 2147483648, %v4283_v50  ;;  %v4324_v20 = vand.u32 2147483647, %v4283_v50  ;;  %v5060_v51 = vld [vmem:[%s7964_s7 + $0x118] sm:$0xff]  ;;  %v5059_v55 = vld [vmem:[%s7964_s7 + $0x110] sm:$0xff] }
0x1662   :  { %5623 = vmatmul.msk.f32.vlgmr.msra.gmra.mxu3 %vm560_vm9, %v4298_v44  ;;  %v4302_v46 = vsub.f32 1.0, %v4301_v57  ;;  %vm4320_vm13 = vweird.f32 %v4283_v50  ;;  %v5058_v57 = vld [vmem:[%s7964_s7 + $0x108] sm:$0xff]  ;;  %v5057_v44 = vld [vmem:[%s7964_s7 + $0x100] sm:$0xff] }
0x1663   :  { %v4327_v24 = vor.u32 1.1754944e-38, %v4326_v18  ;;  %vm4325_vm1 = vcmp.eq.f32.partialorder %v4324_v20, 8.507059e+37  ;;  %v4648_v18 = vld [vmem:[%s7964_s7 + $0x68] sm:$0xff] }
0x1664   :  { %v4303_v56 = vmul.f32 %v5797_v48, %v4302_v46  ;;  %v4451_v20 = vld [vmem:[%s7965_s10 + $0x28] sm:$0xff] }
0x1666   :  { %v5799_v33 = vpop.eup %5798  ;;  %v4304_v37 = vadd.f32 %v5797_v48, %v4303_v56 }
0x1667   :  { %v5801_v10 = vpop.eup %5800  ;;  %v4284_v58 = vadd.f32 1.0, %v5799_v33 }
0x1668   :  { %v4308_v12 = vsel %vm4307_vm8, %v5797_v48, %v4304_v37  ;;  %v4316_v60 = vmul.f32 %v5801_v10, %v4283_v50  ;;  %vm4321_vm12 = vweird.f32 %v5801_v10  ;;  %v4894_v48 = vld [vmem:[%s7964_s7 + $0xc8] sm:$0xff]  ;;  %v4893_v50 = vld [vmem:[%s7964_s7 + $0xc0] sm:$0xff] }
0x1669   :  { %5802 = vrcp.f32 %v4284_v58  ;;  %v4313_v14 = vsel %vm4310_vm10, %v4312_v11, %v4308_v12  ;;  %vm4322_vm14 = vmor %vm4320_vm13, %vm4321_vm12  ;;  %v4341_v27 = vand.u32 2147483648, %v4284_v58  ;;  %v4339_v63 = vand.u32 2147483647, %v4284_v58  ;;  %v4450_v11 = vld [vmem:[%s7965_s10 + $0x20] sm:$0xff] }
0x166a   :  { %5624 = vmatmul.msk.f32.gmra.mxu3 %vm560_vm9, %v4313_v14  ;;  %v4317_v15 = vsub.f32 1.0, %v4316_v60  ;;  %vm4335_vm3 = vweird.f32 %v4284_v58  ;;  %v4401_v12 = vld [vmem:[%s7965_s10] sm:$0xff]  ;;  %v4650_v60 = vld [vmem:[%s7964_s7 + $0x78] sm:$0xff] }
0x166b   :  { %v4342_v1 = vor.u32 1.1754944e-38, %v4341_v27  ;;  %vm4340_vm6 = vcmp.eq.f32.partialorder %v4339_v63, 8.507059e+37  ;;  %v4813_v63 = vld [vmem:[%s7964_s7 + $0xb0] sm:$0xff] }
0x166c   :  { %v4318_v35 = vmul.f32 %v5801_v10, %v4317_v15  ;;  %v4649_v15 = vld [vmem:[%s7964_s7 + $0x70] sm:$0xff] }
0x166e   :  { %v4319_v22 = vadd.f32 %v5801_v10, %v4318_v35  ;;  %v4647_v35 = vld [vmem:[%s7964_s7 + $0x60] sm:$0xff] }
0x166f   :  { %v5803_v23 = vpop.eup %5802 }
0x1670   :  { %v4323_v25 = vsel %vm4322_vm14, %v5801_v10, %v4319_v22  ;;  %v4331_v2 = vmul.f32 %v5803_v23, %v4284_v58  ;;  %vm4336_vm2 = vweird.f32 %v5803_v23  ;;  %v4402_v22 = vld [vmem:[%s7965_s10 + $0x8] sm:$0xff] }
0x1671   :  { %v4328_v4 = vsel %vm4325_vm1, %v4327_v24, %v4323_v25  ;;  %vm4337_vm4 = vmor %vm4335_vm3, %vm4336_vm2  ;;  %v4452_v24 = vld [vmem:[%s7965_s10 + $0x30] sm:$0xff] }
0x1672   :  { %5625 = vmatmul.msk.f32.gmra.mxu3 %vm560_vm9, %v4328_v4  ;;  %v4332_v26 = vsub.f32 1.0, %v4331_v2  ;;  %v4403_v25 = vld [vmem:[%s7965_s10 + $0x10] sm:$0xff]  ;;  %v4453_v4 = vld [vmem:[%s7965_s10 + $0x38] sm:$0xff] }
0x1674   :  { %v4333_v62 = vmul.f32 %v5803_v23, %v4332_v26  ;;  %v4404_v26 = vld [vmem:[%s7965_s10 + $0x18] sm:$0xff] }
0x1676   :  { %v4334_v0 = vadd.f32 %v5803_v23, %v4333_v62  ;;  %v4814_v62 = vld [vmem:[%s7964_s7 + $0xb8] sm:$0xff] }
0x1678   :  { %v4338_v47 = vsel %vm4337_vm4, %v5803_v23, %v4334_v0  ;;  %v4569_v0 = vld [vmem:[%s7965_s10 + $0x40] sm:$0xff] }
0x1679   :  { %v4343_v3 = vsel %vm4340_vm6, %v4342_v1, %v4338_v47  ;;  %v4812_v1 = vld [vmem:[%s7964_s7 + $0xa8] sm:$0xff]  ;;  %v4811_v47 = vld [vmem:[%s7964_s7 + $0xa0] sm:$0xff] }
0x167a   :  { %5626 = vmatmul.msk.f32.gmra.mxu3 %vm560_vm9, %v4343_v3 }
0x16e5   :  { %v4377_v19 = vpop.f32.mrf.mxu3 }
0x16e6   :  { %v4389_v38 = vmul.f32 %v4377_v19, %v7603_v49  ;;  %v4975_v19 = vld [vmem:[%s7964_s7 + $0xe0] sm:$0xff] }
0x16e8   :  { %v7658_v52 = vmax.f32 %v4389_v38, 0.0 }
0x16ea   :  { %5627 = vmatmul.msk.f32.vlgmr.msra.gmra.mxu0 %vm4132_vm11, %v7658_v52  ;;  %5631 = vmatmul.msk.f32.vlgmr.msra.gmra.mxu1 %vm4132_vm11, %v7658_v52 }
0x16ed   :  { %v4380_v39 = vpop.f32.mrf.mxu3 }
0x16ee   :  { %v4390_v16 = vmul.f32 %v4380_v39, %v7613_v32 }
0x16f0   :  { %v7665_v28 = vmax.f32 %v4390_v16, 0.0 }
0x16f2   :  { %5628 = vmatmul.msk.f32.gmra.mxu0 %vm4132_vm11, %v7665_v28  ;;  %5632 = vmatmul.msk.f32.gmra.mxu1 %vm4132_vm11, %v7665_v28 }
0x16f5   :  { %v4383_v49 = vpop.f32.mrf.mxu3 }
0x16f6   :  { %v4391_v43 = vmul.f32 %v4383_v49, %v7620_v9  ;;  %v4732_v9 = vld [vmem:[%s7964_s7 + $0x98] sm:$0xff]  ;;  %v4733_v49 = vld [vmem:[%s7965_s10 + $0x80] sm:$0xff] }
0x16f7   :  { %4749 = vmatpush.msra.mxu0 %v4732_v9 }
0x16f8   :  { %v7672_v53 = vmax.f32 %v4391_v43, 0.0 }
0x16f9   :  { %4750 = vmatpush.msra.mxu0 %v4731_v42 }
0x16fa   :  { %5629 = vmatmul.msk.f32.gmra.mxu0 %vm4132_vm11, %v7672_v53  ;;  %5633 = vmatmul.msk.f32.gmra.mxu1 %vm4132_vm11, %v7672_v53 }
0x16fb   :  { %4751 = vmatpush.msra.mxu0 %v4730_v61 }
0x16fd   :  { %v4386_v32 = vpop.f32.mrf.mxu3  ;;  %4752 = vmatpush.msra.mxu0 %v4729_v36 }
0x16fe   :  { %v4392_v54 = vmul.f32 %v4386_v32, %v7624_v13  ;;  %v4896_v13 = vld [vmem:[%s7964_s7 + $0xd8] sm:$0xff] }
0x1700   :  { %v7679_v30 = vmax.f32 %v4392_v54, 0.0 }
0x1702   :  { %5630 = vmatmul.msk.f32.gmra.mxu0 %vm4132_vm11, %v7679_v30  ;;  %5634 = vmatmul.msk.f32.gmra.mxu1 %vm4132_vm11, %v7679_v30 }
0x170a   :  { %5643 = vmatmul.msk.f32.vlgmr.msrb.gmra.mxu0 %vm4132_vm11, %v7658_v52 }
0x170b   :  { %4913 = vmatpush.msrb.mxu0 %v4896_v13 }
0x170d   :  { %4914 = vmatpush.msrb.mxu0 %v4895_v17 }
0x170f   :  { %4915 = vmatpush.msrb.mxu0 %v4894_v48 }
0x1711   :  { %4916 = vmatpush.msrb.mxu0 %v4893_v50 }
0x1712   :  { %5644 = vmatmul.msk.f32.gmra.mxu0 %vm4132_vm11, %v7665_v28 }
0x171a   :  { %5645 = vmatmul.msk.f32.gmra.mxu0 %vm4132_vm11, %v7672_v53 }
0x1722   :  { %5646 = vmatmul.msk.f32.gmra.mxu0 %vm4132_vm11, %v7679_v30 }
0x172a   :  { %5659 = vmatmul.msk.f32.vlgmr.msra.gmra.mxu0 %vm4132_vm11, %v7658_v52 }
0x172b   :  { %5077 = vmatpush.msra.mxu0 %v5060_v51 }
0x172d   :  { %5078 = vmatpush.msra.mxu0 %v5059_v55 }
0x172f   :  { %5079 = vmatpush.msra.mxu0 %v5058_v57 }
0x1731   :  { %5080 = vmatpush.msra.mxu0 %v5057_v44 }
0x1732   :  { %5660 = vmatmul.msk.f32.gmra.mxu0 %vm4132_vm11, %v7665_v28 }
0x173a   :  { %5661 = vmatmul.msk.f32.gmra.mxu0 %vm4132_vm11, %v7672_v53 }
0x1742   :  { %5662 = vmatmul.msk.f32.gmra.mxu0 %vm4132_vm11, %v7679_v30 }
0x174a   :  { %5675 = vmatmul.msk.f32.vlgmr.msrb.gmra.mxu0 %vm4132_vm11, %v7658_v52 }
0x1752   :  { %5676 = vmatmul.msk.f32.gmra.mxu0 %vm4132_vm11, %v7665_v28 }
0x175a   :  { %5677 = vmatmul.msk.f32.gmra.mxu0 %vm4132_vm11, %v7672_v53 }
0x1762   :  { %5678 = vmatmul.msk.f32.gmra.mxu0 %vm4132_vm11, %v7679_v30 }
0x1767   :  { %v4434_v46 = vpop.f32.mrf.mxu0  ;;  %v4471_v21 = vpop.f32.mrf.mxu1 }
0x176a   :  { %5691 = vmatmul.msk.f32.vlgmr.msra.gmra.mxu0 %vm4132_vm11, %v7658_v52 }
0x176f   :  { %v4437_v56 = vpop.f32.mrf.mxu0  ;;  %v4474_v8 = vpop.f32.mrf.mxu1 }
0x1772   :  { %5692 = vmatmul.msk.f32.gmra.mxu0 %vm4132_vm11, %v7665_v28 }
0x1777   :  { %v4440_v33 = vpop.f32.mrf.mxu0  ;;  %v4477_v37 = vpop.f32.mrf.mxu1 }
0x177a   :  { %5693 = vmatmul.msk.f32.gmra.mxu0 %vm4132_vm11, %v7672_v53 }
0x177f   :  { %v4443_v10 = vpop.f32.mrf.mxu0  ;;  %v4480_v58 = vpop.f32.mrf.mxu1 }
0x1780   :  { %4507 = vmatpush.msra.mxu2 %v4480_v58  ;;  %4548 = vmatpush.msrb.mxu3 %v4443_v10  ;;  %v4735_v10 = vld [vmem:[%s7965_s10 + $0x90] sm:$0xff]  ;;  %v4651_v58 = vld [vmem:[%s7965_s10 + $0x60] sm:$0xff] }
0x1782   :  { %4508 = vmatpush.msra.mxu2 %v4477_v37  ;;  %4549 = vmatpush.msrb.mxu3 %v4440_v33  ;;  %v4734_v33 = vld [vmem:[%s7965_s10 + $0x88] sm:$0xff] }
0x1783   :  { %5694 = vmatmul.msk.f32.gmra.mxu0 %vm4132_vm11, %v7679_v30 }
0x1784   :  { %4509 = vmatpush.msra.mxu2 %v4474_v8  ;;  %4550 = vmatpush.msrb.mxu3 %v4437_v56 }
0x1786   :  { %4510 = vmatpush.msra.mxu2 %v4471_v21  ;;  %4551 = vmatpush.msrb.mxu3 %v4434_v46 }
0x1787   :  { %5635 = vmatmul.msk.f32.vlgmr.msra.gmra.mxu2 %vm4132_vm11, %v4450_v11  ;;  %5639 = vmatmul.msk.f32.vlgmr.msrb.gmra.mxu3 %vm4132_vm11, %v4401_v12  ;;  %v4590_v14 = vpop.f32.mrf.mxu0  ;;  %v4736_v11 = vld [vmem:[%s7965_s10 + $0x98] sm:$0xff] }
0x1788   :  { %4667 = vmatpush.msrb.mxu2 %v4650_v60  ;;  %v4652_v60 = vld [vmem:[%s7965_s10 + $0x68] sm:$0xff] }
0x178a   :  { %4668 = vmatpush.msrb.mxu2 %v4649_v15  ;;  %v4897_v15 = vld [vmem:[%s7965_s10 + $0xc0] sm:$0xff] }
0x178c   :  { %4669 = vmatpush.msrb.mxu2 %v4648_v18  ;;  %v4653_v18 = vld [vmem:[%s7965_s10 + $0x70] sm:$0xff] }
0x178e   :  { %4670 = vmatpush.msrb.mxu2 %v4647_v35 }
0x178f   :  { %5636 = vmatmul.msk.f32.gmra.mxu2 %vm4132_vm11, %v4451_v20  ;;  %5640 = vmatmul.msk.f32.gmra.mxu3 %vm4132_vm11, %v4402_v22  ;;  %v4593_v23 = vpop.f32.mrf.mxu0  ;;  %v4898_v20 = vld [vmem:[%s7965_s10 + $0xc8] sm:$0xff]  ;;  %v4654_v22 = vld [vmem:[%s7965_s10 + $0x78] sm:$0xff] }
0x1790   :  { %4831 = vmatpush.msra.mxu2 %v4814_v62  ;;  %v5061_v62 = vld [vmem:[%s7965_s10 + $0x100] sm:$0xff] }
0x1792   :  { %4832 = vmatpush.msra.mxu2 %v4813_v63  ;;  %v4817_v63 = vld [vmem:[%s7965_s10 + $0xb0] sm:$0xff] }
0x1794   :  { %4833 = vmatpush.msra.mxu2 %v4812_v1  ;;  %v5062_v1 = vld [vmem:[%s7965_s10 + $0x108] sm:$0xff] }
0x1796   :  { %4834 = vmatpush.msra.mxu2 %v4811_v47  ;;  %v4818_v47 = vld [vmem:[%s7965_s10 + $0xb8] sm:$0xff] }
0x1797   :  { %5637 = vmatmul.msk.f32.gmra.mxu2 %vm4132_vm11, %v4452_v24  ;;  %5641 = vmatmul.msk.f32.gmra.mxu3 %vm4132_vm11, %v4403_v25  ;;  %v4596_v2 = vpop.f32.mrf.mxu0  ;;  %v4899_v24 = vld [vmem:[%s7965_s10 + $0xd0] sm:$0xff]  ;;  %v4815_v25 = vld [vmem:[%s7965_s10 + $0xa0] sm:$0xff] }
0x179f   :  { %5638 = vmatmul.msk.f32.gmra.mxu2 %vm4132_vm11, %v4453_v4  ;;  %5642 = vmatmul.msk.f32.gmra.mxu3 %vm4132_vm11, %v4404_v26  ;;  %v4599_v27 = vpop.f32.mrf.mxu0  ;;  %v4816_v26 = vld [vmem:[%s7965_s10 + $0xa8] sm:$0xff] }
0x17a0   :  { %4626 = vmatpush.msrb.mxu1 %v4599_v27 }
0x17a2   :  { %4627 = vmatpush.msrb.mxu1 %v4596_v2  ;;  %v4900_v2 = vld [vmem:[%s7965_s10 + $0xd8] sm:$0xff] }
0x17a4   :  { %4628 = vmatpush.msrb.mxu1 %v4593_v23 }
0x17a6   :  { %4629 = vmatpush.msrb.mxu1 %v4590_v14 }
0x17a7   :  { %5647 = vmatmul.msk.f32.vlgmr.msrb.gmra.mxu1 %vm4132_vm11, %v4569_v0  ;;  %5651 = vmatmul.msk.f32.vlgmr.msrb.gmra.mxu2 %vm4132_vm11, %v7658_v52  ;;  %v4754_v3 = vpop.f32.mrf.mxu0 }
0x17a8   :  { %4995 = vmatpush.msrb.mxu2 %v4978_v31 }
0x17aa   :  { %4996 = vmatpush.msrb.mxu2 %v4977_v7 }
0x17ac   :  { %4997 = vmatpush.msrb.mxu2 %v4976_v34 }
0x17ae   :  { %4998 = vmatpush.msrb.mxu2 %v4975_v19 }
0x17af   :  { %5648 = vmatmul.msk.f32.gmra.mxu1 %vm4132_vm11, %v4570_v29  ;;  %5652 = vmatmul.msk.f32.gmra.mxu2 %vm4132_vm11, %v7665_v28  ;;  %v4757_v5 = vpop.f32.mrf.mxu0  ;;  %v5063_v29 = vld [vmem:[%s7965_s10 + $0x110] sm:$0xff] }
0x17b7   :  { %5649 = vmatmul.msk.f32.gmra.mxu1 %vm4132_vm11, %v4571_v6  ;;  %5653 = vmatmul.msk.f32.gmra.mxu2 %vm4132_vm11, %v7672_v53  ;;  %v4760_v40 = vpop.f32.mrf.mxu0  ;;  %v5064_v6 = vld [vmem:[%s7965_s10 + $0x118] sm:$0xff] }
0x17bf   :  { %5650 = vmatmul.msk.f32.gmra.mxu1 %vm4132_vm11, %v4572_v41  ;;  %5654 = vmatmul.msk.f32.gmra.mxu2 %vm4132_vm11, %v7679_v30  ;;  %v4763_v59 = vpop.f32.mrf.mxu0  ;;  %v4981_v41 = vld [vmem:[%s7965_s10 + $0xf0] sm:$0xff] }
0x17c0   :  { %4790 = vmatpush.msra.mxu1 %v4763_v59  ;;  %v4982_v59 = vld [vmem:[%s7965_s10 + $0xf8] sm:$0xff] }
0x17c2   :  { %4791 = vmatpush.msra.mxu1 %v4760_v40  ;;  %v4980_v40 = vld [vmem:[%s7965_s10 + $0xe8] sm:$0xff] }
0x17c4   :  { %4792 = vmatpush.msra.mxu1 %v4757_v5  ;;  %v4979_v5 = vld [vmem:[%s7965_s10 + $0xe0] sm:$0xff] }
0x17c6   :  { %4793 = vmatpush.msra.mxu1 %v4754_v3 }
0x17c7   :  { %5667 = vmatmul.msk.f32.vlgmr.msra.gmra.mxu2 %vm4132_vm11, %v7658_v52  ;;  %v4918_v38 = vpop.f32.mrf.mxu0  ;;  %5663 = vmatmul.msk.f32.vlgmr.msra.gmra.mxu1 %vm4132_vm11, %v4733_v49 }
0x17cf   :  { %5668 = vmatmul.msk.f32.gmra.mxu2 %vm4132_vm11, %v7665_v28  ;;  %v4921_v45 = vpop.f32.mrf.mxu0  ;;  %5664 = vmatmul.msk.f32.gmra.mxu1 %vm4132_vm11, %v4734_v33 }
0x17d7   :  { %5669 = vmatmul.msk.f32.gmra.mxu2 %vm4132_vm11, %v7672_v53  ;;  %v4924_v39 = vpop.f32.mrf.mxu0  ;;  %5665 = vmatmul.msk.f32.gmra.mxu1 %vm4132_vm11, %v4735_v10 }
0x17df   :  { %5670 = vmatmul.msk.f32.gmra.mxu2 %vm4132_vm11, %v7679_v30  ;;  %v4927_v16 = vpop.f32.mrf.mxu0  ;;  %5666 = vmatmul.msk.f32.gmra.mxu1 %vm4132_vm11, %v4736_v11 }
0x17e0   :  { %4954 = vmatpush.msrb.mxu1 %v4927_v16 }
0x17e2   :  { %4955 = vmatpush.msrb.mxu1 %v4924_v39 }
0x17e4   :  { %4956 = vmatpush.msrb.mxu1 %v4921_v45 }
0x17e6   :  { %4957 = vmatpush.msrb.mxu1 %v4918_v38 }
0x17e7   :  { %5683 = vmatmul.msk.f32.vlgmr.msrb.gmra.mxu2 %vm4132_vm11, %v7658_v52  ;;  %v5082_v43 = vpop.f32.mrf.mxu0  ;;  %5679 = vmatmul.msk.f32.vlgmr.msrb.gmra.mxu1 %vm4132_vm11, %v4897_v15 }
0x17ef   :  { %5684 = vmatmul.msk.f32.gmra.mxu2 %vm4132_vm11, %v7665_v28  ;;  %v5085_v32 = vpop.f32.mrf.mxu0  ;;  %5680 = vmatmul.msk.f32.gmra.mxu1 %vm4132_vm11, %v4898_v20 }
0x17f7   :  { %5685 = vmatmul.msk.f32.gmra.mxu2 %vm4132_vm11, %v7672_v53  ;;  %v5088_v54 = vpop.f32.mrf.mxu0  ;;  %5681 = vmatmul.msk.f32.gmra.mxu1 %vm4132_vm11, %v4899_v24 }
0x17ff   :  { %5686 = vmatmul.msk.f32.gmra.mxu2 %vm4132_vm11, %v7679_v30  ;;  %5682 = vmatmul.msk.f32.gmra.mxu1 %vm4132_vm11, %v4900_v2 }
0x1800   :  { %v5091_v9 = vpop.f32.mrf.mxu0 }
0x1801   :  { %5118 = vmatpush.msra.mxu1 %v5091_v9 }
0x1803   :  { %5119 = vmatpush.msra.mxu1 %v5088_v54 }
0x1805   :  { %5120 = vmatpush.msra.mxu1 %v5085_v32 }
0x1807   :  { %5121 = vmatpush.msra.mxu1 %v5082_v43 }
0x1808   :  { %5695 = vmatmul.msk.f32.vlgmr.msra.gmra.mxu1 %vm4132_vm11, %v5061_v62 }
0x180a   :  { %v4512_v42 = vpop.f32.mrf.mxu2  ;;  %v4553_v61 = vpop.f32.mrf.mxu3 }
0x180b   :  { %v4554_v52 = vadd.f32 %v4553_v61, %v4512_v42  ;;  %v5156_v42 = vld [vmem:[%s6114_s12 + $0x18] sm:$0xff]  ;;  %v5155_v61 = vld [vmem:[%s6114_s12 + $0x10] sm:$0xff] }
0x180c   :  { %5206 = vmatpush.msra.mxu2 %v5156_v42  ;;  %v5157_v42 = vld [vmem:[%s6119_s14] sm:$0x3] }
0x180d   :  { %5713 = vmatpush.msk.msrb.mxu0 %vm564_vm5, %v5157_v42 }
0x180e   :  { %5207 = vmatpush.msra.mxu2 %v5155_v61 }
0x1810   :  { %5696 = vmatmul.msk.f32.gmra.mxu1 %vm4132_vm11, %v5062_v1 }
0x1812   :  { %v4515_v36 = vpop.f32.mrf.mxu2  ;;  %v4556_v13 = vpop.f32.mrf.mxu3 }
0x1813   :  { %v4557_v28 = vadd.f32 %v4556_v13, %v4515_v36  ;;  %v5153_v36 = vld [vmem:[%s6114_s12] sm:$0xff] }
0x1818   :  { %5697 = vmatmul.msk.f32.gmra.mxu1 %vm4132_vm11, %v5063_v29 }
0x181a   :  { %v4518_v17 = vpop.f32.mrf.mxu2  ;;  %v4559_v48 = vpop.f32.mrf.mxu3 }
0x181b   :  { %v4560_v53 = vadd.f32 %v4559_v48, %v4518_v17 }
0x1820   :  { %5698 = vmatmul.msk.f32.gmra.mxu1 %vm4132_vm11, %v5064_v6 }
0x1822   :  { %v7791_v50 = vpop.f32.mrf.mxu2  ;;  %v4562_v19 = vpop.f32.mrf.mxu3 }
0x1824   :  { %v4631_v51 = vpop.f32.mrf.mxu1 }
0x1825   :  { %v7793_v30 = vadd.f32 %v4631_v51, %v4554_v52  ;;  %v5154_v52 = vld [vmem:[%s6114_s12 + $0x8] sm:$0xff]  ;;  %s7966_s12 = sld [smem:[#allocation30_spill]] }
0x1826   :  { %5208 = vmatpush.msra.mxu2 %v5154_v52 }
0x1828   :  { %5209 = vmatpush.msra.mxu2 %v5153_v36 }
0x182a   :  { %v4672_v55 = vpop.f32.mrf.mxu2 }
0x182c   :  { %v4634_v57 = vpop.f32.mrf.mxu1 }
0x182d   :  { %v7795_v44 = vadd.f32 %v4634_v57, %v4557_v28 }
0x1832   :  { %v4675_v46 = vpop.f32.mrf.mxu2 }
0x1834   :  { %v4637_v21 = vpop.f32.mrf.mxu1 }
0x1835   :  { %v7797_v56 = vadd.f32 %v4637_v21, %v4560_v53 }
0x183a   :  { %v4678_v8 = vpop.f32.mrf.mxu2 }
0x183c   :  { %v4640_v31 = vpop.f32.mrf.mxu1 }
0x1842   :  { %v4681_v37 = vpop.f32.mrf.mxu2 }
0x1843   :  { %4708 = vmatpush.msra.mxu3 %v4681_v37 }
0x1844   :  { %v4795_v7 = vpop.f32.mrf.mxu1 }
0x1845   :  { %4709 = vmatpush.msra.mxu3 %v4678_v8 }
0x1847   :  { %4710 = vmatpush.msra.mxu3 %v4675_v46 }
0x1849   :  { %4711 = vmatpush.msra.mxu3 %v4672_v55 }
0x184a   :  { %5655 = vmatmul.msk.f32.vlgmr.msra.gmra.mxu3 %vm4132_vm11, %v4651_v58  ;;  %v4836_v12 = vpop.f32.mrf.mxu2 }
0x184c   :  { %v4798_v34 = vpop.f32.mrf.mxu1 }
0x1852   :  { %5656 = vmatmul.msk.f32.gmra.mxu3 %vm4132_vm11, %v4652_v60  ;;  %v4839_v14 = vpop.f32.mrf.mxu2 }
0x1854   :  { %v4801_v38 = vpop.f32.mrf.mxu1 }
0x185a   :  { %5657 = vmatmul.msk.f32.gmra.mxu3 %vm4132_vm11, %v4653_v18  ;;  %v4842_v35 = vpop.f32.mrf.mxu2 }
0x185c   :  { %v4804_v16 = vpop.f32.mrf.mxu1 }
0x1862   :  { %5658 = vmatmul.msk.f32.gmra.mxu3 %vm4132_vm11, %v4654_v22  ;;  %v4845_v23 = vpop.f32.mrf.mxu2 }
0x1863   :  { %4872 = vmatpush.msrb.mxu3 %v4845_v23 }
0x1864   :  { %v4959_v43 = vpop.f32.mrf.mxu1 }
0x1865   :  { %4873 = vmatpush.msrb.mxu3 %v4842_v35  ;;  %v4563_v35 = vadd.f32 %v4562_v19, %v7791_v50  ;;  %v5171_v50 = vpop.permute.xlu0 %5170 }
0x1867   :  { %4874 = vmatpush.msrb.mxu3 %v4839_v14  ;;  %v4646_v22 = vadd.f32 %v4640_v31, %v4563_v35 }
0x1869   :  { %4875 = vmatpush.msrb.mxu3 %v4836_v12  ;;  %v5161_v12 = vpop.permute.xlu1 %5160 }
0x186a   :  { %5671 = vmatmul.msk.f32.vlgmr.msrb.gmra.mxu3 %vm4132_vm11, %v4815_v25  ;;  %v5000_v4 = vpop.f32.mrf.mxu2  ;;  %v5166_v25 = vpop.permute.xlu2 %5165 }
0x186c   :  { %v4962_v54 = vpop.f32.mrf.mxu1 }
0x186d   :  { %v5255_v61 = vpop.permute.xlu0 %5254 }
0x1872   :  { %5672 = vmatmul.msk.f32.gmra.mxu3 %vm4132_vm11, %v4816_v26  ;;  %v5003_v27 = vpop.f32.mrf.mxu2 }
0x1874   :  { %v4965_v13 = vpop.f32.mrf.mxu1 }
0x187a   :  { %5673 = vmatmul.msk.f32.gmra.mxu3 %vm4132_vm11, %v4817_v63  ;;  %v5006_v0 = vpop.f32.mrf.mxu2 }
0x187c   :  { %v4968_v48 = vpop.f32.mrf.mxu1 }
0x1882   :  { %5674 = vmatmul.msk.f32.gmra.mxu3 %vm4132_vm11, %v4818_v47  ;;  %v5009_v3 = vpop.f32.mrf.mxu2 }
0x1883   :  { %5036 = vmatpush.msra.mxu3 %v5009_v3 }
0x1885   :  { %5037 = vmatpush.msra.mxu3 %v5006_v0  ;;  %v5123_v57 = vpop.f32.mrf.mxu1 }
0x1887   :  { %5038 = vmatpush.msra.mxu3 %v5003_v27 }
0x1889   :  { %5039 = vmatpush.msra.mxu3 %v5000_v4 }
0x188a   :  { %5687 = vmatmul.msk.f32.vlgmr.msra.gmra.mxu3 %vm4132_vm11, %v4979_v5 }
0x188d   :  { %v5126_v60 = vpop.f32.mrf.mxu1 }
0x1892   :  { %5688 = vmatmul.msk.f32.gmra.mxu3 %vm4132_vm11, %v4980_v40 }
0x1895   :  { %v5129_v26 = vpop.f32.mrf.mxu1 }
0x189a   :  { %5689 = vmatmul.msk.f32.gmra.mxu3 %vm4132_vm11, %v4981_v41  ;;  %v5176_v41 = vpop.permute.xlu1 %5175 }
0x189d   :  { %v5132_v5 = vpop.f32.mrf.mxu1 }
0x18a2   :  { %5690 = vmatmul.msk.f32.gmra.mxu3 %vm4132_vm11, %v4982_v59 }
0x18cd   :  { %v4713_v45 = vpop.f32.mrf.mxu3 }
0x18ce   :  { %v4725_v53 = vadd.f32 %v4713_v45, %v7793_v30  ;;  %v5226_v45 = vpop.permute.xlu2 %5225 }
0x18d0   :  { %v4807_v55 = vadd.f32 %v4795_v7, %v4725_v53 }
0x18d5   :  { %v4716_v39 = vpop.f32.mrf.mxu3 }
0x18d6   :  { %v4726_v21 = vadd.f32 %v4716_v39, %v7795_v44 }
0x18d8   :  { %v4808_v37 = vadd.f32 %v4798_v34, %v4726_v21 }
0x18dd   :  { %v4719_v49 = vpop.f32.mrf.mxu3 }
0x18de   :  { %v4727_v14 = vadd.f32 %v4719_v49, %v7797_v56 }
0x18e0   :  { %v4809_v44 = vadd.f32 %v4801_v38, %v4727_v14  ;;  %v5143_v38 = vld [vmem:[%s7966_s12] sm:$0xf] }
0x18e5   :  { %v4722_v32 = vpop.f32.mrf.mxu3 }
0x18e6   :  { %v4728_v2 = vadd.f32 %v4722_v32, %v4646_v22  ;;  %v5146_v32 = vld [vmem:[%s7967_s15 + $0x8] sm:$0xff] }
0x18e8   :  { %v4810_v62 = vadd.f32 %v4804_v16, %v4728_v2 }
0x18ed   :  { %v4877_v9 = vpop.f32.mrf.mxu3 }
0x18ee   :  { %v4889_v46 = vadd.f32 %v4877_v9, %v4807_v55  ;;  %v5148_v9 = vld [vmem:[%s7967_s15 + $0x18] sm:$0xff] }
0x18f0   :  { %v4971_v8 = vadd.f32 %v4959_v43, %v4889_v46  ;;  %v5145_v43 = vld [vmem:[%s7967_s15] sm:$0xff] }
0x18f5   :  { %v4880_v28 = vpop.f32.mrf.mxu3 }
0x18f6   :  { %v4890_v58 = vadd.f32 %v4880_v28, %v4808_v37  ;;  %v5260_v28 = vpop.permute.xlu1 %5259 }
0x18f8   :  { %v4972_v18 = vadd.f32 %v4962_v54, %v4890_v58  ;;  %v5147_v54 = vld [vmem:[%s7967_s15 + $0x10] sm:$0xff] }
0x18fd   :  { %v4883_v17 = vpop.f32.mrf.mxu3 }
0x18fe   :  { %v4891_v23 = vadd.f32 %v4883_v17, %v4809_v44 }
0x1900   :  { %v4973_v56 = vadd.f32 %v4965_v13, %v4891_v23 }
0x1905   :  { %v4886_v51 = vpop.f32.mrf.mxu3 }
0x1906   :  { %v4892_v0 = vadd.f32 %v4886_v51, %v4810_v62 }
0x1908   :  { %v4974_v3 = vadd.f32 %v4968_v48, %v4892_v0 }
0x190d   :  { %v5041_v33 = vpop.f32.mrf.mxu3 }
0x190e   :  { %v5053_v10 = vadd.f32 %v5041_v33, %v4971_v8 }
0x1910   :  { %v5135_v11 = vadd.f32 %v5123_v57, %v5053_v10  ;;  %v5265_v57 = vpop.permute.xlu2 %5264 }
0x1912   :  { %v7852_v15 = vadd.f32 %v5161_v12, %v5135_v11  ;;  %v5270_v12 = vpop.permute.xlu0 %5269 }
0x1914   :  { %5699 = vmatmul.msk.f32.vlgmr.msra.gmra.mxu2 %vm4132_vm11, %v7852_v15 }
0x1915   :  { %v5044_v30 = vpop.f32.mrf.mxu3 }
0x1916   :  { %v5054_v20 = vadd.f32 %v5044_v30, %v4972_v18 }
0x1918   :  { %v5136_v24 = vadd.f32 %v5126_v60, %v5054_v20 }
0x191a   :  { %v7857_v4 = vadd.f32 %v5166_v25, %v5136_v24 }
0x191c   :  { %5700 = vmatmul.msk.f32.gmra.mxu2 %vm4132_vm11, %v7857_v4 }
0x191d   :  { %v5047_v27 = vpop.f32.mrf.mxu3 }
0x191e   :  { %v5055_v63 = vadd.f32 %v5047_v27, %v4973_v56 }
0x1920   :  { %v5137_v1 = vadd.f32 %v5129_v26, %v5055_v63 }
0x1922   :  { %v7861_v47 = vadd.f32 %v5171_v50, %v5137_v1 }
0x1924   :  { %5701 = vmatmul.msk.f32.gmra.mxu2 %vm4132_vm11, %v7861_v47 }
0x1925   :  { %v5050_v29 = vpop.f32.mrf.mxu3 }
0x1926   :  { %v5056_v6 = vadd.f32 %v5050_v29, %v4974_v3 }
0x1928   :  { %v5138_v40 = vadd.f32 %v5132_v5, %v5056_v6 }
0x192a   :  { %v7865_v59 = vadd.f32 %v5176_v41, %v5138_v40 }
0x192c   :  { %5702 = vmatmul.msk.f32.gmra.mxu2 %vm4132_vm11, %v7865_v59 }
0x1997   :  { %v5211_v31 = vpop.f32.mrf.mxu2 }
0x199f   :  { %v5214_v7 = vpop.f32.mrf.mxu2 }
0x19a7   :  { %v5217_v34 = vpop.f32.mrf.mxu2 }
0x19af   :  { %v5220_v19 = vpop.f32.mrf.mxu2 }
0x19b0   :  { %5243 = vmatpush.msrb.mxu3 %v5220_v19 }
0x19b2   :  { %5244 = vmatpush.msrb.mxu3 %v5217_v34 }
0x19b4   :  { %5245 = vmatpush.msrb.mxu3 %v5214_v7 }
0x19b6   :  { %5246 = vmatpush.msrb.mxu3 %v5211_v31 }
0x19b7   :  { %5703 = vmatmul.msk.f32.vlgmr.msrb.gmra.mxu3 %vm4132_vm11, %v5143_v38 }
0x1a3a   :  { %v5248_v39 = vpop.f32.mrf.mxu3 }
0x1a3b   :  { %v5249_v16 = vadd.f32 %v5248_v39, %v5226_v45 }
0x1a3d   :  { %v5251_v49 = vmax.f32 %v5249_v16, 0.0 }
0x1a3f   :  { %5704 = vmatpush.msk.msra.mxu3 %vm4236_vm15, %v5251_v49 }
0x1a40   :  { %5705 = vmatmul.msk.f32.vlgmr.msra.gmra.mxu3 %vm4223_vm0, %v5145_v43 }
0x1a48   :  { %5706 = vmatmul.msk.f32.gmra.mxu3 %vm4223_vm0, %v5146_v32 }
0x1a50   :  { %5707 = vmatmul.msk.f32.gmra.mxu3 %vm4223_vm0, %v5147_v54 }
0x1a58   :  { %5708 = vmatmul.msk.f32.gmra.mxu3 %vm4223_vm0, %v5148_v9 }
0x1ac3   :  { %v5304_v52 = vpop.f32.mrf.mxu3 }
0x1ac4   :  { %v5305_v36 = vadd.f32 %v5304_v52, %v5255_v61 }
0x1ac6   :  { %v5709_v13 = vmul.f32 -1.442695, %v5305_v36 }
0x1ac8   :  { %5804 = vpow2.f32 %v5709_v13 }
0x1acb   :  { %v5307_v17 = vpop.f32.mrf.mxu3 }
0x1acc   :  { %v5308_v48 = vadd.f32 %v5307_v17, %v5260_v28 }
0x1ace   :  { %v5805_v53 = vpop.eup %5804  ;;  %v5710_v51 = vmul.f32 -1.442695, %v5308_v48 }
0x1acf   :  { %v5328_v55 = vadd.f32 1.0, %v5805_v53 }
0x1ad0   :  { %5806 = vpow2.f32 %v5710_v51 }
0x1ad1   :  { %5808 = vrcp.f32 %v5328_v55  ;;  %v5343_v14 = vand.u32 2147483648, %v5328_v55  ;;  %v5341_v35 = vand.u32 2147483647, %v5328_v55  ;;  %vm5337_vm15 = vweird.f32 %v5328_v55 }
0x1ad3   :  { %v5310_v46 = vpop.f32.mrf.mxu3  ;;  %v5344_v25 = vor.u32 1.1754944e-38, %v5343_v14  ;;  %vm5342_vm7 = vcmp.eq.f32.partialorder %v5341_v35, 8.507059e+37 }
0x1ad4   :  { %v5311_v21 = vadd.f32 %v5310_v46, %v5265_v57 }
0x1ad6   :  { %v5807_v8 = vpop.eup %5806  ;;  %v5711_v33 = vmul.f32 -1.442695, %v5311_v21 }
0x1ad7   :  { %v5809_v37 = vpop.eup %5808  ;;  %v5329_v10 = vadd.f32 1.0, %v5807_v8 }
0x1ad8   :  { %v5333_v58 = vmul.f32 %v5809_v37, %v5328_v55  ;;  %5810 = vpow2.f32 %v5711_v33  ;;  %vm5338_vm5 = vweird.f32 %v5809_v37 }
0x1ad9   :  { %5812 = vrcp.f32 %v5329_v10  ;;  %vm5339_vm0 = vmor %vm5337_vm15, %vm5338_vm5  ;;  %v5358_v62 = vand.u32 2147483648, %v5329_v10  ;;  %v5356_v0 = vand.u32 2147483647, %v5329_v10  ;;  %vm5352_vm10 = vweird.f32 %v5329_v10 }
0x1ada   :  { %v5334_v11 = vsub.f32 1.0, %v5333_v58 }
0x1adb   :  { %v5313_v60 = vpop.f32.mrf.mxu3  ;;  %v5359_v5 = vor.u32 1.1754944e-38, %v5358_v62  ;;  %vm5357_vm13 = vcmp.eq.f32.partialorder %v5356_v0, 8.507059e+37 }
0x1adc   :  { %v5314_v18 = vadd.f32 %v5313_v60, %v5270_v12  ;;  %v5335_v30 = vmul.f32 %v5809_v37, %v5334_v11 }
0x1ade   :  { %v5811_v44 = vpop.eup %5810  ;;  %v5712_v20 = vmul.f32 -1.442695, %v5314_v18  ;;  %v5336_v22 = vadd.f32 %v5809_v37, %v5335_v30 }
0x1adf   :  { %v5813_v23 = vpop.eup %5812  ;;  %v5330_v24 = vadd.f32 1.0, %v5811_v44 }
0x1ae0   :  { %5814 = vpow2.f32 %v5712_v20  ;;  %v5340_v2 = vsel %vm5339_vm0, %v5809_v37, %v5336_v22  ;;  %v5348_v26 = vmul.f32 %v5813_v23, %v5329_v10  ;;  %vm5353_vm8 = vweird.f32 %v5813_v23 }
0x1ae1   :  { %5816 = vrcp.f32 %v5330_v24  ;;  %v5345_v56 = vsel %vm5342_vm7, %v5344_v25, %v5340_v2  ;;  %vm5354_vm12 = vmor %vm5352_vm10, %vm5353_vm8  ;;  %v5373_v7 = vand.u32 2147483648, %v5330_v24  ;;  %v5371_v19 = vand.u32 2147483647, %v5330_v24 }
0x1ae2   :  { %5714 = vmatmul.msk.f32.vlgmr.msrb.gmra.mxu0 %vm560_vm9, %v5345_v56  ;;  %v5349_v27 = vsub.f32 1.0, %v5348_v26  ;;  %vm5367_vm1 = vweird.f32 %v5330_v24 }
0x1ae3   :  { %v5374_v39 = vor.u32 1.1754944e-38, %v5373_v7  ;;  %vm5372_vm3 = vcmp.eq.f32.partialorder %v5371_v19, 8.507059e+37 }
0x1ae4   :  { %v5350_v63 = vmul.f32 %v5813_v23, %v5349_v27 }
0x1ae6   :  { %v5815_v1 = vpop.eup %5814  ;;  %v5351_v50 = vadd.f32 %v5813_v23, %v5350_v63 }
0x1ae7   :  { %v5817_v3 = vpop.eup %5816  ;;  %v5331_v29 = vadd.f32 1.0, %v5815_v1 }
0x1ae8   :  { %v5355_v6 = vsel %vm5354_vm12, %v5813_v23, %v5351_v50  ;;  %v5363_v40 = vmul.f32 %v5817_v3, %v5330_v24  ;;  %vm5368_vm14 = vweird.f32 %v5817_v3 }
0x1ae9   :  { %5818 = vrcp.f32 %v5331_v29  ;;  %v5360_v41 = vsel %vm5357_vm13, %v5359_v5, %v5355_v6  ;;  %vm5369_vm2 = vmor %vm5367_vm1, %vm5368_vm14  ;;  %v5388_v54 = vand.u32 2147483648, %v5331_v29  ;;  %v5386_v42 = vand.u32 2147483647, %v5331_v29 }
0x1aea   :  { %5715 = vmatmul.msk.f32.gmra.mxu0 %vm560_vm9, %v5360_v41  ;;  %v5364_v31 = vsub.f32 1.0, %v5363_v40  ;;  %vm5382_vm6 = vweird.f32 %v5331_v29 }
0x1aeb   :  { %v5389_v52 = vor.u32 1.1754944e-38, %v5388_v54  ;;  %vm5387_vm15 = vcmp.eq.f32.partialorder %v5386_v42, 8.507059e+37 }
0x1aec   :  { %v5365_v34 = vmul.f32 %v5817_v3, %v5364_v31 }
0x1aee   :  { %v5366_v38 = vadd.f32 %v5817_v3, %v5365_v34 }
0x1aef   :  { %v5819_v45 = vpop.eup %5818 }
0x1af0   :  { %v5370_v16 = vsel %vm5369_vm2, %v5817_v3, %v5366_v38  ;;  %v5378_v49 = vmul.f32 %v5819_v45, %v5331_v29  ;;  %vm5383_vm4 = vweird.f32 %v5819_v45 }
0x1af1   :  { %v5375_v43 = vsel %vm5372_vm3, %v5374_v39, %v5370_v16  ;;  %vm5384_vm5 = vmor %vm5382_vm6, %vm5383_vm4 }
0x1af2   :  { %5716 = vmatmul.msk.f32.gmra.mxu0 %vm560_vm9, %v5375_v43  ;;  %v5379_v32 = vsub.f32 1.0, %v5378_v49 }
0x1af4   :  { %v5380_v9 = vmul.f32 %v5819_v45, %v5379_v32 }
0x1af6   :  { %v5381_v61 = vadd.f32 %v5819_v45, %v5380_v9 }
0x1af8   :  { %v5385_v36 = vsel %vm5384_vm5, %v5819_v45, %v5381_v61 }
0x1af9   :  { %v5390_v13 = vsel %vm5387_vm15, %v5389_v52, %v5385_v36 }
0x1afa   :  { %5717 = vmatmul.msk.f32.gmra.mxu0 %vm560_vm9, %v5390_v13 }
0x1b5f   :  { %v5424_v28 = vpop.f32.mrf.mxu0 }
0x1b60   :  { %v5436_v17 = vmul.f32 %v5424_v28, %v7852_v15 }
0x1b62   :  { %v5440_v48 = vmax.f32 %v5436_v17, 0.0 }
0x1b64   :  { %5444 = vst.msk [vmem:[%s6124_s8] sm:$0xff] %vm4132_vm11, %v5440_v48 }
0x1b67   :  { %v5427_v53 = vpop.f32.mrf.mxu0 }
0x1b68   :  { %v5437_v51 = vmul.f32 %v5427_v53, %v7857_v4 }
0x1b6a   :  { %v5441_v55 = vmax.f32 %v5437_v51, 0.0 }
0x1b6c   :  { %5445 = vst.msk [vmem:[%s6124_s8 + $0x8] sm:$0xff] %vm4132_vm11, %v5441_v55 }
0x1b6f   :  { %v5430_v57 = vpop.f32.mrf.mxu0 }
0x1b70   :  { %v5438_v46 = vmul.f32 %v5430_v57, %v7861_v47 }
0x1b72   :  { %v5442_v21 = vmax.f32 %v5438_v46, 0.0 }
0x1b74   :  { %5446 = vst.msk [vmem:[%s6124_s8 + $0x10] sm:$0xff] %vm4132_vm11, %v5442_v21 }
0x1b77   :  { %v5433_v8 = vpop.f32.mrf.mxu0 }
0x1b78   :  { %v5439_v33 = vmul.f32 %v5433_v8, %v7865_v59 }
0x1b7a   :  { %v5443_v37 = vmax.f32 %v5439_v33, 0.0 }
0x1b7c   :  { %5447 = vst.msk [vmem:[%s6124_s8 + $0x18] sm:$0xff] %vm4132_vm11, %v5443_v37 }
0x1b7d   :  { %5452 = vsyncpa [#allocation4], 1 }

</bundles_post_ra>
